<compile_context>
chip_gen: v6e
topology: v6e:2x2x1
jax: 0.10.0
libtpu: 0.0.40
codegen_flags: <defaults>
</compile_context>

<pallas_src>
import functools

import jax
import jax.numpy as jnp
from jax.experimental import pallas as pl
from jax.experimental.pallas import tpu as pltpu


# ----------------------------------------------------------------------------
# Conv kernel: one fused (m_tile, 9*Cin) x (9*Cin, Cout) matmul + bias + ReLU
# ----------------------------------------------------------------------------
def _matmul_bias_relu_kernel(x_ref, w_ref, b_ref, o_ref):
    # x_ref: (m_tile, Kp) bf16; w_ref: (Kp, Cout) bf16; b_ref: (1, Cout) f32
    acc = jnp.dot(x_ref[...], w_ref[...], preferred_element_type=jnp.float32)
    acc = jnp.maximum(acc + b_ref[...], 0.0)
    o_ref[...] = acc.astype(o_ref.dtype)


def conv3x3_relu(x_nhwc, w_kc, b):
    """3x3 'same' conv + ReLU.

    x_nhwc: (B, H, W, Cin) bf16   channels-last activation
    w_kc:   (Kp, Cout)     bf16   rows ordered (dy, dx, cin), zero-padded to Kp
    b:      (Cout,)        f32
    returns (B, H, W, Cout) bf16
    """
    B, H, W, Cin = x_nhwc.shape
    HW = H * W
    Kp, Cout = w_kc.shape
    K9 = 9 * Cin

    # im2col glue (pure data movement, built in XLA): 9 shifted taps folded
    # into the K dimension so the kernel runs a single dense MXU matmul.
    xp = jnp.pad(x_nhwc, ((0, 0), (1, 1), (1, 1), (0, 0)))
    taps = [xp[:, dy:dy + H, dx:dx + W, :]
            for dy in range(3) for dx in range(3)]
    xt = jnp.concatenate(taps, axis=-1)                    # (B, H, W, 9*Cin)
    if Kp > K9:                                            # lane-pad K (126 -> 128)
        xt = jnp.pad(xt, ((0, 0), (0, 0), (0, 0), (0, Kp - K9)))
    xt = xt.reshape(B * HW, Kp)

    # Tile several images per grid step so the matmul M dim fills the MXU.
    M = B * HW
    m_tile = 256 if M >= 256 else 128
    Mp = pl.cdiv(M, m_tile) * m_tile
    if Mp != M:
        xt = jnp.pad(xt, ((0, Mp - M), (0, 0)))

    out = pl.pallas_call(
        _matmul_bias_relu_kernel,
        out_shape=jax.ShapeDtypeStruct((Mp, Cout), jnp.bfloat16),
        grid=(Mp // m_tile,),
        in_specs=[
            pl.BlockSpec((m_tile, Kp), lambda i: (i, 0)),
            pl.BlockSpec((Kp, Cout), lambda i: (0, 0)),
            pl.BlockSpec((1, Cout), lambda i: (0, 0)),
        ],
        out_specs=pl.BlockSpec((m_tile, Cout), lambda i: (i, 0)),
        compiler_params=pltpu.CompilerParams(dimension_semantics=("parallel",)),
    )(xt, w_kc, b.reshape(1, Cout))

    if Mp != M:
        out = out[:M]
    return out.reshape(B, H, W, Cout)


# ----------------------------------------------------------------------------
# Linear kernel: tiled bf16 matmul, K-reduction grid axis, f32 VMEM accumulator,
# fused bias (+ optional ReLU) on the last K step.
# ----------------------------------------------------------------------------
def _linear_kernel(x_ref, w_ref, b_ref, o_ref, acc_ref, *, relu):
    k = pl.program_id(1)

    @pl.when(k == 0)
    def _():
        acc_ref[...] = jnp.zeros_like(acc_ref)

    acc_ref[...] += jnp.dot(x_ref[...], w_ref[...],
                            preferred_element_type=jnp.float32)

    @pl.when(k == pl.num_programs(1) - 1)
    def _():
        r = acc_ref[...] + b_ref[...]
        if relu:
            r = jnp.maximum(r, 0.0)
        o_ref[...] = r.astype(o_ref.dtype)


def linear(x, w, b, *, relu, tk, tn):
    """y = act(x @ w + b).  x: (B, K); w: (K, N) bf16; b: (N,) f32 -> (B, N) f32."""
    B, K = x.shape
    N = w.shape[1]
    assert K % tk == 0 and N % tn == 0, (K, tk, N, tn)
    x = x.astype(w.dtype)                 # bf16 operands, f32 accumulate
    b2 = b.reshape(1, N)
    kernel = functools.partial(_linear_kernel, relu=relu)
    return pl.pallas_call(
        kernel,
        out_shape=jax.ShapeDtypeStruct((B, N), jnp.float32),
        grid=(N // tn, K // tk),
        in_specs=[
            pl.BlockSpec((B, tk), lambda n, k: (0, k)),
            pl.BlockSpec((tk, tn), lambda n, k: (k, n)),
            pl.BlockSpec((1, tn), lambda n, k: (0, n)),
        ],
        out_specs=pl.BlockSpec((B, tn), lambda n, k: (0, n)),
        scratch_shapes=[pltpu.VMEM((B, tn), jnp.float32)],
        compiler_params=pltpu.CompilerParams(
            dimension_semantics=("parallel", "arbitrary")),
    )(x, w, b2)


# ----------------------------------------------------------------------------
# Model: parameters + forward
# ----------------------------------------------------------------------------
def init_params(key):
    """PyTorch-convention f32 params (conv as HWIO, fc as (K, N); fc1 rows are
    in the NCHW flatten order c*64 + h*8 + w, matching x.view(B, -1))."""
    ks = jax.random.split(key, 10)

    def winit(k, shape, fan_in):
        return jax.random.normal(k, shape, jnp.float32) / jnp.sqrt(fan_in)

    return {
        "w1": winit(ks[0], (3, 3, 14, 64), 14 * 9),
        "b1": winit(ks[1], (64,), 14 * 9),
        "w2": winit(ks[2], (3, 3, 64, 128), 64 * 9),
        "b2": winit(ks[3], (128,), 64 * 9),
        "w3": winit(ks[4], (3, 3, 128, 256), 128 * 9),
        "b3": winit(ks[5], (256,), 128 * 9),
        "wf1": winit(ks[6], (256 * 8 * 8, 1024), 256 * 8 * 8),
        "bf1": winit(ks[7], (1024,), 256 * 8 * 8),
        "wf2": winit(ks[8], (1024, 4096), 1024),
        "bf2": winit(ks[9], (4096,), 1024),
    }


def prepare_params(p):
    """One-time conversion of PyTorch-convention params into kernel layout:
      * conv weights (3,3,Cin,Cout) -> (9*Cin, Cout) bf16; conv1 K padded 126->128
      * fc1 rows permuted from the NCHW flatten (c*64+hw) to the channels-last
        flatten (hw*256+c) so the runtime flatten is a plain reshape
      * matmul weights cast to bf16 (f32 accumulate in-kernel); biases stay f32
    """
    def conv_w(w, kpad=None):
        cin, cout = w.shape[2], w.shape[3]
        wk = w.reshape(9 * cin, cout)
        if kpad is not None and kpad > 9 * cin:
            wk = jnp.pad(wk, ((0, kpad - 9 * cin), (0, 0)))
        return wk.astype(jnp.bfloat16)

    wf1 = jnp.transpose(p["wf1"].reshape(256, 64, 1024), (1, 0, 2))
    wf1 = wf1.reshape(256 * 64, 1024)
    return {
        "w1": conv_w(p["w1"], kpad=128), "b1": p["b1"],
        "w2": conv_w(p["w2"]),           "b2": p["b2"],
        "w3": conv_w(p["w3"]),           "b3": p["b3"],
        "wf1": wf1.astype(jnp.bfloat16), "bf1": p["bf1"],
        "wf2": p["wf2"].astype(jnp.bfloat16), "bf2": p["bf2"],
    }


@jax.jit
def chess_model_forward(x_nchw, kp):
    # x_nchw: (B, 14, 8, 8) f32 (PyTorch layout)
    B = x_nchw.shape[0]
    x = jnp.transpose(x_nchw, (0, 2, 3, 1)).astype(jnp.bfloat16)   # NHWC bf16

    # TODO(synk): fuse the three conv layers (and the pad/tap glue) into one
    # pallas_call keeping the tiny (B, 64, C) activation resident in VMEM.
    x = conv3x3_relu(x, kp["w1"], kp["b1"])            # (B, 8, 8, 64)
    x = conv3x3_relu(x, kp["w2"], kp["b2"])            # (B, 8, 8, 128)
    x = conv3x3_relu(x, kp["w3"], kp["b3"])            # (B, 8, 8, 256)

    # Channels-last flatten; fc1 rows were permuted at prep time to match the
    # PyTorch NCHW flatten order, so no runtime transpose is needed here.
    x = x.reshape(B, 8 * 8 * 256)

    x = linear(x, kp["wf1"], kp["bf1"], relu=True, tk=2048, tn=512)    # (B, 1024)
    x = linear(x, kp["wf2"], kp["bf2"], relu=False, tk=1024, tn=1024)  # (B, 4096)
    return x                                            # f32 logits


if __name__ == "__main__":
    key = jax.random.PRNGKey(0)
    k_x, k_p = jax.random.split(key)

    B = 2
    x = jax.random.normal(k_x, (B, 14, 8, 8), jnp.float32)   # NCHW, like PyTorch
    params = init_params(k_p)
    kparams = prepare_params(params)

    out = chess_model_forward(x, kparams)
    out = jax.block_until_ready(out)

    assert out.shape == (B, 4096), out.shape
    assert bool(jnp.all(jnp.isfinite(out)))
    print("KERNEL_OK")
</pallas_src>

<mosaic_0001>
module attributes {stable_mosaic.version = 11 : i64} {
  func.func @_matmul_bias_relu_kernel(%arg0: i32, %arg1: memref<128x128xbf16, #tpu.memory_space<vmem>>, %arg2: memref<128x64xbf16, #tpu.memory_space<vmem>>, %arg3: memref<1x64xf32, #tpu.memory_space<vmem>>, %arg4: memref<128x64xbf16, #tpu.memory_space<vmem>>) attributes {dimension_semantics = [#tpu.dimension_semantics<parallel>], iteration_bounds = array<i64: 1>, scalar_prefetch = 0 : i64, scratch_operands = 0 : i64, tpu.core_type = #tpu.core_type<tc>, window_params = [{transform_indices = @transform_0, window_bounds = array<i64: 128, 128>}, {pipeline_mode = #tpu.pipeline_mode<synchronous>, transform_indices = @transform_1, window_bounds = array<i64: 128, 64>}, {pipeline_mode = #tpu.pipeline_mode<synchronous>, transform_indices = @transform_2, window_bounds = array<i64: 1, 64>}, {transform_indices = @transform_3, window_bounds = array<i64: 128, 64>}]} {
    %c0 = arith.constant 0 : index
    %c0_0 = arith.constant 0 : index
    %0 = vector.load %arg1[%c0, %c0_0] : memref<128x128xbf16, #tpu.memory_space<vmem>>, vector<128x128xbf16>
    %c0_1 = arith.constant 0 : index
    %c0_2 = arith.constant 0 : index
    %1 = vector.load %arg2[%c0_1, %c0_2] : memref<128x64xbf16, #tpu.memory_space<vmem>>, vector<128x64xbf16>
    %cst = arith.constant dense<0.000000e+00> : vector<128x64xf32>
    %2 = tpu.matmul %0, %1, %cst {dimension_numbers = #tpu.dot_dimension_numbers<[1], [0], [0], [1], [0, 0, 1, 1], [], []>} : vector<128x128xbf16>, vector<128x64xbf16>, vector<128x64xf32> -> vector<128x64xf32>
    %c0_3 = arith.constant 0 : index
    %c0_4 = arith.constant 0 : index
    %3 = vector.load %arg3[%c0_3, %c0_4] : memref<1x64xf32, #tpu.memory_space<vmem>>, vector<1x64xf32>
    %4 = vector.broadcast %3 : vector<1x64xf32> to vector<128x64xf32>
    %5 = arith.addf %2, %4 : vector<128x64xf32>
    %cst_5 = arith.constant 0.000000e+00 : f32
    %6 = vector.broadcast %cst_5 : f32 to vector<128x64xf32>
    %7 = arith.maximumf %5, %6 : vector<128x64xf32>
    %8 = arith.truncf %7 : vector<128x64xf32> to vector<128x64xbf16>
    %c0_6 = arith.constant 0 : index
    %c0_7 = arith.constant 0 : index
    %9 = vector.load %arg4[%c0_6, %c0_7] : memref<128x64xbf16, #tpu.memory_space<vmem>>, vector<128x64xbf16>
    tpu.vector_store %arg4[%c0_6, %c0_7], %8 {strides = array<i32>} : memref<128x64xbf16, #tpu.memory_space<vmem>>, vector<128x64xbf16>,
    return
  }
  func.func @transform_0(%arg0: i32) -> (i32, i32) {
    %c0_i32 = arith.constant 0 : i32
    %c0_i32_0 = arith.constant 0 : i32
    return %arg0, %c0_i32 : i32, i32
  }
  func.func @transform_1(%arg0: i32) -> (i32, i32) {
    %c0_i32 = arith.constant 0 : i32
    %c0_i32_0 = arith.constant 0 : i32
    %c0_i32_1 = arith.constant 0 : i32
    return %c0_i32, %c0_i32_0 : i32, i32
  }
  func.func @transform_2(%arg0: i32) -> (i32, i32) {
    %c0_i32 = arith.constant 0 : i32
    %c0_i32_0 = arith.constant 0 : i32
    %c0_i32_1 = arith.constant 0 : i32
    return %c0_i32, %c0_i32_0 : i32, i32
  }
  func.func @transform_3(%arg0: i32) -> (i32, i32) {
    %c0_i32 = arith.constant 0 : i32
    %c0_i32_0 = arith.constant 0 : i32
    return %arg0, %c0_i32 : i32, i32
  }
}

module attributes {stable_mosaic.version = 11 : i64} {
  func.func @_matmul_bias_relu_kernel(%arg0: i32, %arg1: memref<128x576xbf16, #tpu.memory_space<vmem>>, %arg2: memref<576x128xbf16, #tpu.memory_space<vmem>>, %arg3: memref<1x128xf32, #tpu.memory_space<vmem>>, %arg4: memref<128x128xbf16, #tpu.memory_space<vmem>>) attributes {dimension_semantics = [#tpu.dimension_semantics<parallel>], iteration_bounds = array<i64: 1>, scalar_prefetch = 0 : i64, scratch_operands = 0 : i64, tpu.core_type = #tpu.core_type<tc>, window_params = [{transform_indices = @transform_0, window_bounds = array<i64: 128, 576>}, {pipeline_mode = #tpu.pipeline_mode<synchronous>, transform_indices = @transform_1, window_bounds = array<i64: 576, 128>}, {pipeline_mode = #tpu.pipeline_mode<synchronous>, transform_indices = @transform_2, window_bounds = array<i64: 1, 128>}, {transform_indices = @transform_3, window_bounds = array<i64: 128, 128>}]} {
    %c0 = arith.constant 0 : index
    %c0_0 = arith.constant 0 : index
    %0 = vector.load %arg1[%c0, %c0_0] : memref<128x576xbf16, #tpu.memory_space<vmem>>, vector<128x576xbf16>
    %c0_1 = arith.constant 0 : index
    %c0_2 = arith.constant 0 : index
    %1 = vector.load %arg2[%c0_1, %c0_2] : memref<576x128xbf16, #tpu.memory_space<vmem>>, vector<576x128xbf16>
    %cst = arith.constant dense<0.000000e+00> : vector<128x128xf32>
    %2 = tpu.matmul %0, %1, %cst {dimension_numbers = #tpu.dot_dimension_numbers<[1], [0], [0], [1], [0, 0, 1, 1], [], []>} : vector<128x576xbf16>, vector<576x128xbf16>, vector<128x128xf32> -> vector<128x128xf32>
    %c0_3 = arith.constant 0 : index
    %c0_4 = arith.constant 0 : index
    %3 = vector.load %arg3[%c0_3, %c0_4] : memref<1x128xf32, #tpu.memory_space<vmem>>, vector<1x128xf32>
    %4 = vector.broadcast %3 : vector<1x128xf32> to vector<128x128xf32>
    %5 = arith.addf %2, %4 : vector<128x128xf32>
    %cst_5 = arith.constant 0.000000e+00 : f32
    %6 = vector.broadcast %cst_5 : f32 to vector<128x128xf32>
    %7 = arith.maximumf %5, %6 : vector<128x128xf32>
    %8 = arith.truncf %7 : vector<128x128xf32> to vector<128x128xbf16>
    %c0_6 = arith.constant 0 : index
    %c0_7 = arith.constant 0 : index
    %9 = vector.load %arg4[%c0_6, %c0_7] : memref<128x128xbf16, #tpu.memory_space<vmem>>, vector<128x128xbf16>
    tpu.vector_store %arg4[%c0_6, %c0_7], %8 {strides = array<i32>} : memref<128x128xbf16, #tpu.memory_space<vmem>>, vector<128x128xbf16>,
    return
  }
  func.func @transform_0(%arg0: i32) -> (i32, i32) {
    %c0_i32 = arith.constant 0 : i32
    %c0_i32_0 = arith.constant 0 : i32
    return %arg0, %c0_i32 : i32, i32
  }
  func.func @transform_1(%arg0: i32) -> (i32, i32) {
    %c0_i32 = arith.constant 0 : i32
    %c0_i32_0 = arith.constant 0 : i32
    %c0_i32_1 = arith.constant 0 : i32
    return %c0_i32, %c0_i32_0 : i32, i32
  }
  func.func @transform_2(%arg0: i32) -> (i32, i32) {
    %c0_i32 = arith.constant 0 : i32
    %c0_i32_0 = arith.constant 0 : i32
    %c0_i32_1 = arith.constant 0 : i32
    return %c0_i32, %c0_i32_0 : i32, i32
  }
  func.func @transform_3(%arg0: i32) -> (i32, i32) {
    %c0_i32 = arith.constant 0 : i32
    %c0_i32_0 = arith.constant 0 : i32
    return %arg0, %c0_i32 : i32, i32
  }
}

module attributes {stable_mosaic.version = 11 : i64} {
  func.func @_matmul_bias_relu_kernel(%arg0: i32, %arg1: memref<128x1152xbf16, #tpu.memory_space<vmem>>, %arg2: memref<1152x256xbf16, #tpu.memory_space<vmem>>, %arg3: memref<1x256xf32, #tpu.memory_space<vmem>>, %arg4: memref<128x256xbf16, #tpu.memory_space<vmem>>) attributes {dimension_semantics = [#tpu.dimension_semantics<parallel>], iteration_bounds = array<i64: 1>, scalar_prefetch = 0 : i64, scratch_operands = 0 : i64, tpu.core_type = #tpu.core_type<tc>, window_params = [{transform_indices = @transform_0, window_bounds = array<i64: 128, 1152>}, {pipeline_mode = #tpu.pipeline_mode<synchronous>, transform_indices = @transform_1, window_bounds = array<i64: 1152, 256>}, {pipeline_mode = #tpu.pipeline_mode<synchronous>, transform_indices = @transform_2, window_bounds = array<i64: 1, 256>}, {transform_indices = @transform_3, window_bounds = array<i64: 128, 256>}]} {
    %c0 = arith.constant 0 : index
    %c0_0 = arith.constant 0 : index
    %0 = vector.load %arg1[%c0, %c0_0] : memref<128x1152xbf16, #tpu.memory_space<vmem>>, vector<128x1152xbf16>
    %c0_1 = arith.constant 0 : index
    %c0_2 = arith.constant 0 : index
    %1 = vector.load %arg2[%c0_1, %c0_2] : memref<1152x256xbf16, #tpu.memory_space<vmem>>, vector<1152x256xbf16>
    %cst = arith.constant dense<0.000000e+00> : vector<128x256xf32>
    %2 = tpu.matmul %0, %1, %cst {dimension_numbers = #tpu.dot_dimension_numbers<[1], [0], [0], [1], [0, 0, 1, 1], [], []>} : vector<128x1152xbf16>, vector<1152x256xbf16>, vector<128x256xf32> -> vector<128x256xf32>
    %c0_3 = arith.constant 0 : index
    %c0_4 = arith.constant 0 : index
    %3 = vector.load %arg3[%c0_3, %c0_4] : memref<1x256xf32, #tpu.memory_space<vmem>>, vector<1x256xf32>
    %4 = vector.broadcast %3 : vector<1x256xf32> to vector<128x256xf32>
    %5 = arith.addf %2, %4 : vector<128x256xf32>
    %cst_5 = arith.constant 0.000000e+00 : f32
    %6 = vector.broadcast %cst_5 : f32 to vector<128x256xf32>
    %7 = arith.maximumf %5, %6 : vector<128x256xf32>
    %8 = arith.truncf %7 : vector<128x256xf32> to vector<128x256xbf16>
    %c0_6 = arith.constant 0 : index
    %c0_7 = arith.constant 0 : index
    %9 = vector.load %arg4[%c0_6, %c0_7] : memref<128x256xbf16, #tpu.memory_space<vmem>>, vector<128x256xbf16>
    tpu.vector_store %arg4[%c0_6, %c0_7], %8 {strides = array<i32>} : memref<128x256xbf16, #tpu.memory_space<vmem>>, vector<128x256xbf16>,
    return
  }
  func.func @transform_0(%arg0: i32) -> (i32, i32) {
    %c0_i32 = arith.constant 0 : i32
    %c0_i32_0 = arith.constant 0 : i32
    return %arg0, %c0_i32 : i32, i32
  }
  func.func @transform_1(%arg0: i32) -> (i32, i32) {
    %c0_i32 = arith.constant 0 : i32
    %c0_i32_0 = arith.constant 0 : i32
    %c0_i32_1 = arith.constant 0 : i32
    return %c0_i32, %c0_i32_0 : i32, i32
  }
  func.func @transform_2(%arg0: i32) -> (i32, i32) {
    %c0_i32 = arith.constant 0 : i32
    %c0_i32_0 = arith.constant 0 : i32
    %c0_i32_1 = arith.constant 0 : i32
    return %c0_i32, %c0_i32_0 : i32, i32
  }
  func.func @transform_3(%arg0: i32) -> (i32, i32) {
    %c0_i32 = arith.constant 0 : i32
    %c0_i32_0 = arith.constant 0 : i32
    return %arg0, %c0_i32 : i32, i32
  }
}

module attributes {stable_mosaic.version = 11 : i64} {
  func.func @_linear_kernel(%arg0: i32, %arg1: i32, %arg2: memref<2x1024xbf16, #tpu.memory_space<vmem>>, %arg3: memref<1024x1024xbf16, #tpu.memory_space<vmem>>, %arg4: memref<1x1024xf32, #tpu.memory_space<vmem>>, %arg5: memref<2x1024xf32, #tpu.memory_space<vmem>>, %arg6: memref<2x1024xf32, #tpu.memory_space<vmem>>) attributes {dimension_semantics = [#tpu.dimension_semantics<parallel>, #tpu.dimension_semantics<arbitrary>], iteration_bounds = array<i64: 4, 1>, scalar_prefetch = 0 : i64, scratch_operands = 1 : i64, tpu.core_type = #tpu.core_type<tc>, window_params = [{transform_indices = @transform_0, window_bounds = array<i64: 2, 1024>}, {transform_indices = @transform_1, window_bounds = array<i64: 1024, 1024>}, {transform_indices = @transform_2, window_bounds = array<i64: 1, 1024>}, {transform_indices = @transform_3, window_bounds = array<i64: 2, 1024>}]} {
    %c0_i32 = arith.constant 0 : i32
    %0 = arith.cmpi eq, %arg1, %c0_i32 : i32
    %1 = arith.extui %0 : i1 to i32
    %c0_i32_0 = arith.constant 0 : i32
    %2 = arith.cmpi ne, %1, %c0_i32_0 : i32
    scf.if %2 {
      %cst_10 = arith.constant 0.000000e+00 : f32
      %12 = vector.broadcast %cst_10 : f32 to vector<2x1024xf32>
      %c0_11 = arith.constant 0 : index
      %c0_12 = arith.constant 0 : index
      %13 = vector.load %arg6[%c0_11, %c0_12] : memref<2x1024xf32, #tpu.memory_space<vmem>>, vector<2x1024xf32>
      tpu.vector_store %arg6[%c0_11, %c0_12], %12 {strides = array<i32>} : memref<2x1024xf32, #tpu.memory_space<vmem>>, vector<2x1024xf32>,
    } else {
    }
    %c0 = arith.constant 0 : index
    %c0_1 = arith.constant 0 : index
    %3 = vector.load %arg6[%c0, %c0_1] : memref<2x1024xf32, #tpu.memory_space<vmem>>, vector<2x1024xf32>
    %c0_2 = arith.constant 0 : index
    %c0_3 = arith.constant 0 : index
    %4 = vector.load %arg2[%c0_2, %c0_3] : memref<2x1024xbf16, #tpu.memory_space<vmem>>, vector<2x1024xbf16>
    %c0_4 = arith.constant 0 : index
    %c0_5 = arith.constant 0 : index
    %5 = vector.load %arg3[%c0_4, %c0_5] : memref<1024x1024xbf16, #tpu.memory_space<vmem>>, vector<1024x1024xbf16>
    %cst = arith.constant dense<0.000000e+00> : vector<2x1024xf32>
    %6 = tpu.matmul %4, %5, %cst {dimension_numbers = #tpu.dot_dimension_numbers<[1], [0], [0], [1], [0, 0, 1, 1], [], []>} : vector<2x1024xbf16>, vector<1024x1024xbf16>, vector<2x1024xf32> -> vector<2x1024xf32>
    %7 = arith.addf %3, %6 : vector<2x1024xf32>
    %c0_6 = arith.constant 0 : index
    %c0_7 = arith.constant 0 : index
    %8 = vector.load %arg6[%c0_6, %c0_7] : memref<2x1024xf32, #tpu.memory_space<vmem>>, vector<2x1024xf32>
    tpu.vector_store %arg6[%c0_6, %c0_7], %7 {strides = array<i32>} : memref<2x1024xf32, #tpu.memory_space<vmem>>, vector<2x1024xf32>,
    %c0_i32_8 = arith.constant 0 : i32
    %9 = arith.cmpi eq, %arg1, %c0_i32_8 : i32
    %10 = arith.extui %9 : i1 to i32
    %c0_i32_9 = arith.constant 0 : i32
    %11 = arith.cmpi ne, %10, %c0_i32_9 : i32
    scf.if %11 {
      %c0_10 = arith.constant 0 : index
      %c0_11 = arith.constant 0 : index
      %12 = vector.load %arg6[%c0_10, %c0_11] : memref<2x1024xf32, #tpu.memory_space<vmem>>, vector<2x1024xf32>
      %c0_12 = arith.constant 0 : index
      %c0_13 = arith.constant 0 : index
      %13 = vector.load %arg4[%c0_12, %c0_13] : memref<1x1024xf32, #tpu.memory_space<vmem>>, vector<1x1024xf32>
      %14 = vector.broadcast %13 : vector<1x1024xf32> to vector<2x1024xf32>
      %15 = arith.addf %12, %14 : vector<2x1024xf32>
      %c0_14 = arith.constant 0 : index
      %c0_15 = arith.constant 0 : index
      %16 = vector.load %arg5[%c0_14, %c0_15] : memref<2x1024xf32, #tpu.memory_space<vmem>>, vector<2x1024xf32>
      tpu.vector_store %arg5[%c0_14, %c0_15], %15 {strides = array<i32>} : memref<2x1024xf32, #tpu.memory_space<vmem>>, vector<2x1024xf32>,
    } else {
    }
    return
  }
  func.func @transform_0(%arg0: i32, %arg1: i32) -> (i32, i32) {
    %c0_i32 = arith.constant 0 : i32
    %c0_i32_0 = arith.constant 0 : i32
    return %c0_i32, %arg1 : i32, i32
  }
  func.func @transform_1(%arg0: i32, %arg1: i32) -> (i32, i32) {
    %c0_i32 = arith.constant 0 : i32
    return %arg1, %arg0 : i32, i32
  }
  func.func @transform_2(%arg0: i32, %arg1: i32) -> (i32, i32) {
    %c0_i32 = arith.constant 0 : i32
    %c0_i32_0 = arith.constant 0 : i32
    return %c0_i32, %arg0 : i32, i32
  }
  func.func @transform_3(%arg0: i32, %arg1: i32) -> (i32, i32) {
    %c0_i32 = arith.constant 0 : i32
    %c0_i32_0 = arith.constant 0 : i32
    return %c0_i32, %arg0 : i32, i32
  }
}

module attributes {stable_mosaic.version = 11 : i64} {
  func.func @_linear_kernel(%arg0: i32, %arg1: i32, %arg2: memref<2x2048xbf16, #tpu.memory_space<vmem>>, %arg3: memref<2048x512xbf16, #tpu.memory_space<vmem>>, %arg4: memref<1x512xf32, #tpu.memory_space<vmem>>, %arg5: memref<2x512xf32, #tpu.memory_space<vmem>>, %arg6: memref<2x512xf32, #tpu.memory_space<vmem>>) attributes {dimension_semantics = [#tpu.dimension_semantics<parallel>, #tpu.dimension_semantics<arbitrary>], iteration_bounds = array<i64: 2, 8>, scalar_prefetch = 0 : i64, scratch_operands = 1 : i64, tpu.core_type = #tpu.core_type<tc>, window_params = [{transform_indices = @transform_0, window_bounds = array<i64: 2, 2048>}, {transform_indices = @transform_1, window_bounds = array<i64: 2048, 512>}, {transform_indices = @transform_2, window_bounds = array<i64: 1, 512>}, {transform_indices = @transform_3, window_bounds = array<i64: 2, 512>}]} {
    %c0_i32 = arith.constant 0 : i32
    %0 = arith.cmpi eq, %arg1, %c0_i32 : i32
    %1 = arith.extui %0 : i1 to i32
    %c0_i32_0 = arith.constant 0 : i32
    %2 = arith.cmpi ne, %1, %c0_i32_0 : i32
    scf.if %2 {
      %cst_9 = arith.constant 0.000000e+00 : f32
      %12 = vector.broadcast %cst_9 : f32 to vector<2x512xf32>
      %c0_10 = arith.constant 0 : index
      %c0_11 = arith.constant 0 : index
      %13 = vector.load %arg6[%c0_10, %c0_11] : memref<2x512xf32, #tpu.memory_space<vmem>>, vector<2x512xf32>
      tpu.vector_store %arg6[%c0_10, %c0_11], %12 {strides = array<i32>} : memref<2x512xf32, #tpu.memory_space<vmem>>, vector<2x512xf32>,
    } else {
    }
    %c0 = arith.constant 0 : index
    %c0_1 = arith.constant 0 : index
    %3 = vector.load %arg6[%c0, %c0_1] : memref<2x512xf32, #tpu.memory_space<vmem>>, vector<2x512xf32>
    %c0_2 = arith.constant 0 : index
    %c0_3 = arith.constant 0 : index
    %4 = vector.load %arg2[%c0_2, %c0_3] : memref<2x2048xbf16, #tpu.memory_space<vmem>>, vector<2x2048xbf16>
    %c0_4 = arith.constant 0 : index
    %c0_5 = arith.constant 0 : index
    %5 = vector.load %arg3[%c0_4, %c0_5] : memref<2048x512xbf16, #tpu.memory_space<vmem>>, vector<2048x512xbf16>
    %cst = arith.constant dense<0.000000e+00> : vector<2x512xf32>
    %6 = tpu.matmul %4, %5, %cst {dimension_numbers = #tpu.dot_dimension_numbers<[1], [0], [0], [1], [0, 0, 1, 1], [], []>} : vector<2x2048xbf16>, vector<2048x512xbf16>, vector<2x512xf32> -> vector<2x512xf32>
    %7 = arith.addf %3, %6 : vector<2x512xf32>
    %c0_6 = arith.constant 0 : index
    %c0_7 = arith.constant 0 : index
    %8 = vector.load %arg6[%c0_6, %c0_7] : memref<2x512xf32, #tpu.memory_space<vmem>>, vector<2x512xf32>
    tpu.vector_store %arg6[%c0_6, %c0_7], %7 {strides = array<i32>} : memref<2x512xf32, #tpu.memory_space<vmem>>, vector<2x512xf32>,
    %c7_i32 = arith.constant 7 : i32
    %9 = arith.cmpi eq, %arg1, %c7_i32 : i32
    %10 = arith.extui %9 : i1 to i32
    %c0_i32_8 = arith.constant 0 : i32
    %11 = arith.cmpi ne, %10, %c0_i32_8 : i32
    scf.if %11 {
      %c0_9 = arith.constant 0 : index
      %c0_10 = arith.constant 0 : index
      %12 = vector.load %arg6[%c0_9, %c0_10] : memref<2x512xf32, #tpu.memory_space<vmem>>, vector<2x512xf32>
      %c0_11 = arith.constant 0 : index
      %c0_12 = arith.constant 0 : index
      %13 = vector.load %arg4[%c0_11, %c0_12] : memref<1x512xf32, #tpu.memory_space<vmem>>, vector<1x512xf32>
      %14 = vector.broadcast %13 : vector<1x512xf32> to vector<2x512xf32>
      %15 = arith.addf %12, %14 : vector<2x512xf32>
      %cst_13 = arith.constant 0.000000e+00 : f32
      %16 = vector.broadcast %cst_13 : f32 to vector<2x512xf32>
      %17 = arith.maximumf %15, %16 : vector<2x512xf32>
      %c0_14 = arith.constant 0 : index
      %c0_15 = arith.constant 0 : index
      %18 = vector.load %arg5[%c0_14, %c0_15] : memref<2x512xf32, #tpu.memory_space<vmem>>, vector<2x512xf32>
      tpu.vector_store %arg5[%c0_14, %c0_15], %17 {strides = array<i32>} : memref<2x512xf32, #tpu.memory_space<vmem>>, vector<2x512xf32>,
    } else {
    }
    return
  }
  func.func @transform_0(%arg0: i32, %arg1: i32) -> (i32, i32) {
    %c0_i32 = arith.constant 0 : i32
    %c0_i32_0 = arith.constant 0 : i32
    return %c0_i32, %arg1 : i32, i32
  }
  func.func @transform_1(%arg0: i32, %arg1: i32) -> (i32, i32) {
    %c0_i32 = arith.constant 0 : i32
    return %arg1, %arg0 : i32, i32
  }
  func.func @transform_2(%arg0: i32, %arg1: i32) -> (i32, i32) {
    %c0_i32 = arith.constant 0 : i32
    %c0_i32_0 = arith.constant 0 : i32
    return %c0_i32, %arg0 : i32, i32
  }
  func.func @transform_3(%arg0: i32, %arg1: i32) -> (i32, i32) {
    %c0_i32 = arith.constant 0 : i32
    %c0_i32_0 = arith.constant 0 : i32
    return %c0_i32, %arg0 : i32, i32
  }
}

</mosaic_0001>

<bundles_post_ra>
// kernel: chess_model_forward.5
= control target key start
LH: loop header
LB: loop body
LE: loop exit
PB: predicated region body
PF: predicated region fallthrough
CT: control target
= control target key end

     0   :  { %8 = vsyncpa [#allocation3], 0  ;;  %s513_s12 = smov [#allocation2]   ;;  %s667_s0 = inlined_call_operand.vmem [shape: bf16[128,128], index: 0, kind: input, shape index: {}]   ;;  %s668_s1 = inlined_call_operand.vmem [shape: bf16[128,64], index: 1, kind: input, shape index: {}]   ;;  %s669_s2 = inlined_call_operand.hbm [shape: f32[1,64], index: 2, kind: input, shape index: {}]   ;;  %s670_s3 = inlined_call_operand.vmem [shape: bf16[128,64], index: 3, kind: output, shape index: {}]  }
   0x1   :  { %s19_s13 = sshll.u32 %s513_s12, 4  ;;  %s20_s13 = int_to_ptr.vmem [resolvable:$true] %s19_s13 }
   0x2   :  { %s499_s14 = scalar_lea.vmem %s20_s13, 16  ;;  %s503_s15 = scalar_lea.vmem %s20_s13, 32 }
   0x3   :  { %p500_p0 = scmp.ne.s32.totalorder %s20_s13, %s499_s14  ;;  %p504_p1 = scmp.lt.s32.totalorder %s20_s13, %s20_s13 }
   0x4   :  { %p505_p2 = scmp.lt.s32.totalorder %s503_s15, %s499_s14 }
   0x6   :  { %p506_p3 = por %p505_p2, %p504_p1 }
   0x8   :  { %p507_p4 = pnand %p506_p3, %p500_p0 }
   0xa   :  { %510 = shalt.err (!%p507_p4)
}
   0xb   :  { %22 = dma.hbm_to_vmem [thread:$0]  %s669_s2, 16, %s20_s13, [#allocation3]  }
   0xc   :  { %511 = dma.done.wait [#allocation3], 16  }
   0xd   :  { %512 = vsyncadd [#allocation3], 4294967280  ;;  %v475_v0 = vld [vmem:[%s668_s1 + $0x38] sm:$0xff]   ;;  %v476_v1 = vld [vmem:[%s668_s1 + $0x30] sm:$0xff]   ;;  %vm339_vm0 = vcmask 519168  }
   0xe   :  { %426 = vmatprep.subr.bf16.mxu0 %v475_v0  ;;  %458 = vmatprep.subr.bf16.mxu1 %v475_v0  ;;  %v477_v2 = vld [vmem:[%s668_s1 + $0x28] sm:$0xff]   ;;  %v478_v3 = vld [vmem:[%s668_s1 + $0x20] sm:$0xff]   ;;  %v479_v6 = vld [vmem:[%s668_s1 + $0x18] sm:$0xff]  }
   0xf   :  { %427 = vmatpush3.bf16.msra.mxu0 %v475_v0  ;;  %466 = vmatpush3.bf16.msra.mxu1 %v475_v0  ;;  %v483_v4 = vld [vmem:[%s667_s0] sm:$0xff]   ;;  %v480_v7 = vld [vmem:[%s668_s1 + $0x10] sm:$0xff]   ;;  %v481_v8 = vld [vmem:[%s668_s1 + $0x8] sm:$0xff]  }
  0x10   :  { %428 = vmatprep.subr.bf16.mxu0 %v476_v1  ;;  %459 = vmatprep.subr.bf16.mxu1 %v476_v1  ;;  %v484_v5 = vld [vmem:[%s667_s0 + $0x20] sm:$0xff]   ;;  %v485_v10 = vld [vmem:[%s667_s0 + $0x8] sm:$0xff]   ;;  %v487_v12 = vld [vmem:[%s667_s0 + $0x10] sm:$0xff]  }
  0x11   :  { %442 = vmatprep.mubr.bf16.mxu0 %v483_v4  ;;  %450 = vmatprep.mubr.bf16.mxu1 %v484_v5  ;;  %v482_v9 = vld [vmem:[%s668_s1] sm:$0xff]   ;;  %v486_v11 = vld [vmem:[%s667_s0 + $0x28] sm:$0xff]   ;;  %v488_v13 = vld [vmem:[%s667_s0 + $0x30] sm:$0xff]  }
  0x12   :  { %v489_v14 = vld [vmem:[%s667_s0 + $0x18] sm:$0xff]   ;;  %v585_v16 = vld [vmem:[#allocation2] ss:$0 sm:$0xff] }
  0x13   :  { %429 = vmatpush3.bf16.msra.mxu0 %v476_v1  ;;  %467 = vmatpush3.bf16.msra.mxu1 %v476_v1  ;;  %v490_v15 = vld [vmem:[%s667_s0 + $0x38] sm:$0xff]  }
  0x14   :  { %430 = vmatprep.subr.bf16.mxu0 %v477_v2  ;;  %460 = vmatprep.subr.bf16.mxu1 %v477_v2 }
  0x17   :  { %431 = vmatpush3.bf16.msra.mxu0 %v477_v2  ;;  %468 = vmatpush3.bf16.msra.mxu1 %v477_v2 }
  0x18   :  { %432 = vmatprep.subr.bf16.mxu0 %v478_v3  ;;  %461 = vmatprep.subr.bf16.mxu1 %v478_v3 }
  0x1b   :  { %433 = vmatpush3.bf16.msra.mxu0 %v478_v3  ;;  %469 = vmatpush3.bf16.msra.mxu1 %v478_v3 }
  0x1c   :  { %434 = vmatprep.subr.bf16.mxu0 %v479_v6  ;;  %462 = vmatprep.subr.bf16.mxu1 %v479_v6 }
  0x1f   :  { %435 = vmatpush3.bf16.msra.mxu0 %v479_v6  ;;  %470 = vmatpush3.bf16.msra.mxu1 %v479_v6 }
  0x20   :  { %436 = vmatprep.subr.bf16.mxu0 %v480_v7  ;;  %463 = vmatprep.subr.bf16.mxu1 %v480_v7 }
  0x23   :  { %437 = vmatpush3.bf16.msra.mxu0 %v480_v7  ;;  %471 = vmatpush3.bf16.msra.mxu1 %v480_v7 }
  0x24   :  { %438 = vmatprep.subr.bf16.mxu0 %v481_v8  ;;  %464 = vmatprep.subr.bf16.mxu1 %v481_v8 }
  0x27   :  { %439 = vmatpush3.bf16.msra.mxu0 %v481_v8  ;;  %472 = vmatpush3.bf16.msra.mxu1 %v481_v8 }
  0x28   :  { %440 = vmatprep.subr.bf16.mxu0 %v482_v9  ;;  %465 = vmatprep.subr.bf16.mxu1 %v482_v9 }
  0x2b   :  { %441 = vmatpush3.bf16.msra.mxu0 %v482_v9  ;;  %473 = vmatpush3.bf16.msra.mxu1 %v482_v9 }
  0x2e   :  { %443 = vmatmul.mubr.bf16.vlgmr.msra.gmra.mxu0 %v485_v10  ;;  %451 = vmatmul.mubr.bf16.vlgmr.msra.gmra.mxu1 %v486_v11 }
  0x2f   :  { %446 = vmatprep.mubr.bf16.mxu0 %v487_v12  ;;  %454 = vmatprep.mubr.bf16.mxu1 %v488_v13 }
  0x36   :  { %447 = vmatmul.mubr.bf16.gmra.mxu0 %v489_v14  ;;  %455 = vmatmul.mubr.bf16.gmra.mxu1 %v490_v15 }
  0xee   :  { %v444_v17 = vpop.f32.mrf.mxu0  ;;  %v452_v18 = vpop.f32.mrf.mxu1 }
  0xef   :  { %v205_v19 = vadd.f32 %v444_v17, %v585_v16  ;;  %v237_v20 = vadd.f32 %v452_v18, %v585_v16 }
  0xf0   :  { %v196_v21 = vpop.f32.mrf.mxu0  ;;  %v228_v22 = vpop.f32.mrf.mxu1 }
  0xf1   :  { %v261_v23 = vmax.f32 %v205_v19, 0.0  ;;  %v269_v24 = vmax.f32 %v237_v20, 0.0  ;;  %v197_v25 = vadd.f32 %v585_v16, %v196_v21  ;;  %v229_v26 = vadd.f32 %v585_v16, %v228_v22 }
  0xf2   :  { %v445_v27 = vpop.f32.mrf.mxu0  ;;  %v453_v28 = vpop.f32.mrf.mxu1 }
  0xf3   :  { %v396_v29 = vpack.c.bf16 %v261_v23, %v261_v23  ;;  %v404_v30 = vpack.c.bf16 %v269_v24, %v269_v24  ;;  %v259_v31 = vmax.f32 %v197_v25, 0.0  ;;  %v267_v32 = vmax.f32 %v229_v26, 0.0 }
  0xf4   :  { %v208_v33 = vadd.f32 %v445_v27, %v585_v16  ;;  %v240_v34 = vadd.f32 %v453_v28, %v585_v16  ;;  %v199_v35 = vpop.f32.mrf.mxu0  ;;  %v231_v36 = vpop.f32.mrf.mxu1 }
  0xf5   :  { %342 = vst.msk [vmem:[%s670_s3 + $0x8] sm:$0xf] %vm339_vm0, %v396_v29  ;;  %350 = vst.msk [vmem:[%s670_s3 + $0x28] sm:$0xf] %vm339_vm0, %v404_v30  ;;  %v394_v37 = vpack.c.bf16 %v259_v31, %v259_v31  ;;  %v402_v38 = vpack.c.bf16 %v267_v32, %v267_v32  ;;  %v200_v39 = vadd.f32 %v585_v16, %v199_v35 }
  0xf6   :  { %v232_v40 = vadd.f32 %v585_v16, %v231_v36  ;;  %v262_v41 = vmax.f32 %v208_v33, 0.0  ;;  %v270_v42 = vmax.f32 %v240_v34, 0.0  ;;  %v448_v43 = vpop.f32.mrf.mxu0  ;;  %v456_v44 = vpop.f32.mrf.mxu1 }
  0xf7   :  { %340 = vst.msk [vmem:[%s670_s3] sm:$0xf] %vm339_vm0, %v394_v37  ;;  %348 = vst.msk [vmem:[%s670_s3 + $0x20] sm:$0xf] %vm339_vm0, %v402_v38  ;;  %v260_v45 = vmax.f32 %v200_v39, 0.0  ;;  %v221_v47 = vadd.f32 %v448_v43, %v585_v16  ;;  %v253_v48 = vadd.f32 %v456_v44, %v585_v16 }
  0xf8   :  { %v268_v46 = vmax.f32 %v232_v40, 0.0  ;;  %v397_v49 = vpack.c.bf16 %v262_v41, %v262_v41  ;;  %v405_v50 = vpack.c.bf16 %v270_v42, %v270_v42  ;;  %v212_v51 = vpop.f32.mrf.mxu0  ;;  %v244_v52 = vpop.f32.mrf.mxu1 }
  0xf9   :  { %v395_v53 = vpack.c.bf16 %v260_v45, %v260_v45  ;;  %v265_v55 = vmax.f32 %v221_v47, 0.0  ;;  %v273_v56 = vmax.f32 %v253_v48, 0.0  ;;  %v213_v57 = vadd.f32 %v585_v16, %v212_v51 }
  0xfa   :  { %v403_v54 = vpack.c.bf16 %v268_v46, %v268_v46  ;;  %343 = vst.msk [vmem:[%s670_s3 + $0xc] sm:$0xf] %vm339_vm0, %v397_v49  ;;  %351 = vst.msk [vmem:[%s670_s3 + $0x2c] sm:$0xf] %vm339_vm0, %v405_v50  ;;  %v245_v58 = vadd.f32 %v585_v16, %v244_v52  ;;  %v449_v59 = vpop.f32.mrf.mxu0  ;;  %v457_v60 = vpop.f32.mrf.mxu1 }
  0xfb   :  { %341 = vst.msk [vmem:[%s670_s3 + $0x4] sm:$0xf] %vm339_vm0, %v395_v53  ;;  %v400_v61 = vpack.c.bf16 %v265_v55, %v265_v55  ;;  %v408_v62 = vpack.c.bf16 %v273_v56, %v273_v56  ;;  %v224_v63 = vadd.f32 %v449_v59, %v585_v16  ;;  %v256_v0 = vadd.f32 %v457_v60, %v585_v16 }
  0xfc   :  { %349 = vst.msk [vmem:[%s670_s3 + $0x24] sm:$0xf] %vm339_vm0, %v403_v54  ;;  %v263_v1 = vmax.f32 %v213_v57, 0.0  ;;  %v271_v2 = vmax.f32 %v245_v58, 0.0  ;;  %v215_v3 = vpop.f32.mrf.mxu0  ;;  %v247_v4 = vpop.f32.mrf.mxu1 }
  0xfd   :  { %346 = vst.msk [vmem:[%s670_s3 + $0x18] sm:$0xf] %vm339_vm0, %v400_v61  ;;  %354 = vst.msk [vmem:[%s670_s3 + $0x38] sm:$0xf] %vm339_vm0, %v408_v62  ;;  %v266_v5 = vmax.f32 %v224_v63, 0.0  ;;  %v274_v6 = vmax.f32 %v256_v0, 0.0  ;;  %v216_v7 = vadd.f32 %v585_v16, %v215_v3  ;;  %v248_v8 = vadd.f32 %v585_v16, %v247_v4 }
  0xfe   :  { %v398_v9 = vpack.c.bf16 %v263_v1, %v263_v1  ;;  %v406_v10 = vpack.c.bf16 %v271_v2, %v271_v2 }
  0xff   :  { %v401_v11 = vpack.c.bf16 %v266_v5, %v266_v5  ;;  %v409_v12 = vpack.c.bf16 %v274_v6, %v274_v6  ;;  %v264_v13 = vmax.f32 %v216_v7, 0.0  ;;  %v272_v14 = vmax.f32 %v248_v8, 0.0 }
 0x100   :  { %344 = vst.msk [vmem:[%s670_s3 + $0x10] sm:$0xf] %vm339_vm0, %v398_v9  ;;  %352 = vst.msk [vmem:[%s670_s3 + $0x30] sm:$0xf] %vm339_vm0, %v406_v10 }
 0x101   :  { %347 = vst.msk [vmem:[%s670_s3 + $0x1c] sm:$0xf] %vm339_vm0, %v401_v11  ;;  %355 = vst.msk [vmem:[%s670_s3 + $0x3c] sm:$0xf] %vm339_vm0, %v409_v12  ;;  %v399_v15 = vpack.c.bf16 %v264_v13, %v264_v13  ;;  %v407_v16 = vpack.c.bf16 %v272_v14, %v272_v14 }
 0x103   :  { %345 = vst.msk [vmem:[%s670_s3 + $0x14] sm:$0xf] %vm339_vm0, %v399_v15  ;;  %353 = vst.msk [vmem:[%s670_s3 + $0x34] sm:$0xf] %vm339_vm0, %v407_v16 }
 0x104   :  { %360 = vsyncpa [#allocation3], 1 }

// kernel: chess_model_forward.6
= control target key start
LH: loop header
LB: loop body
LE: loop exit
PB: predicated region body
PF: predicated region fallthrough
CT: control target
= control target key end

     0   :  { %8 = vsyncpa [#allocation3], 0  ;;  %s1729_s0 = inlined_call_operand.vmem [shape: bf16[128,576], index: 0, kind: input, shape index: {}]   ;;  %s1730_s1 = inlined_call_operand.hbm [shape: bf16[576,128], index: 1, kind: input, shape index: {}]   ;;  %s1731_s2 = inlined_call_operand.hbm [shape: f32[1,128], index: 2, kind: input, shape index: {}]   ;;  %s1732_s3 = inlined_call_operand.vmem [shape: bf16[128,128], index: 3, kind: output, shape index: {}]  }
   0x1   :  { %9 = vsyncpa [#allocation5], 0  ;;  %s1478_s12 = smov [#allocation2]  }
   0x2   :  { %s17_s13 = sshll.u32 %s1478_s12, 4  ;;  %s18_s13 = int_to_ptr.vmem [resolvable:$true] %s17_s13 }
   0x3   :  { %s1442_s14 = scalar_lea.vmem %s18_s13, 4608  ;;  %p1447_p1 = scmp.lt.s32.totalorder %s18_s13, %s18_s13 }
   0x4   :  { %p1443_p0 = scmp.ne.s32.totalorder %s18_s13, %s1442_s14  ;;  %p1448_p2 = scmp.lt.s32.totalorder %s1442_s14, %s1442_s14 }
   0x6   :  { %p1449_p3 = por %p1448_p2, %p1447_p1 }
   0x8   :  { %p1450_p4 = pnand %p1449_p3, %p1443_p0 }
   0xa   :  { %1453 = shalt.err (!%p1450_p4)
}
   0xb   :  { %s1479_s15 = smov 64   ;;  %s1480_s16 = smov 4  }
   0xc   :  { %23 = dma.hbm_to_vmem [thread:$0]  %s1730_s1, 4608, %s18_s13, [#allocation3], %s1479_s15, %s1479_s15, %s1480_s16  }
   0xd   :  { %s1481_s19 = smov [#allocation4]  }
   0xe   :  { %s30_s20 = sshll.u32 %s1481_s19, 4  ;;  %s31_s20 = int_to_ptr.vmem [resolvable:$true] %s30_s20 }
   0xf   :  { %s1462_s21 = scalar_lea.vmem %s31_s20, 16  ;;  %s1466_s22 = scalar_lea.vmem %s31_s20, 32 }
  0x10   :  { %p1463_p5 = scmp.ne.s32.totalorder %s31_s20, %s1462_s21  ;;  %p1467_p6 = scmp.lt.s32.totalorder %s31_s20, %s31_s20 }
  0x11   :  { %p1468_p7 = scmp.lt.s32.totalorder %s1466_s22, %s1462_s21 }
  0x13   :  { %p1469_p8 = por %p1468_p7, %p1467_p6 }
  0x15   :  { %p1470_p9 = pnand %p1469_p8, %p1463_p5 }
  0x17   :  { %1473 = shalt.err (!%p1470_p9)
}
  0x18   :  { %33 = dma.hbm_to_vmem [thread:$0]  %s1731_s2, 16, %s31_s20, [#allocation5]  }
  0x19   :  { %1474 = dma.done.wait [#allocation3], 4608  }
  0x1a   :  { %1475 = vsyncadd [#allocation3], 4294962688 }
  0x1b   :  { %1476 = dma.done.wait [#allocation5], 16  }
  0x1c   :  { %1477 = vsyncadd [#allocation5], 4294967280  ;;  %v1342_v0 = vld [vmem:[#allocation2 + $0x78] sm:$0xff]   ;;  %v1346_v4 = vld [vmem:[#allocation2 + $0x70] sm:$0xff]   ;;  %vm584_vm0 = vcmask 523264  }
  0x1d   :  { %v1343_v1 = vld [vmem:[#allocation2 + $0xf8] sm:$0xff]   ;;  %1166 = vmatprep.subr.bf16.mxu0 %v1342_v0  ;;  %v1347_v5 = vld [vmem:[#allocation2 + $0xf0] sm:$0xff]   ;;  %v1350_v8 = vld [vmem:[#allocation2 + $0x68] sm:$0xff]  }
  0x1e   :  { %v1344_v2 = vld [vmem:[#allocation2 + $0x38] sm:$0xff]   ;;  %1230 = vmatprep.subr.bf16.mxu1 %v1343_v1  ;;  %v1348_v6 = vld [vmem:[#allocation2 + $0x30] sm:$0xff]   ;;  %v1351_v9 = vld [vmem:[#allocation2 + $0xe8] sm:$0xff]  }
  0x1f   :  { %v1345_v3 = vld [vmem:[#allocation2 + $0xb8] sm:$0xff]   ;;  %1167 = vmatpush3.bf16.msra.mxu0 %v1344_v2  ;;  %v1349_v7 = vld [vmem:[#allocation2 + $0xb0] sm:$0xff]   ;;  %v1352_v10 = vld [vmem:[#allocation2 + $0x28] sm:$0xff]  }
  0x20   :  { %1231 = vmatpush3.bf16.msra.mxu1 %v1345_v3  ;;  %1168 = vmatprep.subr.bf16.mxu0 %v1346_v4  ;;  %v1353_v11 = vld [vmem:[#allocation2 + $0xa8] sm:$0xff]   ;;  %v1354_v12 = vld [vmem:[#allocation2 + $0x60] sm:$0xff]   ;;  %v1358_v16 = vld [vmem:[#allocation2 + $0x58] sm:$0xff]  }
  0x21   :  { %1232 = vmatprep.subr.bf16.mxu1 %v1347_v5  ;;  %v1355_v13 = vld [vmem:[#allocation2 + $0xe0] sm:$0xff]   ;;  %v1359_v17 = vld [vmem:[#allocation2 + $0xd8] sm:$0xff]   ;;  %v1362_v20 = vld [vmem:[#allocation2 + $0x50] sm:$0xff]  }
  0x22   :  { %v1356_v14 = vld [vmem:[#allocation2 + $0x20] sm:$0xff]   ;;  %v1360_v18 = vld [vmem:[#allocation2 + $0x18] sm:$0xff]   ;;  %v1363_v21 = vld [vmem:[#allocation2 + $0xd0] sm:$0xff]  }
  0x23   :  { %1169 = vmatpush3.bf16.msra.mxu0 %v1348_v6  ;;  %v1357_v15 = vld [vmem:[#allocation2 + $0xa0] sm:$0xff]   ;;  %v1361_v19 = vld [vmem:[#allocation2 + $0x98] sm:$0xff]   ;;  %v1364_v22 = vld [vmem:[#allocation2 + $0x10] sm:$0xff]  }
  0x24   :  { %1233 = vmatpush3.bf16.msra.mxu1 %v1349_v7  ;;  %1170 = vmatprep.subr.bf16.mxu0 %v1350_v8  ;;  %v1365_v23 = vld [vmem:[#allocation2 + $0x90] sm:$0xff]   ;;  %v1366_v24 = vld [vmem:[#allocation2 + $0x48] sm:$0xff]   ;;  %v1370_v28 = vld [vmem:[#allocation2 + $0x40] sm:$0xff]  }
  0x25   :  { %1234 = vmatprep.subr.bf16.mxu1 %v1351_v9  ;;  %v1367_v25 = vld [vmem:[#allocation2 + $0xc8] sm:$0xff]   ;;  %v1371_v29 = vld [vmem:[#allocation2 + $0xc0] sm:$0xff]   ;;  %v1380_v36 = vld [vmem:[#allocation2 + $0x118] sm:$0xff]  }
  0x26   :  { %v1368_v26 = vld [vmem:[#allocation2 + $0x8] sm:$0xff]   ;;  %v1372_v30 = vld [vmem:[#allocation2] sm:$0xff]   ;;  %v1393_v42 = vld [vmem:[#allocation2 + $0x110] sm:$0xff]  }
  0x27   :  { %1171 = vmatpush3.bf16.msra.mxu0 %v1352_v10  ;;  %v1369_v27 = vld [vmem:[#allocation2 + $0x88] sm:$0xff]   ;;  %v1373_v31 = vld [vmem:[#allocation2 + $0x80] sm:$0xff]   ;;  %v1389_v43 = vld [vmem:[%s1729_s0 + $0x5c] ss:$20 sps:$4 sm:$0xff]  }
  0x28   :  { %1235 = vmatpush3.bf16.msra.mxu1 %v1353_v11  ;;  %1172 = vmatprep.subr.bf16.mxu0 %v1354_v12  ;;  %v1374_v32 = vld [vmem:[%s1729_s0] ss:$20 sps:$4 sm:$0xff]   ;;  %v1376_v33 = vld [vmem:[%s1729_s0 + $0x4] ss:$20 sps:$4 sm:$0xff]   ;;  %v1377_v34 = vld [vmem:[%s1729_s0 + $0x8] ss:$20 sps:$4 sm:$0xff]  }
  0x29   :  { %1236 = vmatprep.subr.bf16.mxu1 %v1355_v13  ;;  %v1379_v35 = vld [vmem:[%s1729_s0 + $0xc] ss:$20 sps:$4 sm:$0xff]   ;;  %641 = vmatprep.mubr.bf16.mxu0 %v1376_v33  ;;  %v1383_v38 = vld [vmem:[%s1729_s0 + $0x34] ss:$20 sps:$4 sm:$0xff]   ;;  %v1386_v40 = vld [vmem:[%s1729_s0 + $0x30] ss:$20 sps:$4 sm:$0xff]  }
  0x2a   :  { %738 = vmatprep.mubr.bf16.mxu1 %v1379_v35  ;;  %v1381_v37 = vld [vmem:[%s1729_s0 + $0x2c] ss:$20 sps:$4 sm:$0xff]   ;;  %v1385_v39 = vld [vmem:[%s1729_s0 + $0x28] ss:$20 sps:$4 sm:$0xff]   ;;  %v1391_v44 = vld [vmem:[%s1729_s0 + $0x50] ss:$20 sps:$4 sm:$0xff]  }
  0x2b   :  { %1173 = vmatpush3.bf16.msra.mxu0 %v1356_v14  ;;  %v1387_v41 = vld [vmem:[%s1729_s0 + $0x54] ss:$20 sps:$4 sm:$0xff]   ;;  %v1392_v45 = vld [vmem:[%s1729_s0 + $0x58] ss:$20 sps:$4 sm:$0xff]   ;;  %v1394_v47 = vld [vmem:[%s1729_s0 + $0x7c] ss:$20 sps:$4 sm:$0xff]  }
  0x2c   :  { %1237 = vmatpush3.bf16.msra.mxu1 %v1357_v15  ;;  %1174 = vmatprep.subr.bf16.mxu0 %v1358_v16  ;;  %v1406_v46 = vld [vmem:[#allocation2 + $0x108] sm:$0xff]   ;;  %v1396_v48 = vld [vmem:[%s1729_s0 + $0x84] ss:$20 sps:$4 sm:$0xff]   ;;  %v1399_v51 = vld [vmem:[%s1729_s0 + $0x80] ss:$20 sps:$4 sm:$0xff]  }
  0x2d   :  { %1238 = vmatprep.subr.bf16.mxu1 %v1359_v17  ;;  %v1419_v49 = vld [vmem:[#allocation2 + $0x100] sm:$0xff]   ;;  %v1398_v50 = vld [vmem:[%s1729_s0 + $0x78] ss:$20 sps:$4 sm:$0xff]   ;;  %v1405_v55 = vld [vmem:[%s1729_s0 + $0xa8] ss:$20 sps:$4 sm:$0xff]  }
  0x2e   :  { %v1400_v52 = vld [vmem:[%s1729_s0 + $0xa4] ss:$20 sps:$4 sm:$0xff]   ;;  %v1402_v53 = vld [vmem:[%s1729_s0 + $0xac] ss:$20 sps:$4 sm:$0xff]   ;;  %v1409_v57 = vld [vmem:[%s1729_s0 + $0xd4] ss:$20 sps:$4 sm:$0xff]  }
  0x2f   :  { %1175 = vmatpush3.bf16.msra.mxu0 %v1360_v18  ;;  %v1404_v54 = vld [vmem:[%s1729_s0 + $0xa0] ss:$20 sps:$4 sm:$0xff]   ;;  %v1411_v58 = vld [vmem:[%s1729_s0 + $0xc8] ss:$20 sps:$4 sm:$0xff]   ;;  %v1412_v59 = vld [vmem:[%s1729_s0 + $0xd0] ss:$20 sps:$4 sm:$0xff]  }
  0x30   :  { %1239 = vmatpush3.bf16.msra.mxu1 %v1361_v19  ;;  %1176 = vmatprep.subr.bf16.mxu0 %v1362_v20  ;;  %v1407_v56 = vld [vmem:[%s1729_s0 + $0xcc] ss:$20 sps:$4 sm:$0xff]   ;;  %v1413_v60 = vld [vmem:[%s1729_s0 + $0xf4] ss:$20 sps:$4 sm:$0xff]   ;;  %v1415_v61 = vld [vmem:[%s1729_s0 + $0xfc] ss:$20 sps:$4 sm:$0xff]  }
  0x31   :  { %1240 = vmatprep.subr.bf16.mxu1 %v1363_v21  ;;  %v1417_v62 = vld [vmem:[%s1729_s0 + $0xf0] ss:$20 sps:$4 sm:$0xff]   ;;  %v1418_v63 = vld [vmem:[%s1729_s0 + $0xf8] ss:$20 sps:$4 sm:$0xff]   ;;  %v1425_v3 = vld [vmem:[%s1729_s0 + $0x120] ss:$20 sps:$4 sm:$0xff]  }
  0x32   :  { %v1420_v0 = vld [vmem:[%s1729_s0 + $0x11c] ss:$20 sps:$4 sm:$0xff]   ;;  %v1422_v1 = vld [vmem:[%s1729_s0 + $0x124] ss:$20 sps:$4 sm:$0xff]   ;;  %v1430_v8 = vld [vmem:[%s1729_s0 + $0x60] ss:$20 sps:$4 sm:$0xff]  }
  0x33   :  { %1177 = vmatpush3.bf16.msra.mxu0 %v1364_v22  ;;  %v1424_v2 = vld [vmem:[%s1729_s0 + $0x118] ss:$20 sps:$4 sm:$0xff]   ;;  %v1426_v4 = vld [vmem:[%s1729_s0 + $0x10] ss:$20 sps:$4 sm:$0xff]   ;;  %v1431_v9 = vld [vmem:[%s1729_s0 + $0x100] ss:$20 sps:$4 sm:$0xff]  }
  0x34   :  { %1241 = vmatpush3.bf16.msra.mxu1 %v1365_v23  ;;  %1178 = vmatprep.subr.bf16.mxu0 %v1366_v24  ;;  %v1427_v5 = vld [vmem:[%s1729_s0 + $0xb0] ss:$20 sps:$4 sm:$0xff]   ;;  %v1428_v6 = vld [vmem:[%s1729_s0 + $0x38] ss:$20 sps:$4 sm:$0xff]   ;;  %v1432_v10 = vld [vmem:[%s1729_s0 + $0x88] ss:$20 sps:$4 sm:$0xff]  }
  0x35   :  { %1242 = vmatprep.subr.bf16.mxu1 %v1367_v25  ;;  %v1429_v7 = vld [vmem:[%s1729_s0 + $0xd8] ss:$20 sps:$4 sm:$0xff]   ;;  %v1433_v11 = vld [vmem:[%s1729_s0 + $0x128] ss:$20 sps:$4 sm:$0xff]   ;;  %v1636_v14 = vld [vmem:[#allocation4] ss:$0 sm:$0xff] }
  0x37   :  { %1179 = vmatpush3.bf16.msra.mxu0 %v1368_v26 }
  0x38   :  { %1243 = vmatpush3.bf16.msra.mxu1 %v1369_v27  ;;  %1180 = vmatprep.subr.bf16.mxu0 %v1370_v28 }
  0x39   :  { %1244 = vmatprep.subr.bf16.mxu1 %v1371_v29 }
  0x3b   :  { %1181 = vmatpush3.bf16.msra.mxu0 %v1372_v30 }
  0x3c   :  { %1245 = vmatpush3.bf16.msra.mxu1 %v1373_v31  ;;  %1306 = vmatprep.subr.bf16.mxu0 %v1380_v36 }
  0x3d   :  { %1330 = vmatprep.subr.bf16.mxu1 %v1380_v36 }
  0x3e   :  { %642 = vmatmul.mubr.bf16.vlgmr.msra.gmra.mxu0 %v1374_v32 }
  0x3f   :  { %739 = vmatmul.mubr.bf16.vlgmr.msra.gmra.mxu1 %v1377_v34  ;;  %1307 = vmatpush3.bf16.msra.mxu0 %v1380_v36 }
  0x40   :  { %1334 = vmatpush3.bf16.msra.mxu1 %v1380_v36  ;;  %649 = vmatprep.mubr.bf16.mxu0 %v1381_v37 }
  0x41   :  { %746 = vmatprep.mubr.bf16.mxu1 %v1383_v38  ;;  %1308 = vmatprep.subr.bf16.mxu0 %v1393_v42 }
  0x42   :  { %1331 = vmatprep.subr.bf16.mxu1 %v1393_v42 }
  0x43   :  { %1309 = vmatpush3.bf16.msra.mxu0 %v1393_v42 }
  0x44   :  { %1335 = vmatpush3.bf16.msra.mxu1 %v1393_v42  ;;  %1310 = vmatprep.subr.bf16.mxu0 %v1406_v46 }
  0x45   :  { %1332 = vmatprep.subr.bf16.mxu1 %v1406_v46 }
  0x46   :  { %650 = vmatmul.mubr.bf16.gmra.mxu0 %v1385_v39 }
  0x47   :  { %747 = vmatmul.mubr.bf16.gmra.mxu1 %v1386_v40  ;;  %657 = vmatprep.mubr.bf16.mxu0 %v1387_v41 }
  0x48   :  { %754 = vmatprep.mubr.bf16.mxu1 %v1389_v43  ;;  %1311 = vmatpush3.bf16.msra.mxu0 %v1406_v46 }
  0x49   :  { %1336 = vmatpush3.bf16.msra.mxu1 %v1406_v46  ;;  %1312 = vmatprep.subr.bf16.mxu0 %v1419_v49 }
  0x4a   :  { %1333 = vmatprep.subr.bf16.mxu1 %v1419_v49 }
  0x4c   :  { %1313 = vmatpush3.bf16.msra.mxu0 %v1419_v49 }
  0x4d   :  { %1337 = vmatpush3.bf16.msra.mxu1 %v1419_v49 }
  0x4e   :  { %658 = vmatmul.mubr.bf16.gmra.mxu0 %v1391_v44 }
  0x4f   :  { %755 = vmatmul.mubr.bf16.gmra.mxu1 %v1392_v45  ;;  %665 = vmatprep.mubr.bf16.mxu0 %v1394_v47 }
  0x50   :  { %762 = vmatprep.mubr.bf16.mxu1 %v1396_v48 }
  0x56   :  { %666 = vmatmul.mubr.bf16.gmra.mxu0 %v1398_v50 }
  0x57   :  { %763 = vmatmul.mubr.bf16.gmra.mxu1 %v1399_v51  ;;  %673 = vmatprep.mubr.bf16.mxu0 %v1400_v52 }
  0x58   :  { %770 = vmatprep.mubr.bf16.mxu1 %v1402_v53 }
  0x5e   :  { %674 = vmatmul.mubr.bf16.gmra.mxu0 %v1404_v54 }
  0x5f   :  { %771 = vmatmul.mubr.bf16.gmra.mxu1 %v1405_v55  ;;  %681 = vmatprep.mubr.bf16.mxu0 %v1407_v56 }
  0x60   :  { %778 = vmatprep.mubr.bf16.mxu1 %v1409_v57 }
  0x66   :  { %682 = vmatmul.mubr.bf16.gmra.mxu0 %v1411_v58 }
  0x67   :  { %779 = vmatmul.mubr.bf16.gmra.mxu1 %v1412_v59  ;;  %689 = vmatprep.mubr.bf16.mxu0 %v1413_v60 }
  0x68   :  { %786 = vmatprep.mubr.bf16.mxu1 %v1415_v61 }
  0x6e   :  { %690 = vmatmul.mubr.bf16.gmra.mxu0 %v1417_v62 }
  0x6f   :  { %787 = vmatmul.mubr.bf16.gmra.mxu1 %v1418_v63  ;;  %697 = vmatprep.mubr.bf16.mxu0 %v1420_v0 }
  0x70   :  { %794 = vmatprep.mubr.bf16.mxu1 %v1422_v1 }
  0x76   :  { %698 = vmatmul.mubr.bf16.gmra.mxu0 %v1424_v2 }
  0x77   :  { %795 = vmatmul.mubr.bf16.gmra.mxu1 %v1425_v3  ;;  %1314 = vmatprep.mubr.msk.bf16.mxu0 %vm584_vm0, %v1426_v4 }
  0x78   :  { %1322 = vmatprep.mubr.msk.bf16.mxu1 %vm584_vm0, %v1427_v5 }
  0x7e   :  { %1315 = vmatmul.mubr.msk.bf16.vlgmr.msra.gmra.mxu0 %vm584_vm0, %v1428_v6 }
  0x7f   :  { %1323 = vmatmul.mubr.msk.bf16.vlgmr.msra.gmra.mxu1 %vm584_vm0, %v1429_v7  ;;  %1318 = vmatprep.mubr.msk.bf16.mxu0 %vm584_vm0, %v1430_v8 }
  0x80   :  { %1326 = vmatprep.mubr.msk.bf16.mxu1 %vm584_vm0, %v1431_v9 }
  0x86   :  { %1319 = vmatmul.mubr.msk.bf16.gmra.mxu0 %vm584_vm0, %v1432_v10 }
  0x87   :  { %1327 = vmatmul.mubr.msk.bf16.gmra.mxu1 %vm584_vm0, %v1433_v11 }
  0xfe   :  { %v1182_v12 = vpop.f32.mrf.mxu0 }
  0xff   :  { %v1246_v13 = vpop.f32.mrf.mxu1 }
 0x100   :  { %v1183_v15 = vpop.f32.mrf.mxu0 }
 0x101   :  { %v1184_v16 = vadd.f32 %v1183_v15, %v1182_v12  ;;  %v1247_v17 = vpop.f32.mrf.mxu1 }
 0x102   :  { %v1185_v18 = vpop.f32.mrf.mxu0  ;;  %v1248_v20 = vadd.f32 %v1247_v17, %v1246_v13 }
 0x103   :  { %v644_v19 = vadd.f32 %v1184_v16, %v1636_v14  ;;  %v1639_v21 = vpop.f32.mrf.mxu1 }
 0x104   :  { %v1186_v22 = vpop.f32.mrf.mxu0 }
 0x105   :  { %v1641_v23 = vpop.f32.mrf.mxu1  ;;  %v1643_v24 = vadd.f32 %v1248_v20, %v644_v19  ;;  %v1187_v6 = vadd.f32 %v1186_v22, %v1185_v18 }
 0x106   :  { %v1188_v25 = vpop.f32.mrf.mxu0 }
 0x107   :  { %1733 = vst [vmem:[#allocation8_spill] sm:$0xff] %v1643_v24  ;;  %v1252_v26 = vpop.f32.mrf.mxu1  ;;  %v647_v15 = vadd.f32 %v1187_v6, %v1636_v14 }
 0x108   :  { %v1189_v27 = vpop.f32.mrf.mxu0 }
 0x109   :  { %v1253_v28 = vpop.f32.mrf.mxu1  ;;  %v1190_v8 = vadd.f32 %v1189_v27, %v1188_v25  ;;  %v1251_v25 = vadd.f32 %v1641_v23, %v1639_v21 }
 0x10a   :  { %v1191_v29 = vpop.f32.mrf.mxu0  ;;  %v1254_v27 = vadd.f32 %v1253_v28, %v1252_v26 }
 0x10b   :  { %v1255_v30 = vpop.f32.mrf.mxu1  ;;  %v652_v19 = vadd.f32 %v1190_v8, %v1636_v14 }
 0x10c   :  { %v1192_v31 = vpop.f32.mrf.mxu0 }
 0x10d   :  { %v1256_v32 = vpop.f32.mrf.mxu1  ;;  %v1193_v9 = vadd.f32 %v1192_v31, %v1191_v29 }
 0x10e   :  { %v1194_v33 = vpop.f32.mrf.mxu0  ;;  %v1257_v29 = vadd.f32 %v1256_v32, %v1255_v30 }
 0x10f   :  { %v1258_v34 = vpop.f32.mrf.mxu1  ;;  %v655_v20 = vadd.f32 %v1193_v9, %v1636_v14  ;;  %v744_v9 = vadd.f32 %v1251_v25, %v647_v15 }
 0x110   :  { %v1195_v35 = vpop.f32.mrf.mxu0 }
 0x111   :  { %v1259_v36 = vpop.f32.mrf.mxu1  ;;  %v1196_v10 = vadd.f32 %v1195_v35, %v1194_v33  ;;  %v752_v24 = vadd.f32 %v1257_v29, %v655_v20 }
 0x112   :  { %v1197_v37 = vpop.f32.mrf.mxu0  ;;  %v1260_v35 = vadd.f32 %v1259_v36, %v1258_v34 }
 0x113   :  { %v1645_v38 = vpop.f32.mrf.mxu1  ;;  %v660_v18 = vadd.f32 %v1196_v10, %v1636_v14 }
 0x114   :  { %v1198_v39 = vpop.f32.mrf.mxu0 }
 0x115   :  { %v1647_v40 = vpop.f32.mrf.mxu1  ;;  %v1199_v6 = vadd.f32 %v1198_v39, %v1197_v37 }
 0x116   :  { %v1200_v41 = vpop.f32.mrf.mxu0  ;;  %v1679_v21 = vadd.f32 %v1647_v40, %v1645_v38 }
 0x117   :  { %v1649_v42 = vpop.f32.mrf.mxu1  ;;  %v1684_v32 = vadd.f32 %v1199_v6, %v1636_v14 }
 0x118   :  { %v1201_v43 = vpop.f32.mrf.mxu0 }
 0x119   :  { %v1265_v44 = vpop.f32.mrf.mxu1  ;;  %v1202_v16 = vadd.f32 %v1201_v43, %v1200_v41 }
 0x11a   :  { %v1203_v45 = vpop.f32.mrf.mxu0  ;;  %v1266_v23 = vadd.f32 %v1265_v44, %v1649_v42 }
 0x11b   :  { %v1651_v46 = vpop.f32.mrf.mxu1  ;;  %v668_v8 = vadd.f32 %v1202_v16, %v1636_v14 }
 0x11c   :  { %v1204_v47 = vpop.f32.mrf.mxu0 }
 0x11d   :  { %v1653_v48 = vpop.f32.mrf.mxu1  ;;  %v1205_v26 = vadd.f32 %v1204_v47, %v1203_v45 }
 0x11e   :  { %v1206_v49 = vpop.f32.mrf.mxu0 }
 0x11f   :  { %v1655_v50 = vpop.f32.mrf.mxu1 }
 0x120   :  { %v1207_v51 = vpop.f32.mrf.mxu0 }
 0x121   :  { %v1271_v52 = vpop.f32.mrf.mxu1  ;;  %v1208_v31 = vadd.f32 %v1207_v51, %v1206_v49 }
 0x122   :  { %v1209_v53 = vpop.f32.mrf.mxu0  ;;  %v1272_v49 = vadd.f32 %v1271_v52, %v1655_v50 }
 0x123   :  { %v1273_v54 = vpop.f32.mrf.mxu1  ;;  %v676_v28 = vadd.f32 %v1208_v31, %v1636_v14 }
 0x124   :  { %v1210_v55 = vpop.f32.mrf.mxu0 }
 0x125   :  { %v1274_v56 = vpop.f32.mrf.mxu1  ;;  %v1211_v41 = vadd.f32 %v1210_v55, %v1209_v53  ;;  %v765_v53 = vadd.f32 %v1266_v23, %v668_v8 }
 0x126   :  { %v1212_v57 = vpop.f32.mrf.mxu0  ;;  %v1275_v51 = vadd.f32 %v1274_v56, %v1273_v54 }
 0x127   :  { %v1276_v58 = vpop.f32.mrf.mxu1  ;;  %v679_v34 = vadd.f32 %v1211_v41, %v1636_v14 }
 0x128   :  { %v1213_v59 = vpop.f32.mrf.mxu0 }
 0x129   :  { %v1277_v60 = vpop.f32.mrf.mxu1  ;;  %v1214_v22 = vadd.f32 %v1213_v59, %v1212_v57  ;;  %v749_v59 = vadd.f32 %v1254_v27, %v652_v19  ;;  %v776_v54 = vadd.f32 %v1275_v51, %v679_v34 }
 0x12a   :  { %v1215_v61 = vpop.f32.mrf.mxu0  ;;  %v1278_v36 = vadd.f32 %v1277_v60, %v1276_v58  ;;  %v773_v60 = vadd.f32 %v1272_v49, %v676_v28 }
 0x12b   :  { %v1279_v62 = vpop.f32.mrf.mxu1  ;;  %v684_v10 = vadd.f32 %v1214_v22, %v1636_v14 }
 0x12c   :  { %v1216_v63 = vpop.f32.mrf.mxu0 }
 0x12d   :  { %v1280_v0 = vpop.f32.mrf.mxu1  ;;  %v1217_v43 = vadd.f32 %v1216_v63, %v1215_v61  ;;  %v781_v47 = vadd.f32 %v1278_v36, %v684_v10  ;;  %v671_v61 = vadd.f32 %v1205_v26, %v1636_v14  ;;  %v1269_v63 = vadd.f32 %v1653_v48, %v1651_v46 }
 0x12e   :  { %v1218_v1 = vpop.f32.mrf.mxu0  ;;  %v1281_v42 = vadd.f32 %v1280_v0, %v1279_v62 }
 0x12f   :  { %v1657_v2 = vpop.f32.mrf.mxu1  ;;  %v687_v37 = vadd.f32 %v1217_v43, %v1636_v14 }
 0x130   :  { %v1219_v3 = vpop.f32.mrf.mxu0 }
 0x131   :  { %v1659_v4 = vpop.f32.mrf.mxu1  ;;  %v1220_v44 = vadd.f32 %v1219_v3, %v1218_v1  ;;  %v784_v52 = vadd.f32 %v1281_v42, %v687_v37  ;;  %v1739_v1 = vld [vmem:[#allocation8_spill] sm:$0xff]  ;;  %v768_v37 = vadd.f32 %v1269_v63, %v671_v61 }
 0x132   :  { %1734 = vst [vmem:[#allocation9_spill] sm:$0xff] %v1659_v4  ;;  %v1221_v5 = vpop.f32.mrf.mxu0  ;;  %v1675_v4 = vadd.f32 %v1260_v35, %v660_v18 }
 0x133   :  { %v1661_v7 = vpop.f32.mrf.mxu1 }
 0x134   :  { %1735 = vst [vmem:[#allocation10_spill] sm:$0xff] %v1661_v7  ;;  %v1222_v11 = vpop.f32.mrf.mxu0 }
 0x135   :  { %v1663_v12 = vpop.f32.mrf.mxu1  ;;  %v1223_v45 = vadd.f32 %v1222_v11, %v1221_v5  ;;  %v692_v11 = vadd.f32 %v1220_v44, %v1636_v14 }
 0x136   :  { %1736 = vst [vmem:[#allocation11_spill] sm:$0xff] %v1663_v12  ;;  %v1224_v13 = vpop.f32.mrf.mxu0 }
 0x137   :  { %v1666_v17 = vpop.f32.mrf.mxu1  ;;  %v695_v46 = vadd.f32 %v1223_v45, %v1636_v14  ;;  %v760_v45 = vadd.f32 %v1679_v21, %v1684_v32 }
 0x138   :  { %1737 = vst [vmem:[#allocation12_spill] sm:$0xff] %v1666_v17  ;;  %v1225_v7 = vpop.f32.mrf.mxu0 }
 0x139   :  { %v1289_v33 = vpop.f32.mrf.mxu1  ;;  %v1226_v38 = vadd.f32 %v1225_v7, %v1224_v13  ;;  %v1738_v56 = vld [vmem:[#allocation9_spill] sm:$0xff] }
 0x13a   :  { %v1227_v12 = vpop.f32.mrf.mxu0  ;;  %v1284_v62 = vadd.f32 %v1738_v56, %v1657_v2 }
 0x13b   :  { %v1291_v17 = vpop.f32.mrf.mxu1  ;;  %v700_v0 = vadd.f32 %v1226_v38, %v1636_v14 }
 0x13c   :  { %v1228_v57 = vpop.f32.mrf.mxu0  ;;  %v789_v34 = vadd.f32 %v1284_v62, %v692_v11 }
 0x13d   :  { %v1292_v30 = vpop.f32.mrf.mxu1  ;;  %v1229_v16 = vadd.f32 %v1228_v57, %v1227_v12  ;;  %v1742_v49 = vld [vmem:[#allocation11_spill] sm:$0xff] }
 0x13e   :  { %v1316_v39 = vpop.f32.mrf.mxu0 }
 0x13f   :  { %v1324_v40 = vpop.f32.mrf.mxu1  ;;  %v846_v58 = vadd.f32 %v1316_v39, %v749_v59  ;;  %v1740_v20 = vld [vmem:[#allocation12_spill] sm:$0xff]  ;;  %v703_v2 = vadd.f32 %v1229_v16, %v1636_v14  ;;  %v1293_v59 = vadd.f32 %v1292_v30, %v1291_v17  ;;  %v1741_v39 = vld [vmem:[#allocation10_spill] sm:$0xff] }
 0x140   :  { %v837_v55 = vpop.f32.mrf.mxu0  ;;  %v878_v19 = vadd.f32 %v1324_v40, %v781_v47  ;;  %v1290_v18 = vadd.f32 %v1289_v33, %v1740_v20  ;;  %v1287_v51 = vadd.f32 %v1742_v49, %v1741_v39 }
 0x141   :  { %v869_v15 = vpop.f32.mrf.mxu1  ;;  %v838_v3 = vadd.f32 %v837_v55, %v1739_v1  ;;  %v902_v22 = vmax.f32 %v846_v58, 0.0  ;;  %v800_v40 = vadd.f32 %v1293_v59, %v703_v2 }
 0x142   :  { %v1317_v50 = vpop.f32.mrf.mxu0  ;;  %v870_v48 = vadd.f32 %v869_v15, %v773_v60  ;;  %v910_v31 = vmax.f32 %v878_v19, 0.0  ;;  %v797_v10 = vadd.f32 %v1290_v18, %v700_v0  ;;  %v792_v63 = vadd.f32 %v1287_v51, %v695_v46 }
 0x143   :  { %v849_v5 = vadd.f32 %v1317_v50, %v752_v24  ;;  %v1325_v7 = vpop.f32.mrf.mxu1  ;;  %v900_v41 = vmax.f32 %v838_v3, 0.0 }
 0x144   :  { %v881_v13 = vadd.f32 %v1325_v7, %v784_v52  ;;  %v840_v12 = vpop.f32.mrf.mxu0  ;;  %v908_v23 = vmax.f32 %v870_v48, 0.0 }
 0x145   :  { %v903_v25 = vmax.f32 %v849_v5, 0.0  ;;  %v841_v27 = vadd.f32 %v840_v12, %v744_v9  ;;  %v872_v29 = vpop.f32.mrf.mxu1 }
 0x146   :  { %v911_v35 = vmax.f32 %v881_v13, 0.0  ;;  %v873_v6 = vadd.f32 %v872_v29, %v776_v54  ;;  %v1320_v24 = vpop.f32.mrf.mxu0 }
 0x147   :  { %v1127_v43 = vpack.c.bf16 %v903_v25, %v902_v22  ;;  %v901_v8 = vmax.f32 %v841_v27, 0.0  ;;  %v1328_v57 = vpop.f32.mrf.mxu1  ;;  %v862_v14 = vadd.f32 %v1320_v24, %v765_v53 }
 0x148   :  { %v1147_v26 = vpack.c.bf16 %v911_v35, %v910_v31  ;;  %v909_v28 = vmax.f32 %v873_v6, 0.0  ;;  %v853_v33 = vpop.f32.mrf.mxu0  ;;  %v894_v30 = vadd.f32 %v1328_v57, %v797_v10 }
 0x149   :  { %1159 = vst [vmem:[%s1732_s3 + $0x8] sm:$0xff] %v1127_v43   ;;  %v1122_v9 = vpack.c.bf16 %v901_v8, %v900_v41  ;;  %v885_v36 = vpop.f32.mrf.mxu1  ;;  %v854_v53 = vadd.f32 %v853_v33, %v1675_v4  ;;  %v906_v58 = vmax.f32 %v862_v14, 0.0 }
 0x14a   :  { %1163 = vst [vmem:[%s1732_s3 + $0x28] sm:$0xff] %v1147_v26   ;;  %v1142_v17 = vpack.c.bf16 %v909_v28, %v908_v23  ;;  %v1321_v38 = vpop.f32.mrf.mxu0  ;;  %v886_v47 = vadd.f32 %v885_v36, %v789_v34  ;;  %v914_v19 = vmax.f32 %v894_v30, 0.0 }
 0x14b   :  { %1123 = vst [vmem:[%s1732_s3] sm:$0xff] %v1122_v9   ;;  %v865_v42 = vadd.f32 %v1321_v38, %v768_v37  ;;  %v1329_v44 = vpop.f32.mrf.mxu1  ;;  %v904_v52 = vmax.f32 %v854_v53, 0.0 }
 0x14c   :  { %1162 = vst [vmem:[%s1732_s3 + $0x20] sm:$0xff] %v1142_v17   ;;  %v897_v55 = vadd.f32 %v1329_v44, %v800_v40  ;;  %v856_v61 = vpop.f32.mrf.mxu0  ;;  %v912_v62 = vmax.f32 %v886_v47, 0.0 }
 0x14d   :  { %v907_v60 = vmax.f32 %v865_v42, 0.0  ;;  %v857_v15 = vadd.f32 %v856_v61, %v760_v45  ;;  %v888_v16 = vpop.f32.mrf.mxu1 }
 0x14e   :  { %v915_v50 = vmax.f32 %v897_v55, 0.0  ;;  %v889_v4 = vadd.f32 %v888_v16, %v792_v63 }
 0x14f   :  { %v1137_v54 = vpack.c.bf16 %v907_v60, %v906_v58  ;;  %v905_v56 = vmax.f32 %v857_v15, 0.0 }
 0x150   :  { %v1157_v21 = vpack.c.bf16 %v915_v50, %v914_v19  ;;  %v913_v32 = vmax.f32 %v889_v4, 0.0 }
 0x151   :  { %1161 = vst [vmem:[%s1732_s3 + $0x18] sm:$0xff] %v1137_v54   ;;  %v1132_v0 = vpack.c.bf16 %v905_v56, %v904_v52 }
 0x152   :  { %1165 = vst [vmem:[%s1732_s3 + $0x38] sm:$0xff] %v1157_v21   ;;  %v1152_v1 = vpack.c.bf16 %v913_v32, %v912_v62 }
 0x153   :  { %1160 = vst [vmem:[%s1732_s3 + $0x10] sm:$0xff] %v1132_v0  }
 0x154   :  { %1164 = vst [vmem:[%s1732_s3 + $0x30] sm:$0xff] %v1152_v1  }
 0x155   :  { %1000 = vsyncpa [#allocation3], 1 }
 0x156   :  { %1001 = vsyncpa [#allocation5], 1 }

// kernel: chess_model_forward.7
= control target key start
LH: loop header
LB: loop body
LE: loop exit
PB: predicated region body
PF: predicated region fallthrough
CT: control target
= control target key end

     0   :  { %8 = vsyncpa [#allocation3], 0  ;;  %s3269_s0 = inlined_call_operand.vmem [shape: bf16[128,1152], index: 0, kind: input, shape index: {}]   ;;  %s3270_s1 = inlined_call_operand.hbm [shape: bf16[1152,256], index: 1, kind: input, shape index: {}]   ;;  %s3271_s2 = inlined_call_operand.hbm [shape: f32[1,256], index: 2, kind: input, shape index: {}]   ;;  %s3272_s3 = inlined_call_operand.vmem [shape: bf16[128,256], index: 3, kind: output, shape index: {}]  }
   0x1   :  { %9 = vsyncpa [#allocation5], 0  ;;  %s2713_s12 = smov [#allocation2]  }
   0x2   :  { %s17_s13 = sshll.u32 %s2713_s12, 4  ;;  %s18_s13 = int_to_ptr.vmem [resolvable:$true] %s17_s13 }
   0x3   :  { %s2677_s14 = scalar_lea.vmem %s18_s13, 18432  ;;  %p2682_p1 = scmp.lt.s32.totalorder %s18_s13, %s18_s13 }
   0x4   :  { %p2678_p0 = scmp.ne.s32.totalorder %s18_s13, %s2677_s14  ;;  %p2683_p2 = scmp.lt.s32.totalorder %s2677_s14, %s2677_s14 }
   0x6   :  { %p2684_p3 = por %p2683_p2, %p2682_p1 }
   0x8   :  { %p2685_p4 = pnand %p2684_p3, %p2678_p0 }
   0xa   :  { %2688 = shalt.err (!%p2685_p4)
}
   0xb   :  { %s2714_s15 = smov 128   ;;  %s2715_s16 = smov 8  }
   0xc   :  { %23 = dma.hbm_to_vmem [thread:$0]  %s3270_s1, 18432, %s18_s13, [#allocation3], %s2714_s15, %s2714_s15, %s2715_s16  }
   0xd   :  { %s2716_s19 = smov [#allocation4]  }
   0xe   :  { %s30_s20 = sshll.u32 %s2716_s19, 4  ;;  %s31_s20 = int_to_ptr.vmem [resolvable:$true] %s30_s20 }
   0xf   :  { %s2697_s21 = scalar_lea.vmem %s31_s20, 32  ;;  %p2702_p6 = scmp.lt.s32.totalorder %s31_s20, %s31_s20 }
  0x10   :  { %p2698_p5 = scmp.ne.s32.totalorder %s31_s20, %s2697_s21  ;;  %p2703_p7 = scmp.lt.s32.totalorder %s2697_s21, %s2697_s21 }
  0x12   :  { %p2704_p8 = por %p2703_p7, %p2702_p6 }
  0x14   :  { %p2705_p9 = pnand %p2704_p8, %p2698_p5 }
  0x16   :  { %2708 = shalt.err (!%p2705_p9)
}
  0x17   :  { %33 = dma.hbm_to_vmem [thread:$0]  %s3271_s2, 32, %s31_s20, [#allocation5]  }
  0x18   :  { %2709 = dma.done.wait [#allocation3], 18432  }
  0x19   :  { %2710 = vsyncadd [#allocation3], 4294948864 }
  0x1a   :  { %2711 = dma.done.wait [#allocation5], 32  }
  0x1b   :  { %2712 = vsyncadd [#allocation5], 4294967264  ;;  %v2349_v0 = vld [vmem:[#allocation2 + $0x74] ss:$8 sps:$4 sm:$0xff]   ;;  %v2353_v2 = vld [vmem:[#allocation2 + $0x70] ss:$8 sps:$4 sm:$0xff]  }
  0x1c   :  { %v2351_v1 = vld [vmem:[#allocation2 + $0x174] ss:$8 sps:$4 sm:$0xff]   ;;  %1365 = vmatprep.subr.bf16.mxu0 %v2349_v0  ;;  %v2354_v3 = vld [vmem:[#allocation2 + $0x170] ss:$8 sps:$4 sm:$0xff]   ;;  %v2355_v4 = vld [vmem:[#allocation2 + $0x64] ss:$8 sps:$4 sm:$0xff]  }
  0x1d   :  { %1478 = vmatprep.subr.bf16.mxu1 %v2351_v1  ;;  %1366 = vmatpush1.bf16.msra.mxu0 %v2353_v2  ;;  %v2357_v5 = vld [vmem:[#allocation2 + $0x164] ss:$8 sps:$4 sm:$0xff]   ;;  %v2359_v6 = vld [vmem:[#allocation2 + $0x60] ss:$8 sps:$4 sm:$0xff]   ;;  %v2361_v8 = vld [vmem:[#allocation2 + $0x54] ss:$8 sps:$4 sm:$0xff]  }
  0x1e   :  { %1479 = vmatpush1.bf16.msra.mxu1 %v2354_v3  ;;  %1367 = vmatprep.subr.bf16.mxu0 %v2355_v4  ;;  %v2360_v7 = vld [vmem:[#allocation2 + $0x160] ss:$8 sps:$4 sm:$0xff]   ;;  %v2363_v9 = vld [vmem:[#allocation2 + $0x154] ss:$8 sps:$4 sm:$0xff]   ;;  %v2365_v10 = vld [vmem:[#allocation2 + $0x50] ss:$8 sps:$4 sm:$0xff]  }
  0x1f   :  { %1480 = vmatprep.subr.bf16.mxu1 %v2357_v5  ;;  %v2366_v11 = vld [vmem:[#allocation2 + $0x150] ss:$8 sps:$4 sm:$0xff]   ;;  %v2367_v12 = vld [vmem:[#allocation2 + $0x44] ss:$8 sps:$4 sm:$0xff]   ;;  %v2371_v14 = vld [vmem:[#allocation2 + $0x40] ss:$8 sps:$4 sm:$0xff]  }
  0x20   :  { %v2369_v13 = vld [vmem:[#allocation2 + $0x144] ss:$8 sps:$4 sm:$0xff]   ;;  %v2372_v15 = vld [vmem:[#allocation2 + $0x140] ss:$8 sps:$4 sm:$0xff]   ;;  %v2373_v16 = vld [vmem:[#allocation2 + $0x34] ss:$8 sps:$4 sm:$0xff]  }
  0x21   :  { %1368 = vmatpush1.bf16.msra.mxu0 %v2359_v6  ;;  %v2375_v17 = vld [vmem:[#allocation2 + $0x134] ss:$8 sps:$4 sm:$0xff]   ;;  %v2377_v18 = vld [vmem:[#allocation2 + $0x30] ss:$8 sps:$4 sm:$0xff]   ;;  %v2379_v20 = vld [vmem:[#allocation2 + $0x24] ss:$8 sps:$4 sm:$0xff]  }
  0x22   :  { %1481 = vmatpush1.bf16.msra.mxu1 %v2360_v7  ;;  %1369 = vmatprep.subr.bf16.mxu0 %v2361_v8  ;;  %v2378_v19 = vld [vmem:[#allocation2 + $0x130] ss:$8 sps:$4 sm:$0xff]   ;;  %v2381_v21 = vld [vmem:[#allocation2 + $0x124] ss:$8 sps:$4 sm:$0xff]   ;;  %v2383_v22 = vld [vmem:[#allocation2 + $0x20] ss:$8 sps:$4 sm:$0xff]  }
  0x23   :  { %1482 = vmatprep.subr.bf16.mxu1 %v2363_v9  ;;  %v2384_v23 = vld [vmem:[#allocation2 + $0x120] ss:$8 sps:$4 sm:$0xff]   ;;  %v2385_v24 = vld [vmem:[#allocation2 + $0x14] ss:$8 sps:$4 sm:$0xff]   ;;  %v2389_v26 = vld [vmem:[#allocation2 + $0x10] ss:$8 sps:$4 sm:$0xff]  }
  0x24   :  { %v2387_v25 = vld [vmem:[#allocation2 + $0x114] ss:$8 sps:$4 sm:$0xff]   ;;  %v2390_v27 = vld [vmem:[#allocation2 + $0x110] ss:$8 sps:$4 sm:$0xff]   ;;  %v2391_v28 = vld [vmem:[#allocation2 + $0x4] ss:$8 sps:$4 sm:$0xff]  }
  0x25   :  { %1370 = vmatpush1.bf16.msra.mxu0 %v2365_v10  ;;  %v2393_v29 = vld [vmem:[#allocation2 + $0x104] ss:$8 sps:$4 sm:$0xff]   ;;  %v2395_v30 = vld [vmem:[#allocation2] ss:$8 sps:$4 sm:$0xff]   ;;  %v2397_v32 = vld [vmem:[#allocation2 + $0xf4] ss:$8 sps:$4 sm:$0xff]  }
  0x26   :  { %1483 = vmatpush1.bf16.msra.mxu1 %v2366_v11  ;;  %1371 = vmatprep.subr.bf16.mxu0 %v2367_v12  ;;  %v2396_v31 = vld [vmem:[#allocation2 + $0x100] ss:$8 sps:$4 sm:$0xff]   ;;  %v2399_v33 = vld [vmem:[#allocation2 + $0x1f4] ss:$8 sps:$4 sm:$0xff]   ;;  %v2401_v34 = vld [vmem:[#allocation2 + $0xf0] ss:$8 sps:$4 sm:$0xff]  }
  0x27   :  { %1484 = vmatprep.subr.bf16.mxu1 %v2369_v13  ;;  %v2402_v35 = vld [vmem:[#allocation2 + $0x1f0] ss:$8 sps:$4 sm:$0xff]   ;;  %v2403_v36 = vld [vmem:[#allocation2 + $0xe4] ss:$8 sps:$4 sm:$0xff]   ;;  %v2407_v38 = vld [vmem:[#allocation2 + $0xe0] ss:$8 sps:$4 sm:$0xff]  }
  0x28   :  { %v2405_v37 = vld [vmem:[#allocation2 + $0x1e4] ss:$8 sps:$4 sm:$0xff]   ;;  %v2408_v39 = vld [vmem:[#allocation2 + $0x1e0] ss:$8 sps:$4 sm:$0xff]   ;;  %v2409_v40 = vld [vmem:[#allocation2 + $0xd4] ss:$8 sps:$4 sm:$0xff]  }
  0x29   :  { %1372 = vmatpush1.bf16.msra.mxu0 %v2371_v14  ;;  %v2411_v41 = vld [vmem:[#allocation2 + $0x1d4] ss:$8 sps:$4 sm:$0xff]   ;;  %v2413_v42 = vld [vmem:[#allocation2 + $0xd0] ss:$8 sps:$4 sm:$0xff]   ;;  %v2415_v44 = vld [vmem:[#allocation2 + $0xc4] ss:$8 sps:$4 sm:$0xff]  }
  0x2a   :  { %1485 = vmatpush1.bf16.msra.mxu1 %v2372_v15  ;;  %1373 = vmatprep.subr.bf16.mxu0 %v2373_v16  ;;  %v2414_v43 = vld [vmem:[#allocation2 + $0x1d0] ss:$8 sps:$4 sm:$0xff]   ;;  %v2417_v45 = vld [vmem:[#allocation2 + $0x1c4] ss:$8 sps:$4 sm:$0xff]   ;;  %v2419_v46 = vld [vmem:[#allocation2 + $0xc0] ss:$8 sps:$4 sm:$0xff]  }
  0x2b   :  { %1486 = vmatprep.subr.bf16.mxu1 %v2375_v17  ;;  %v2420_v47 = vld [vmem:[#allocation2 + $0x1c0] ss:$8 sps:$4 sm:$0xff]   ;;  %v2421_v48 = vld [vmem:[#allocation2 + $0xb4] ss:$8 sps:$4 sm:$0xff]   ;;  %v2450_v51 = vld [vmem:[%s3269_s0 + $0xc] ss:$36 sps:$4 sm:$0xff]  }
  0x2c   :  { %v2447_v49 = vld [vmem:[%s3269_s0 + $0x4] ss:$36 sps:$4 sm:$0xff]   ;;  %v2423_v50 = vld [vmem:[#allocation2 + $0x1b4] ss:$8 sps:$4 sm:$0xff]   ;;  %v2425_v52 = vld [vmem:[#allocation2 + $0xb0] ss:$8 sps:$4 sm:$0xff]   ;;  %1510 = vmatprep.mubr.bf16.mxu1 %v2450_v51 }
  0x2d   :  { %1374 = vmatpush1.bf16.msra.mxu0 %v2377_v18  ;;  %1397 = vmatprep.mubr.bf16.mxu0 %v2447_v49  ;;  %v2426_v53 = vld [vmem:[#allocation2 + $0x1b0] ss:$8 sps:$4 sm:$0xff]   ;;  %v2427_v54 = vld [vmem:[#allocation2 + $0xa4] ss:$8 sps:$4 sm:$0xff]   ;;  %v2431_v56 = vld [vmem:[#allocation2 + $0xa0] ss:$8 sps:$4 sm:$0xff]  }
  0x2e   :  { %1487 = vmatpush1.bf16.msra.mxu1 %v2378_v19  ;;  %1375 = vmatprep.subr.bf16.mxu0 %v2379_v20  ;;  %v2429_v55 = vld [vmem:[#allocation2 + $0x1a4] ss:$8 sps:$4 sm:$0xff]   ;;  %v2432_v57 = vld [vmem:[#allocation2 + $0x1a0] ss:$8 sps:$4 sm:$0xff]   ;;  %v2433_v58 = vld [vmem:[#allocation2 + $0x94] ss:$8 sps:$4 sm:$0xff]  }
  0x2f   :  { %1488 = vmatprep.subr.bf16.mxu1 %v2381_v21  ;;  %v2435_v59 = vld [vmem:[#allocation2 + $0x194] ss:$8 sps:$4 sm:$0xff]   ;;  %v2437_v60 = vld [vmem:[#allocation2 + $0x90] ss:$8 sps:$4 sm:$0xff]   ;;  %v2439_v62 = vld [vmem:[#allocation2 + $0x84] ss:$8 sps:$4 sm:$0xff]  }
  0x30   :  { %v2438_v61 = vld [vmem:[#allocation2 + $0x190] ss:$8 sps:$4 sm:$0xff]   ;;  %v2441_v63 = vld [vmem:[#allocation2 + $0x184] ss:$8 sps:$4 sm:$0xff]   ;;  %v2443_v0 = vld [vmem:[#allocation2 + $0x80] ss:$8 sps:$4 sm:$0xff]  }
  0x31   :  { %1376 = vmatpush1.bf16.msra.mxu0 %v2383_v22  ;;  %v2444_v1 = vld [vmem:[#allocation2 + $0x180] ss:$8 sps:$4 sm:$0xff]   ;;  %v2453_v2 = vld [vmem:[#allocation2 + $0x274] ss:$8 sps:$4 sm:$0xff]   ;;  %v2451_v6 = vld [vmem:[#allocation2 + $0x270] ss:$8 sps:$4 sm:$0xff]  }
  0x32   :  { %1489 = vmatpush1.bf16.msra.mxu1 %v2384_v23  ;;  %1377 = vmatprep.subr.bf16.mxu0 %v2385_v24  ;;  %v2456_v3 = vld [vmem:[#allocation2 + $0x374] ss:$8 sps:$4 sm:$0xff]   ;;  %v2445_v4 = vld [vmem:[%s3269_s0] ss:$36 sps:$4 sm:$0xff]   ;;  %v2448_v5 = vld [vmem:[%s3269_s0 + $0x8] ss:$36 sps:$4 sm:$0xff]  }
  0x33   :  { %1490 = vmatprep.subr.bf16.mxu1 %v2387_v25  ;;  %v2454_v7 = vld [vmem:[#allocation2 + $0x370] ss:$8 sps:$4 sm:$0xff]   ;;  %v2459_v8 = vld [vmem:[#allocation2 + $0x264] ss:$8 sps:$4 sm:$0xff]   ;;  %v2457_v12 = vld [vmem:[#allocation2 + $0x260] ss:$8 sps:$4 sm:$0xff]  }
  0x34   :  { %v2462_v9 = vld [vmem:[#allocation2 + $0x364] ss:$8 sps:$4 sm:$0xff]   ;;  %v2465_v11 = vld [vmem:[%s3269_s0 + $0x54] ss:$36 sps:$4 sm:$0xff]   ;;  %v2460_v13 = vld [vmem:[#allocation2 + $0x360] ss:$8 sps:$4 sm:$0xff]  }
  0x35   :  { %1378 = vmatpush1.bf16.msra.mxu0 %v2389_v26  ;;  %v2463_v10 = vld [vmem:[%s3269_s0 + $0x4c] ss:$36 sps:$4 sm:$0xff]   ;;  %v2471_v14 = vld [vmem:[#allocation2 + $0x254] ss:$8 sps:$4 sm:$0xff]   ;;  %v2475_v24 = vld [vmem:[#allocation2 + $0x240] ss:$8 sps:$4 sm:$0xff]  }
  0x36   :  { %1491 = vmatpush1.bf16.msra.mxu1 %v2390_v27  ;;  %1379 = vmatprep.subr.bf16.mxu0 %v2391_v28  ;;  %v2474_v15 = vld [vmem:[#allocation2 + $0x354] ss:$8 sps:$4 sm:$0xff]   ;;  %v2467_v16 = vld [vmem:[%s3269_s0 + $0x48] ss:$36 sps:$4 sm:$0xff]   ;;  %v2469_v18 = vld [vmem:[#allocation2 + $0x250] ss:$8 sps:$4 sm:$0xff]  }
  0x37   :  { %1492 = vmatprep.subr.bf16.mxu1 %v2393_v29  ;;  %v2468_v17 = vld [vmem:[%s3269_s0 + $0x50] ss:$36 sps:$4 sm:$0xff]   ;;  %v2477_v20 = vld [vmem:[#allocation2 + $0x244] ss:$8 sps:$4 sm:$0xff]   ;;  %v2483_v23 = vld [vmem:[%s3269_s0 + $0x9c] ss:$36 sps:$4 sm:$0xff]  }
  0x38   :  { %v2472_v19 = vld [vmem:[#allocation2 + $0x350] ss:$8 sps:$4 sm:$0xff]   ;;  %v2480_v21 = vld [vmem:[#allocation2 + $0x344] ss:$8 sps:$4 sm:$0xff]   ;;  %v2478_v25 = vld [vmem:[#allocation2 + $0x340] ss:$8 sps:$4 sm:$0xff]  }
  0x39   :  { %1380 = vmatpush1.bf16.msra.mxu0 %v2395_v30  ;;  %v2481_v22 = vld [vmem:[%s3269_s0 + $0x94] ss:$36 sps:$4 sm:$0xff]   ;;  %v2514_v49 = vld [vmem:[#allocation2 + $0x300] ss:$8 sps:$4 sm:$0xff]  }
  0x3a   :  { %1493 = vmatpush1.bf16.msra.mxu1 %v2396_v31  ;;  %1381 = vmatprep.subr.bf16.mxu0 %v2397_v32  ;;  %v2489_v26 = vld [vmem:[#allocation2 + $0x234] ss:$8 sps:$4 sm:$0xff]   ;;  %v2487_v30 = vld [vmem:[#allocation2 + $0x230] ss:$8 sps:$4 sm:$0xff]   ;;  %v2495_v32 = vld [vmem:[#allocation2 + $0x224] ss:$8 sps:$4 sm:$0xff]  }
  0x3b   :  { %1494 = vmatprep.subr.bf16.mxu1 %v2399_v33  ;;  %v2492_v27 = vld [vmem:[#allocation2 + $0x334] ss:$8 sps:$4 sm:$0xff]   ;;  %v2490_v31 = vld [vmem:[#allocation2 + $0x330] ss:$8 sps:$4 sm:$0xff]   ;;  %v2498_v33 = vld [vmem:[#allocation2 + $0x324] ss:$8 sps:$4 sm:$0xff]  }
  0x3c   :  { %v2485_v28 = vld [vmem:[%s3269_s0 + $0x90] ss:$36 sps:$4 sm:$0xff]   ;;  %v2486_v29 = vld [vmem:[%s3269_s0 + $0x98] ss:$36 sps:$4 sm:$0xff]  }
  0x3d   :  { %1382 = vmatpush2.bf16.msra.mxu0 %v2401_v34  ;;  %v2499_v34 = vld [vmem:[%s3269_s0 + $0xdc] ss:$36 sps:$4 sm:$0xff]  }
  0x3e   :  { %1495 = vmatpush2.bf16.msra.mxu1 %v2402_v35  ;;  %1383 = vmatprep.subr.bf16.mxu0 %v2403_v36  ;;  %v2501_v35 = vld [vmem:[%s3269_s0 + $0xe4] ss:$36 sps:$4 sm:$0xff]   ;;  %v2528_v51 = vld [vmem:[#allocation2 + $0x3f4] ss:$8 sps:$4 sm:$0xff]  }
  0x3f   :  { %1496 = vmatprep.subr.bf16.mxu1 %v2405_v37  ;;  %v2493_v36 = vld [vmem:[#allocation2 + $0x220] ss:$8 sps:$4 sm:$0xff]  }
  0x40   :  { %v2496_v37 = vld [vmem:[#allocation2 + $0x320] ss:$8 sps:$4 sm:$0xff]  }
  0x41   :  { %1384 = vmatpush2.bf16.msra.mxu0 %v2407_v38  ;;  %v2507_v38 = vld [vmem:[#allocation2 + $0x214] ss:$8 sps:$4 sm:$0xff]  }
  0x42   :  { %1497 = vmatpush2.bf16.msra.mxu1 %v2408_v39  ;;  %1385 = vmatprep.subr.bf16.mxu0 %v2409_v40  ;;  %v2510_v39 = vld [vmem:[#allocation2 + $0x314] ss:$8 sps:$4 sm:$0xff]  }
  0x43   :  { %1498 = vmatprep.subr.bf16.mxu1 %v2411_v41  ;;  %v2503_v40 = vld [vmem:[%s3269_s0 + $0xd8] ss:$36 sps:$4 sm:$0xff]   ;;  %v2504_v41 = vld [vmem:[%s3269_s0 + $0xe0] ss:$36 sps:$4 sm:$0xff]  }
  0x45   :  { %1386 = vmatpush2.bf16.msra.mxu0 %v2413_v42  ;;  %v2505_v42 = vld [vmem:[#allocation2 + $0x210] ss:$8 sps:$4 sm:$0xff]  }
  0x46   :  { %1499 = vmatpush2.bf16.msra.mxu1 %v2414_v43  ;;  %1387 = vmatprep.subr.bf16.mxu0 %v2415_v44  ;;  %v2508_v43 = vld [vmem:[#allocation2 + $0x310] ss:$8 sps:$4 sm:$0xff]   ;;  %v2513_v44 = vld [vmem:[#allocation2 + $0x204] ss:$8 sps:$4 sm:$0xff]  }
  0x47   :  { %1500 = vmatprep.subr.bf16.mxu1 %v2417_v45  ;;  %v2516_v45 = vld [vmem:[#allocation2 + $0x304] ss:$8 sps:$4 sm:$0xff]  }
  0x49   :  { %1388 = vmatpush2.bf16.msra.mxu0 %v2419_v46  ;;  %v2517_v46 = vld [vmem:[%s3269_s0 + $0x124] ss:$36 sps:$4 sm:$0xff]  }
  0x4a   :  { %1501 = vmatpush2.bf16.msra.mxu1 %v2420_v47  ;;  %1389 = vmatprep.subr.bf16.mxu0 %v2421_v48  ;;  %v2519_v47 = vld [vmem:[%s3269_s0 + $0x12c] ss:$36 sps:$4 sm:$0xff]   ;;  %v2511_v48 = vld [vmem:[#allocation2 + $0x200] ss:$8 sps:$4 sm:$0xff]  }
  0x4b   :  { %1502 = vmatprep.subr.bf16.mxu1 %v2423_v50  ;;  %v2525_v50 = vld [vmem:[#allocation2 + $0x2f4] ss:$8 sps:$4 sm:$0xff]  }
  0x4d   :  { %1390 = vmatpush2.bf16.msra.mxu0 %v2425_v52  ;;  %v2521_v52 = vld [vmem:[%s3269_s0 + $0x120] ss:$36 sps:$4 sm:$0xff]  }
  0x4e   :  { %1503 = vmatpush2.bf16.msra.mxu1 %v2426_v53  ;;  %1391 = vmatprep.subr.bf16.mxu0 %v2427_v54  ;;  %v2522_v53 = vld [vmem:[%s3269_s0 + $0x128] ss:$36 sps:$4 sm:$0xff]   ;;  %v2523_v54 = vld [vmem:[#allocation2 + $0x2f0] ss:$8 sps:$4 sm:$0xff]  }
  0x4f   :  { %1504 = vmatprep.subr.bf16.mxu1 %v2429_v55  ;;  %v2526_v55 = vld [vmem:[#allocation2 + $0x3f0] ss:$8 sps:$4 sm:$0xff]  }
  0x51   :  { %1392 = vmatpush2.bf16.msra.mxu0 %v2431_v56  ;;  %v2531_v56 = vld [vmem:[#allocation2 + $0x2e4] ss:$8 sps:$4 sm:$0xff]  }
  0x52   :  { %1505 = vmatpush2.bf16.msra.mxu1 %v2432_v57  ;;  %1393 = vmatprep.subr.bf16.mxu0 %v2433_v58  ;;  %v2534_v57 = vld [vmem:[#allocation2 + $0x3e4] ss:$8 sps:$4 sm:$0xff]  }
  0x53   :  { %1506 = vmatprep.subr.bf16.mxu1 %v2435_v59  ;;  %v2535_v58 = vld [vmem:[%s3269_s0 + $0x16c] ss:$36 sps:$4 sm:$0xff]   ;;  %v2537_v59 = vld [vmem:[%s3269_s0 + $0x174] ss:$36 sps:$4 sm:$0xff]  }
  0x55   :  { %1394 = vmatpush2.bf16.msra.mxu0 %v2437_v60  ;;  %v2529_v60 = vld [vmem:[#allocation2 + $0x2e0] ss:$8 sps:$4 sm:$0xff]  }
  0x56   :  { %1507 = vmatpush2.bf16.msra.mxu1 %v2438_v61  ;;  %1395 = vmatprep.subr.bf16.mxu0 %v2439_v62  ;;  %v2532_v61 = vld [vmem:[#allocation2 + $0x3e0] ss:$8 sps:$4 sm:$0xff]   ;;  %v2543_v62 = vld [vmem:[#allocation2 + $0x2d4] ss:$8 sps:$4 sm:$0xff]  }
  0x57   :  { %1508 = vmatprep.subr.bf16.mxu1 %v2441_v63  ;;  %v2546_v63 = vld [vmem:[#allocation2 + $0x3d4] ss:$8 sps:$4 sm:$0xff]  }
  0x59   :  { %1396 = vmatpush2.bf16.msra.mxu0 %v2443_v0  ;;  %v2539_v0 = vld [vmem:[%s3269_s0 + $0x168] ss:$36 sps:$4 sm:$0xff]  }
  0x5a   :  { %1509 = vmatpush2.bf16.msra.mxu1 %v2444_v1  ;;  %1591 = vmatprep.subr.bf16.mxu0 %v2453_v2  ;;  %v2540_v1 = vld [vmem:[%s3269_s0 + $0x170] ss:$36 sps:$4 sm:$0xff]  }
  0x5b   :  { %1704 = vmatprep.subr.bf16.mxu1 %v2456_v3  ;;  %v2541_v2 = vld [vmem:[#allocation2 + $0x2d0] ss:$8 sps:$4 sm:$0xff]  }
  0x5c   :  { %1398 = vmatmul.mubr.bf16.vlgmr.msra.gmra.mxu0 %v2445_v4  ;;  %v2544_v3 = vld [vmem:[#allocation2 + $0x3d0] ss:$8 sps:$4 sm:$0xff]   ;;  %v2549_v4 = vld [vmem:[#allocation2 + $0x2c4] ss:$8 sps:$4 sm:$0xff]  }
  0x5d   :  { %1511 = vmatmul.mubr.bf16.vlgmr.msra.gmra.mxu1 %v2448_v5  ;;  %1592 = vmatpush1.bf16.msra.mxu0 %v2451_v6  ;;  %v2552_v5 = vld [vmem:[#allocation2 + $0x3c4] ss:$8 sps:$4 sm:$0xff]   ;;  %v2553_v6 = vld [vmem:[%s3269_s0 + $0x1b4] ss:$36 sps:$4 sm:$0xff]  }
  0x5e   :  { %1705 = vmatpush1.bf16.msra.mxu1 %v2454_v7  ;;  %1593 = vmatprep.subr.bf16.mxu0 %v2459_v8  ;;  %v2555_v7 = vld [vmem:[%s3269_s0 + $0x1bc] ss:$36 sps:$4 sm:$0xff]  }
  0x5f   :  { %1706 = vmatprep.subr.bf16.mxu1 %v2462_v9  ;;  %1407 = vmatprep.mubr.bf16.mxu0 %v2463_v10  ;;  %v2547_v8 = vld [vmem:[#allocation2 + $0x2c0] ss:$8 sps:$4 sm:$0xff]   ;;  %v2561_v10 = vld [vmem:[#allocation2 + $0x2b4] ss:$8 sps:$4 sm:$0xff]  }
  0x60   :  { %1520 = vmatprep.mubr.bf16.mxu1 %v2465_v11  ;;  %v2550_v9 = vld [vmem:[#allocation2 + $0x3c0] ss:$8 sps:$4 sm:$0xff]   ;;  %v2564_v11 = vld [vmem:[#allocation2 + $0x3b4] ss:$8 sps:$4 sm:$0xff]  }
  0x61   :  { %1594 = vmatpush1.bf16.msra.mxu0 %v2457_v12  ;;  %v2557_v12 = vld [vmem:[%s3269_s0 + $0x1b0] ss:$36 sps:$4 sm:$0xff]  }
  0x62   :  { %1707 = vmatpush1.bf16.msra.mxu1 %v2460_v13  ;;  %1595 = vmatprep.subr.bf16.mxu0 %v2471_v14  ;;  %v2558_v13 = vld [vmem:[%s3269_s0 + $0x1b8] ss:$36 sps:$4 sm:$0xff]  }
  0x63   :  { %1708 = vmatprep.subr.bf16.mxu1 %v2474_v15  ;;  %v2559_v14 = vld [vmem:[#allocation2 + $0x2b0] ss:$8 sps:$4 sm:$0xff]  }
  0x64   :  { %1408 = vmatmul.mubr.bf16.gmra.mxu0 %v2467_v16  ;;  %v2562_v15 = vld [vmem:[#allocation2 + $0x3b0] ss:$8 sps:$4 sm:$0xff]   ;;  %v2567_v16 = vld [vmem:[#allocation2 + $0x2a4] ss:$8 sps:$4 sm:$0xff]  }
  0x65   :  { %1521 = vmatmul.mubr.bf16.gmra.mxu1 %v2468_v17  ;;  %1596 = vmatpush1.bf16.msra.mxu0 %v2469_v18  ;;  %v2570_v17 = vld [vmem:[#allocation2 + $0x3a4] ss:$8 sps:$4 sm:$0xff]   ;;  %v2571_v18 = vld [vmem:[%s3269_s0 + $0x1fc] ss:$36 sps:$4 sm:$0xff]  }
  0x66   :  { %1709 = vmatpush1.bf16.msra.mxu1 %v2472_v19  ;;  %1597 = vmatprep.subr.bf16.mxu0 %v2477_v20  ;;  %v2573_v19 = vld [vmem:[%s3269_s0 + $0x204] ss:$36 sps:$4 sm:$0xff]  }
  0x67   :  { %1710 = vmatprep.subr.bf16.mxu1 %v2480_v21  ;;  %1417 = vmatprep.mubr.bf16.mxu0 %v2481_v22  ;;  %v2565_v20 = vld [vmem:[#allocation2 + $0x2a0] ss:$8 sps:$4 sm:$0xff]   ;;  %v2579_v22 = vld [vmem:[#allocation2 + $0x294] ss:$8 sps:$4 sm:$0xff]  }
  0x68   :  { %1530 = vmatprep.mubr.bf16.mxu1 %v2483_v23  ;;  %v2568_v21 = vld [vmem:[#allocation2 + $0x3a0] ss:$8 sps:$4 sm:$0xff]   ;;  %v2582_v23 = vld [vmem:[#allocation2 + $0x394] ss:$8 sps:$4 sm:$0xff]  }
  0x69   :  { %1598 = vmatpush1.bf16.msra.mxu0 %v2475_v24  ;;  %v2575_v24 = vld [vmem:[%s3269_s0 + $0x1f8] ss:$36 sps:$4 sm:$0xff]  }
  0x6a   :  { %1711 = vmatpush1.bf16.msra.mxu1 %v2478_v25  ;;  %1599 = vmatprep.subr.bf16.mxu0 %v2489_v26  ;;  %v2576_v25 = vld [vmem:[%s3269_s0 + $0x200] ss:$36 sps:$4 sm:$0xff]   ;;  %v2577_v26 = vld [vmem:[#allocation2 + $0x290] ss:$8 sps:$4 sm:$0xff]  }
  0x6b   :  { %1712 = vmatprep.subr.bf16.mxu1 %v2492_v27  ;;  %v2580_v27 = vld [vmem:[#allocation2 + $0x390] ss:$8 sps:$4 sm:$0xff]  }
  0x6c   :  { %1418 = vmatmul.mubr.bf16.gmra.mxu0 %v2485_v28  ;;  %v2585_v28 = vld [vmem:[#allocation2 + $0x284] ss:$8 sps:$4 sm:$0xff]  }
  0x6d   :  { %1531 = vmatmul.mubr.bf16.gmra.mxu1 %v2486_v29  ;;  %1600 = vmatpush1.bf16.msra.mxu0 %v2487_v30  ;;  %v2588_v29 = vld [vmem:[#allocation2 + $0x384] ss:$8 sps:$4 sm:$0xff]   ;;  %v2591_v30 = vld [vmem:[%s3269_s0 + $0x14] ss:$36 sps:$4 sm:$0xff]  }
  0x6e   :  { %1713 = vmatpush1.bf16.msra.mxu1 %v2490_v31  ;;  %1601 = vmatprep.subr.bf16.mxu0 %v2495_v32  ;;  %v2594_v31 = vld [vmem:[%s3269_s0 + $0x1c] ss:$36 sps:$4 sm:$0xff]  }
  0x6f   :  { %1714 = vmatprep.subr.bf16.mxu1 %v2498_v33  ;;  %1427 = vmatprep.mubr.bf16.mxu0 %v2499_v34  ;;  %v2583_v32 = vld [vmem:[#allocation2 + $0x280] ss:$8 sps:$4 sm:$0xff]   ;;  %v2597_v34 = vld [vmem:[#allocation2 + $0x474] ss:$8 sps:$4 sm:$0xff]  }
  0x70   :  { %1540 = vmatprep.mubr.bf16.mxu1 %v2501_v35  ;;  %v2586_v33 = vld [vmem:[#allocation2 + $0x380] ss:$8 sps:$4 sm:$0xff]   ;;  %v2589_v35 = vld [vmem:[%s3269_s0 + $0x10] ss:$36 sps:$4 sm:$0xff]  }
  0x71   :  { %1602 = vmatpush1.bf16.msra.mxu0 %v2493_v36  ;;  %v2592_v36 = vld [vmem:[%s3269_s0 + $0x18] ss:$36 sps:$4 sm:$0xff]  }
  0x72   :  { %1715 = vmatpush1.bf16.msra.mxu1 %v2496_v37  ;;  %1603 = vmatprep.subr.bf16.mxu0 %v2507_v38  ;;  %v2595_v37 = vld [vmem:[#allocation2 + $0x470] ss:$8 sps:$4 sm:$0xff]   ;;  %v2598_v38 = vld [vmem:[%s3269_s0 + $0x5c] ss:$36 sps:$4 sm:$0xff]  }
  0x73   :  { %1716 = vmatprep.subr.bf16.mxu1 %v2510_v39  ;;  %v2600_v39 = vld [vmem:[%s3269_s0 + $0x64] ss:$36 sps:$4 sm:$0xff]  }
  0x74   :  { %1428 = vmatmul.mubr.bf16.gmra.mxu0 %v2503_v40  ;;  %v2606_v40 = vld [vmem:[#allocation2 + $0x464] ss:$8 sps:$4 sm:$0xff]  }
  0x75   :  { %1541 = vmatmul.mubr.bf16.gmra.mxu1 %v2504_v41  ;;  %1604 = vmatpush1.bf16.msra.mxu0 %v2505_v42  ;;  %v2604_v41 = vld [vmem:[#allocation2 + $0x460] ss:$8 sps:$4 sm:$0xff]   ;;  %v2615_v42 = vld [vmem:[#allocation2 + $0x454] ss:$8 sps:$4 sm:$0xff]  }
  0x76   :  { %1717 = vmatpush1.bf16.msra.mxu1 %v2508_v43  ;;  %1605 = vmatprep.subr.bf16.mxu0 %v2513_v44  ;;  %v2602_v43 = vld [vmem:[%s3269_s0 + $0x58] ss:$36 sps:$4 sm:$0xff]   ;;  %v2603_v44 = vld [vmem:[%s3269_s0 + $0x60] ss:$36 sps:$4 sm:$0xff]  }
  0x77   :  { %1718 = vmatprep.subr.bf16.mxu1 %v2516_v45  ;;  %1437 = vmatprep.mubr.bf16.mxu0 %v2517_v46  ;;  %v2607_v45 = vld [vmem:[%s3269_s0 + $0xa4] ss:$36 sps:$4 sm:$0xff]   ;;  %v2609_v46 = vld [vmem:[%s3269_s0 + $0xac] ss:$36 sps:$4 sm:$0xff]  }
  0x78   :  { %1550 = vmatprep.mubr.bf16.mxu1 %v2519_v47  ;;  %v2613_v47 = vld [vmem:[#allocation2 + $0x450] ss:$8 sps:$4 sm:$0xff]  }
  0x79   :  { %1606 = vmatpush1.bf16.msra.mxu0 %v2511_v48  ;;  %v2624_v48 = vld [vmem:[#allocation2 + $0x444] ss:$8 sps:$4 sm:$0xff]  }
  0x7a   :  { %1719 = vmatpush1.bf16.msra.mxu1 %v2514_v49  ;;  %1607 = vmatprep.subr.bf16.mxu0 %v2525_v50  ;;  %v2611_v49 = vld [vmem:[%s3269_s0 + $0xa0] ss:$36 sps:$4 sm:$0xff]   ;;  %v2612_v50 = vld [vmem:[%s3269_s0 + $0xa8] ss:$36 sps:$4 sm:$0xff]  }
  0x7b   :  { %1720 = vmatprep.subr.bf16.mxu1 %v2528_v51  ;;  %v2622_v51 = vld [vmem:[#allocation2 + $0x440] ss:$8 sps:$4 sm:$0xff]  }
  0x7c   :  { %1438 = vmatmul.mubr.bf16.gmra.mxu0 %v2521_v52  ;;  %v2633_v52 = vld [vmem:[#allocation2 + $0x434] ss:$8 sps:$4 sm:$0xff]  }
  0x7d   :  { %1551 = vmatmul.mubr.bf16.gmra.mxu1 %v2522_v53  ;;  %1608 = vmatpush2.bf16.msra.mxu0 %v2523_v54  ;;  %v2616_v53 = vld [vmem:[%s3269_s0 + $0xec] ss:$36 sps:$4 sm:$0xff]   ;;  %v2618_v54 = vld [vmem:[%s3269_s0 + $0xf4] ss:$36 sps:$4 sm:$0xff]  }
  0x7e   :  { %1721 = vmatpush2.bf16.msra.mxu1 %v2526_v55  ;;  %1609 = vmatprep.subr.bf16.mxu0 %v2531_v56  ;;  %v2631_v55 = vld [vmem:[#allocation2 + $0x430] ss:$8 sps:$4 sm:$0xff]   ;;  %v2642_v56 = vld [vmem:[#allocation2 + $0x424] ss:$8 sps:$4 sm:$0xff]  }
  0x7f   :  { %1722 = vmatprep.subr.bf16.mxu1 %v2534_v57  ;;  %1447 = vmatprep.mubr.bf16.mxu0 %v2535_v58  ;;  %v2640_v57 = vld [vmem:[#allocation2 + $0x420] ss:$8 sps:$4 sm:$0xff]   ;;  %v2651_v58 = vld [vmem:[#allocation2 + $0x414] ss:$8 sps:$4 sm:$0xff]  }
  0x80   :  { %1560 = vmatprep.mubr.bf16.mxu1 %v2537_v59  ;;  %v2620_v59 = vld [vmem:[%s3269_s0 + $0xe8] ss:$36 sps:$4 sm:$0xff]  }
  0x81   :  { %1610 = vmatpush2.bf16.msra.mxu0 %v2529_v60  ;;  %v2621_v60 = vld [vmem:[%s3269_s0 + $0xf0] ss:$36 sps:$4 sm:$0xff]  }
  0x82   :  { %1723 = vmatpush2.bf16.msra.mxu1 %v2532_v61  ;;  %1611 = vmatprep.subr.bf16.mxu0 %v2543_v62  ;;  %v2625_v61 = vld [vmem:[%s3269_s0 + $0x134] ss:$36 sps:$4 sm:$0xff]   ;;  %v2627_v62 = vld [vmem:[%s3269_s0 + $0x13c] ss:$36 sps:$4 sm:$0xff]  }
  0x83   :  { %1724 = vmatprep.subr.bf16.mxu1 %v2546_v63  ;;  %v2649_v63 = vld [vmem:[#allocation2 + $0x410] ss:$8 sps:$4 sm:$0xff]  }
  0x84   :  { %1448 = vmatmul.mubr.bf16.gmra.mxu0 %v2539_v0  ;;  %v2660_v0 = vld [vmem:[#allocation2 + $0x404] ss:$8 sps:$4 sm:$0xff]  }
  0x85   :  { %1561 = vmatmul.mubr.bf16.gmra.mxu1 %v2540_v1  ;;  %1612 = vmatpush2.bf16.msra.mxu0 %v2541_v2  ;;  %v2658_v1 = vld [vmem:[#allocation2 + $0x400] ss:$8 sps:$4 sm:$0xff]   ;;  %v2629_v2 = vld [vmem:[%s3269_s0 + $0x130] ss:$36 sps:$4 sm:$0xff]  }
  0x86   :  { %1725 = vmatpush2.bf16.msra.mxu1 %v2544_v3  ;;  %1613 = vmatprep.subr.bf16.mxu0 %v2549_v4  ;;  %v2630_v3 = vld [vmem:[%s3269_s0 + $0x138] ss:$36 sps:$4 sm:$0xff]  }
  0x87   :  { %1726 = vmatprep.subr.bf16.mxu1 %v2552_v5  ;;  %1457 = vmatprep.mubr.bf16.mxu0 %v2553_v6  ;;  %v2634_v4 = vld [vmem:[%s3269_s0 + $0x17c] ss:$36 sps:$4 sm:$0xff]   ;;  %v2636_v5 = vld [vmem:[%s3269_s0 + $0x184] ss:$36 sps:$4 sm:$0xff]  }
  0x88   :  { %1570 = vmatprep.mubr.bf16.mxu1 %v2555_v7  ;;  %v2638_v6 = vld [vmem:[%s3269_s0 + $0x178] ss:$36 sps:$4 sm:$0xff]   ;;  %v2639_v7 = vld [vmem:[%s3269_s0 + $0x180] ss:$36 sps:$4 sm:$0xff]  }
  0x89   :  { %1614 = vmatpush2.bf16.msra.mxu0 %v2547_v8  ;;  %v2643_v8 = vld [vmem:[%s3269_s0 + $0x1c4] ss:$36 sps:$4 sm:$0xff]  }
  0x8a   :  { %1727 = vmatpush2.bf16.msra.mxu1 %v2550_v9  ;;  %1615 = vmatprep.subr.bf16.mxu0 %v2561_v10  ;;  %v2645_v9 = vld [vmem:[%s3269_s0 + $0x1cc] ss:$36 sps:$4 sm:$0xff]   ;;  %v2647_v10 = vld [vmem:[%s3269_s0 + $0x1c0] ss:$36 sps:$4 sm:$0xff]  }
  0x8b   :  { %1728 = vmatprep.subr.bf16.mxu1 %v2564_v11  ;;  %v2648_v11 = vld [vmem:[%s3269_s0 + $0x1c8] ss:$36 sps:$4 sm:$0xff]  }
  0x8c   :  { %1458 = vmatmul.mubr.bf16.gmra.mxu0 %v2557_v12  ;;  %v2652_v12 = vld [vmem:[%s3269_s0 + $0x20c] ss:$36 sps:$4 sm:$0xff]  }
  0x8d   :  { %1571 = vmatmul.mubr.bf16.gmra.mxu1 %v2558_v13  ;;  %1616 = vmatpush2.bf16.msra.mxu0 %v2559_v14  ;;  %v2654_v13 = vld [vmem:[%s3269_s0 + $0x214] ss:$36 sps:$4 sm:$0xff]   ;;  %v2656_v14 = vld [vmem:[%s3269_s0 + $0x208] ss:$36 sps:$4 sm:$0xff]  }
  0x8e   :  { %1729 = vmatpush2.bf16.msra.mxu1 %v2562_v15  ;;  %1617 = vmatprep.subr.bf16.mxu0 %v2567_v16  ;;  %v2657_v15 = vld [vmem:[%s3269_s0 + $0x210] ss:$36 sps:$4 sm:$0xff]   ;;  %v2717_v16 = vmov 0  }
  0x8f   :  { %1730 = vmatprep.subr.bf16.mxu1 %v2570_v17  ;;  %1467 = vmatprep.mubr.bf16.mxu0 %v2571_v18  ;;  %v2661_v17 = vld [vmem:[%s3269_s0 + $0x20] ss:$36 sps:$4 sm:$0xff]  }
  0x90   :  { %1580 = vmatprep.mubr.bf16.mxu1 %v2573_v19  ;;  %v2662_v18 = vld [vmem:[%s3269_s0 + $0x140] ss:$36 sps:$4 sm:$0xff]   ;;  %v2663_v19 = vld [vmem:[%s3269_s0 + $0x68] ss:$36 sps:$4 sm:$0xff]  }
  0x91   :  { %1618 = vmatpush2.bf16.msra.mxu0 %v2565_v20  ;;  %v2664_v20 = vld [vmem:[%s3269_s0 + $0x188] ss:$36 sps:$4 sm:$0xff]  }
  0x92   :  { %1731 = vmatpush2.bf16.msra.mxu1 %v2568_v21  ;;  %1619 = vmatprep.subr.bf16.mxu0 %v2579_v22  ;;  %v2665_v21 = vld [vmem:[%s3269_s0 + $0xb0] ss:$36 sps:$4 sm:$0xff]  }
  0x93   :  { %1732 = vmatprep.subr.bf16.mxu1 %v2582_v23  ;;  %v2666_v22 = vld [vmem:[%s3269_s0 + $0x1d0] ss:$36 sps:$4 sm:$0xff]   ;;  %v2667_v23 = vld [vmem:[%s3269_s0 + $0xf8] ss:$36 sps:$4 sm:$0xff]  }
  0x94   :  { %1468 = vmatmul.mubr.bf16.gmra.mxu0 %v2575_v24  ;;  %v2668_v24 = vld [vmem:[%s3269_s0 + $0x218] ss:$36 sps:$4 sm:$0xff]  }
  0x95   :  { %1581 = vmatmul.mubr.bf16.gmra.mxu1 %v2576_v25  ;;  %1620 = vmatpush2.bf16.msra.mxu0 %v2577_v26  ;;  %v267_v25 = vlaneseq }
  0x96   :  { %1733 = vmatpush2.bf16.msra.mxu1 %v2580_v27  ;;  %1621 = vmatprep.subr.bf16.mxu0 %v2585_v28  ;;  %v265_v28 = vld [vmem:[#allocation4] sm:$0x3] }
  0x97   :  { %1734 = vmatprep.subr.bf16.mxu1 %v2588_v29  ;;  %1623 = vmatprep.mubr.bf16.mxu0 %v2591_v30  ;;  %v268_v26 = vshrl.u32 %v267_v25, 7 }
  0x98   :  { %1736 = vmatprep.mubr.bf16.mxu1 %v2594_v31 }
  0x99   :  { %1622 = vmatpush2.bf16.msra.mxu0 %v2583_v32  ;;  %v269_v27 = vsub.s32 0, %v268_v26  ;;  %v273_v29 = vsub.s32 1, %v268_v26 }
  0x9a   :  { %1735 = vmatpush2.bf16.msra.mxu1 %v2586_v33  ;;  %1817 = vmatprep.subr.bf16.mxu0 %v2597_v34 }
  0x9b   :  { %2328 = vmatprep.subr.bf16.mxu1 %v2597_v34  ;;  %v2960_v30 = vrot.slane %v265_v28, %v269_v27  ;;  %v2962_v31 = vrot.slane %v265_v28, %v273_v29 }
  0x9c   :  { %1624 = vmatmul.mubr.bf16.vlgmr.msra.gmra.mxu0 %v2589_v35 }
  0x9d   :  { %1737 = vmatmul.mubr.bf16.vlgmr.msra.gmra.mxu1 %v2592_v36  ;;  %1818 = vmatpush1.bf16.msra.mxu0 %v2595_v37 }
  0x9e   :  { %2336 = vmatpush1.bf16.msra.mxu1 %v2595_v37  ;;  %1633 = vmatprep.mubr.bf16.mxu0 %v2598_v38 }
  0x9f   :  { %1746 = vmatprep.mubr.bf16.mxu1 %v2600_v39  ;;  %1819 = vmatprep.subr.bf16.mxu0 %v2606_v40 }
  0xa0   :  { %2329 = vmatprep.subr.bf16.mxu1 %v2606_v40 }
  0xa1   :  { %1820 = vmatpush1.bf16.msra.mxu0 %v2604_v41 }
  0xa2   :  { %2337 = vmatpush1.bf16.msra.mxu1 %v2604_v41  ;;  %1821 = vmatprep.subr.bf16.mxu0 %v2615_v42 }
  0xa3   :  { %2330 = vmatprep.subr.bf16.mxu1 %v2615_v42 }
  0xa4   :  { %1634 = vmatmul.mubr.bf16.gmra.mxu0 %v2602_v43 }
  0xa5   :  { %1747 = vmatmul.mubr.bf16.gmra.mxu1 %v2603_v44  ;;  %1643 = vmatprep.mubr.bf16.mxu0 %v2607_v45 }
  0xa6   :  { %1756 = vmatprep.mubr.bf16.mxu1 %v2609_v46  ;;  %1822 = vmatpush1.bf16.msra.mxu0 %v2613_v47 }
  0xa7   :  { %2338 = vmatpush1.bf16.msra.mxu1 %v2613_v47  ;;  %1823 = vmatprep.subr.bf16.mxu0 %v2624_v48 }
  0xa8   :  { %2331 = vmatprep.subr.bf16.mxu1 %v2624_v48 }
  0xaa   :  { %1824 = vmatpush1.bf16.msra.mxu0 %v2622_v51 }
  0xab   :  { %2339 = vmatpush1.bf16.msra.mxu1 %v2622_v51  ;;  %1825 = vmatprep.subr.bf16.mxu0 %v2633_v52 }
  0xac   :  { %2332 = vmatprep.subr.bf16.mxu1 %v2633_v52  ;;  %1644 = vmatmul.mubr.bf16.gmra.mxu0 %v2611_v49 }
  0xad   :  { %1757 = vmatmul.mubr.bf16.gmra.mxu1 %v2612_v50  ;;  %1653 = vmatprep.mubr.bf16.mxu0 %v2616_v53 }
  0xae   :  { %1766 = vmatprep.mubr.bf16.mxu1 %v2618_v54  ;;  %1826 = vmatpush1.bf16.msra.mxu0 %v2631_v55 }
  0xaf   :  { %2340 = vmatpush1.bf16.msra.mxu1 %v2631_v55  ;;  %1827 = vmatprep.subr.bf16.mxu0 %v2642_v56 }
  0xb0   :  { %2333 = vmatprep.subr.bf16.mxu1 %v2642_v56 }
  0xb2   :  { %1828 = vmatpush1.bf16.msra.mxu0 %v2640_v57 }
  0xb3   :  { %2341 = vmatpush1.bf16.msra.mxu1 %v2640_v57  ;;  %1829 = vmatprep.subr.bf16.mxu0 %v2651_v58 }
  0xb4   :  { %2334 = vmatprep.subr.bf16.mxu1 %v2651_v58  ;;  %1654 = vmatmul.mubr.bf16.gmra.mxu0 %v2620_v59 }
  0xb5   :  { %1767 = vmatmul.mubr.bf16.gmra.mxu1 %v2621_v60  ;;  %1663 = vmatprep.mubr.bf16.mxu0 %v2625_v61 }
  0xb6   :  { %1776 = vmatprep.mubr.bf16.mxu1 %v2627_v62  ;;  %1830 = vmatpush1.bf16.msra.mxu0 %v2649_v63 }
  0xb7   :  { %2342 = vmatpush1.bf16.msra.mxu1 %v2649_v63  ;;  %1831 = vmatprep.subr.bf16.mxu0 %v2660_v0 }
  0xb8   :  { %2335 = vmatprep.subr.bf16.mxu1 %v2660_v0 }
  0xba   :  { %1832 = vmatpush1.bf16.msra.mxu0 %v2658_v1 }
  0xbb   :  { %2343 = vmatpush1.bf16.msra.mxu1 %v2658_v1 }
  0xbc   :  { %1664 = vmatmul.mubr.bf16.gmra.mxu0 %v2629_v2 }
  0xbd   :  { %1777 = vmatmul.mubr.bf16.gmra.mxu1 %v2630_v3  ;;  %1673 = vmatprep.mubr.bf16.mxu0 %v2634_v4 }
  0xbe   :  { %1786 = vmatprep.mubr.bf16.mxu1 %v2636_v5 }
  0xc4   :  { %1674 = vmatmul.mubr.bf16.gmra.mxu0 %v2638_v6 }
  0xc5   :  { %1787 = vmatmul.mubr.bf16.gmra.mxu1 %v2639_v7  ;;  %1683 = vmatprep.mubr.bf16.mxu0 %v2643_v8 }
  0xc6   :  { %1796 = vmatprep.mubr.bf16.mxu1 %v2645_v9 }
  0xcc   :  { %1684 = vmatmul.mubr.bf16.gmra.mxu0 %v2647_v10 }
  0xcd   :  { %1797 = vmatmul.mubr.bf16.gmra.mxu1 %v2648_v11  ;;  %1693 = vmatprep.mubr.bf16.mxu0 %v2652_v12 }
  0xce   :  { %1806 = vmatprep.mubr.bf16.mxu1 %v2654_v13 }
  0xd4   :  { %1694 = vmatmul.mubr.bf16.gmra.mxu0 %v2656_v14 }
  0xd5   :  { %1807 = vmatmul.mubr.bf16.gmra.mxu1 %v2657_v15  ;;  %1849 = vmatprep.mubr.bf16.mxu0 %v2717_v16 }
  0xd6   :  { %1889 = vmatprep.mubr.bf16.mxu1 %v2717_v16 }
  0xdc   :  { %1850 = vmatmul.mubr.bf16.vlgmr.msra.gmra.mxu0 %v2661_v17 }
  0xdd   :  { %1890 = vmatmul.mubr.bf16.vlgmr.msra.gmra.mxu1 %v2662_v18  ;;  %1859 = vmatprep.mubr.bf16.mxu0 %v2717_v16 }
  0xde   :  { %1899 = vmatprep.mubr.bf16.mxu1 %v2717_v16 }
  0xe4   :  { %1860 = vmatmul.mubr.bf16.gmra.mxu0 %v2663_v19 }
  0xe5   :  { %1900 = vmatmul.mubr.bf16.gmra.mxu1 %v2664_v20  ;;  %1869 = vmatprep.mubr.bf16.mxu0 %v2717_v16 }
  0xe6   :  { %1909 = vmatprep.mubr.bf16.mxu1 %v2717_v16 }
  0xec   :  { %1870 = vmatmul.mubr.bf16.gmra.mxu0 %v2665_v21 }
  0xed   :  { %1910 = vmatmul.mubr.bf16.gmra.mxu1 %v2666_v22  ;;  %1879 = vmatprep.mubr.bf16.mxu0 %v2717_v16 }
  0xee   :  { %1919 = vmatprep.mubr.bf16.mxu1 %v2717_v16 }
  0xf4   :  { %1880 = vmatmul.mubr.bf16.gmra.mxu0 %v2667_v23 }
  0xf5   :  { %1920 = vmatmul.mubr.bf16.gmra.mxu1 %v2668_v24 }
 0x11c   :  { %v1399_v32 = vpop.f32.mrf.mxu0 }
 0x11d   :  { %v1512_v33 = vpop.f32.mrf.mxu1  ;;  %v1400_v34 = vadd.f32 %v1399_v32, %v2960_v30 }
 0x11e   :  { %v1401_v35 = vpop.f32.mrf.mxu0 }
 0x11f   :  { %v1514_v36 = vpop.f32.mrf.mxu1  ;;  %v2965_v37 = vadd.f32 %v1512_v33, %v1400_v34  ;;  %v1402_v38 = vadd.f32 %v1401_v35, %v2962_v31 }
 0x120   :  { %v1403_v39 = vpop.f32.mrf.mxu0 }
 0x121   :  { %v1516_v40 = vpop.f32.mrf.mxu1  ;;  %v2968_v41 = vadd.f32 %v1514_v36, %v1402_v38  ;;  %v1404_v42 = vadd.f32 %v1403_v39, %v2960_v30 }
 0x122   :  { %v1405_v43 = vpop.f32.mrf.mxu0 }
 0x123   :  { %v1518_v44 = vpop.f32.mrf.mxu1  ;;  %v2971_v45 = vadd.f32 %v1516_v40, %v1404_v42  ;;  %v1406_v46 = vadd.f32 %v1405_v43, %v2962_v31 }
 0x124   :  { %v1409_v47 = vpop.f32.mrf.mxu0 }
 0x125   :  { %v1522_v48 = vpop.f32.mrf.mxu1  ;;  %v2974_v49 = vadd.f32 %v1518_v44, %v1406_v46  ;;  %v1410_v50 = vadd.f32 %v1409_v47, %v2960_v30 }
 0x126   :  { %v1411_v51 = vpop.f32.mrf.mxu0 }
 0x127   :  { %v1524_v52 = vpop.f32.mrf.mxu1  ;;  %v2977_v53 = vadd.f32 %v1522_v48, %v1410_v50  ;;  %v1412_v54 = vadd.f32 %v1411_v51, %v2962_v31 }
 0x128   :  { %v1413_v55 = vpop.f32.mrf.mxu0 }
 0x129   :  { %v1526_v56 = vpop.f32.mrf.mxu1  ;;  %v2980_v57 = vadd.f32 %v1524_v52, %v1412_v54  ;;  %v1414_v58 = vadd.f32 %v1413_v55, %v2960_v30 }
 0x12a   :  { %v1415_v59 = vpop.f32.mrf.mxu0 }
 0x12b   :  { %v1528_v60 = vpop.f32.mrf.mxu1  ;;  %v2983_v61 = vadd.f32 %v1526_v56, %v1414_v58  ;;  %v1416_v62 = vadd.f32 %v1415_v59, %v2962_v31 }
 0x12c   :  { %v1419_v63 = vpop.f32.mrf.mxu0 }
 0x12d   :  { %v1532_v0 = vpop.f32.mrf.mxu1  ;;  %v2986_v1 = vadd.f32 %v1528_v60, %v1416_v62  ;;  %v1420_v2 = vadd.f32 %v1419_v63, %v2960_v30 }
 0x12e   :  { %v1421_v3 = vpop.f32.mrf.mxu0 }
 0x12f   :  { %v1534_v4 = vpop.f32.mrf.mxu1  ;;  %v2989_v5 = vadd.f32 %v1532_v0, %v1420_v2  ;;  %v1422_v6 = vadd.f32 %v1421_v3, %v2962_v31 }
 0x130   :  { %v1423_v7 = vpop.f32.mrf.mxu0 }
 0x131   :  { %v1536_v8 = vpop.f32.mrf.mxu1  ;;  %v2992_v9 = vadd.f32 %v1534_v4, %v1422_v6  ;;  %v1424_v10 = vadd.f32 %v1423_v7, %v2960_v30 }
 0x132   :  { %v1425_v11 = vpop.f32.mrf.mxu0 }
 0x133   :  { %v1538_v12 = vpop.f32.mrf.mxu1  ;;  %v2995_v13 = vadd.f32 %v1536_v8, %v1424_v10  ;;  %v1426_v14 = vadd.f32 %v1425_v11, %v2962_v31 }
 0x134   :  { %v1429_v15 = vpop.f32.mrf.mxu0 }
 0x135   :  { %v1542_v16 = vpop.f32.mrf.mxu1  ;;  %v2998_v17 = vadd.f32 %v1538_v12, %v1426_v14  ;;  %v1430_v18 = vadd.f32 %v1429_v15, %v2960_v30 }
 0x136   :  { %v1431_v19 = vpop.f32.mrf.mxu0 }
 0x137   :  { %v1544_v20 = vpop.f32.mrf.mxu1  ;;  %v3001_v21 = vadd.f32 %v1542_v16, %v1430_v18  ;;  %v1432_v22 = vadd.f32 %v1431_v19, %v2962_v31 }
 0x138   :  { %v1433_v23 = vpop.f32.mrf.mxu0 }
 0x139   :  { %v1546_v24 = vpop.f32.mrf.mxu1  ;;  %v3004_v25 = vadd.f32 %v1544_v20, %v1432_v22  ;;  %v1434_v26 = vadd.f32 %v1433_v23, %v2960_v30 }
 0x13a   :  { %v1435_v27 = vpop.f32.mrf.mxu0 }
 0x13b   :  { %3273 = vst [vmem:[#allocation8_spill] sm:$0xff] %v3004_v25  ;;  %v1548_v28 = vpop.f32.mrf.mxu1  ;;  %v3007_v29 = vadd.f32 %v1546_v24, %v1434_v26  ;;  %v1436_v32 = vadd.f32 %v1435_v27, %v2962_v31 }
 0x13c   :  { %v1439_v33 = vpop.f32.mrf.mxu0 }
 0x13d   :  { %v1552_v34 = vpop.f32.mrf.mxu1  ;;  %v3010_v35 = vadd.f32 %v1548_v28, %v1436_v32  ;;  %v1440_v36 = vadd.f32 %v1439_v33, %v2960_v30 }
 0x13e   :  { %v1441_v38 = vpop.f32.mrf.mxu0 }
 0x13f   :  { %3274 = vst [vmem:[#allocation9_spill] sm:$0xff] %v3010_v35  ;;  %v1554_v39 = vpop.f32.mrf.mxu1  ;;  %v3013_v40 = vadd.f32 %v1552_v34, %v1440_v36  ;;  %v1442_v42 = vadd.f32 %v1441_v38, %v2962_v31 }
 0x140   :  { %v1443_v43 = vpop.f32.mrf.mxu0 }
 0x141   :  { %v1556_v44 = vpop.f32.mrf.mxu1  ;;  %v3016_v46 = vadd.f32 %v1554_v39, %v1442_v42  ;;  %v1444_v47 = vadd.f32 %v1443_v43, %v2960_v30 }
 0x142   :  { %v1445_v48 = vpop.f32.mrf.mxu0 }
 0x143   :  { %v1558_v50 = vpop.f32.mrf.mxu1  ;;  %v3019_v51 = vadd.f32 %v1556_v44, %v1444_v47  ;;  %v1446_v52 = vadd.f32 %v1445_v48, %v2962_v31 }
 0x144   :  { %v1449_v54 = vpop.f32.mrf.mxu0 }
 0x145   :  { %v1562_v55 = vpop.f32.mrf.mxu1  ;;  %v3022_v56 = vadd.f32 %v1558_v50, %v1446_v52  ;;  %v1450_v58 = vadd.f32 %v1449_v54, %v2960_v30 }
 0x146   :  { %v1451_v59 = vpop.f32.mrf.mxu0 }
 0x147   :  { %v1564_v60 = vpop.f32.mrf.mxu1  ;;  %v3025_v62 = vadd.f32 %v1562_v55, %v1450_v58  ;;  %v1452_v63 = vadd.f32 %v1451_v59, %v2962_v31 }
 0x148   :  { %v1453_v0 = vpop.f32.mrf.mxu0 }
 0x149   :  { %v1566_v2 = vpop.f32.mrf.mxu1  ;;  %v3028_v3 = vadd.f32 %v1564_v60, %v1452_v63  ;;  %v1454_v4 = vadd.f32 %v1453_v0, %v2960_v30 }
 0x14a   :  { %v1455_v6 = vpop.f32.mrf.mxu0 }
 0x14b   :  { %v1568_v7 = vpop.f32.mrf.mxu1  ;;  %v3031_v8 = vadd.f32 %v1566_v2, %v1454_v4  ;;  %v1456_v10 = vadd.f32 %v1455_v6, %v2962_v31 }
 0x14c   :  { %v1459_v11 = vpop.f32.mrf.mxu0 }
 0x14d   :  { %v1572_v12 = vpop.f32.mrf.mxu1  ;;  %v3034_v14 = vadd.f32 %v1568_v7, %v1456_v10  ;;  %v1460_v15 = vadd.f32 %v1459_v11, %v2960_v30 }
 0x14e   :  { %v1461_v16 = vpop.f32.mrf.mxu0 }
 0x14f   :  { %v1574_v18 = vpop.f32.mrf.mxu1  ;;  %v3037_v19 = vadd.f32 %v1572_v12, %v1460_v15  ;;  %v1462_v20 = vadd.f32 %v1461_v16, %v2962_v31 }
 0x150   :  { %v1463_v22 = vpop.f32.mrf.mxu0 }
 0x151   :  { %v1576_v23 = vpop.f32.mrf.mxu1  ;;  %v3040_v24 = vadd.f32 %v1574_v18, %v1462_v20  ;;  %v1464_v26 = vadd.f32 %v1463_v22, %v2960_v30 }
 0x152   :  { %v1465_v27 = vpop.f32.mrf.mxu0 }
 0x153   :  { %v1578_v28 = vpop.f32.mrf.mxu1  ;;  %v3043_v32 = vadd.f32 %v1576_v23, %v1464_v26  ;;  %v1466_v33 = vadd.f32 %v1465_v27, %v2962_v31 }
 0x154   :  { %v1469_v34 = vpop.f32.mrf.mxu0 }
 0x155   :  { %v1582_v36 = vpop.f32.mrf.mxu1  ;;  %v3046_v38 = vadd.f32 %v1578_v28, %v1466_v33  ;;  %v1470_v39 = vadd.f32 %v1469_v34, %v2960_v30 }
 0x156   :  { %v1471_v42 = vpop.f32.mrf.mxu0 }
 0x157   :  { %3275 = vst [vmem:[#allocation10_spill] sm:$0xff] %v3046_v38  ;;  %v1584_v43 = vpop.f32.mrf.mxu1  ;;  %v3049_v44 = vadd.f32 %v1582_v36, %v1470_v39  ;;  %v1472_v47 = vadd.f32 %v1471_v42, %v2962_v31 }
 0x158   :  { %v1473_v48 = vpop.f32.mrf.mxu0 }
 0x159   :  { %3276 = vst [vmem:[#allocation11_spill] sm:$0xff] %v3049_v44  ;;  %v1586_v50 = vpop.f32.mrf.mxu1  ;;  %v3052_v52 = vadd.f32 %v1584_v43, %v1472_v47  ;;  %v1474_v54 = vadd.f32 %v1473_v48, %v2960_v30 }
 0x15a   :  { %v1475_v55 = vpop.f32.mrf.mxu0 }
 0x15b   :  { %3277 = vst [vmem:[#allocation12_spill] sm:$0xff] %v3052_v52  ;;  %v1588_v58 = vpop.f32.mrf.mxu1  ;;  %v3055_v59 = vadd.f32 %v1586_v50, %v1474_v54  ;;  %v1476_v60 = vadd.f32 %v1475_v55, %v2962_v31 }
 0x15c   :  { %v1625_v63 = vpop.f32.mrf.mxu0 }
 0x15d   :  { %3278 = vst [vmem:[#allocation13_spill] sm:$0xff] %v3055_v59  ;;  %v1738_v0 = vpop.f32.mrf.mxu1  ;;  %v3058_v2 = vadd.f32 %v1588_v58, %v1476_v60  ;;  %v1626_v4 = vadd.f32 %v1625_v63, %v2965_v37 }
 0x15e   :  { %v3061_v6 = vpop.f32.mrf.mxu0 }
 0x15f   :  { %3279 = vst [vmem:[#allocation14_spill] sm:$0xff] %v3058_v2  ;;  %v3063_v7 = vpop.f32.mrf.mxu1  ;;  %v3065_v10 = vadd.f32 %v1738_v0, %v1626_v4 }
 0x160   :  { %v1629_v11 = vpop.f32.mrf.mxu0 }
 0x161   :  { %v1742_v30 = vpop.f32.mrf.mxu1  ;;  %v1630_v12 = vadd.f32 %v1629_v11, %v2971_v45 }
 0x162   :  { %v3068_v15 = vpop.f32.mrf.mxu0 }
 0x163   :  { %v3070_v16 = vpop.f32.mrf.mxu1  ;;  %v3072_v31 = vadd.f32 %v1742_v30, %v1630_v12 }
 0x164   :  { %v1635_v18 = vpop.f32.mrf.mxu0 }
 0x165   :  { %v1748_v20 = vpop.f32.mrf.mxu1  ;;  %v1636_v37 = vadd.f32 %v1635_v18, %v2977_v53 }
 0x166   :  { %v3075_v22 = vpop.f32.mrf.mxu0 }
 0x167   :  { %v3077_v23 = vpop.f32.mrf.mxu1  ;;  %v3079_v26 = vadd.f32 %v1748_v20, %v1636_v37 }
 0x168   :  { %v1639_v27 = vpop.f32.mrf.mxu0 }
 0x169   :  { %v1752_v28 = vpop.f32.mrf.mxu1  ;;  %v1640_v45 = vadd.f32 %v1639_v27, %v2983_v61 }
 0x16a   :  { %v3082_v33 = vpop.f32.mrf.mxu0 }
 0x16b   :  { %v3084_v34 = vpop.f32.mrf.mxu1  ;;  %v3086_v36 = vadd.f32 %v1752_v28, %v1640_v45 }
 0x16c   :  { %v1645_v39 = vpop.f32.mrf.mxu0 }
 0x16d   :  { %v1758_v42 = vpop.f32.mrf.mxu1  ;;  %v1646_v53 = vadd.f32 %v1645_v39, %v2989_v5 }
 0x16e   :  { %v3089_v43 = vpop.f32.mrf.mxu0 }
 0x16f   :  { %v3091_v47 = vpop.f32.mrf.mxu1  ;;  %v3093_v48 = vadd.f32 %v1758_v42, %v1646_v53 }
 0x170   :  { %v1649_v50 = vpop.f32.mrf.mxu0 }
 0x171   :  { %3280 = vst [vmem:[#allocation15_spill] sm:$0xff] %v3093_v48  ;;  %v1762_v54 = vpop.f32.mrf.mxu1  ;;  %v1650_v61 = vadd.f32 %v1649_v50, %v2995_v13 }
 0x172   :  { %v3096_v55 = vpop.f32.mrf.mxu0 }
 0x173   :  { %v3098_v58 = vpop.f32.mrf.mxu1  ;;  %v3100_v60 = vadd.f32 %v1762_v54, %v1650_v61 }
 0x174   :  { %3281 = vst [vmem:[#allocation16_spill] sm:$0xff] %v3098_v58  ;;  %v1655_v63 = vpop.f32.mrf.mxu0 }
 0x175   :  { %3282 = vst [vmem:[#allocation17_spill] sm:$0xff] %v3100_v60  ;;  %v1768_v0 = vpop.f32.mrf.mxu1  ;;  %v1656_v5 = vadd.f32 %v1655_v63, %v3001_v21 }
 0x176   :  { %v3103_v4 = vpop.f32.mrf.mxu0 }
 0x177   :  { %3283 = vst [vmem:[#allocation18_spill] sm:$0xff] %v3103_v4  ;;  %v3105_v11 = vpop.f32.mrf.mxu1  ;;  %v3107_v30 = vadd.f32 %v1768_v0, %v1656_v5 }
 0x178   :  { %3284 = vst [vmem:[#allocation19_spill] sm:$0xff] %v3105_v11  ;;  %v1659_v12 = vpop.f32.mrf.mxu0 }
 0x179   :  { %3285 = vst [vmem:[#allocation20_spill] sm:$0xff] %v3107_v30  ;;  %v1772_v18 = vpop.f32.mrf.mxu1  ;;  %v1660_v13 = vadd.f32 %v1659_v12, %v3007_v29 }
 0x17a   :  { %v3110_v20 = vpop.f32.mrf.mxu0 }
 0x17b   :  { %3286 = vst [vmem:[#allocation21_spill] sm:$0xff] %v3110_v20  ;;  %v3112_v37 = vpop.f32.mrf.mxu1  ;;  %v3114_v27 = vadd.f32 %v1772_v18, %v1660_v13 }
 0x17c   :  { %3287 = vst [vmem:[#allocation22_spill] sm:$0xff] %v3112_v37  ;;  %v1665_v28 = vpop.f32.mrf.mxu0 }
 0x17d   :  { %3288 = vst [vmem:[#allocation23_spill] sm:$0xff] %v3114_v27  ;;  %v1778_v45 = vpop.f32.mrf.mxu1  ;;  %v1666_v4 = vadd.f32 %v1665_v28, %v3013_v40 }
 0x17e   :  { %v1667_v39 = vpop.f32.mrf.mxu0 }
 0x17f   :  { %v1780_v21 = vpop.f32.mrf.mxu1 }
 0x180   :  { %v1669_v42 = vpop.f32.mrf.mxu0 }
 0x181   :  { %v1782_v53 = vpop.f32.mrf.mxu1 }
 0x182   :  { %v1671_v50 = vpop.f32.mrf.mxu0 }
 0x183   :  { %v1784_v54 = vpop.f32.mrf.mxu1 }
 0x184   :  { %v1675_v61 = vpop.f32.mrf.mxu0 }
 0x185   :  { %v1788_v63 = vpop.f32.mrf.mxu1 }
 0x186   :  { %v1677_v0 = vpop.f32.mrf.mxu0 }
 0x187   :  { %v3116_v5 = vpop.f32.mrf.mxu1 }
 0x188   :  { %v1679_v29 = vpop.f32.mrf.mxu0 }
 0x189   :  { %v3118_v12 = vpop.f32.mrf.mxu1 }
 0x18a   :  { %v1681_v30 = vpop.f32.mrf.mxu0 }
 0x18b   :  { %v3120_v37 = vpop.f32.mrf.mxu1 }
 0x18c   :  { %v3122_v18 = vpop.f32.mrf.mxu0 }
 0x18d   :  { %v3124_v13 = vpop.f32.mrf.mxu1 }
 0x18e   :  { %v3126_v27 = vpop.f32.mrf.mxu0 }
 0x18f   :  { %v3128_v2 = vpop.f32.mrf.mxu1 }
 0x190   :  { %v3130_v59 = vpop.f32.mrf.mxu0 }
 0x191   :  { %v3132_v20 = vpop.f32.mrf.mxu1 }
 0x192   :  { %3289 = vst [vmem:[#allocation24_spill] sm:$0xff] %v3132_v20  ;;  %v3134_v35 = vpop.f32.mrf.mxu0  ;;  %v1628_v20 = vadd.f32 %v3061_v6, %v2968_v41  ;;  %v1632_v41 = vadd.f32 %v3068_v15, %v2974_v49 }
 0x193   :  { %3290 = vst [vmem:[#allocation25_spill] sm:$0xff] %v3134_v35  ;;  %v3136_v11 = vpop.f32.mrf.mxu1  ;;  %v1668_v35 = vadd.f32 %v1667_v39, %v3016_v46  ;;  %v1672_v46 = vadd.f32 %v1671_v50, %v3022_v56 }
 0x194   :  { %3291 = vst [vmem:[#allocation26_spill] sm:$0xff] %v3136_v11  ;;  %v3138_v60 = vpop.f32.mrf.mxu0  ;;  %v1741_v40 = vadd.f32 %v3063_v7, %v1628_v20  ;;  %v1745_v56 = vadd.f32 %v3070_v16, %v1632_v41 }
 0x195   :  { %3292 = vst [vmem:[#allocation27_spill] sm:$0xff] %v3138_v60  ;;  %v3140_v58 = vpop.f32.mrf.mxu1  ;;  %v1781_v28 = vadd.f32 %v1780_v21, %v1668_v35  ;;  %v1678_v35 = vadd.f32 %v1677_v0, %v3028_v3  ;;  %v1785_v15 = vadd.f32 %v1784_v54, %v1672_v46  ;;  %v1642_v3 = vadd.f32 %v3082_v33, %v2986_v1 }
 0x196   :  { %3293 = vst [vmem:[#allocation28_spill] sm:$0xff] %v3140_v58  ;;  %v3142_v52 = vpop.f32.mrf.mxu0  ;;  %v1779_v58 = vadd.f32 %v1778_v45, %v1666_v4  ;;  %v1638_v4 = vadd.f32 %v3075_v22, %v2980_v57 }
 0x197   :  { %3294 = vst [vmem:[#allocation29_spill] sm:$0xff] %v3142_v52  ;;  %v3144_v44 = vpop.f32.mrf.mxu1  ;;  %v1670_v52 = vadd.f32 %v1669_v42, %v3019_v51  ;;  %v1676_v51 = vadd.f32 %v1675_v61, %v3025_v62  ;;  %v1791_v54 = vadd.f32 %v3116_v5, %v1678_v35 }
 0x198   :  { %3295 = vst [vmem:[#allocation30_spill] sm:$0xff] %v3144_v44  ;;  %v3147_v25 = vpop.f32.mrf.mxu0  ;;  %v1751_v62 = vadd.f32 %v3077_v23, %v1638_v4 }
 0x199   :  { %3296 = vst [vmem:[#allocation31_spill] sm:$0xff] %v3147_v25  ;;  %v3149_v48 = vpop.f32.mrf.mxu1  ;;  %v1789_v50 = vadd.f32 %v1788_v63, %v1676_v51 }
 0x19a   :  { %3297 = vst [vmem:[#allocation32_spill] sm:$0xff] %v3149_v48  ;;  %v3154_v11 = vpop.f32.mrf.mxu0 }
 0x19b   :  { %v3156_v60 = vpop.f32.mrf.mxu1 }
 0x19c   :  { %3298 = vst [vmem:[#allocation33_spill] sm:$0xff] %v3156_v60  ;;  %v1851_v38 = vpop.f32.mrf.mxu0  ;;  %v1783_v60 = vadd.f32 %v1782_v53, %v1670_v52 }
 0x19d   :  { %v1891_v44 = vpop.f32.mrf.mxu1  ;;  %v1852_v25 = vadd.f32 %v1851_v38, %v3065_v10 }
 0x19e   :  { %v1892_v48 = vadd.f32 %v1891_v44, %v1779_v58  ;;  %v1853_v6 = vpop.f32.mrf.mxu0 }
 0x19f   :  { %v1893_v39 = vpop.f32.mrf.mxu1  ;;  %v1854_v45 = vadd.f32 %v1853_v6, %v1741_v40  ;;  %v1930_v44 = vmax.f32 %v1852_v25, 0.0  ;;  %v1680_v25 = vadd.f32 %v1679_v29, %v3031_v8 }
 0x1a0   :  { %v1894_v42 = vadd.f32 %v1893_v39, %v1781_v28  ;;  %v1855_v7 = vpop.f32.mrf.mxu0  ;;  %v1946_v10 = vmax.f32 %v1892_v48, 0.0 }
 0x1a1   :  { %v1895_v38 = vpop.f32.mrf.mxu1  ;;  %v1931_v58 = vmax.f32 %v1854_v45, 0.0  ;;  %v1856_v20 = vadd.f32 %v1855_v7, %v3072_v31  ;;  %v1682_v31 = vadd.f32 %v1681_v30, %v3034_v14  ;;  %v1648_v14 = vadd.f32 %v3089_v43, %v2992_v9 }
 0x1a2   :  { %v1947_v49 = vmax.f32 %v1894_v42, 0.0  ;;  %v1896_v21 = vadd.f32 %v1895_v38, %v1783_v60  ;;  %v1857_v57 = vpop.f32.mrf.mxu0  ;;  %v1686_v30 = vadd.f32 %v3122_v18, %v3037_v19  ;;  %v1793_v41 = vadd.f32 %v3118_v12, %v1680_v25 }
 0x1a3   :  { %v1897_v22 = vpop.f32.mrf.mxu1  ;;  %v2312_v52 = vpack.c.bf16 %v1931_v58, %v1930_v44  ;;  %v1858_v48 = vadd.f32 %v1857_v57, %v1745_v56  ;;  %v1932_v8 = vmax.f32 %v1856_v20, 0.0  ;;  %v1755_v9 = vadd.f32 %v3084_v34, %v1642_v3  ;;  %v3300_v20 = vld [vmem:[#allocation25_spill] sm:$0xff]  ;;  %v3305_v3 = vld [vmem:[#allocation27_spill] sm:$0xff] }
 0x1a4   :  { %v2320_v53 = vpack.c.bf16 %v1947_v49, %v1946_v10  ;;  %v1898_v61 = vadd.f32 %v1897_v22, %v1785_v15  ;;  %v1861_v0 = vpop.f32.mrf.mxu0  ;;  %v1948_v33 = vmax.f32 %v1896_v21, 0.0  ;;  %v1795_v43 = vadd.f32 %v3120_v37, %v1682_v31  ;;  %v3299_v15 = vld [vmem:[#allocation10_spill] sm:$0xff]  ;;  %v3308_v31 = vld [vmem:[#allocation29_spill] sm:$0xff] }
 0x1a5   :  { %v1901_v16 = vpop.f32.mrf.mxu1  ;;  %2058 = vst [vmem:[%s3272_s3] sm:$0xff] %v2312_v52  ;;  %v1862_v1 = vadd.f32 %v1861_v0, %v3079_v26  ;;  %v1933_v60 = vmax.f32 %v1858_v48, 0.0  ;;  %v1688_v26 = vadd.f32 %v3126_v27, %v3040_v24  ;;  %v1761_v18 = vadd.f32 %v3091_v47, %v1648_v14  ;;  %v3306_v0 = vld [vmem:[#allocation24_spill] sm:$0xff] }
 0x1a6   :  { %2066 = vst [vmem:[%s3272_s3 + $0x40] sm:$0xff] %v2320_v53  ;;  %v1902_v23 = vadd.f32 %v1901_v16, %v1789_v50  ;;  %v1949_v63 = vmax.f32 %v1898_v61, 0.0  ;;  %v1863_v29 = vpop.f32.mrf.mxu0  ;;  %v1799_v7 = vadd.f32 %v3124_v13, %v1686_v30  ;;  %v1652_v37 = vadd.f32 %v3096_v55, %v2998_v17  ;;  %v3301_v17 = vld [vmem:[#allocation15_spill] sm:$0xff]  ;;  %v3303_v50 = vld [vmem:[#allocation18_spill] sm:$0xff]  ;;  %v3309_v30 = vld [vmem:[#allocation16_spill] sm:$0xff] }
 0x1a7   :  { %v1903_v40 = vpop.f32.mrf.mxu1  ;;  %v1864_v5 = vadd.f32 %v1863_v29, %v1751_v62  ;;  %v2313_v46 = vpack.c.bf16 %v1933_v60, %v1932_v8  ;;  %v1934_v51 = vmax.f32 %v1862_v1, 0.0  ;;  %v1690_v44 = vadd.f32 %v3130_v59, %v3043_v32  ;;  %v3302_v62 = vld [vmem:[#allocation8_spill] sm:$0xff]  ;;  %v3304_v53 = vld [vmem:[#allocation11_spill] sm:$0xff] }
 0x1a8   :  { %v1904_v28 = vadd.f32 %v1903_v40, %v1791_v54  ;;  %v2321_v6 = vpack.c.bf16 %v1949_v63, %v1948_v33  ;;  %v1865_v39 = vpop.f32.mrf.mxu0  ;;  %v1950_v45 = vmax.f32 %v1902_v23, 0.0  ;;  %v1692_v21 = vadd.f32 %v3300_v20, %v3299_v15  ;;  %v3307_v54 = vld [vmem:[#allocation12_spill] sm:$0xff] }
 0x1a9   :  { %v1905_v4 = vpop.f32.mrf.mxu1  ;;  %v1935_v42 = vmax.f32 %v1864_v5, 0.0  ;;  %2059 = vst [vmem:[%s3272_s3 + $0x8] sm:$0xff] %v2313_v46  ;;  %v1866_v19 = vadd.f32 %v1865_v39, %v3086_v36  ;;  %v1801_v36 = vadd.f32 %v3128_v2, %v1688_v26  ;;  %v1658_v52 = vadd.f32 %v3303_v50, %v3302_v62  ;;  %v3311_v26 = vld [vmem:[#allocation17_spill] sm:$0xff] }
 0x1aa   :  { %v1951_v35 = vmax.f32 %v1904_v28, 0.0  ;;  %2067 = vst [vmem:[%s3272_s3 + $0x48] sm:$0xff] %v2321_v6  ;;  %v1906_v24 = vadd.f32 %v1905_v4, %v1793_v41  ;;  %v1867_v27 = vpop.f32.mrf.mxu0  ;;  %v1696_v25 = vadd.f32 %v3305_v3, %v3304_v53  ;;  %v1803_v16 = vadd.f32 %v3306_v0, %v1690_v44  ;;  %v3310_v28 = vld [vmem:[#allocation26_spill] sm:$0xff] }
 0x1ab   :  { %v1907_v12 = vpop.f32.mrf.mxu1  ;;  %v2314_v34 = vpack.c.bf16 %v1935_v42, %v1934_v51  ;;  %v1868_v10 = vadd.f32 %v1867_v27, %v1755_v9  ;;  %v1936_v59 = vmax.f32 %v1866_v19, 0.0  ;;  %v1698_v1 = vadd.f32 %v3308_v31, %v3307_v54  ;;  %v3312_v51 = vld [vmem:[#allocation19_spill] sm:$0xff]  ;;  %v3313_v42 = vld [vmem:[#allocation28_spill] sm:$0xff]  ;;  %v3314_v19 = vld [vmem:[#allocation9_spill] sm:$0xff] }
 0x1ac   :  { %v2322_v38 = vpack.c.bf16 %v1951_v35, %v1950_v45  ;;  %v1908_v58 = vadd.f32 %v1907_v12, %v1795_v43  ;;  %v1871_v49 = vpop.f32.mrf.mxu0  ;;  %v1952_v55 = vmax.f32 %v1906_v24, 0.0  ;;  %v1765_v5 = vadd.f32 %v3309_v30, %v1652_v37  ;;  %v3315_v24 = vld [vmem:[#allocation21_spill] sm:$0xff]  ;;  %v3324_v31 = vld [vmem:[#allocation23_spill] sm:$0xff] }
 0x1ad   :  { %v1911_v56 = vpop.f32.mrf.mxu1  ;;  %2060 = vst [vmem:[%s3272_s3 + $0x10] sm:$0xff] %v2314_v34  ;;  %v1872_v47 = vadd.f32 %v1871_v49, %v3301_v17  ;;  %v1937_v13 = vmax.f32 %v1868_v10, 0.0  ;;  %v1805_v41 = vadd.f32 %v3310_v28, %v1692_v21  ;;  %v1771_v45 = vadd.f32 %v3312_v51, %v1658_v52  ;;  %v3316_v12 = vld [vmem:[#allocation13_spill] sm:$0xff]  ;;  %v3318_v10 = vld [vmem:[#allocation30_spill] sm:$0xff] }
 0x1ae   :  { %2068 = vst [vmem:[%s3272_s3 + $0x50] sm:$0xff] %v2322_v38  ;;  %v1912_v32 = vadd.f32 %v1911_v56, %v1799_v7  ;;  %v1953_v57 = vmax.f32 %v1908_v58, 0.0  ;;  %v1873_v22 = vpop.f32.mrf.mxu0  ;;  %v1809_v35 = vadd.f32 %v3313_v42, %v1696_v25  ;;  %v1662_v27 = vadd.f32 %v3315_v24, %v3314_v19  ;;  %v3319_v49 = vld [vmem:[#allocation14_spill] sm:$0xff] }
 0x1af   :  { %v1913_v2 = vpop.f32.mrf.mxu1  ;;  %v1874_v48 = vadd.f32 %v1873_v22, %v1761_v18  ;;  %v2315_v23 = vpack.c.bf16 %v1937_v13, %v1936_v59  ;;  %v1938_v63 = vmax.f32 %v1872_v47, 0.0  ;;  %v3317_v18 = vld [vmem:[#allocation31_spill] sm:$0xff]  ;;  %v1811_v58 = vadd.f32 %v3318_v10, %v1698_v1 }
 0x1b0   :  { %v1914_v61 = vadd.f32 %v1913_v2, %v1801_v36  ;;  %v2323_v8 = vpack.c.bf16 %v1953_v57, %v1952_v55  ;;  %v1875_v33 = vpop.f32.mrf.mxu0  ;;  %v1954_v29 = vmax.f32 %v1912_v32, 0.0  ;;  %v1700_v7 = vadd.f32 %v3317_v18, %v3316_v12  ;;  %v3320_v36 = vld [vmem:[#allocation20_spill] sm:$0xff] }
 0x1b1   :  { %v1915_v60 = vpop.f32.mrf.mxu1  ;;  %v1939_v40 = vmax.f32 %v1874_v48, 0.0  ;;  %2061 = vst [vmem:[%s3272_s3 + $0x18] sm:$0xff] %v2315_v23  ;;  %v1876_v46 = vadd.f32 %v1875_v33, %v3311_v26  ;;  %v1702_v56 = vadd.f32 %v3154_v11, %v3319_v49  ;;  %v3321_v11 = vld [vmem:[#allocation32_spill] sm:$0xff] }
 0x1b2   :  { %v1955_v14 = vmax.f32 %v1914_v61, 0.0  ;;  %2069 = vst [vmem:[%s3272_s3 + $0x58] sm:$0xff] %v2323_v8  ;;  %v1916_v6 = vadd.f32 %v1915_v60, %v1803_v16  ;;  %v1877_v39 = vpop.f32.mrf.mxu0  ;;  %v1813_v22 = vadd.f32 %v3321_v11, %v1700_v7  ;;  %v3322_v61 = vld [vmem:[#allocation22_spill] sm:$0xff]  ;;  %v3323_v16 = vld [vmem:[#allocation33_spill] sm:$0xff] }
 0x1b3   :  { %v1917_v4 = vpop.f32.mrf.mxu1  ;;  %v2316_v9 = vpack.c.bf16 %v1939_v40, %v1938_v63  ;;  %v1878_v34 = vadd.f32 %v1877_v39, %v1765_v5  ;;  %v1940_v21 = vmax.f32 %v1876_v46, 0.0  ;;  %v1775_v0 = vadd.f32 %v3322_v61, %v1662_v27 }
 0x1b4   :  { %v2324_v43 = vpack.c.bf16 %v1955_v14, %v1954_v29  ;;  %v1918_v38 = vadd.f32 %v1917_v4, %v1805_v41  ;;  %v1881_v37 = vpop.f32.mrf.mxu0  ;;  %v1956_v17 = vmax.f32 %v1916_v6, 0.0  ;;  %v1815_v54 = vadd.f32 %v3323_v16, %v1702_v56 }
 0x1b5   :  { %v1921_v44 = vpop.f32.mrf.mxu1  ;;  %2062 = vst [vmem:[%s3272_s3 + $0x20] sm:$0xff] %v2316_v9  ;;  %v1882_v15 = vadd.f32 %v1881_v37, %v3320_v36  ;;  %v1941_v47 = vmax.f32 %v1878_v34, 0.0 }
 0x1b6   :  { %2070 = vst [vmem:[%s3272_s3 + $0x60] sm:$0xff] %v2324_v43  ;;  %v1922_v20 = vadd.f32 %v1921_v44, %v1809_v35  ;;  %v1957_v32 = vmax.f32 %v1918_v38, 0.0  ;;  %v1883_v59 = vpop.f32.mrf.mxu0 }
 0x1b7   :  { %v1923_v55 = vpop.f32.mrf.mxu1  ;;  %v1884_v13 = vadd.f32 %v1883_v59, %v1771_v45  ;;  %v2317_v2 = vpack.c.bf16 %v1941_v47, %v1940_v21  ;;  %v1942_v53 = vmax.f32 %v1882_v15, 0.0 }
 0x1b8   :  { %v1924_v57 = vadd.f32 %v1923_v55, %v1811_v58  ;;  %v2325_v62 = vpack.c.bf16 %v1957_v32, %v1956_v17  ;;  %v1885_v50 = vpop.f32.mrf.mxu0  ;;  %v1958_v3 = vmax.f32 %v1922_v20, 0.0 }
 0x1b9   :  { %v1925_v52 = vpop.f32.mrf.mxu1  ;;  %v1943_v25 = vmax.f32 %v1884_v13, 0.0  ;;  %2063 = vst [vmem:[%s3272_s3 + $0x28] sm:$0xff] %v2317_v2  ;;  %v1886_v1 = vadd.f32 %v1885_v50, %v3324_v31 }
 0x1ba   :  { %v1959_v48 = vmax.f32 %v1924_v57, 0.0  ;;  %2071 = vst [vmem:[%s3272_s3 + $0x68] sm:$0xff] %v2325_v62  ;;  %v1926_v23 = vadd.f32 %v1925_v52, %v1813_v22  ;;  %v1887_v8 = vpop.f32.mrf.mxu0 }
 0x1bb   :  { %v1927_v33 = vpop.f32.mrf.mxu1  ;;  %v2318_v60 = vpack.c.bf16 %v1943_v25, %v1942_v53  ;;  %v1888_v29 = vadd.f32 %v1887_v8, %v1775_v0  ;;  %v1944_v14 = vmax.f32 %v1886_v1, 0.0 }
 0x1bc   :  { %v2326_v63 = vpack.c.bf16 %v1959_v48, %v1958_v3  ;;  %v1928_v40 = vadd.f32 %v1927_v33, %v1815_v54  ;;  %v1960_v30 = vmax.f32 %v1926_v23, 0.0 }
 0x1bd   :  { %2064 = vst [vmem:[%s3272_s3 + $0x30] sm:$0xff] %v2318_v60  ;;  %v1945_v5 = vmax.f32 %v1888_v29, 0.0 }
 0x1be   :  { %2072 = vst [vmem:[%s3272_s3 + $0x70] sm:$0xff] %v2326_v63  ;;  %v1961_v28 = vmax.f32 %v1928_v40, 0.0 }
 0x1bf   :  { %v2319_v41 = vpack.c.bf16 %v1945_v5, %v1944_v14 }
 0x1c0   :  { %v2327_v26 = vpack.c.bf16 %v1961_v28, %v1960_v30 }
 0x1c1   :  { %2065 = vst [vmem:[%s3272_s3 + $0x38] sm:$0xff] %v2319_v41 }
 0x1c2   :  { %2073 = vst [vmem:[%s3272_s3 + $0x78] sm:$0xff] %v2327_v26 }
 0x1c3   :  { %2078 = vsyncpa [#allocation3], 1 }
 0x1c4   :  { %2079 = vsyncpa [#allocation5], 1 }

// kernel: chess_model_forward.9
= control target key start
LH: loop header
LB: loop body
LE: loop exit
PB: predicated region body
PF: predicated region fallthrough
CT: control target
= control target key end

     0   :  { %8 = vsyncpa [#allocation5], 0  ;;  %s7786_s0 = inlined_call_operand.vmem [shape: bf16[2,1024], index: 0, kind: input, shape index: {}]   ;;  %s7787_s1 = inlined_call_operand.vmem [shape: bf16[1024,4096], index: 1, kind: input, shape index: {}]   ;;  %s7788_s2 = inlined_call_operand.vmem [shape: f32[1,4096], index: 2, kind: input, shape index: {}]   ;;  %s7789_s3 = inlined_call_operand.hbm [shape: f32[2,4096], index: 3, kind: output, shape index: {}]  }
   0x1   :  { %10 = vsyncpa [#allocation5 + $0x1], 0  ;;  %s5993_s12 = smov 0   ;;  %s5995_s13 = smov 0  }
   0x2   :  { %s5997_s14 = smov 0   ;;  %s5999_s15 = smov 0  }
   0x3   :  { %s6001_s16 = smov 0   ;;  %s6003_s17 = smov 0  }
   0x4 LB: > { %s5303_s18 = sadd.s32 4294967295, %s5968_s17   ;;  %s5304_s19 = sadd.s32 4294967294, %s5968_s17   ;;  %s5968_s17 = sphi %s6003_s17, %s16_s17   ;;  %s5964_s16 = sphi %s6001_s16, %s7796_s16   ;;  %s5960_s15 = sphi %s5999_s15, %s7795_s15   ;;  %s5956_s14 = sphi %s5997_s14, %s7794_s14   ;;  %s5952_s13 = sphi %s5995_s13, %s7793_s13   ;;  %s5948_s12 = sphi %s5993_s12, %s7792_s12  }
   0x5   : > { %s28_s20 = sadd.s32 1, %s5964_s16  ;;  %s63_s21 = sadd.s32 1, %s5956_s14 }
   0x6   : > { %p30_p0 = scmp.ge.s32.totalorder %s28_s20, 4  ;;  %p70_p1 = scmp.ne.s32.totalorder %s5956_s14, %s5952_s13 }
   0x7   : > { %p71_p2 = scmp.eq.s32.totalorder %s5968_s17, 0  ;;  %p126_p3 = scmp.eq.s32.totalorder %s5303_s18, 3 }
   0x8   : > { %s7798_s20 = smov (%p30_p0, %s28_s20), 0  ;;  %p131_p6 = scmp.ne.s32.totalorder %s5952_s13, %s5948_s12 }
   0x9   : > { %p72_p4 = por %p71_p2, %p70_p1  ;;  %p6032_p5 = por %p126_p3, %p70_p1 }
   0xa   : > { %s59_s23 = ssub.s32 %s5964_s16, %s7798_s20  ;;  %p132_p8 = scmp.eq.s32.totalorder %s5304_s19, 3 }
   0xb   : > { %p61_p7 = scmp.eq.s32.totalorder %s59_s23, 0  ;;  %p5307_p10 = scmp.ge.s32.totalorder %s5968_s17, 4 }
   0xc   : > { %p6043_p9 = por %p132_p8, %p131_p6 }
   0xd   : > { %s6041_s24 = scalar_select %p61_p7, %s5956_s14, %s63_s21  }
   0xe   : > { %156 = sbr.rel (%p5307_p10) target bundleno = 279 (0x117), region = 20 }
  0x13   : > { %159 = sbr.rel (!%p72_p4) target bundleno = 279 (0x117), region = 24  ;;  %s161_s26 = sand.u32 (%p72_p4), 1, %s5956_s14  }
  0x14   : > { %s5832_s27 = sshll.u32 (%p72_p4), %s5964_s16, 5  ;;  %s5308_s28 = sshll.u32 (%p72_p4), %s161_s26, 12 }
  0x15   : > { %s6053_s4 = scalar_lea.vmem (%p72_p4), %s7787_s1, %s5832_s27  ;;  %s6058_s5 = scalar_lea.vmem (%p72_p4), [#allocation3], %s5308_s28 }
  0x16   : > { %v182_v0 = vld [vmem:[%s6053_s4] sm:$0xff] (%p72_p4)  ;;  %v184_v1 = vld [vmem:[%s6053_s4 + $0x8] sm:$0xff] (%p72_p4)  ;;  %v186_v2 = vld [vmem:[%s6053_s4 + $0x10] sm:$0xff] (%p72_p4) }
  0x17   : > { %183 = vst [vmem:[%s6058_s5] sm:$0xff] (%p72_p4), %v182_v0  ;;  %185 = vst [vmem:[%s6058_s5 + $0x8] sm:$0xff] (%p72_p4), %v184_v1  ;;  %v188_v3 = vld [vmem:[%s6053_s4 + $0x18] sm:$0xff] (%p72_p4)  ;;  %v190_v4 = vld [vmem:[%s6053_s4 + $0x80] sm:$0xff] (%p72_p4) }
  0x18   : > { %187 = vst [vmem:[%s6058_s5 + $0x10] sm:$0xff] %v186_v2  ;;  %v192_v5 = vld [vmem:[%s6053_s4 + $0x88] sm:$0xff]  ;;  %189 = vst [vmem:[%s6058_s5 + $0x18] sm:$0xff] %v188_v3  ;;  %v194_v6 = vld [vmem:[%s6053_s4 + $0x90] sm:$0xff] }
  0x19   : > { %191 = vst [vmem:[%s6058_s5 + $0x20] sm:$0xff] %v190_v4  ;;  %193 = vst [vmem:[%s6058_s5 + $0x28] sm:$0xff] %v192_v5  ;;  %v196_v7 = vld [vmem:[%s6053_s4 + $0x98] sm:$0xff]  ;;  %v198_v8 = vld [vmem:[%s6053_s4 + $0x100] sm:$0xff] }
  0x1a   : > { %195 = vst [vmem:[%s6058_s5 + $0x30] sm:$0xff] %v194_v6  ;;  %197 = vst [vmem:[%s6058_s5 + $0x38] sm:$0xff] %v196_v7  ;;  %v200_v9 = vld [vmem:[%s6053_s4 + $0x108] sm:$0xff]  ;;  %v202_v10 = vld [vmem:[%s6053_s4 + $0x110] sm:$0xff] }
  0x1b   : > { %199 = vst [vmem:[%s6058_s5 + $0x40] sm:$0xff] %v198_v8  ;;  %v204_v11 = vld [vmem:[%s6053_s4 + $0x118] sm:$0xff]  ;;  %201 = vst [vmem:[%s6058_s5 + $0x48] sm:$0xff] %v200_v9  ;;  %v206_v12 = vld [vmem:[%s6053_s4 + $0x180] sm:$0xff] }
  0x1c   : > { %203 = vst [vmem:[%s6058_s5 + $0x50] sm:$0xff] %v202_v10  ;;  %205 = vst [vmem:[%s6058_s5 + $0x58] sm:$0xff] %v204_v11  ;;  %v208_v13 = vld [vmem:[%s6053_s4 + $0x188] sm:$0xff]  ;;  %v210_v14 = vld [vmem:[%s6053_s4 + $0x190] sm:$0xff] }
  0x1d   : > { %207 = vst [vmem:[%s6058_s5 + $0x60] sm:$0xff] %v206_v12  ;;  %209 = vst [vmem:[%s6058_s5 + $0x68] sm:$0xff] %v208_v13  ;;  %v212_v15 = vld [vmem:[%s6053_s4 + $0x198] sm:$0xff]  ;;  %v214_v16 = vld [vmem:[%s6053_s4 + $0x200] sm:$0xff] }
  0x1e   : > { %211 = vst [vmem:[%s6058_s5 + $0x70] sm:$0xff] %v210_v14  ;;  %v216_v17 = vld [vmem:[%s6053_s4 + $0x208] sm:$0xff]  ;;  %213 = vst [vmem:[%s6058_s5 + $0x78] sm:$0xff] %v212_v15  ;;  %v218_v18 = vld [vmem:[%s6053_s4 + $0x210] sm:$0xff] }
  0x1f   : > { %215 = vst [vmem:[%s6058_s5 + $0x80] sm:$0xff] %v214_v16  ;;  %217 = vst [vmem:[%s6058_s5 + $0x88] sm:$0xff] %v216_v17  ;;  %v220_v19 = vld [vmem:[%s6053_s4 + $0x218] sm:$0xff]  ;;  %v222_v20 = vld [vmem:[%s6053_s4 + $0x280] sm:$0xff] }
  0x20   : > { %219 = vst [vmem:[%s6058_s5 + $0x90] sm:$0xff] %v218_v18  ;;  %221 = vst [vmem:[%s6058_s5 + $0x98] sm:$0xff] %v220_v19  ;;  %v224_v21 = vld [vmem:[%s6053_s4 + $0x288] sm:$0xff]  ;;  %v226_v22 = vld [vmem:[%s6053_s4 + $0x290] sm:$0xff] }
  0x21   : > { %223 = vst [vmem:[%s6058_s5 + $0xa0] sm:$0xff] %v222_v20  ;;  %v228_v23 = vld [vmem:[%s6053_s4 + $0x298] sm:$0xff]  ;;  %225 = vst [vmem:[%s6058_s5 + $0xa8] sm:$0xff] %v224_v21  ;;  %v230_v24 = vld [vmem:[%s6053_s4 + $0x300] sm:$0xff] }
  0x22   : > { %227 = vst [vmem:[%s6058_s5 + $0xb0] sm:$0xff] %v226_v22  ;;  %229 = vst [vmem:[%s6058_s5 + $0xb8] sm:$0xff] %v228_v23  ;;  %v232_v25 = vld [vmem:[%s6053_s4 + $0x308] sm:$0xff]  ;;  %v234_v26 = vld [vmem:[%s6053_s4 + $0x310] sm:$0xff] }
  0x23   : > { %231 = vst [vmem:[%s6058_s5 + $0xc0] sm:$0xff] %v230_v24  ;;  %233 = vst [vmem:[%s6058_s5 + $0xc8] sm:$0xff] %v232_v25  ;;  %v236_v27 = vld [vmem:[%s6053_s4 + $0x318] sm:$0xff]  ;;  %v238_v28 = vld [vmem:[%s6053_s4 + $0x380] sm:$0xff] }
  0x24   : > { %235 = vst [vmem:[%s6058_s5 + $0xd0] sm:$0xff] %v234_v26  ;;  %v240_v29 = vld [vmem:[%s6053_s4 + $0x388] sm:$0xff]  ;;  %237 = vst [vmem:[%s6058_s5 + $0xd8] sm:$0xff] %v236_v27  ;;  %v242_v30 = vld [vmem:[%s6053_s4 + $0x390] sm:$0xff] }
  0x25   : > { %239 = vst [vmem:[%s6058_s5 + $0xe0] sm:$0xff] %v238_v28  ;;  %241 = vst [vmem:[%s6058_s5 + $0xe8] sm:$0xff] %v240_v29  ;;  %v244_v31 = vld [vmem:[%s6053_s4 + $0x398] sm:$0xff]  ;;  %v246_v32 = vld [vmem:[%s6053_s4 + $0x400] sm:$0xff] }
  0x26   : > { %243 = vst [vmem:[%s6058_s5 + $0xf0] sm:$0xff] %v242_v30  ;;  %245 = vst [vmem:[%s6058_s5 + $0xf8] sm:$0xff] %v244_v31  ;;  %v248_v33 = vld [vmem:[%s6053_s4 + $0x408] sm:$0xff]  ;;  %v250_v34 = vld [vmem:[%s6053_s4 + $0x410] sm:$0xff] }
  0x27   : > { %247 = vst [vmem:[%s6058_s5 + $0x100] sm:$0xff] %v246_v32  ;;  %v252_v35 = vld [vmem:[%s6053_s4 + $0x418] sm:$0xff]  ;;  %249 = vst [vmem:[%s6058_s5 + $0x108] sm:$0xff] %v248_v33  ;;  %v254_v36 = vld [vmem:[%s6053_s4 + $0x480] sm:$0xff] }
  0x28   : > { %251 = vst [vmem:[%s6058_s5 + $0x110] sm:$0xff] %v250_v34  ;;  %253 = vst [vmem:[%s6058_s5 + $0x118] sm:$0xff] %v252_v35  ;;  %v256_v37 = vld [vmem:[%s6053_s4 + $0x488] sm:$0xff]  ;;  %v258_v38 = vld [vmem:[%s6053_s4 + $0x490] sm:$0xff] }
  0x29   : > { %255 = vst [vmem:[%s6058_s5 + $0x120] sm:$0xff] %v254_v36  ;;  %257 = vst [vmem:[%s6058_s5 + $0x128] sm:$0xff] %v256_v37  ;;  %v260_v39 = vld [vmem:[%s6053_s4 + $0x498] sm:$0xff]  ;;  %v262_v40 = vld [vmem:[%s6053_s4 + $0x500] sm:$0xff] }
  0x2a   : > { %259 = vst [vmem:[%s6058_s5 + $0x130] sm:$0xff] %v258_v38  ;;  %v264_v41 = vld [vmem:[%s6053_s4 + $0x508] sm:$0xff]  ;;  %261 = vst [vmem:[%s6058_s5 + $0x138] sm:$0xff] %v260_v39  ;;  %v266_v42 = vld [vmem:[%s6053_s4 + $0x510] sm:$0xff] }
  0x2b   : > { %263 = vst [vmem:[%s6058_s5 + $0x140] sm:$0xff] %v262_v40  ;;  %265 = vst [vmem:[%s6058_s5 + $0x148] sm:$0xff] %v264_v41  ;;  %v268_v43 = vld [vmem:[%s6053_s4 + $0x518] sm:$0xff]  ;;  %v270_v44 = vld [vmem:[%s6053_s4 + $0x580] sm:$0xff] }
  0x2c   : > { %267 = vst [vmem:[%s6058_s5 + $0x150] sm:$0xff] %v266_v42  ;;  %269 = vst [vmem:[%s6058_s5 + $0x158] sm:$0xff] %v268_v43  ;;  %v272_v45 = vld [vmem:[%s6053_s4 + $0x588] sm:$0xff]  ;;  %v274_v46 = vld [vmem:[%s6053_s4 + $0x590] sm:$0xff] }
  0x2d   : > { %271 = vst [vmem:[%s6058_s5 + $0x160] sm:$0xff] %v270_v44  ;;  %v276_v47 = vld [vmem:[%s6053_s4 + $0x598] sm:$0xff]  ;;  %273 = vst [vmem:[%s6058_s5 + $0x168] sm:$0xff] %v272_v45  ;;  %v278_v48 = vld [vmem:[%s6053_s4 + $0x600] sm:$0xff] }
  0x2e   : > { %275 = vst [vmem:[%s6058_s5 + $0x170] sm:$0xff] %v274_v46  ;;  %277 = vst [vmem:[%s6058_s5 + $0x178] sm:$0xff] %v276_v47  ;;  %v280_v49 = vld [vmem:[%s6053_s4 + $0x608] sm:$0xff]  ;;  %v282_v50 = vld [vmem:[%s6053_s4 + $0x610] sm:$0xff] }
  0x2f   : > { %279 = vst [vmem:[%s6058_s5 + $0x180] sm:$0xff] %v278_v48  ;;  %281 = vst [vmem:[%s6058_s5 + $0x188] sm:$0xff] %v280_v49  ;;  %v284_v51 = vld [vmem:[%s6053_s4 + $0x618] sm:$0xff]  ;;  %v286_v52 = vld [vmem:[%s6053_s4 + $0x680] sm:$0xff] }
  0x30   : > { %283 = vst [vmem:[%s6058_s5 + $0x190] sm:$0xff] %v282_v50  ;;  %v288_v53 = vld [vmem:[%s6053_s4 + $0x688] sm:$0xff]  ;;  %285 = vst [vmem:[%s6058_s5 + $0x198] sm:$0xff] %v284_v51  ;;  %v290_v54 = vld [vmem:[%s6053_s4 + $0x690] sm:$0xff] }
  0x31   : > { %287 = vst [vmem:[%s6058_s5 + $0x1a0] sm:$0xff] %v286_v52  ;;  %289 = vst [vmem:[%s6058_s5 + $0x1a8] sm:$0xff] %v288_v53  ;;  %v292_v55 = vld [vmem:[%s6053_s4 + $0x698] sm:$0xff]  ;;  %v294_v56 = vld [vmem:[%s6053_s4 + $0x700] sm:$0xff] }
  0x32   : > { %291 = vst [vmem:[%s6058_s5 + $0x1b0] sm:$0xff] %v290_v54  ;;  %293 = vst [vmem:[%s6058_s5 + $0x1b8] sm:$0xff] %v292_v55  ;;  %v296_v57 = vld [vmem:[%s6053_s4 + $0x708] sm:$0xff]  ;;  %v298_v58 = vld [vmem:[%s6053_s4 + $0x710] sm:$0xff] }
  0x33   : > { %295 = vst [vmem:[%s6058_s5 + $0x1c0] sm:$0xff] %v294_v56  ;;  %v300_v59 = vld [vmem:[%s6053_s4 + $0x718] sm:$0xff]  ;;  %297 = vst [vmem:[%s6058_s5 + $0x1c8] sm:$0xff] %v296_v57  ;;  %v302_v60 = vld [vmem:[%s6053_s4 + $0x780] sm:$0xff] }
  0x34   : > { %299 = vst [vmem:[%s6058_s5 + $0x1d0] sm:$0xff] %v298_v58  ;;  %301 = vst [vmem:[%s6058_s5 + $0x1d8] sm:$0xff] %v300_v59  ;;  %v304_v61 = vld [vmem:[%s6053_s4 + $0x788] sm:$0xff]  ;;  %v306_v62 = vld [vmem:[%s6053_s4 + $0x790] sm:$0xff] }
  0x35   : > { %303 = vst [vmem:[%s6058_s5 + $0x1e0] sm:$0xff] %v302_v60  ;;  %305 = vst [vmem:[%s6058_s5 + $0x1e8] sm:$0xff] %v304_v61  ;;  %v308_v63 = vld [vmem:[%s6053_s4 + $0x798] sm:$0xff]  ;;  %v310_v0 = vld [vmem:[%s6053_s4 + $0x800] sm:$0xff] }
  0x36   : > { %307 = vst [vmem:[%s6058_s5 + $0x1f0] sm:$0xff] %v306_v62  ;;  %v312_v1 = vld [vmem:[%s6053_s4 + $0x808] sm:$0xff]  ;;  %309 = vst [vmem:[%s6058_s5 + $0x1f8] sm:$0xff] %v308_v63  ;;  %v314_v2 = vld [vmem:[%s6053_s4 + $0x810] sm:$0xff] }
  0x37   : > { %311 = vst [vmem:[%s6058_s5 + $0x200] sm:$0xff] %v310_v0  ;;  %313 = vst [vmem:[%s6058_s5 + $0x208] sm:$0xff] %v312_v1  ;;  %v316_v3 = vld [vmem:[%s6053_s4 + $0x818] sm:$0xff]  ;;  %v318_v4 = vld [vmem:[%s6053_s4 + $0x880] sm:$0xff] }
  0x38   : > { %315 = vst [vmem:[%s6058_s5 + $0x210] sm:$0xff] %v314_v2  ;;  %317 = vst [vmem:[%s6058_s5 + $0x218] sm:$0xff] %v316_v3  ;;  %v320_v5 = vld [vmem:[%s6053_s4 + $0x888] sm:$0xff]  ;;  %v322_v6 = vld [vmem:[%s6053_s4 + $0x890] sm:$0xff] }
  0x39   : > { %319 = vst [vmem:[%s6058_s5 + $0x220] sm:$0xff] %v318_v4  ;;  %v324_v7 = vld [vmem:[%s6053_s4 + $0x898] sm:$0xff]  ;;  %321 = vst [vmem:[%s6058_s5 + $0x228] sm:$0xff] %v320_v5  ;;  %v326_v8 = vld [vmem:[%s6053_s4 + $0x900] sm:$0xff] }
  0x3a   : > { %323 = vst [vmem:[%s6058_s5 + $0x230] sm:$0xff] %v322_v6  ;;  %325 = vst [vmem:[%s6058_s5 + $0x238] sm:$0xff] %v324_v7  ;;  %v328_v9 = vld [vmem:[%s6053_s4 + $0x908] sm:$0xff]  ;;  %v330_v10 = vld [vmem:[%s6053_s4 + $0x910] sm:$0xff] }
  0x3b   : > { %327 = vst [vmem:[%s6058_s5 + $0x240] sm:$0xff] %v326_v8  ;;  %329 = vst [vmem:[%s6058_s5 + $0x248] sm:$0xff] %v328_v9  ;;  %v332_v11 = vld [vmem:[%s6053_s4 + $0x918] sm:$0xff]  ;;  %v334_v12 = vld [vmem:[%s6053_s4 + $0x980] sm:$0xff] }
  0x3c   : > { %331 = vst [vmem:[%s6058_s5 + $0x250] sm:$0xff] %v330_v10  ;;  %v336_v13 = vld [vmem:[%s6053_s4 + $0x988] sm:$0xff]  ;;  %333 = vst [vmem:[%s6058_s5 + $0x258] sm:$0xff] %v332_v11  ;;  %v338_v14 = vld [vmem:[%s6053_s4 + $0x990] sm:$0xff] }
  0x3d   : > { %335 = vst [vmem:[%s6058_s5 + $0x260] sm:$0xff] %v334_v12  ;;  %337 = vst [vmem:[%s6058_s5 + $0x268] sm:$0xff] %v336_v13  ;;  %v340_v15 = vld [vmem:[%s6053_s4 + $0x998] sm:$0xff]  ;;  %v342_v16 = vld [vmem:[%s6053_s4 + $0xa00] sm:$0xff] }
  0x3e   : > { %339 = vst [vmem:[%s6058_s5 + $0x270] sm:$0xff] %v338_v14  ;;  %341 = vst [vmem:[%s6058_s5 + $0x278] sm:$0xff] %v340_v15  ;;  %v344_v17 = vld [vmem:[%s6053_s4 + $0xa08] sm:$0xff]  ;;  %v346_v18 = vld [vmem:[%s6053_s4 + $0xa10] sm:$0xff] }
  0x3f   : > { %343 = vst [vmem:[%s6058_s5 + $0x280] sm:$0xff] %v342_v16  ;;  %v348_v19 = vld [vmem:[%s6053_s4 + $0xa18] sm:$0xff]  ;;  %345 = vst [vmem:[%s6058_s5 + $0x288] sm:$0xff] %v344_v17  ;;  %v350_v20 = vld [vmem:[%s6053_s4 + $0xa80] sm:$0xff] }
  0x40   : > { %347 = vst [vmem:[%s6058_s5 + $0x290] sm:$0xff] %v346_v18  ;;  %349 = vst [vmem:[%s6058_s5 + $0x298] sm:$0xff] %v348_v19  ;;  %v352_v21 = vld [vmem:[%s6053_s4 + $0xa88] sm:$0xff]  ;;  %v354_v22 = vld [vmem:[%s6053_s4 + $0xa90] sm:$0xff] }
  0x41   : > { %351 = vst [vmem:[%s6058_s5 + $0x2a0] sm:$0xff] %v350_v20  ;;  %353 = vst [vmem:[%s6058_s5 + $0x2a8] sm:$0xff] %v352_v21  ;;  %v356_v23 = vld [vmem:[%s6053_s4 + $0xa98] sm:$0xff]  ;;  %v358_v24 = vld [vmem:[%s6053_s4 + $0xb00] sm:$0xff] }
  0x42   : > { %355 = vst [vmem:[%s6058_s5 + $0x2b0] sm:$0xff] %v354_v22  ;;  %v360_v25 = vld [vmem:[%s6053_s4 + $0xb08] sm:$0xff]  ;;  %357 = vst [vmem:[%s6058_s5 + $0x2b8] sm:$0xff] %v356_v23  ;;  %v362_v26 = vld [vmem:[%s6053_s4 + $0xb10] sm:$0xff] }
  0x43   : > { %359 = vst [vmem:[%s6058_s5 + $0x2c0] sm:$0xff] %v358_v24  ;;  %361 = vst [vmem:[%s6058_s5 + $0x2c8] sm:$0xff] %v360_v25  ;;  %v364_v27 = vld [vmem:[%s6053_s4 + $0xb18] sm:$0xff]  ;;  %v366_v28 = vld [vmem:[%s6053_s4 + $0xb80] sm:$0xff] }
  0x44   : > { %363 = vst [vmem:[%s6058_s5 + $0x2d0] sm:$0xff] %v362_v26  ;;  %365 = vst [vmem:[%s6058_s5 + $0x2d8] sm:$0xff] %v364_v27  ;;  %v368_v29 = vld [vmem:[%s6053_s4 + $0xb88] sm:$0xff]  ;;  %v370_v30 = vld [vmem:[%s6053_s4 + $0xb90] sm:$0xff] }
  0x45   : > { %367 = vst [vmem:[%s6058_s5 + $0x2e0] sm:$0xff] %v366_v28  ;;  %v372_v31 = vld [vmem:[%s6053_s4 + $0xb98] sm:$0xff]  ;;  %369 = vst [vmem:[%s6058_s5 + $0x2e8] sm:$0xff] %v368_v29  ;;  %v374_v32 = vld [vmem:[%s6053_s4 + $0xc00] sm:$0xff] }
  0x46   : > { %371 = vst [vmem:[%s6058_s5 + $0x2f0] sm:$0xff] %v370_v30  ;;  %373 = vst [vmem:[%s6058_s5 + $0x2f8] sm:$0xff] %v372_v31  ;;  %v376_v33 = vld [vmem:[%s6053_s4 + $0xc08] sm:$0xff]  ;;  %v378_v34 = vld [vmem:[%s6053_s4 + $0xc10] sm:$0xff] }
  0x47   : > { %375 = vst [vmem:[%s6058_s5 + $0x300] sm:$0xff] %v374_v32  ;;  %377 = vst [vmem:[%s6058_s5 + $0x308] sm:$0xff] %v376_v33  ;;  %v380_v35 = vld [vmem:[%s6053_s4 + $0xc18] sm:$0xff]  ;;  %v382_v36 = vld [vmem:[%s6053_s4 + $0xc80] sm:$0xff] }
  0x48   : > { %379 = vst [vmem:[%s6058_s5 + $0x310] sm:$0xff] %v378_v34  ;;  %v384_v37 = vld [vmem:[%s6053_s4 + $0xc88] sm:$0xff]  ;;  %381 = vst [vmem:[%s6058_s5 + $0x318] sm:$0xff] %v380_v35  ;;  %v386_v38 = vld [vmem:[%s6053_s4 + $0xc90] sm:$0xff] }
  0x49   : > { %383 = vst [vmem:[%s6058_s5 + $0x320] sm:$0xff] %v382_v36  ;;  %385 = vst [vmem:[%s6058_s5 + $0x328] sm:$0xff] %v384_v37  ;;  %v388_v39 = vld [vmem:[%s6053_s4 + $0xc98] sm:$0xff]  ;;  %v390_v40 = vld [vmem:[%s6053_s4 + $0xd00] sm:$0xff] }
  0x4a   : > { %387 = vst [vmem:[%s6058_s5 + $0x330] sm:$0xff] %v386_v38  ;;  %389 = vst [vmem:[%s6058_s5 + $0x338] sm:$0xff] %v388_v39  ;;  %v392_v41 = vld [vmem:[%s6053_s4 + $0xd08] sm:$0xff]  ;;  %v394_v42 = vld [vmem:[%s6053_s4 + $0xd10] sm:$0xff] }
  0x4b   : > { %391 = vst [vmem:[%s6058_s5 + $0x340] sm:$0xff] %v390_v40  ;;  %v396_v43 = vld [vmem:[%s6053_s4 + $0xd18] sm:$0xff]  ;;  %393 = vst [vmem:[%s6058_s5 + $0x348] sm:$0xff] %v392_v41  ;;  %v398_v44 = vld [vmem:[%s6053_s4 + $0xd80] sm:$0xff] }
  0x4c   : > { %395 = vst [vmem:[%s6058_s5 + $0x350] sm:$0xff] %v394_v42  ;;  %397 = vst [vmem:[%s6058_s5 + $0x358] sm:$0xff] %v396_v43  ;;  %v400_v45 = vld [vmem:[%s6053_s4 + $0xd88] sm:$0xff]  ;;  %v402_v46 = vld [vmem:[%s6053_s4 + $0xd90] sm:$0xff] }
  0x4d   : > { %399 = vst [vmem:[%s6058_s5 + $0x360] sm:$0xff] %v398_v44  ;;  %401 = vst [vmem:[%s6058_s5 + $0x368] sm:$0xff] %v400_v45  ;;  %v404_v47 = vld [vmem:[%s6053_s4 + $0xd98] sm:$0xff]  ;;  %v406_v48 = vld [vmem:[%s6053_s4 + $0xe00] sm:$0xff] }
  0x4e   : > { %403 = vst [vmem:[%s6058_s5 + $0x370] sm:$0xff] %v402_v46  ;;  %v408_v49 = vld [vmem:[%s6053_s4 + $0xe08] sm:$0xff]  ;;  %405 = vst [vmem:[%s6058_s5 + $0x378] sm:$0xff] %v404_v47  ;;  %v410_v50 = vld [vmem:[%s6053_s4 + $0xe10] sm:$0xff] }
  0x4f   : > { %407 = vst [vmem:[%s6058_s5 + $0x380] sm:$0xff] %v406_v48  ;;  %409 = vst [vmem:[%s6058_s5 + $0x388] sm:$0xff] %v408_v49  ;;  %v412_v51 = vld [vmem:[%s6053_s4 + $0xe18] sm:$0xff]  ;;  %v414_v52 = vld [vmem:[%s6053_s4 + $0xe80] sm:$0xff] }
  0x50   : > { %411 = vst [vmem:[%s6058_s5 + $0x390] sm:$0xff] %v410_v50  ;;  %413 = vst [vmem:[%s6058_s5 + $0x398] sm:$0xff] %v412_v51  ;;  %v416_v53 = vld [vmem:[%s6053_s4 + $0xe88] sm:$0xff]  ;;  %v418_v54 = vld [vmem:[%s6053_s4 + $0xe90] sm:$0xff] }
  0x51   : > { %415 = vst [vmem:[%s6058_s5 + $0x3a0] sm:$0xff] %v414_v52  ;;  %v420_v55 = vld [vmem:[%s6053_s4 + $0xe98] sm:$0xff]  ;;  %417 = vst [vmem:[%s6058_s5 + $0x3a8] sm:$0xff] %v416_v53  ;;  %v422_v56 = vld [vmem:[%s6053_s4 + $0xf00] sm:$0xff] }
  0x52   : > { %419 = vst [vmem:[%s6058_s5 + $0x3b0] sm:$0xff] %v418_v54  ;;  %421 = vst [vmem:[%s6058_s5 + $0x3b8] sm:$0xff] %v420_v55  ;;  %v424_v57 = vld [vmem:[%s6053_s4 + $0xf08] sm:$0xff]  ;;  %v426_v58 = vld [vmem:[%s6053_s4 + $0xf10] sm:$0xff] }
  0x53   : > { %423 = vst [vmem:[%s6058_s5 + $0x3c0] sm:$0xff] %v422_v56  ;;  %425 = vst [vmem:[%s6058_s5 + $0x3c8] sm:$0xff] %v424_v57  ;;  %v428_v59 = vld [vmem:[%s6053_s4 + $0xf18] sm:$0xff]  ;;  %v430_v60 = vld [vmem:[%s6053_s4 + $0xf80] sm:$0xff] }
  0x54   : > { %427 = vst [vmem:[%s6058_s5 + $0x3d0] sm:$0xff] %v426_v58  ;;  %v432_v61 = vld [vmem:[%s6053_s4 + $0xf88] sm:$0xff]  ;;  %429 = vst [vmem:[%s6058_s5 + $0x3d8] sm:$0xff] %v428_v59  ;;  %v434_v62 = vld [vmem:[%s6053_s4 + $0xf90] sm:$0xff] }
  0x55   : > { %431 = vst [vmem:[%s6058_s5 + $0x3e0] sm:$0xff] %v430_v60  ;;  %433 = vst [vmem:[%s6058_s5 + $0x3e8] sm:$0xff] %v432_v61  ;;  %v436_v63 = vld [vmem:[%s6053_s4 + $0xf98] sm:$0xff]  ;;  %v438_v0 = vld [vmem:[%s6053_s4 + $0x1000] sm:$0xff] }
  0x56   : > { %435 = vst [vmem:[%s6058_s5 + $0x3f0] sm:$0xff] %v434_v62  ;;  %437 = vst [vmem:[%s6058_s5 + $0x3f8] sm:$0xff] %v436_v63  ;;  %v440_v1 = vld [vmem:[%s6053_s4 + $0x1008] sm:$0xff]  ;;  %v442_v2 = vld [vmem:[%s6053_s4 + $0x1010] sm:$0xff] }
  0x57   : > { %439 = vst [vmem:[%s6058_s5 + $0x400] sm:$0xff] %v438_v0  ;;  %v444_v3 = vld [vmem:[%s6053_s4 + $0x1018] sm:$0xff]  ;;  %441 = vst [vmem:[%s6058_s5 + $0x408] sm:$0xff] %v440_v1  ;;  %v446_v4 = vld [vmem:[%s6053_s4 + $0x1080] sm:$0xff] }
  0x58   : > { %443 = vst [vmem:[%s6058_s5 + $0x410] sm:$0xff] %v442_v2  ;;  %445 = vst [vmem:[%s6058_s5 + $0x418] sm:$0xff] %v444_v3  ;;  %v448_v5 = vld [vmem:[%s6053_s4 + $0x1088] sm:$0xff]  ;;  %v450_v6 = vld [vmem:[%s6053_s4 + $0x1090] sm:$0xff] }
  0x59   : > { %447 = vst [vmem:[%s6058_s5 + $0x420] sm:$0xff] %v446_v4  ;;  %449 = vst [vmem:[%s6058_s5 + $0x428] sm:$0xff] %v448_v5  ;;  %v452_v7 = vld [vmem:[%s6053_s4 + $0x1098] sm:$0xff]  ;;  %v454_v8 = vld [vmem:[%s6053_s4 + $0x1100] sm:$0xff] }
  0x5a   : > { %451 = vst [vmem:[%s6058_s5 + $0x430] sm:$0xff] %v450_v6  ;;  %v456_v9 = vld [vmem:[%s6053_s4 + $0x1108] sm:$0xff]  ;;  %453 = vst [vmem:[%s6058_s5 + $0x438] sm:$0xff] %v452_v7  ;;  %v458_v10 = vld [vmem:[%s6053_s4 + $0x1110] sm:$0xff] }
  0x5b   : > { %455 = vst [vmem:[%s6058_s5 + $0x440] sm:$0xff] %v454_v8  ;;  %457 = vst [vmem:[%s6058_s5 + $0x448] sm:$0xff] %v456_v9  ;;  %v460_v11 = vld [vmem:[%s6053_s4 + $0x1118] sm:$0xff]  ;;  %v462_v12 = vld [vmem:[%s6053_s4 + $0x1180] sm:$0xff] }
  0x5c   : > { %459 = vst [vmem:[%s6058_s5 + $0x450] sm:$0xff] %v458_v10  ;;  %461 = vst [vmem:[%s6058_s5 + $0x458] sm:$0xff] %v460_v11  ;;  %v464_v13 = vld [vmem:[%s6053_s4 + $0x1188] sm:$0xff]  ;;  %v466_v14 = vld [vmem:[%s6053_s4 + $0x1190] sm:$0xff] }
  0x5d   : > { %463 = vst [vmem:[%s6058_s5 + $0x460] sm:$0xff] %v462_v12  ;;  %v468_v15 = vld [vmem:[%s6053_s4 + $0x1198] sm:$0xff]  ;;  %465 = vst [vmem:[%s6058_s5 + $0x468] sm:$0xff] %v464_v13  ;;  %v470_v16 = vld [vmem:[%s6053_s4 + $0x1200] sm:$0xff] }
  0x5e   : > { %467 = vst [vmem:[%s6058_s5 + $0x470] sm:$0xff] %v466_v14  ;;  %469 = vst [vmem:[%s6058_s5 + $0x478] sm:$0xff] %v468_v15  ;;  %v472_v17 = vld [vmem:[%s6053_s4 + $0x1208] sm:$0xff]  ;;  %v474_v18 = vld [vmem:[%s6053_s4 + $0x1210] sm:$0xff] }
  0x5f   : > { %471 = vst [vmem:[%s6058_s5 + $0x480] sm:$0xff] %v470_v16  ;;  %473 = vst [vmem:[%s6058_s5 + $0x488] sm:$0xff] %v472_v17  ;;  %v476_v19 = vld [vmem:[%s6053_s4 + $0x1218] sm:$0xff]  ;;  %v478_v20 = vld [vmem:[%s6053_s4 + $0x1280] sm:$0xff] }
  0x60   : > { %475 = vst [vmem:[%s6058_s5 + $0x490] sm:$0xff] %v474_v18  ;;  %v480_v21 = vld [vmem:[%s6053_s4 + $0x1288] sm:$0xff]  ;;  %477 = vst [vmem:[%s6058_s5 + $0x498] sm:$0xff] %v476_v19  ;;  %v482_v22 = vld [vmem:[%s6053_s4 + $0x1290] sm:$0xff] }
  0x61   : > { %479 = vst [vmem:[%s6058_s5 + $0x4a0] sm:$0xff] %v478_v20  ;;  %481 = vst [vmem:[%s6058_s5 + $0x4a8] sm:$0xff] %v480_v21  ;;  %v484_v23 = vld [vmem:[%s6053_s4 + $0x1298] sm:$0xff]  ;;  %v486_v24 = vld [vmem:[%s6053_s4 + $0x1300] sm:$0xff] }
  0x62   : > { %483 = vst [vmem:[%s6058_s5 + $0x4b0] sm:$0xff] %v482_v22  ;;  %485 = vst [vmem:[%s6058_s5 + $0x4b8] sm:$0xff] %v484_v23  ;;  %v488_v25 = vld [vmem:[%s6053_s4 + $0x1308] sm:$0xff]  ;;  %v490_v26 = vld [vmem:[%s6053_s4 + $0x1310] sm:$0xff] }
  0x63   : > { %487 = vst [vmem:[%s6058_s5 + $0x4c0] sm:$0xff] %v486_v24  ;;  %v492_v27 = vld [vmem:[%s6053_s4 + $0x1318] sm:$0xff]  ;;  %489 = vst [vmem:[%s6058_s5 + $0x4c8] sm:$0xff] %v488_v25  ;;  %v494_v28 = vld [vmem:[%s6053_s4 + $0x1380] sm:$0xff] }
  0x64   : > { %491 = vst [vmem:[%s6058_s5 + $0x4d0] sm:$0xff] %v490_v26  ;;  %493 = vst [vmem:[%s6058_s5 + $0x4d8] sm:$0xff] %v492_v27  ;;  %v496_v29 = vld [vmem:[%s6053_s4 + $0x1388] sm:$0xff]  ;;  %v498_v30 = vld [vmem:[%s6053_s4 + $0x1390] sm:$0xff] }
  0x65   : > { %495 = vst [vmem:[%s6058_s5 + $0x4e0] sm:$0xff] %v494_v28  ;;  %497 = vst [vmem:[%s6058_s5 + $0x4e8] sm:$0xff] %v496_v29  ;;  %v500_v31 = vld [vmem:[%s6053_s4 + $0x1398] sm:$0xff]  ;;  %v502_v32 = vld [vmem:[%s6053_s4 + $0x1400] sm:$0xff] }
  0x66   : > { %499 = vst [vmem:[%s6058_s5 + $0x4f0] sm:$0xff] %v498_v30  ;;  %v504_v33 = vld [vmem:[%s6053_s4 + $0x1408] sm:$0xff]  ;;  %501 = vst [vmem:[%s6058_s5 + $0x4f8] sm:$0xff] %v500_v31  ;;  %v506_v34 = vld [vmem:[%s6053_s4 + $0x1410] sm:$0xff] }
  0x67   : > { %503 = vst [vmem:[%s6058_s5 + $0x500] sm:$0xff] %v502_v32  ;;  %505 = vst [vmem:[%s6058_s5 + $0x508] sm:$0xff] %v504_v33  ;;  %v508_v35 = vld [vmem:[%s6053_s4 + $0x1418] sm:$0xff]  ;;  %v510_v36 = vld [vmem:[%s6053_s4 + $0x1480] sm:$0xff] }
  0x68   : > { %507 = vst [vmem:[%s6058_s5 + $0x510] sm:$0xff] %v506_v34  ;;  %509 = vst [vmem:[%s6058_s5 + $0x518] sm:$0xff] %v508_v35  ;;  %v512_v37 = vld [vmem:[%s6053_s4 + $0x1488] sm:$0xff]  ;;  %v514_v38 = vld [vmem:[%s6053_s4 + $0x1490] sm:$0xff] }
  0x69   : > { %511 = vst [vmem:[%s6058_s5 + $0x520] sm:$0xff] %v510_v36  ;;  %v516_v39 = vld [vmem:[%s6053_s4 + $0x1498] sm:$0xff]  ;;  %513 = vst [vmem:[%s6058_s5 + $0x528] sm:$0xff] %v512_v37  ;;  %v518_v40 = vld [vmem:[%s6053_s4 + $0x1500] sm:$0xff] }
  0x6a   : > { %515 = vst [vmem:[%s6058_s5 + $0x530] sm:$0xff] %v514_v38  ;;  %517 = vst [vmem:[%s6058_s5 + $0x538] sm:$0xff] %v516_v39  ;;  %v520_v41 = vld [vmem:[%s6053_s4 + $0x1508] sm:$0xff]  ;;  %v522_v42 = vld [vmem:[%s6053_s4 + $0x1510] sm:$0xff] }
  0x6b   : > { %519 = vst [vmem:[%s6058_s5 + $0x540] sm:$0xff] %v518_v40  ;;  %521 = vst [vmem:[%s6058_s5 + $0x548] sm:$0xff] %v520_v41  ;;  %v524_v43 = vld [vmem:[%s6053_s4 + $0x1518] sm:$0xff]  ;;  %v526_v44 = vld [vmem:[%s6053_s4 + $0x1580] sm:$0xff] }
  0x6c   : > { %523 = vst [vmem:[%s6058_s5 + $0x550] sm:$0xff] %v522_v42  ;;  %v528_v45 = vld [vmem:[%s6053_s4 + $0x1588] sm:$0xff]  ;;  %525 = vst [vmem:[%s6058_s5 + $0x558] sm:$0xff] %v524_v43  ;;  %v530_v46 = vld [vmem:[%s6053_s4 + $0x1590] sm:$0xff] }
  0x6d   : > { %527 = vst [vmem:[%s6058_s5 + $0x560] sm:$0xff] %v526_v44  ;;  %529 = vst [vmem:[%s6058_s5 + $0x568] sm:$0xff] %v528_v45  ;;  %v532_v47 = vld [vmem:[%s6053_s4 + $0x1598] sm:$0xff]  ;;  %v534_v48 = vld [vmem:[%s6053_s4 + $0x1600] sm:$0xff] }
  0x6e   : > { %531 = vst [vmem:[%s6058_s5 + $0x570] sm:$0xff] %v530_v46  ;;  %533 = vst [vmem:[%s6058_s5 + $0x578] sm:$0xff] %v532_v47  ;;  %v536_v49 = vld [vmem:[%s6053_s4 + $0x1608] sm:$0xff]  ;;  %v538_v50 = vld [vmem:[%s6053_s4 + $0x1610] sm:$0xff] }
  0x6f   : > { %535 = vst [vmem:[%s6058_s5 + $0x580] sm:$0xff] %v534_v48  ;;  %v540_v51 = vld [vmem:[%s6053_s4 + $0x1618] sm:$0xff]  ;;  %537 = vst [vmem:[%s6058_s5 + $0x588] sm:$0xff] %v536_v49  ;;  %v542_v52 = vld [vmem:[%s6053_s4 + $0x1680] sm:$0xff] }
  0x70   : > { %539 = vst [vmem:[%s6058_s5 + $0x590] sm:$0xff] %v538_v50  ;;  %541 = vst [vmem:[%s6058_s5 + $0x598] sm:$0xff] %v540_v51  ;;  %v544_v53 = vld [vmem:[%s6053_s4 + $0x1688] sm:$0xff]  ;;  %v546_v54 = vld [vmem:[%s6053_s4 + $0x1690] sm:$0xff] }
  0x71   : > { %543 = vst [vmem:[%s6058_s5 + $0x5a0] sm:$0xff] %v542_v52  ;;  %545 = vst [vmem:[%s6058_s5 + $0x5a8] sm:$0xff] %v544_v53  ;;  %v548_v55 = vld [vmem:[%s6053_s4 + $0x1698] sm:$0xff]  ;;  %v550_v56 = vld [vmem:[%s6053_s4 + $0x1700] sm:$0xff] }
  0x72   : > { %547 = vst [vmem:[%s6058_s5 + $0x5b0] sm:$0xff] %v546_v54  ;;  %v552_v57 = vld [vmem:[%s6053_s4 + $0x1708] sm:$0xff]  ;;  %549 = vst [vmem:[%s6058_s5 + $0x5b8] sm:$0xff] %v548_v55  ;;  %v554_v58 = vld [vmem:[%s6053_s4 + $0x1710] sm:$0xff] }
  0x73   : > { %551 = vst [vmem:[%s6058_s5 + $0x5c0] sm:$0xff] %v550_v56  ;;  %553 = vst [vmem:[%s6058_s5 + $0x5c8] sm:$0xff] %v552_v57  ;;  %v556_v59 = vld [vmem:[%s6053_s4 + $0x1718] sm:$0xff]  ;;  %v558_v60 = vld [vmem:[%s6053_s4 + $0x1780] sm:$0xff] }
  0x74   : > { %555 = vst [vmem:[%s6058_s5 + $0x5d0] sm:$0xff] %v554_v58  ;;  %557 = vst [vmem:[%s6058_s5 + $0x5d8] sm:$0xff] %v556_v59  ;;  %v560_v61 = vld [vmem:[%s6053_s4 + $0x1788] sm:$0xff]  ;;  %v562_v62 = vld [vmem:[%s6053_s4 + $0x1790] sm:$0xff] }
  0x75   : > { %559 = vst [vmem:[%s6058_s5 + $0x5e0] sm:$0xff] %v558_v60  ;;  %v564_v63 = vld [vmem:[%s6053_s4 + $0x1798] sm:$0xff]  ;;  %561 = vst [vmem:[%s6058_s5 + $0x5e8] sm:$0xff] %v560_v61  ;;  %v566_v0 = vld [vmem:[%s6053_s4 + $0x1800] sm:$0xff] }
  0x76   : > { %563 = vst [vmem:[%s6058_s5 + $0x5f0] sm:$0xff] %v562_v62  ;;  %565 = vst [vmem:[%s6058_s5 + $0x5f8] sm:$0xff] %v564_v63  ;;  %v568_v1 = vld [vmem:[%s6053_s4 + $0x1808] sm:$0xff]  ;;  %v570_v2 = vld [vmem:[%s6053_s4 + $0x1810] sm:$0xff] }
  0x77   : > { %567 = vst [vmem:[%s6058_s5 + $0x600] sm:$0xff] %v566_v0  ;;  %569 = vst [vmem:[%s6058_s5 + $0x608] sm:$0xff] %v568_v1  ;;  %v572_v3 = vld [vmem:[%s6053_s4 + $0x1818] sm:$0xff]  ;;  %v574_v4 = vld [vmem:[%s6053_s4 + $0x1880] sm:$0xff] }
  0x78   : > { %571 = vst [vmem:[%s6058_s5 + $0x610] sm:$0xff] %v570_v2  ;;  %v576_v5 = vld [vmem:[%s6053_s4 + $0x1888] sm:$0xff]  ;;  %573 = vst [vmem:[%s6058_s5 + $0x618] sm:$0xff] %v572_v3  ;;  %v578_v6 = vld [vmem:[%s6053_s4 + $0x1890] sm:$0xff] }
  0x79   : > { %575 = vst [vmem:[%s6058_s5 + $0x620] sm:$0xff] %v574_v4  ;;  %577 = vst [vmem:[%s6058_s5 + $0x628] sm:$0xff] %v576_v5  ;;  %v580_v7 = vld [vmem:[%s6053_s4 + $0x1898] sm:$0xff]  ;;  %v582_v8 = vld [vmem:[%s6053_s4 + $0x1900] sm:$0xff] }
  0x7a   : > { %579 = vst [vmem:[%s6058_s5 + $0x630] sm:$0xff] %v578_v6  ;;  %581 = vst [vmem:[%s6058_s5 + $0x638] sm:$0xff] %v580_v7  ;;  %v584_v9 = vld [vmem:[%s6053_s4 + $0x1908] sm:$0xff]  ;;  %v586_v10 = vld [vmem:[%s6053_s4 + $0x1910] sm:$0xff] }
  0x7b   : > { %583 = vst [vmem:[%s6058_s5 + $0x640] sm:$0xff] %v582_v8  ;;  %v588_v11 = vld [vmem:[%s6053_s4 + $0x1918] sm:$0xff]  ;;  %585 = vst [vmem:[%s6058_s5 + $0x648] sm:$0xff] %v584_v9  ;;  %v590_v12 = vld [vmem:[%s6053_s4 + $0x1980] sm:$0xff] }
  0x7c   : > { %587 = vst [vmem:[%s6058_s5 + $0x650] sm:$0xff] %v586_v10  ;;  %589 = vst [vmem:[%s6058_s5 + $0x658] sm:$0xff] %v588_v11  ;;  %v592_v13 = vld [vmem:[%s6053_s4 + $0x1988] sm:$0xff]  ;;  %v594_v14 = vld [vmem:[%s6053_s4 + $0x1990] sm:$0xff] }
  0x7d   : > { %591 = vst [vmem:[%s6058_s5 + $0x660] sm:$0xff] %v590_v12  ;;  %593 = vst [vmem:[%s6058_s5 + $0x668] sm:$0xff] %v592_v13  ;;  %v596_v15 = vld [vmem:[%s6053_s4 + $0x1998] sm:$0xff]  ;;  %v598_v16 = vld [vmem:[%s6053_s4 + $0x1a00] sm:$0xff] }
  0x7e   : > { %595 = vst [vmem:[%s6058_s5 + $0x670] sm:$0xff] %v594_v14  ;;  %v600_v17 = vld [vmem:[%s6053_s4 + $0x1a08] sm:$0xff]  ;;  %597 = vst [vmem:[%s6058_s5 + $0x678] sm:$0xff] %v596_v15  ;;  %v602_v18 = vld [vmem:[%s6053_s4 + $0x1a10] sm:$0xff] }
  0x7f   : > { %599 = vst [vmem:[%s6058_s5 + $0x680] sm:$0xff] %v598_v16  ;;  %601 = vst [vmem:[%s6058_s5 + $0x688] sm:$0xff] %v600_v17  ;;  %v604_v19 = vld [vmem:[%s6053_s4 + $0x1a18] sm:$0xff]  ;;  %v606_v20 = vld [vmem:[%s6053_s4 + $0x1a80] sm:$0xff] }
  0x80   : > { %603 = vst [vmem:[%s6058_s5 + $0x690] sm:$0xff] %v602_v18  ;;  %605 = vst [vmem:[%s6058_s5 + $0x698] sm:$0xff] %v604_v19  ;;  %v608_v21 = vld [vmem:[%s6053_s4 + $0x1a88] sm:$0xff]  ;;  %v610_v22 = vld [vmem:[%s6053_s4 + $0x1a90] sm:$0xff] }
  0x81   : > { %607 = vst [vmem:[%s6058_s5 + $0x6a0] sm:$0xff] %v606_v20  ;;  %v612_v23 = vld [vmem:[%s6053_s4 + $0x1a98] sm:$0xff]  ;;  %609 = vst [vmem:[%s6058_s5 + $0x6a8] sm:$0xff] %v608_v21  ;;  %v614_v24 = vld [vmem:[%s6053_s4 + $0x1b00] sm:$0xff] }
  0x82   : > { %611 = vst [vmem:[%s6058_s5 + $0x6b0] sm:$0xff] %v610_v22  ;;  %613 = vst [vmem:[%s6058_s5 + $0x6b8] sm:$0xff] %v612_v23  ;;  %v616_v25 = vld [vmem:[%s6053_s4 + $0x1b08] sm:$0xff]  ;;  %v618_v26 = vld [vmem:[%s6053_s4 + $0x1b10] sm:$0xff] }
  0x83   : > { %615 = vst [vmem:[%s6058_s5 + $0x6c0] sm:$0xff] %v614_v24  ;;  %617 = vst [vmem:[%s6058_s5 + $0x6c8] sm:$0xff] %v616_v25  ;;  %v620_v27 = vld [vmem:[%s6053_s4 + $0x1b18] sm:$0xff]  ;;  %v622_v28 = vld [vmem:[%s6053_s4 + $0x1b80] sm:$0xff] }
  0x84   : > { %619 = vst [vmem:[%s6058_s5 + $0x6d0] sm:$0xff] %v618_v26  ;;  %v624_v29 = vld [vmem:[%s6053_s4 + $0x1b88] sm:$0xff]  ;;  %621 = vst [vmem:[%s6058_s5 + $0x6d8] sm:$0xff] %v620_v27  ;;  %v626_v30 = vld [vmem:[%s6053_s4 + $0x1b90] sm:$0xff] }
  0x85   : > { %623 = vst [vmem:[%s6058_s5 + $0x6e0] sm:$0xff] %v622_v28  ;;  %625 = vst [vmem:[%s6058_s5 + $0x6e8] sm:$0xff] %v624_v29  ;;  %v628_v31 = vld [vmem:[%s6053_s4 + $0x1b98] sm:$0xff]  ;;  %v630_v32 = vld [vmem:[%s6053_s4 + $0x1c00] sm:$0xff] }
  0x86   : > { %627 = vst [vmem:[%s6058_s5 + $0x6f0] sm:$0xff] %v626_v30  ;;  %629 = vst [vmem:[%s6058_s5 + $0x6f8] sm:$0xff] %v628_v31  ;;  %v632_v33 = vld [vmem:[%s6053_s4 + $0x1c08] sm:$0xff]  ;;  %v634_v34 = vld [vmem:[%s6053_s4 + $0x1c10] sm:$0xff] }
  0x87   : > { %631 = vst [vmem:[%s6058_s5 + $0x700] sm:$0xff] %v630_v32  ;;  %v636_v35 = vld [vmem:[%s6053_s4 + $0x1c18] sm:$0xff]  ;;  %633 = vst [vmem:[%s6058_s5 + $0x708] sm:$0xff] %v632_v33  ;;  %v638_v36 = vld [vmem:[%s6053_s4 + $0x1c80] sm:$0xff] }
  0x88   : > { %635 = vst [vmem:[%s6058_s5 + $0x710] sm:$0xff] %v634_v34  ;;  %637 = vst [vmem:[%s6058_s5 + $0x718] sm:$0xff] %v636_v35  ;;  %v640_v37 = vld [vmem:[%s6053_s4 + $0x1c88] sm:$0xff]  ;;  %v642_v38 = vld [vmem:[%s6053_s4 + $0x1c90] sm:$0xff] }
  0x89   : > { %639 = vst [vmem:[%s6058_s5 + $0x720] sm:$0xff] %v638_v36  ;;  %641 = vst [vmem:[%s6058_s5 + $0x728] sm:$0xff] %v640_v37  ;;  %v644_v39 = vld [vmem:[%s6053_s4 + $0x1c98] sm:$0xff]  ;;  %v646_v40 = vld [vmem:[%s6053_s4 + $0x1d00] sm:$0xff] }
  0x8a   : > { %643 = vst [vmem:[%s6058_s5 + $0x730] sm:$0xff] %v642_v38  ;;  %v648_v41 = vld [vmem:[%s6053_s4 + $0x1d08] sm:$0xff]  ;;  %645 = vst [vmem:[%s6058_s5 + $0x738] sm:$0xff] %v644_v39  ;;  %v650_v42 = vld [vmem:[%s6053_s4 + $0x1d10] sm:$0xff] }
  0x8b   : > { %647 = vst [vmem:[%s6058_s5 + $0x740] sm:$0xff] %v646_v40  ;;  %649 = vst [vmem:[%s6058_s5 + $0x748] sm:$0xff] %v648_v41  ;;  %v652_v43 = vld [vmem:[%s6053_s4 + $0x1d18] sm:$0xff]  ;;  %v654_v44 = vld [vmem:[%s6053_s4 + $0x1d80] sm:$0xff] }
  0x8c   : > { %651 = vst [vmem:[%s6058_s5 + $0x750] sm:$0xff] %v650_v42  ;;  %653 = vst [vmem:[%s6058_s5 + $0x758] sm:$0xff] %v652_v43  ;;  %v656_v45 = vld [vmem:[%s6053_s4 + $0x1d88] sm:$0xff]  ;;  %v658_v46 = vld [vmem:[%s6053_s4 + $0x1d90] sm:$0xff] }
  0x8d   : > { %655 = vst [vmem:[%s6058_s5 + $0x760] sm:$0xff] %v654_v44  ;;  %v660_v47 = vld [vmem:[%s6053_s4 + $0x1d98] sm:$0xff]  ;;  %657 = vst [vmem:[%s6058_s5 + $0x768] sm:$0xff] %v656_v45  ;;  %v662_v48 = vld [vmem:[%s6053_s4 + $0x1e00] sm:$0xff] }
  0x8e   : > { %659 = vst [vmem:[%s6058_s5 + $0x770] sm:$0xff] %v658_v46  ;;  %661 = vst [vmem:[%s6058_s5 + $0x778] sm:$0xff] %v660_v47  ;;  %v664_v49 = vld [vmem:[%s6053_s4 + $0x1e08] sm:$0xff]  ;;  %v666_v50 = vld [vmem:[%s6053_s4 + $0x1e10] sm:$0xff] }
  0x8f   : > { %663 = vst [vmem:[%s6058_s5 + $0x780] sm:$0xff] %v662_v48  ;;  %665 = vst [vmem:[%s6058_s5 + $0x788] sm:$0xff] %v664_v49  ;;  %v668_v51 = vld [vmem:[%s6053_s4 + $0x1e18] sm:$0xff]  ;;  %v670_v52 = vld [vmem:[%s6053_s4 + $0x1e80] sm:$0xff] }
  0x90   : > { %667 = vst [vmem:[%s6058_s5 + $0x790] sm:$0xff] %v666_v50  ;;  %v672_v53 = vld [vmem:[%s6053_s4 + $0x1e88] sm:$0xff]  ;;  %669 = vst [vmem:[%s6058_s5 + $0x798] sm:$0xff] %v668_v51  ;;  %v674_v54 = vld [vmem:[%s6053_s4 + $0x1e90] sm:$0xff] }
  0x91   : > { %671 = vst [vmem:[%s6058_s5 + $0x7a0] sm:$0xff] %v670_v52  ;;  %673 = vst [vmem:[%s6058_s5 + $0x7a8] sm:$0xff] %v672_v53  ;;  %v676_v55 = vld [vmem:[%s6053_s4 + $0x1e98] sm:$0xff]  ;;  %v678_v56 = vld [vmem:[%s6053_s4 + $0x1f00] sm:$0xff] }
  0x92   : > { %675 = vst [vmem:[%s6058_s5 + $0x7b0] sm:$0xff] %v674_v54  ;;  %677 = vst [vmem:[%s6058_s5 + $0x7b8] sm:$0xff] %v676_v55  ;;  %v680_v57 = vld [vmem:[%s6053_s4 + $0x1f08] sm:$0xff]  ;;  %v682_v58 = vld [vmem:[%s6053_s4 + $0x1f10] sm:$0xff] }
  0x93   : > { %679 = vst [vmem:[%s6058_s5 + $0x7c0] sm:$0xff] %v678_v56  ;;  %v684_v59 = vld [vmem:[%s6053_s4 + $0x1f18] sm:$0xff]  ;;  %681 = vst [vmem:[%s6058_s5 + $0x7c8] sm:$0xff] %v680_v57  ;;  %v686_v60 = vld [vmem:[%s6053_s4 + $0x1f80] sm:$0xff] }
  0x94   : > { %683 = vst [vmem:[%s6058_s5 + $0x7d0] sm:$0xff] %v682_v58  ;;  %685 = vst [vmem:[%s6058_s5 + $0x7d8] sm:$0xff] %v684_v59  ;;  %v688_v61 = vld [vmem:[%s6053_s4 + $0x1f88] sm:$0xff]  ;;  %v690_v62 = vld [vmem:[%s6053_s4 + $0x1f90] sm:$0xff] }
  0x95   : > { %687 = vst [vmem:[%s6058_s5 + $0x7e0] sm:$0xff] %v686_v60  ;;  %689 = vst [vmem:[%s6058_s5 + $0x7e8] sm:$0xff] %v688_v61  ;;  %v692_v63 = vld [vmem:[%s6053_s4 + $0x1f98] sm:$0xff]  ;;  %v694_v0 = vld [vmem:[%s6053_s4 + $0x2000] sm:$0xff] }
  0x96   : > { %691 = vst [vmem:[%s6058_s5 + $0x7f0] sm:$0xff] %v690_v62  ;;  %v696_v1 = vld [vmem:[%s6053_s4 + $0x2008] sm:$0xff]  ;;  %693 = vst [vmem:[%s6058_s5 + $0x7f8] sm:$0xff] %v692_v63  ;;  %v698_v2 = vld [vmem:[%s6053_s4 + $0x2010] sm:$0xff] }
  0x97   : > { %695 = vst [vmem:[%s6058_s5 + $0x800] sm:$0xff] %v694_v0  ;;  %697 = vst [vmem:[%s6058_s5 + $0x808] sm:$0xff] %v696_v1  ;;  %v700_v3 = vld [vmem:[%s6053_s4 + $0x2018] sm:$0xff]  ;;  %v702_v4 = vld [vmem:[%s6053_s4 + $0x2080] sm:$0xff] }
  0x98   : > { %699 = vst [vmem:[%s6058_s5 + $0x810] sm:$0xff] %v698_v2  ;;  %701 = vst [vmem:[%s6058_s5 + $0x818] sm:$0xff] %v700_v3  ;;  %v704_v5 = vld [vmem:[%s6053_s4 + $0x2088] sm:$0xff]  ;;  %v706_v6 = vld [vmem:[%s6053_s4 + $0x2090] sm:$0xff] }
  0x99   : > { %703 = vst [vmem:[%s6058_s5 + $0x820] sm:$0xff] %v702_v4  ;;  %v708_v7 = vld [vmem:[%s6053_s4 + $0x2098] sm:$0xff]  ;;  %705 = vst [vmem:[%s6058_s5 + $0x828] sm:$0xff] %v704_v5  ;;  %v710_v8 = vld [vmem:[%s6053_s4 + $0x2100] sm:$0xff] }
  0x9a   : > { %707 = vst [vmem:[%s6058_s5 + $0x830] sm:$0xff] %v706_v6  ;;  %709 = vst [vmem:[%s6058_s5 + $0x838] sm:$0xff] %v708_v7  ;;  %v712_v9 = vld [vmem:[%s6053_s4 + $0x2108] sm:$0xff]  ;;  %v714_v10 = vld [vmem:[%s6053_s4 + $0x2110] sm:$0xff] }
  0x9b   : > { %711 = vst [vmem:[%s6058_s5 + $0x840] sm:$0xff] %v710_v8  ;;  %713 = vst [vmem:[%s6058_s5 + $0x848] sm:$0xff] %v712_v9  ;;  %v716_v11 = vld [vmem:[%s6053_s4 + $0x2118] sm:$0xff]  ;;  %v718_v12 = vld [vmem:[%s6053_s4 + $0x2180] sm:$0xff] }
  0x9c   : > { %715 = vst [vmem:[%s6058_s5 + $0x850] sm:$0xff] %v714_v10  ;;  %v720_v13 = vld [vmem:[%s6053_s4 + $0x2188] sm:$0xff]  ;;  %717 = vst [vmem:[%s6058_s5 + $0x858] sm:$0xff] %v716_v11  ;;  %v722_v14 = vld [vmem:[%s6053_s4 + $0x2190] sm:$0xff] }
  0x9d   : > { %719 = vst [vmem:[%s6058_s5 + $0x860] sm:$0xff] %v718_v12  ;;  %721 = vst [vmem:[%s6058_s5 + $0x868] sm:$0xff] %v720_v13  ;;  %v724_v15 = vld [vmem:[%s6053_s4 + $0x2198] sm:$0xff]  ;;  %v726_v16 = vld [vmem:[%s6053_s4 + $0x2200] sm:$0xff] }
  0x9e   : > { %723 = vst [vmem:[%s6058_s5 + $0x870] sm:$0xff] %v722_v14  ;;  %725 = vst [vmem:[%s6058_s5 + $0x878] sm:$0xff] %v724_v15  ;;  %v728_v17 = vld [vmem:[%s6053_s4 + $0x2208] sm:$0xff]  ;;  %v730_v18 = vld [vmem:[%s6053_s4 + $0x2210] sm:$0xff] }
  0x9f   : > { %727 = vst [vmem:[%s6058_s5 + $0x880] sm:$0xff] %v726_v16  ;;  %v732_v19 = vld [vmem:[%s6053_s4 + $0x2218] sm:$0xff]  ;;  %729 = vst [vmem:[%s6058_s5 + $0x888] sm:$0xff] %v728_v17  ;;  %v734_v20 = vld [vmem:[%s6053_s4 + $0x2280] sm:$0xff] }
  0xa0   : > { %731 = vst [vmem:[%s6058_s5 + $0x890] sm:$0xff] %v730_v18  ;;  %733 = vst [vmem:[%s6058_s5 + $0x898] sm:$0xff] %v732_v19  ;;  %v736_v21 = vld [vmem:[%s6053_s4 + $0x2288] sm:$0xff]  ;;  %v738_v22 = vld [vmem:[%s6053_s4 + $0x2290] sm:$0xff] }
  0xa1   : > { %735 = vst [vmem:[%s6058_s5 + $0x8a0] sm:$0xff] %v734_v20  ;;  %737 = vst [vmem:[%s6058_s5 + $0x8a8] sm:$0xff] %v736_v21  ;;  %v740_v23 = vld [vmem:[%s6053_s4 + $0x2298] sm:$0xff]  ;;  %v742_v24 = vld [vmem:[%s6053_s4 + $0x2300] sm:$0xff] }
  0xa2   : > { %739 = vst [vmem:[%s6058_s5 + $0x8b0] sm:$0xff] %v738_v22  ;;  %v744_v25 = vld [vmem:[%s6053_s4 + $0x2308] sm:$0xff]  ;;  %741 = vst [vmem:[%s6058_s5 + $0x8b8] sm:$0xff] %v740_v23  ;;  %v746_v26 = vld [vmem:[%s6053_s4 + $0x2310] sm:$0xff] }
  0xa3   : > { %743 = vst [vmem:[%s6058_s5 + $0x8c0] sm:$0xff] %v742_v24  ;;  %745 = vst [vmem:[%s6058_s5 + $0x8c8] sm:$0xff] %v744_v25  ;;  %v748_v27 = vld [vmem:[%s6053_s4 + $0x2318] sm:$0xff]  ;;  %v750_v28 = vld [vmem:[%s6053_s4 + $0x2380] sm:$0xff] }
  0xa4   : > { %747 = vst [vmem:[%s6058_s5 + $0x8d0] sm:$0xff] %v746_v26  ;;  %749 = vst [vmem:[%s6058_s5 + $0x8d8] sm:$0xff] %v748_v27  ;;  %v752_v29 = vld [vmem:[%s6053_s4 + $0x2388] sm:$0xff]  ;;  %v754_v30 = vld [vmem:[%s6053_s4 + $0x2390] sm:$0xff] }
  0xa5   : > { %751 = vst [vmem:[%s6058_s5 + $0x8e0] sm:$0xff] %v750_v28  ;;  %v756_v31 = vld [vmem:[%s6053_s4 + $0x2398] sm:$0xff]  ;;  %753 = vst [vmem:[%s6058_s5 + $0x8e8] sm:$0xff] %v752_v29  ;;  %v758_v32 = vld [vmem:[%s6053_s4 + $0x2400] sm:$0xff] }
  0xa6   : > { %755 = vst [vmem:[%s6058_s5 + $0x8f0] sm:$0xff] %v754_v30  ;;  %757 = vst [vmem:[%s6058_s5 + $0x8f8] sm:$0xff] %v756_v31  ;;  %v760_v33 = vld [vmem:[%s6053_s4 + $0x2408] sm:$0xff]  ;;  %v762_v34 = vld [vmem:[%s6053_s4 + $0x2410] sm:$0xff] }
  0xa7   : > { %759 = vst [vmem:[%s6058_s5 + $0x900] sm:$0xff] %v758_v32  ;;  %761 = vst [vmem:[%s6058_s5 + $0x908] sm:$0xff] %v760_v33  ;;  %v764_v35 = vld [vmem:[%s6053_s4 + $0x2418] sm:$0xff]  ;;  %v766_v36 = vld [vmem:[%s6053_s4 + $0x2480] sm:$0xff] }
  0xa8   : > { %763 = vst [vmem:[%s6058_s5 + $0x910] sm:$0xff] %v762_v34  ;;  %v768_v37 = vld [vmem:[%s6053_s4 + $0x2488] sm:$0xff]  ;;  %765 = vst [vmem:[%s6058_s5 + $0x918] sm:$0xff] %v764_v35  ;;  %v770_v38 = vld [vmem:[%s6053_s4 + $0x2490] sm:$0xff] }
  0xa9   : > { %767 = vst [vmem:[%s6058_s5 + $0x920] sm:$0xff] %v766_v36  ;;  %769 = vst [vmem:[%s6058_s5 + $0x928] sm:$0xff] %v768_v37  ;;  %v772_v39 = vld [vmem:[%s6053_s4 + $0x2498] sm:$0xff]  ;;  %v774_v40 = vld [vmem:[%s6053_s4 + $0x2500] sm:$0xff] }
  0xaa   : > { %771 = vst [vmem:[%s6058_s5 + $0x930] sm:$0xff] %v770_v38  ;;  %773 = vst [vmem:[%s6058_s5 + $0x938] sm:$0xff] %v772_v39  ;;  %v776_v41 = vld [vmem:[%s6053_s4 + $0x2508] sm:$0xff]  ;;  %v778_v42 = vld [vmem:[%s6053_s4 + $0x2510] sm:$0xff] }
  0xab   : > { %775 = vst [vmem:[%s6058_s5 + $0x940] sm:$0xff] %v774_v40  ;;  %v780_v43 = vld [vmem:[%s6053_s4 + $0x2518] sm:$0xff]  ;;  %777 = vst [vmem:[%s6058_s5 + $0x948] sm:$0xff] %v776_v41  ;;  %v782_v44 = vld [vmem:[%s6053_s4 + $0x2580] sm:$0xff] }
  0xac   : > { %779 = vst [vmem:[%s6058_s5 + $0x950] sm:$0xff] %v778_v42  ;;  %781 = vst [vmem:[%s6058_s5 + $0x958] sm:$0xff] %v780_v43  ;;  %v784_v45 = vld [vmem:[%s6053_s4 + $0x2588] sm:$0xff]  ;;  %v786_v46 = vld [vmem:[%s6053_s4 + $0x2590] sm:$0xff] }
  0xad   : > { %783 = vst [vmem:[%s6058_s5 + $0x960] sm:$0xff] %v782_v44  ;;  %785 = vst [vmem:[%s6058_s5 + $0x968] sm:$0xff] %v784_v45  ;;  %v788_v47 = vld [vmem:[%s6053_s4 + $0x2598] sm:$0xff]  ;;  %v790_v48 = vld [vmem:[%s6053_s4 + $0x2600] sm:$0xff] }
  0xae   : > { %787 = vst [vmem:[%s6058_s5 + $0x970] sm:$0xff] %v786_v46  ;;  %v792_v49 = vld [vmem:[%s6053_s4 + $0x2608] sm:$0xff]  ;;  %789 = vst [vmem:[%s6058_s5 + $0x978] sm:$0xff] %v788_v47  ;;  %v794_v50 = vld [vmem:[%s6053_s4 + $0x2610] sm:$0xff] }
  0xaf   : > { %791 = vst [vmem:[%s6058_s5 + $0x980] sm:$0xff] %v790_v48  ;;  %793 = vst [vmem:[%s6058_s5 + $0x988] sm:$0xff] %v792_v49  ;;  %v796_v51 = vld [vmem:[%s6053_s4 + $0x2618] sm:$0xff]  ;;  %v798_v52 = vld [vmem:[%s6053_s4 + $0x2680] sm:$0xff] }
  0xb0   : > { %795 = vst [vmem:[%s6058_s5 + $0x990] sm:$0xff] %v794_v50  ;;  %797 = vst [vmem:[%s6058_s5 + $0x998] sm:$0xff] %v796_v51  ;;  %v800_v53 = vld [vmem:[%s6053_s4 + $0x2688] sm:$0xff]  ;;  %v802_v54 = vld [vmem:[%s6053_s4 + $0x2690] sm:$0xff] }
  0xb1   : > { %799 = vst [vmem:[%s6058_s5 + $0x9a0] sm:$0xff] %v798_v52  ;;  %v804_v55 = vld [vmem:[%s6053_s4 + $0x2698] sm:$0xff]  ;;  %801 = vst [vmem:[%s6058_s5 + $0x9a8] sm:$0xff] %v800_v53  ;;  %v806_v56 = vld [vmem:[%s6053_s4 + $0x2700] sm:$0xff] }
  0xb2   : > { %803 = vst [vmem:[%s6058_s5 + $0x9b0] sm:$0xff] %v802_v54  ;;  %805 = vst [vmem:[%s6058_s5 + $0x9b8] sm:$0xff] %v804_v55  ;;  %v808_v57 = vld [vmem:[%s6053_s4 + $0x2708] sm:$0xff]  ;;  %v810_v58 = vld [vmem:[%s6053_s4 + $0x2710] sm:$0xff] }
  0xb3   : > { %807 = vst [vmem:[%s6058_s5 + $0x9c0] sm:$0xff] %v806_v56  ;;  %809 = vst [vmem:[%s6058_s5 + $0x9c8] sm:$0xff] %v808_v57  ;;  %v812_v59 = vld [vmem:[%s6053_s4 + $0x2718] sm:$0xff]  ;;  %v814_v60 = vld [vmem:[%s6053_s4 + $0x2780] sm:$0xff] }
  0xb4   : > { %811 = vst [vmem:[%s6058_s5 + $0x9d0] sm:$0xff] %v810_v58  ;;  %v816_v61 = vld [vmem:[%s6053_s4 + $0x2788] sm:$0xff]  ;;  %813 = vst [vmem:[%s6058_s5 + $0x9d8] sm:$0xff] %v812_v59  ;;  %v818_v62 = vld [vmem:[%s6053_s4 + $0x2790] sm:$0xff] }
  0xb5   : > { %815 = vst [vmem:[%s6058_s5 + $0x9e0] sm:$0xff] %v814_v60  ;;  %817 = vst [vmem:[%s6058_s5 + $0x9e8] sm:$0xff] %v816_v61  ;;  %v820_v63 = vld [vmem:[%s6053_s4 + $0x2798] sm:$0xff]  ;;  %v822_v0 = vld [vmem:[%s6053_s4 + $0x2800] sm:$0xff] }
  0xb6   : > { %819 = vst [vmem:[%s6058_s5 + $0x9f0] sm:$0xff] %v818_v62  ;;  %821 = vst [vmem:[%s6058_s5 + $0x9f8] sm:$0xff] %v820_v63  ;;  %v824_v1 = vld [vmem:[%s6053_s4 + $0x2808] sm:$0xff]  ;;  %v826_v2 = vld [vmem:[%s6053_s4 + $0x2810] sm:$0xff] }
  0xb7   : > { %823 = vst [vmem:[%s6058_s5 + $0xa00] sm:$0xff] %v822_v0  ;;  %v828_v3 = vld [vmem:[%s6053_s4 + $0x2818] sm:$0xff]  ;;  %825 = vst [vmem:[%s6058_s5 + $0xa08] sm:$0xff] %v824_v1  ;;  %v830_v4 = vld [vmem:[%s6053_s4 + $0x2880] sm:$0xff] }
  0xb8   : > { %827 = vst [vmem:[%s6058_s5 + $0xa10] sm:$0xff] %v826_v2  ;;  %829 = vst [vmem:[%s6058_s5 + $0xa18] sm:$0xff] %v828_v3  ;;  %v832_v5 = vld [vmem:[%s6053_s4 + $0x2888] sm:$0xff]  ;;  %v834_v6 = vld [vmem:[%s6053_s4 + $0x2890] sm:$0xff] }
  0xb9   : > { %831 = vst [vmem:[%s6058_s5 + $0xa20] sm:$0xff] %v830_v4  ;;  %833 = vst [vmem:[%s6058_s5 + $0xa28] sm:$0xff] %v832_v5  ;;  %v836_v7 = vld [vmem:[%s6053_s4 + $0x2898] sm:$0xff]  ;;  %v838_v8 = vld [vmem:[%s6053_s4 + $0x2900] sm:$0xff] }
  0xba   : > { %835 = vst [vmem:[%s6058_s5 + $0xa30] sm:$0xff] %v834_v6  ;;  %v840_v9 = vld [vmem:[%s6053_s4 + $0x2908] sm:$0xff]  ;;  %837 = vst [vmem:[%s6058_s5 + $0xa38] sm:$0xff] %v836_v7  ;;  %v842_v10 = vld [vmem:[%s6053_s4 + $0x2910] sm:$0xff] }
  0xbb   : > { %839 = vst [vmem:[%s6058_s5 + $0xa40] sm:$0xff] %v838_v8  ;;  %841 = vst [vmem:[%s6058_s5 + $0xa48] sm:$0xff] %v840_v9  ;;  %v844_v11 = vld [vmem:[%s6053_s4 + $0x2918] sm:$0xff]  ;;  %v846_v12 = vld [vmem:[%s6053_s4 + $0x2980] sm:$0xff] }
  0xbc   : > { %843 = vst [vmem:[%s6058_s5 + $0xa50] sm:$0xff] %v842_v10  ;;  %845 = vst [vmem:[%s6058_s5 + $0xa58] sm:$0xff] %v844_v11  ;;  %v848_v13 = vld [vmem:[%s6053_s4 + $0x2988] sm:$0xff]  ;;  %v850_v14 = vld [vmem:[%s6053_s4 + $0x2990] sm:$0xff] }
  0xbd   : > { %847 = vst [vmem:[%s6058_s5 + $0xa60] sm:$0xff] %v846_v12  ;;  %v852_v15 = vld [vmem:[%s6053_s4 + $0x2998] sm:$0xff]  ;;  %849 = vst [vmem:[%s6058_s5 + $0xa68] sm:$0xff] %v848_v13  ;;  %v854_v16 = vld [vmem:[%s6053_s4 + $0x2a00] sm:$0xff] }
  0xbe   : > { %851 = vst [vmem:[%s6058_s5 + $0xa70] sm:$0xff] %v850_v14  ;;  %853 = vst [vmem:[%s6058_s5 + $0xa78] sm:$0xff] %v852_v15  ;;  %v856_v17 = vld [vmem:[%s6053_s4 + $0x2a08] sm:$0xff]  ;;  %v858_v18 = vld [vmem:[%s6053_s4 + $0x2a10] sm:$0xff] }
  0xbf   : > { %855 = vst [vmem:[%s6058_s5 + $0xa80] sm:$0xff] %v854_v16  ;;  %857 = vst [vmem:[%s6058_s5 + $0xa88] sm:$0xff] %v856_v17  ;;  %v860_v19 = vld [vmem:[%s6053_s4 + $0x2a18] sm:$0xff]  ;;  %v862_v20 = vld [vmem:[%s6053_s4 + $0x2a80] sm:$0xff] }
  0xc0   : > { %859 = vst [vmem:[%s6058_s5 + $0xa90] sm:$0xff] %v858_v18  ;;  %v864_v21 = vld [vmem:[%s6053_s4 + $0x2a88] sm:$0xff]  ;;  %861 = vst [vmem:[%s6058_s5 + $0xa98] sm:$0xff] %v860_v19  ;;  %v866_v22 = vld [vmem:[%s6053_s4 + $0x2a90] sm:$0xff] }
  0xc1   : > { %863 = vst [vmem:[%s6058_s5 + $0xaa0] sm:$0xff] %v862_v20  ;;  %865 = vst [vmem:[%s6058_s5 + $0xaa8] sm:$0xff] %v864_v21  ;;  %v868_v23 = vld [vmem:[%s6053_s4 + $0x2a98] sm:$0xff]  ;;  %v870_v24 = vld [vmem:[%s6053_s4 + $0x2b00] sm:$0xff] }
  0xc2   : > { %867 = vst [vmem:[%s6058_s5 + $0xab0] sm:$0xff] %v866_v22  ;;  %869 = vst [vmem:[%s6058_s5 + $0xab8] sm:$0xff] %v868_v23  ;;  %v872_v25 = vld [vmem:[%s6053_s4 + $0x2b08] sm:$0xff]  ;;  %v874_v26 = vld [vmem:[%s6053_s4 + $0x2b10] sm:$0xff] }
  0xc3   : > { %871 = vst [vmem:[%s6058_s5 + $0xac0] sm:$0xff] %v870_v24  ;;  %v876_v27 = vld [vmem:[%s6053_s4 + $0x2b18] sm:$0xff]  ;;  %873 = vst [vmem:[%s6058_s5 + $0xac8] sm:$0xff] %v872_v25  ;;  %v878_v28 = vld [vmem:[%s6053_s4 + $0x2b80] sm:$0xff] }
  0xc4   : > { %875 = vst [vmem:[%s6058_s5 + $0xad0] sm:$0xff] %v874_v26  ;;  %877 = vst [vmem:[%s6058_s5 + $0xad8] sm:$0xff] %v876_v27  ;;  %v880_v29 = vld [vmem:[%s6053_s4 + $0x2b88] sm:$0xff]  ;;  %v882_v30 = vld [vmem:[%s6053_s4 + $0x2b90] sm:$0xff] }
  0xc5   : > { %879 = vst [vmem:[%s6058_s5 + $0xae0] sm:$0xff] %v878_v28  ;;  %881 = vst [vmem:[%s6058_s5 + $0xae8] sm:$0xff] %v880_v29  ;;  %v884_v31 = vld [vmem:[%s6053_s4 + $0x2b98] sm:$0xff]  ;;  %v886_v32 = vld [vmem:[%s6053_s4 + $0x2c00] sm:$0xff] }
  0xc6   : > { %883 = vst [vmem:[%s6058_s5 + $0xaf0] sm:$0xff] %v882_v30  ;;  %v888_v33 = vld [vmem:[%s6053_s4 + $0x2c08] sm:$0xff]  ;;  %885 = vst [vmem:[%s6058_s5 + $0xaf8] sm:$0xff] %v884_v31  ;;  %v890_v34 = vld [vmem:[%s6053_s4 + $0x2c10] sm:$0xff] }
  0xc7   : > { %887 = vst [vmem:[%s6058_s5 + $0xb00] sm:$0xff] %v886_v32  ;;  %889 = vst [vmem:[%s6058_s5 + $0xb08] sm:$0xff] %v888_v33  ;;  %v892_v35 = vld [vmem:[%s6053_s4 + $0x2c18] sm:$0xff]  ;;  %v894_v36 = vld [vmem:[%s6053_s4 + $0x2c80] sm:$0xff] }
  0xc8   : > { %891 = vst [vmem:[%s6058_s5 + $0xb10] sm:$0xff] %v890_v34  ;;  %893 = vst [vmem:[%s6058_s5 + $0xb18] sm:$0xff] %v892_v35  ;;  %v896_v37 = vld [vmem:[%s6053_s4 + $0x2c88] sm:$0xff]  ;;  %v898_v38 = vld [vmem:[%s6053_s4 + $0x2c90] sm:$0xff] }
  0xc9   : > { %895 = vst [vmem:[%s6058_s5 + $0xb20] sm:$0xff] %v894_v36  ;;  %v900_v39 = vld [vmem:[%s6053_s4 + $0x2c98] sm:$0xff]  ;;  %897 = vst [vmem:[%s6058_s5 + $0xb28] sm:$0xff] %v896_v37  ;;  %v902_v40 = vld [vmem:[%s6053_s4 + $0x2d00] sm:$0xff] }
  0xca   : > { %899 = vst [vmem:[%s6058_s5 + $0xb30] sm:$0xff] %v898_v38  ;;  %901 = vst [vmem:[%s6058_s5 + $0xb38] sm:$0xff] %v900_v39  ;;  %v904_v41 = vld [vmem:[%s6053_s4 + $0x2d08] sm:$0xff]  ;;  %v906_v42 = vld [vmem:[%s6053_s4 + $0x2d10] sm:$0xff] }
  0xcb   : > { %903 = vst [vmem:[%s6058_s5 + $0xb40] sm:$0xff] %v902_v40  ;;  %905 = vst [vmem:[%s6058_s5 + $0xb48] sm:$0xff] %v904_v41  ;;  %v908_v43 = vld [vmem:[%s6053_s4 + $0x2d18] sm:$0xff]  ;;  %v910_v44 = vld [vmem:[%s6053_s4 + $0x2d80] sm:$0xff] }
  0xcc   : > { %907 = vst [vmem:[%s6058_s5 + $0xb50] sm:$0xff] %v906_v42  ;;  %v912_v45 = vld [vmem:[%s6053_s4 + $0x2d88] sm:$0xff]  ;;  %909 = vst [vmem:[%s6058_s5 + $0xb58] sm:$0xff] %v908_v43  ;;  %v914_v46 = vld [vmem:[%s6053_s4 + $0x2d90] sm:$0xff] }
  0xcd   : > { %911 = vst [vmem:[%s6058_s5 + $0xb60] sm:$0xff] %v910_v44  ;;  %913 = vst [vmem:[%s6058_s5 + $0xb68] sm:$0xff] %v912_v45  ;;  %v916_v47 = vld [vmem:[%s6053_s4 + $0x2d98] sm:$0xff]  ;;  %v918_v48 = vld [vmem:[%s6053_s4 + $0x2e00] sm:$0xff] }
  0xce   : > { %915 = vst [vmem:[%s6058_s5 + $0xb70] sm:$0xff] %v914_v46  ;;  %917 = vst [vmem:[%s6058_s5 + $0xb78] sm:$0xff] %v916_v47  ;;  %v920_v49 = vld [vmem:[%s6053_s4 + $0x2e08] sm:$0xff]  ;;  %v922_v50 = vld [vmem:[%s6053_s4 + $0x2e10] sm:$0xff] }
  0xcf   : > { %919 = vst [vmem:[%s6058_s5 + $0xb80] sm:$0xff] %v918_v48  ;;  %v924_v51 = vld [vmem:[%s6053_s4 + $0x2e18] sm:$0xff]  ;;  %921 = vst [vmem:[%s6058_s5 + $0xb88] sm:$0xff] %v920_v49  ;;  %v926_v52 = vld [vmem:[%s6053_s4 + $0x2e80] sm:$0xff] }
  0xd0   : > { %923 = vst [vmem:[%s6058_s5 + $0xb90] sm:$0xff] %v922_v50  ;;  %925 = vst [vmem:[%s6058_s5 + $0xb98] sm:$0xff] %v924_v51  ;;  %v928_v53 = vld [vmem:[%s6053_s4 + $0x2e88] sm:$0xff]  ;;  %v930_v54 = vld [vmem:[%s6053_s4 + $0x2e90] sm:$0xff] }
  0xd1   : > { %927 = vst [vmem:[%s6058_s5 + $0xba0] sm:$0xff] %v926_v52  ;;  %929 = vst [vmem:[%s6058_s5 + $0xba8] sm:$0xff] %v928_v53  ;;  %v932_v55 = vld [vmem:[%s6053_s4 + $0x2e98] sm:$0xff]  ;;  %v934_v56 = vld [vmem:[%s6053_s4 + $0x2f00] sm:$0xff] }
  0xd2   : > { %931 = vst [vmem:[%s6058_s5 + $0xbb0] sm:$0xff] %v930_v54  ;;  %v936_v57 = vld [vmem:[%s6053_s4 + $0x2f08] sm:$0xff]  ;;  %933 = vst [vmem:[%s6058_s5 + $0xbb8] sm:$0xff] %v932_v55  ;;  %v938_v58 = vld [vmem:[%s6053_s4 + $0x2f10] sm:$0xff] }
  0xd3   : > { %935 = vst [vmem:[%s6058_s5 + $0xbc0] sm:$0xff] %v934_v56  ;;  %937 = vst [vmem:[%s6058_s5 + $0xbc8] sm:$0xff] %v936_v57  ;;  %v940_v59 = vld [vmem:[%s6053_s4 + $0x2f18] sm:$0xff]  ;;  %v942_v60 = vld [vmem:[%s6053_s4 + $0x2f80] sm:$0xff] }
  0xd4   : > { %939 = vst [vmem:[%s6058_s5 + $0xbd0] sm:$0xff] %v938_v58  ;;  %941 = vst [vmem:[%s6058_s5 + $0xbd8] sm:$0xff] %v940_v59  ;;  %v944_v61 = vld [vmem:[%s6053_s4 + $0x2f88] sm:$0xff]  ;;  %v946_v62 = vld [vmem:[%s6053_s4 + $0x2f90] sm:$0xff] }
  0xd5   : > { %943 = vst [vmem:[%s6058_s5 + $0xbe0] sm:$0xff] %v942_v60  ;;  %v948_v63 = vld [vmem:[%s6053_s4 + $0x2f98] sm:$0xff]  ;;  %945 = vst [vmem:[%s6058_s5 + $0xbe8] sm:$0xff] %v944_v61  ;;  %v950_v0 = vld [vmem:[%s6053_s4 + $0x3000] sm:$0xff] }
  0xd6   : > { %947 = vst [vmem:[%s6058_s5 + $0xbf0] sm:$0xff] %v946_v62  ;;  %949 = vst [vmem:[%s6058_s5 + $0xbf8] sm:$0xff] %v948_v63  ;;  %v952_v1 = vld [vmem:[%s6053_s4 + $0x3008] sm:$0xff]  ;;  %v954_v2 = vld [vmem:[%s6053_s4 + $0x3010] sm:$0xff] }
  0xd7   : > { %951 = vst [vmem:[%s6058_s5 + $0xc00] sm:$0xff] %v950_v0  ;;  %953 = vst [vmem:[%s6058_s5 + $0xc08] sm:$0xff] %v952_v1  ;;  %v956_v3 = vld [vmem:[%s6053_s4 + $0x3018] sm:$0xff]  ;;  %v958_v4 = vld [vmem:[%s6053_s4 + $0x3080] sm:$0xff] }
  0xd8   : > { %955 = vst [vmem:[%s6058_s5 + $0xc10] sm:$0xff] %v954_v2  ;;  %v960_v5 = vld [vmem:[%s6053_s4 + $0x3088] sm:$0xff]  ;;  %957 = vst [vmem:[%s6058_s5 + $0xc18] sm:$0xff] %v956_v3  ;;  %v962_v6 = vld [vmem:[%s6053_s4 + $0x3090] sm:$0xff] }
  0xd9   : > { %959 = vst [vmem:[%s6058_s5 + $0xc20] sm:$0xff] %v958_v4  ;;  %961 = vst [vmem:[%s6058_s5 + $0xc28] sm:$0xff] %v960_v5  ;;  %v964_v7 = vld [vmem:[%s6053_s4 + $0x3098] sm:$0xff]  ;;  %v966_v8 = vld [vmem:[%s6053_s4 + $0x3100] sm:$0xff] }
  0xda   : > { %963 = vst [vmem:[%s6058_s5 + $0xc30] sm:$0xff] %v962_v6  ;;  %965 = vst [vmem:[%s6058_s5 + $0xc38] sm:$0xff] %v964_v7  ;;  %v968_v9 = vld [vmem:[%s6053_s4 + $0x3108] sm:$0xff]  ;;  %v970_v10 = vld [vmem:[%s6053_s4 + $0x3110] sm:$0xff] }
  0xdb   : > { %967 = vst [vmem:[%s6058_s5 + $0xc40] sm:$0xff] %v966_v8  ;;  %v972_v11 = vld [vmem:[%s6053_s4 + $0x3118] sm:$0xff]  ;;  %969 = vst [vmem:[%s6058_s5 + $0xc48] sm:$0xff] %v968_v9  ;;  %v974_v12 = vld [vmem:[%s6053_s4 + $0x3180] sm:$0xff] }
  0xdc   : > { %971 = vst [vmem:[%s6058_s5 + $0xc50] sm:$0xff] %v970_v10  ;;  %973 = vst [vmem:[%s6058_s5 + $0xc58] sm:$0xff] %v972_v11  ;;  %v976_v13 = vld [vmem:[%s6053_s4 + $0x3188] sm:$0xff]  ;;  %v978_v14 = vld [vmem:[%s6053_s4 + $0x3190] sm:$0xff] }
  0xdd   : > { %975 = vst [vmem:[%s6058_s5 + $0xc60] sm:$0xff] %v974_v12  ;;  %977 = vst [vmem:[%s6058_s5 + $0xc68] sm:$0xff] %v976_v13  ;;  %v980_v15 = vld [vmem:[%s6053_s4 + $0x3198] sm:$0xff]  ;;  %v982_v16 = vld [vmem:[%s6053_s4 + $0x3200] sm:$0xff] }
  0xde   : > { %979 = vst [vmem:[%s6058_s5 + $0xc70] sm:$0xff] %v978_v14  ;;  %v984_v17 = vld [vmem:[%s6053_s4 + $0x3208] sm:$0xff]  ;;  %981 = vst [vmem:[%s6058_s5 + $0xc78] sm:$0xff] %v980_v15  ;;  %v986_v18 = vld [vmem:[%s6053_s4 + $0x3210] sm:$0xff] }
  0xdf   : > { %983 = vst [vmem:[%s6058_s5 + $0xc80] sm:$0xff] %v982_v16  ;;  %985 = vst [vmem:[%s6058_s5 + $0xc88] sm:$0xff] %v984_v17  ;;  %v988_v19 = vld [vmem:[%s6053_s4 + $0x3218] sm:$0xff]  ;;  %v990_v20 = vld [vmem:[%s6053_s4 + $0x3280] sm:$0xff] }
  0xe0   : > { %987 = vst [vmem:[%s6058_s5 + $0xc90] sm:$0xff] %v986_v18  ;;  %989 = vst [vmem:[%s6058_s5 + $0xc98] sm:$0xff] %v988_v19  ;;  %v992_v21 = vld [vmem:[%s6053_s4 + $0x3288] sm:$0xff]  ;;  %v994_v22 = vld [vmem:[%s6053_s4 + $0x3290] sm:$0xff] }
  0xe1   : > { %991 = vst [vmem:[%s6058_s5 + $0xca0] sm:$0xff] %v990_v20  ;;  %v996_v23 = vld [vmem:[%s6053_s4 + $0x3298] sm:$0xff]  ;;  %993 = vst [vmem:[%s6058_s5 + $0xca8] sm:$0xff] %v992_v21  ;;  %v998_v24 = vld [vmem:[%s6053_s4 + $0x3300] sm:$0xff] }
  0xe2   : > { %995 = vst [vmem:[%s6058_s5 + $0xcb0] sm:$0xff] %v994_v22  ;;  %997 = vst [vmem:[%s6058_s5 + $0xcb8] sm:$0xff] %v996_v23  ;;  %v1000_v25 = vld [vmem:[%s6053_s4 + $0x3308] sm:$0xff]  ;;  %v1002_v26 = vld [vmem:[%s6053_s4 + $0x3310] sm:$0xff] }
  0xe3   : > { %999 = vst [vmem:[%s6058_s5 + $0xcc0] sm:$0xff] %v998_v24  ;;  %1001 = vst [vmem:[%s6058_s5 + $0xcc8] sm:$0xff] %v1000_v25  ;;  %v1004_v27 = vld [vmem:[%s6053_s4 + $0x3318] sm:$0xff]  ;;  %v1006_v28 = vld [vmem:[%s6053_s4 + $0x3380] sm:$0xff] }
  0xe4   : > { %1003 = vst [vmem:[%s6058_s5 + $0xcd0] sm:$0xff] %v1002_v26  ;;  %v1008_v29 = vld [vmem:[%s6053_s4 + $0x3388] sm:$0xff]  ;;  %1005 = vst [vmem:[%s6058_s5 + $0xcd8] sm:$0xff] %v1004_v27  ;;  %v1010_v30 = vld [vmem:[%s6053_s4 + $0x3390] sm:$0xff] }
  0xe5   : > { %1007 = vst [vmem:[%s6058_s5 + $0xce0] sm:$0xff] %v1006_v28  ;;  %1009 = vst [vmem:[%s6058_s5 + $0xce8] sm:$0xff] %v1008_v29  ;;  %v1012_v31 = vld [vmem:[%s6053_s4 + $0x3398] sm:$0xff]  ;;  %v1014_v32 = vld [vmem:[%s6053_s4 + $0x3400] sm:$0xff] }
  0xe6   : > { %1011 = vst [vmem:[%s6058_s5 + $0xcf0] sm:$0xff] %v1010_v30  ;;  %1013 = vst [vmem:[%s6058_s5 + $0xcf8] sm:$0xff] %v1012_v31  ;;  %v1016_v33 = vld [vmem:[%s6053_s4 + $0x3408] sm:$0xff]  ;;  %v1018_v34 = vld [vmem:[%s6053_s4 + $0x3410] sm:$0xff] }
  0xe7   : > { %1015 = vst [vmem:[%s6058_s5 + $0xd00] sm:$0xff] %v1014_v32  ;;  %v1020_v35 = vld [vmem:[%s6053_s4 + $0x3418] sm:$0xff]  ;;  %1017 = vst [vmem:[%s6058_s5 + $0xd08] sm:$0xff] %v1016_v33  ;;  %v1022_v36 = vld [vmem:[%s6053_s4 + $0x3480] sm:$0xff] }
  0xe8   : > { %1019 = vst [vmem:[%s6058_s5 + $0xd10] sm:$0xff] %v1018_v34  ;;  %1021 = vst [vmem:[%s6058_s5 + $0xd18] sm:$0xff] %v1020_v35  ;;  %v1024_v37 = vld [vmem:[%s6053_s4 + $0x3488] sm:$0xff]  ;;  %v1026_v38 = vld [vmem:[%s6053_s4 + $0x3490] sm:$0xff] }
  0xe9   : > { %1023 = vst [vmem:[%s6058_s5 + $0xd20] sm:$0xff] %v1022_v36  ;;  %1025 = vst [vmem:[%s6058_s5 + $0xd28] sm:$0xff] %v1024_v37  ;;  %v1028_v39 = vld [vmem:[%s6053_s4 + $0x3498] sm:$0xff]  ;;  %v1030_v40 = vld [vmem:[%s6053_s4 + $0x3500] sm:$0xff] }
  0xea   : > { %1027 = vst [vmem:[%s6058_s5 + $0xd30] sm:$0xff] %v1026_v38  ;;  %v1032_v41 = vld [vmem:[%s6053_s4 + $0x3508] sm:$0xff]  ;;  %1029 = vst [vmem:[%s6058_s5 + $0xd38] sm:$0xff] %v1028_v39  ;;  %v1034_v42 = vld [vmem:[%s6053_s4 + $0x3510] sm:$0xff] }
  0xeb   : > { %1031 = vst [vmem:[%s6058_s5 + $0xd40] sm:$0xff] %v1030_v40  ;;  %1033 = vst [vmem:[%s6058_s5 + $0xd48] sm:$0xff] %v1032_v41  ;;  %v1036_v43 = vld [vmem:[%s6053_s4 + $0x3518] sm:$0xff]  ;;  %v1038_v44 = vld [vmem:[%s6053_s4 + $0x3580] sm:$0xff] }
  0xec   : > { %1035 = vst [vmem:[%s6058_s5 + $0xd50] sm:$0xff] %v1034_v42  ;;  %1037 = vst [vmem:[%s6058_s5 + $0xd58] sm:$0xff] %v1036_v43  ;;  %v1040_v45 = vld [vmem:[%s6053_s4 + $0x3588] sm:$0xff]  ;;  %v1042_v46 = vld [vmem:[%s6053_s4 + $0x3590] sm:$0xff] }
  0xed   : > { %1039 = vst [vmem:[%s6058_s5 + $0xd60] sm:$0xff] %v1038_v44  ;;  %v1044_v47 = vld [vmem:[%s6053_s4 + $0x3598] sm:$0xff]  ;;  %1041 = vst [vmem:[%s6058_s5 + $0xd68] sm:$0xff] %v1040_v45  ;;  %v1046_v48 = vld [vmem:[%s6053_s4 + $0x3600] sm:$0xff] }
  0xee   : > { %1043 = vst [vmem:[%s6058_s5 + $0xd70] sm:$0xff] %v1042_v46  ;;  %1045 = vst [vmem:[%s6058_s5 + $0xd78] sm:$0xff] %v1044_v47  ;;  %v1048_v49 = vld [vmem:[%s6053_s4 + $0x3608] sm:$0xff]  ;;  %v1050_v50 = vld [vmem:[%s6053_s4 + $0x3610] sm:$0xff] }
  0xef   : > { %1047 = vst [vmem:[%s6058_s5 + $0xd80] sm:$0xff] %v1046_v48  ;;  %1049 = vst [vmem:[%s6058_s5 + $0xd88] sm:$0xff] %v1048_v49  ;;  %v1052_v51 = vld [vmem:[%s6053_s4 + $0x3618] sm:$0xff]  ;;  %v1054_v52 = vld [vmem:[%s6053_s4 + $0x3680] sm:$0xff] }
  0xf0   : > { %1051 = vst [vmem:[%s6058_s5 + $0xd90] sm:$0xff] %v1050_v50  ;;  %v1056_v53 = vld [vmem:[%s6053_s4 + $0x3688] sm:$0xff]  ;;  %1053 = vst [vmem:[%s6058_s5 + $0xd98] sm:$0xff] %v1052_v51  ;;  %v1058_v54 = vld [vmem:[%s6053_s4 + $0x3690] sm:$0xff] }
  0xf1   : > { %1055 = vst [vmem:[%s6058_s5 + $0xda0] sm:$0xff] %v1054_v52  ;;  %1057 = vst [vmem:[%s6058_s5 + $0xda8] sm:$0xff] %v1056_v53  ;;  %v1060_v55 = vld [vmem:[%s6053_s4 + $0x3698] sm:$0xff]  ;;  %v1062_v56 = vld [vmem:[%s6053_s4 + $0x3700] sm:$0xff] }
  0xf2   : > { %1059 = vst [vmem:[%s6058_s5 + $0xdb0] sm:$0xff] %v1058_v54  ;;  %1061 = vst [vmem:[%s6058_s5 + $0xdb8] sm:$0xff] %v1060_v55  ;;  %v1064_v57 = vld [vmem:[%s6053_s4 + $0x3708] sm:$0xff]  ;;  %v1066_v58 = vld [vmem:[%s6053_s4 + $0x3710] sm:$0xff] }
  0xf3   : > { %1063 = vst [vmem:[%s6058_s5 + $0xdc0] sm:$0xff] %v1062_v56  ;;  %v1068_v59 = vld [vmem:[%s6053_s4 + $0x3718] sm:$0xff]  ;;  %1065 = vst [vmem:[%s6058_s5 + $0xdc8] sm:$0xff] %v1064_v57  ;;  %v1070_v60 = vld [vmem:[%s6053_s4 + $0x3780] sm:$0xff] }
  0xf4   : > { %1067 = vst [vmem:[%s6058_s5 + $0xdd0] sm:$0xff] %v1066_v58  ;;  %1069 = vst [vmem:[%s6058_s5 + $0xdd8] sm:$0xff] %v1068_v59  ;;  %v1072_v61 = vld [vmem:[%s6053_s4 + $0x3788] sm:$0xff]  ;;  %v1074_v62 = vld [vmem:[%s6053_s4 + $0x3790] sm:$0xff] }
  0xf5   : > { %1071 = vst [vmem:[%s6058_s5 + $0xde0] sm:$0xff] %v1070_v60  ;;  %1073 = vst [vmem:[%s6058_s5 + $0xde8] sm:$0xff] %v1072_v61  ;;  %v1076_v63 = vld [vmem:[%s6053_s4 + $0x3798] sm:$0xff]  ;;  %v1078_v0 = vld [vmem:[%s6053_s4 + $0x3800] sm:$0xff] }
  0xf6   : > { %1075 = vst [vmem:[%s6058_s5 + $0xdf0] sm:$0xff] %v1074_v62  ;;  %v1080_v1 = vld [vmem:[%s6053_s4 + $0x3808] sm:$0xff]  ;;  %1077 = vst [vmem:[%s6058_s5 + $0xdf8] sm:$0xff] %v1076_v63  ;;  %v1082_v2 = vld [vmem:[%s6053_s4 + $0x3810] sm:$0xff] }
  0xf7   : > { %1079 = vst [vmem:[%s6058_s5 + $0xe00] sm:$0xff] %v1078_v0  ;;  %1081 = vst [vmem:[%s6058_s5 + $0xe08] sm:$0xff] %v1080_v1  ;;  %v1084_v3 = vld [vmem:[%s6053_s4 + $0x3818] sm:$0xff]  ;;  %v1086_v4 = vld [vmem:[%s6053_s4 + $0x3880] sm:$0xff] }
  0xf8   : > { %1083 = vst [vmem:[%s6058_s5 + $0xe10] sm:$0xff] %v1082_v2  ;;  %1085 = vst [vmem:[%s6058_s5 + $0xe18] sm:$0xff] %v1084_v3  ;;  %v1088_v5 = vld [vmem:[%s6053_s4 + $0x3888] sm:$0xff]  ;;  %v1090_v6 = vld [vmem:[%s6053_s4 + $0x3890] sm:$0xff] }
  0xf9   : > { %1087 = vst [vmem:[%s6058_s5 + $0xe20] sm:$0xff] %v1086_v4  ;;  %v1092_v7 = vld [vmem:[%s6053_s4 + $0x3898] sm:$0xff]  ;;  %1089 = vst [vmem:[%s6058_s5 + $0xe28] sm:$0xff] %v1088_v5  ;;  %v1094_v8 = vld [vmem:[%s6053_s4 + $0x3900] sm:$0xff] }
  0xfa   : > { %1091 = vst [vmem:[%s6058_s5 + $0xe30] sm:$0xff] %v1090_v6  ;;  %1093 = vst [vmem:[%s6058_s5 + $0xe38] sm:$0xff] %v1092_v7  ;;  %v1096_v9 = vld [vmem:[%s6053_s4 + $0x3908] sm:$0xff]  ;;  %v1098_v10 = vld [vmem:[%s6053_s4 + $0x3910] sm:$0xff] }
  0xfb   : > { %1095 = vst [vmem:[%s6058_s5 + $0xe40] sm:$0xff] %v1094_v8  ;;  %1097 = vst [vmem:[%s6058_s5 + $0xe48] sm:$0xff] %v1096_v9  ;;  %v1100_v11 = vld [vmem:[%s6053_s4 + $0x3918] sm:$0xff]  ;;  %v1102_v12 = vld [vmem:[%s6053_s4 + $0x3980] sm:$0xff] }
  0xfc   : > { %1099 = vst [vmem:[%s6058_s5 + $0xe50] sm:$0xff] %v1098_v10  ;;  %v1104_v13 = vld [vmem:[%s6053_s4 + $0x3988] sm:$0xff]  ;;  %1101 = vst [vmem:[%s6058_s5 + $0xe58] sm:$0xff] %v1100_v11  ;;  %v1106_v14 = vld [vmem:[%s6053_s4 + $0x3990] sm:$0xff] }
  0xfd   : > { %1103 = vst [vmem:[%s6058_s5 + $0xe60] sm:$0xff] %v1102_v12  ;;  %1105 = vst [vmem:[%s6058_s5 + $0xe68] sm:$0xff] %v1104_v13  ;;  %v1108_v15 = vld [vmem:[%s6053_s4 + $0x3998] sm:$0xff]  ;;  %v1110_v16 = vld [vmem:[%s6053_s4 + $0x3a00] sm:$0xff] }
  0xfe   : > { %1107 = vst [vmem:[%s6058_s5 + $0xe70] sm:$0xff] %v1106_v14  ;;  %1109 = vst [vmem:[%s6058_s5 + $0xe78] sm:$0xff] %v1108_v15  ;;  %v1112_v17 = vld [vmem:[%s6053_s4 + $0x3a08] sm:$0xff]  ;;  %v1114_v18 = vld [vmem:[%s6053_s4 + $0x3a10] sm:$0xff] }
  0xff   : > { %1111 = vst [vmem:[%s6058_s5 + $0xe80] sm:$0xff] %v1110_v16  ;;  %v1116_v19 = vld [vmem:[%s6053_s4 + $0x3a18] sm:$0xff]  ;;  %1113 = vst [vmem:[%s6058_s5 + $0xe88] sm:$0xff] %v1112_v17  ;;  %v1118_v20 = vld [vmem:[%s6053_s4 + $0x3a80] sm:$0xff] }
 0x100   : > { %1115 = vst [vmem:[%s6058_s5 + $0xe90] sm:$0xff] %v1114_v18  ;;  %1117 = vst [vmem:[%s6058_s5 + $0xe98] sm:$0xff] %v1116_v19  ;;  %v1120_v21 = vld [vmem:[%s6053_s4 + $0x3a88] sm:$0xff]  ;;  %v1122_v22 = vld [vmem:[%s6053_s4 + $0x3a90] sm:$0xff] }
 0x101   : > { %1119 = vst [vmem:[%s6058_s5 + $0xea0] sm:$0xff] %v1118_v20  ;;  %1121 = vst [vmem:[%s6058_s5 + $0xea8] sm:$0xff] %v1120_v21  ;;  %v1124_v23 = vld [vmem:[%s6053_s4 + $0x3a98] sm:$0xff]  ;;  %v1126_v24 = vld [vmem:[%s6053_s4 + $0x3b00] sm:$0xff] }
 0x102   : > { %1123 = vst [vmem:[%s6058_s5 + $0xeb0] sm:$0xff] %v1122_v22  ;;  %v1128_v25 = vld [vmem:[%s6053_s4 + $0x3b08] sm:$0xff]  ;;  %1125 = vst [vmem:[%s6058_s5 + $0xeb8] sm:$0xff] %v1124_v23  ;;  %v1130_v26 = vld [vmem:[%s6053_s4 + $0x3b10] sm:$0xff] }
 0x103   : > { %1127 = vst [vmem:[%s6058_s5 + $0xec0] sm:$0xff] %v1126_v24  ;;  %1129 = vst [vmem:[%s6058_s5 + $0xec8] sm:$0xff] %v1128_v25  ;;  %v1132_v27 = vld [vmem:[%s6053_s4 + $0x3b18] sm:$0xff]  ;;  %v1134_v28 = vld [vmem:[%s6053_s4 + $0x3b80] sm:$0xff] }
 0x104   : > { %1131 = vst [vmem:[%s6058_s5 + $0xed0] sm:$0xff] %v1130_v26  ;;  %1133 = vst [vmem:[%s6058_s5 + $0xed8] sm:$0xff] %v1132_v27  ;;  %v1136_v29 = vld [vmem:[%s6053_s4 + $0x3b88] sm:$0xff]  ;;  %v1138_v30 = vld [vmem:[%s6053_s4 + $0x3b90] sm:$0xff] }
 0x105   : > { %1135 = vst [vmem:[%s6058_s5 + $0xee0] sm:$0xff] %v1134_v28  ;;  %v1140_v31 = vld [vmem:[%s6053_s4 + $0x3b98] sm:$0xff]  ;;  %1137 = vst [vmem:[%s6058_s5 + $0xee8] sm:$0xff] %v1136_v29  ;;  %v1142_v32 = vld [vmem:[%s6053_s4 + $0x3c00] sm:$0xff] }
 0x106   : > { %1139 = vst [vmem:[%s6058_s5 + $0xef0] sm:$0xff] %v1138_v30  ;;  %1141 = vst [vmem:[%s6058_s5 + $0xef8] sm:$0xff] %v1140_v31  ;;  %v1144_v33 = vld [vmem:[%s6053_s4 + $0x3c08] sm:$0xff]  ;;  %v1146_v34 = vld [vmem:[%s6053_s4 + $0x3c10] sm:$0xff] }
 0x107   : > { %1143 = vst [vmem:[%s6058_s5 + $0xf00] sm:$0xff] %v1142_v32  ;;  %1145 = vst [vmem:[%s6058_s5 + $0xf08] sm:$0xff] %v1144_v33  ;;  %v1148_v35 = vld [vmem:[%s6053_s4 + $0x3c18] sm:$0xff]  ;;  %v1150_v36 = vld [vmem:[%s6053_s4 + $0x3c80] sm:$0xff] }
 0x108   : > { %1147 = vst [vmem:[%s6058_s5 + $0xf10] sm:$0xff] %v1146_v34  ;;  %v1152_v37 = vld [vmem:[%s6053_s4 + $0x3c88] sm:$0xff]  ;;  %1149 = vst [vmem:[%s6058_s5 + $0xf18] sm:$0xff] %v1148_v35  ;;  %v1154_v38 = vld [vmem:[%s6053_s4 + $0x3c90] sm:$0xff] }
 0x109   : > { %1151 = vst [vmem:[%s6058_s5 + $0xf20] sm:$0xff] %v1150_v36  ;;  %1153 = vst [vmem:[%s6058_s5 + $0xf28] sm:$0xff] %v1152_v37  ;;  %v1156_v39 = vld [vmem:[%s6053_s4 + $0x3c98] sm:$0xff]  ;;  %v1158_v40 = vld [vmem:[%s6053_s4 + $0x3d00] sm:$0xff] }
 0x10a   : > { %1155 = vst [vmem:[%s6058_s5 + $0xf30] sm:$0xff] %v1154_v38  ;;  %1157 = vst [vmem:[%s6058_s5 + $0xf38] sm:$0xff] %v1156_v39  ;;  %v1160_v41 = vld [vmem:[%s6053_s4 + $0x3d08] sm:$0xff]  ;;  %v1162_v42 = vld [vmem:[%s6053_s4 + $0x3d10] sm:$0xff] }
 0x10b   : > { %1159 = vst [vmem:[%s6058_s5 + $0xf40] sm:$0xff] %v1158_v40  ;;  %v1164_v43 = vld [vmem:[%s6053_s4 + $0x3d18] sm:$0xff]  ;;  %1161 = vst [vmem:[%s6058_s5 + $0xf48] sm:$0xff] %v1160_v41  ;;  %v1166_v44 = vld [vmem:[%s6053_s4 + $0x3d80] sm:$0xff] }
 0x10c   : > { %1163 = vst [vmem:[%s6058_s5 + $0xf50] sm:$0xff] %v1162_v42  ;;  %1165 = vst [vmem:[%s6058_s5 + $0xf58] sm:$0xff] %v1164_v43  ;;  %v1168_v45 = vld [vmem:[%s6053_s4 + $0x3d88] sm:$0xff]  ;;  %v1170_v46 = vld [vmem:[%s6053_s4 + $0x3d90] sm:$0xff] }
 0x10d   : > { %1167 = vst [vmem:[%s6058_s5 + $0xf60] sm:$0xff] %v1166_v44  ;;  %1169 = vst [vmem:[%s6058_s5 + $0xf68] sm:$0xff] %v1168_v45  ;;  %v1172_v47 = vld [vmem:[%s6053_s4 + $0x3d98] sm:$0xff]  ;;  %v1174_v48 = vld [vmem:[%s6053_s4 + $0x3e00] sm:$0xff] }
 0x10e   : > { %1171 = vst [vmem:[%s6058_s5 + $0xf70] sm:$0xff] %v1170_v46  ;;  %v1176_v49 = vld [vmem:[%s6053_s4 + $0x3e08] sm:$0xff]  ;;  %1173 = vst [vmem:[%s6058_s5 + $0xf78] sm:$0xff] %v1172_v47  ;;  %v1178_v50 = vld [vmem:[%s6053_s4 + $0x3e10] sm:$0xff] }
 0x10f   : > { %1175 = vst [vmem:[%s6058_s5 + $0xf80] sm:$0xff] %v1174_v48  ;;  %1177 = vst [vmem:[%s6058_s5 + $0xf88] sm:$0xff] %v1176_v49  ;;  %v1180_v51 = vld [vmem:[%s6053_s4 + $0x3e18] sm:$0xff]  ;;  %v1182_v52 = vld [vmem:[%s6053_s4 + $0x3e80] sm:$0xff] }
 0x110   : > { %1179 = vst [vmem:[%s6058_s5 + $0xf90] sm:$0xff] %v1178_v50  ;;  %1181 = vst [vmem:[%s6058_s5 + $0xf98] sm:$0xff] %v1180_v51  ;;  %v1184_v53 = vld [vmem:[%s6053_s4 + $0x3e88] sm:$0xff]  ;;  %v1186_v54 = vld [vmem:[%s6053_s4 + $0x3e90] sm:$0xff] }
 0x111   : > { %1183 = vst [vmem:[%s6058_s5 + $0xfa0] sm:$0xff] %v1182_v52  ;;  %v1188_v55 = vld [vmem:[%s6053_s4 + $0x3e98] sm:$0xff]  ;;  %1185 = vst [vmem:[%s6058_s5 + $0xfa8] sm:$0xff] %v1184_v53  ;;  %v1190_v56 = vld [vmem:[%s6053_s4 + $0x3f00] sm:$0xff] }
 0x112   : > { %1187 = vst [vmem:[%s6058_s5 + $0xfb0] sm:$0xff] %v1186_v54  ;;  %1189 = vst [vmem:[%s6058_s5 + $0xfb8] sm:$0xff] %v1188_v55  ;;  %v1192_v57 = vld [vmem:[%s6053_s4 + $0x3f08] sm:$0xff]  ;;  %v1194_v58 = vld [vmem:[%s6053_s4 + $0x3f10] sm:$0xff] }
 0x113   : > { %1191 = vst [vmem:[%s6058_s5 + $0xfc0] sm:$0xff] %v1190_v56  ;;  %1193 = vst [vmem:[%s6058_s5 + $0xfc8] sm:$0xff] %v1192_v57  ;;  %v1196_v59 = vld [vmem:[%s6053_s4 + $0x3f18] sm:$0xff]  ;;  %v1198_v60 = vld [vmem:[%s6053_s4 + $0x3f80] sm:$0xff] }
 0x114   : > { %1195 = vst [vmem:[%s6058_s5 + $0xfd0] sm:$0xff] %v1194_v58  ;;  %v1200_v61 = vld [vmem:[%s6053_s4 + $0x3f88] sm:$0xff]  ;;  %1197 = vst [vmem:[%s6058_s5 + $0xfd8] sm:$0xff] %v1196_v59  ;;  %v1202_v62 = vld [vmem:[%s6053_s4 + $0x3f90] sm:$0xff] }
 0x115   : > { %1199 = vst [vmem:[%s6058_s5 + $0xfe0] sm:$0xff] %v1198_v60  ;;  %1201 = vst [vmem:[%s6058_s5 + $0xfe8] sm:$0xff] %v1200_v61  ;;  %v1204_v63 = vld [vmem:[%s6053_s4 + $0x3f98] sm:$0xff] }
 0x116   : > { %1203 = vst [vmem:[%s6058_s5 + $0xff0] sm:$0xff] %v1202_v62  ;;  %1205 = vst [vmem:[%s6058_s5 + $0xff8] sm:$0xff] %v1204_v63 }
 0x117 PF: > { %p5311_p11 = scmp.ge.s32.totalorder %s5968_s17, 1  ;;  %p1218_p12 = scmp.lt.s32.totalorder %s5968_s17, 5 }
 0x119   : > { %p1219_p13 = pnand %p5311_p11, %p1218_p12 }
 0x11a   : > { %s7084_s6 = sand.u32 (!%p1219_p13), 1, %s5952_s13   ;;  %s5314_s11 = sshll.u32 (!%p1219_p13), %s5960_s15, 3 }
 0x11b   : > { %1222 = sbr.rel (%p1219_p13) target bundleno = 1025 (0x401), region = 51  ;;  %s5312_s7 = sshll.u32 (!%p1219_p13), %s7084_s6, 12 }
 0x11c   : > { %s7089_s8 = scalar_lea.vmem (!%p1219_p13), [#allocation3], %s5312_s7  ;;  %p1264_p0 = scmp.lt.s32.totalorder (!%p1219_p13), %s5314_s11, 31 }
 0x11d   : > { %s5313_s23 = sshll.u32 (!%p1219_p13), %s7084_s6, 4  ;;  %s5833_s27 = sshll.u32 (!%p1219_p13), %s5960_s15, 8 }
 0x11e   : > { %s7690_s26 = scalar_lea.vmem (!%p1219_p13), [#allocation4], %s5313_s23  ;;  %s5204_s4 = scalar_lea.hbm (!%p1219_p13), %s7789_s3, %s5833_s27 }
 0x11f   : > { %s5206_s28 = sshll.u32 (!%p1219_p13), %s7690_s26, 4  ;;  %s5192_s5 = scalar_lea.sflag (!%p1219_p13), [#allocation5], %s7084_s6  ;;  %s5207_s28 = int_to_ptr.vmem [resolvable:$true] %s5206_s28 }
 0x120   : > { %v1795_v0 = vlaneseq  ;;  %v5970_v1 = vmov 1966171168   ;;  %v1334_v4 = vld [vmem:[%s7089_s8 + $0x1c0] sm:$0xff]  ;;  %s7800_s11 = smov (!%p1264_p0, %s5314_s11), 31  ;;  %s5892_s7 = scalar_lea.vmem %s5207_s28, 256 }
 0x121   : > { %v1793_v2 = vunpack.c.l.s4 %v5970_v1  ;;  %v1338_v5 = vld [vmem:[%s7089_s8 + $0x1e0] sm:$0xff]  ;;  %s1266_s21 = scalar_lea.vmem %s7788_s2, %s7800_s11  ;;  %p5893_p1 = scmp.ne.s32.totalorder %s5207_s28, %s5892_s7 }
 0x122   : > { %v7087_v3 = vshrl.u32 %v1795_v0, 7  ;;  %v1462_v6 = vld [vmem:[%s7089_s8 + $0x5c0] sm:$0xff]  ;;  %v5372_v8 = vcombine.high %v1334_v4, %v1338_v5  ;;  %v5371_v10 = vcombine.low %v1334_v4, %v1338_v5 }
 0x123   : > { %v1794_v7 = vunpack.c.0.s8 %v1793_v2  ;;  %v1466_v9 = vld [vmem:[%s7089_s8 + $0x5e0] sm:$0xff]  ;;  %p5894_p2 = pnand %p5893_p1, %p6032_p5 }
 0x124   : > { %v1326_v11 = vld [vmem:[%s7089_s8 + $0x180] sm:$0xff]  ;;  %v5500_v13 = vcombine.high %v1462_v6, %v1466_v9  ;;  %v5499_v14 = vcombine.low %v1462_v6, %v1466_v9  ;;  %4408 = vmatprep.subr.bf16.mxu0 %v5372_v8 }
 0x125   : > { %v1330_v12 = vld [vmem:[%s7089_s8 + $0x1a0] sm:$0xff]  ;;  %v7104_v23 = vsub.s32 %v1794_v7, %v7087_v3  ;;  %4409 = vmatpush1.bf16.msra.mxu0 %v5371_v10  ;;  %p5895_p3 = pneg %p5894_p2 }
 0x126   : > { %v5364_v15 = vcombine.high %v1326_v11, %v1330_v12  ;;  %v1454_v16 = vld [vmem:[%s7089_s8 + $0x580] sm:$0xff]  ;;  %4449 = vmatprep.subr.bf16.mxu1 %v5500_v13  ;;  %v5363_v24 = vcombine.low %v1326_v11, %v1330_v12 }
 0x127   : > { %v1458_v17 = vld [vmem:[%s7089_s8 + $0x5a0] sm:$0xff]  ;;  %4450 = vmatpush1.bf16.msra.mxu1 %v5499_v14 }
 0x128   : > { %v1318_v18 = vld [vmem:[%s7089_s8 + $0x140] sm:$0xff]  ;;  %v5492_v19 = vcombine.high %v1454_v16, %v1458_v17  ;;  %4410 = vmatprep.subr.bf16.mxu0 %v5364_v15  ;;  %v5491_v26 = vcombine.low %v1454_v16, %v1458_v17 }
 0x129   : > { %v1322_v20 = vld [vmem:[%s7089_s8 + $0x160] sm:$0xff]  ;;  %4411 = vmatpush1.bf16.msra.mxu0 %v5363_v24 }
 0x12a   : > { %v1446_v21 = vld [vmem:[%s7089_s8 + $0x540] sm:$0xff]  ;;  %v5356_v27 = vcombine.high %v1318_v18, %v1322_v20  ;;  %4451 = vmatprep.subr.bf16.mxu1 %v5492_v19  ;;  %v5355_v34 = vcombine.low %v1318_v18, %v1322_v20 }
 0x12b   : > { %v1450_v22 = vld [vmem:[%s7089_s8 + $0x560] sm:$0xff]  ;;  %4452 = vmatpush1.bf16.msra.mxu1 %v5491_v26 }
 0x12c   : > { %v1277_v25 = vld [vmem:[%s7786_s0] sm:$0xff]  ;;  %v5484_v28 = vcombine.high %v1446_v21, %v1450_v22  ;;  %4412 = vmatprep.subr.bf16.mxu0 %v5356_v27  ;;  %v5483_v35 = vcombine.low %v1446_v21, %v1450_v22 }
 0x12d   : > { %v1310_v29 = vld [vmem:[%s7089_s8 + $0x100] sm:$0xff]  ;;  %v7114_v33 = vrot.slane %v1277_v25, %v7104_v23  ;;  %4413 = vmatpush1.bf16.msra.mxu0 %v5355_v34  ;;  %v1791_v45 = vcombine.high %v1277_v25, %v1277_v25 }
 0x12e   : > { %v1314_v30 = vld [vmem:[%s7089_s8 + $0x120] sm:$0xff]  ;;  %4453 = vmatprep.subr.bf16.mxu1 %v5484_v28 }
 0x12f   : > { %v1438_v31 = vld [vmem:[%s7089_s8 + $0x500] sm:$0xff]  ;;  %v5348_v36 = vcombine.high %v1310_v29, %v1314_v30  ;;  %v1806_v37 = vcombine.high %v7114_v33, %v7114_v33  ;;  %v5347_v44 = vcombine.low %v1310_v29, %v1314_v30  ;;  %4454 = vmatpush1.bf16.msra.mxu1 %v5483_v35  ;;  %v7136_v57 = vrot.slane %v1791_v45, %v7104_v23 }
 0x130   : > { %v1442_v32 = vld [vmem:[%s7089_s8 + $0x520] sm:$0xff] }
 0x131   : > { %v5476_v38 = vcombine.high %v1438_v31, %v1442_v32  ;;  %v1302_v39 = vld [vmem:[%s7089_s8 + $0xc0] sm:$0xff]  ;;  %v7123_v43 = vrot.slane %v1806_v37, %v7104_v23  ;;  %4414 = vmatprep.subr.bf16.mxu0 %v5348_v36  ;;  %v5475_v46 = vcombine.low %v1438_v31, %v1442_v32  ;;  %v7144_v63 = vrot.slane %v7136_v57, %v7104_v23 }
 0x132   : > { %v1306_v40 = vld [vmem:[%s7089_s8 + $0xe0] sm:$0xff]  ;;  %4415 = vmatpush1.bf16.msra.mxu0 %v5347_v44 }
 0x133   : > { %v1430_v41 = vld [vmem:[%s7089_s8 + $0x4c0] sm:$0xff]  ;;  %v5340_v47 = vcombine.high %v1302_v39, %v1306_v40  ;;  %v7127_v48 = vcombine.high %v7123_v43, %v7123_v43  ;;  %4455 = vmatprep.subr.bf16.mxu1 %v5476_v38  ;;  %4440 = vmatprep.mubr.bf16.mxu0 %v7123_v43  ;;  %v5339_v54 = vcombine.low %v1302_v39, %v1306_v40 }
 0x134   : > { %v1434_v42 = vld [vmem:[%s7089_s8 + $0x4e0] sm:$0xff]  ;;  %4456 = vmatpush1.bf16.msra.mxu1 %v5475_v46 }
 0x135   : > { %v5468_v49 = vcombine.high %v1430_v41, %v1434_v42  ;;  %v1294_v50 = vld [vmem:[%s7089_s8 + $0x80] sm:$0xff]  ;;  %4481 = vmatprep.mubr.bf16.mxu1 %v7127_v48  ;;  %4416 = vmatprep.subr.bf16.mxu0 %v5340_v47  ;;  %v5467_v55 = vcombine.low %v1430_v41, %v1434_v42 }
 0x136   : > { %v1298_v51 = vld [vmem:[%s7089_s8 + $0xa0] sm:$0xff]  ;;  %4417 = vmatpush1.bf16.msra.mxu0 %v5339_v54 }
 0x137   : > { %v1422_v52 = vld [vmem:[%s7089_s8 + $0x480] sm:$0xff]  ;;  %v5332_v56 = vcombine.high %v1294_v50, %v1298_v51  ;;  %4457 = vmatprep.subr.bf16.mxu1 %v5468_v49  ;;  %v5331_v0 = vcombine.low %v1294_v50, %v1298_v51 }
 0x138   : > { %v1426_v53 = vld [vmem:[%s7089_s8 + $0x4a0] sm:$0xff]  ;;  %4458 = vmatpush1.bf16.msra.mxu1 %v5467_v55 }
 0x139   : > { %v5460_v58 = vcombine.high %v1422_v52, %v1426_v53  ;;  %v1286_v59 = vld [vmem:[%s7089_s8 + $0x40] sm:$0xff]  ;;  %4418 = vmatprep.subr.bf16.mxu0 %v5332_v56  ;;  %v5459_v1 = vcombine.low %v1422_v52, %v1426_v53 }
 0x13a   : > { %v1290_v60 = vld [vmem:[%s7089_s8 + $0x60] sm:$0xff]  ;;  %4419 = vmatpush1.bf16.msra.mxu0 %v5331_v0 }
 0x13b   : > { %v1414_v61 = vld [vmem:[%s7089_s8 + $0x440] sm:$0xff]  ;;  %v5324_v2 = vcombine.high %v1286_v59, %v1290_v60  ;;  %4459 = vmatprep.subr.bf16.mxu1 %v5460_v58  ;;  %v5323_v9 = vcombine.low %v1286_v59, %v1290_v60 }
 0x13c   : > { %v1418_v62 = vld [vmem:[%s7089_s8 + $0x460] sm:$0xff]  ;;  %4460 = vmatpush1.bf16.msra.mxu1 %v5459_v1 }
 0x13d   : > { %v5452_v4 = vcombine.high %v1414_v61, %v1418_v62  ;;  %v1278_v5 = vld [vmem:[%s7089_s8] sm:$0xff]  ;;  %4420 = vmatprep.subr.bf16.mxu0 %v5324_v2  ;;  %v5451_v10 = vcombine.low %v1414_v61, %v1418_v62 }
 0x13e   : > { %v1282_v6 = vld [vmem:[%s7089_s8 + $0x20] sm:$0xff]  ;;  %4421 = vmatpush1.bf16.msra.mxu0 %v5323_v9 }
 0x13f   : > { %v1406_v7 = vld [vmem:[%s7089_s8 + $0x400] sm:$0xff]  ;;  %v5316_v11 = vcombine.high %v1278_v5, %v1282_v6  ;;  %4461 = vmatprep.subr.bf16.mxu1 %v5452_v4  ;;  %v5315_v17 = vcombine.low %v1278_v5, %v1282_v6 }
 0x140   : > { %v1410_v8 = vld [vmem:[%s7089_s8 + $0x420] sm:$0xff]  ;;  %4462 = vmatpush1.bf16.msra.mxu1 %v5451_v10 }
 0x141   : > { %v5444_v12 = vcombine.high %v1406_v7, %v1410_v8  ;;  %v1398_v13 = vld [vmem:[%s7089_s8 + $0x3c0] sm:$0xff]  ;;  %4422 = vmatprep.subr.bf16.mxu0 %v5316_v11  ;;  %v5443_v18 = vcombine.low %v1406_v7, %v1410_v8 }
 0x142   : > { %v1402_v14 = vld [vmem:[%s7089_s8 + $0x3e0] sm:$0xff]  ;;  %4423 = vmatpush1.bf16.msra.mxu0 %v5315_v17 }
 0x143   : > { %v1526_v15 = vld [vmem:[%s7089_s8 + $0x7c0] sm:$0xff]  ;;  %v5436_v19 = vcombine.high %v1398_v13, %v1402_v14  ;;  %4463 = vmatprep.subr.bf16.mxu1 %v5444_v12  ;;  %v5435_v26 = vcombine.low %v1398_v13, %v1402_v14 }
 0x144   : > { %v1530_v16 = vld [vmem:[%s7089_s8 + $0x7e0] sm:$0xff]  ;;  %4464 = vmatpush1.bf16.msra.mxu1 %v5443_v18 }
 0x145   : > { %v5564_v20 = vcombine.high %v1526_v15, %v1530_v16  ;;  %v1390_v21 = vld [vmem:[%s7089_s8 + $0x380] sm:$0xff]  ;;  %4424 = vmatprep.subr.bf16.mxu0 %v5436_v19  ;;  %v5563_v27 = vcombine.low %v1526_v15, %v1530_v16 }
 0x146   : > { %v1394_v22 = vld [vmem:[%s7089_s8 + $0x3a0] sm:$0xff]  ;;  %4425 = vmatpush2.bf16.msra.mxu0 %v5435_v26 }
 0x147   : > { %v1518_v24 = vld [vmem:[%s7089_s8 + $0x780] sm:$0xff]  ;;  %v5428_v28 = vcombine.high %v1390_v21, %v1394_v22  ;;  %4465 = vmatprep.subr.bf16.mxu1 %v5564_v20  ;;  %v5427_v35 = vcombine.low %v1390_v21, %v1394_v22 }
 0x148   : > { %v1522_v25 = vld [vmem:[%s7089_s8 + $0x7a0] sm:$0xff]  ;;  %4466 = vmatpush2.bf16.msra.mxu1 %v5563_v27  ;;  %v7190_v27 = vrot.slane %v7114_v33, %v7104_v23 }
 0x149   : > { %v5556_v29 = vcombine.high %v1518_v24, %v1522_v25  ;;  %v1382_v30 = vld [vmem:[%s7089_s8 + $0x340] sm:$0xff]  ;;  %4426 = vmatprep.subr.bf16.mxu0 %v5428_v28  ;;  %v5555_v36 = vcombine.low %v1518_v24, %v1522_v25  ;;  %v1807_v25 = vcombine.high %v7136_v57, %v7136_v57 }
 0x14a   : > { %v1386_v31 = vld [vmem:[%s7089_s8 + $0x360] sm:$0xff]  ;;  %4427 = vmatpush2.bf16.msra.mxu0 %v5427_v35  ;;  %v7201_v33 = vcombine.high %v7190_v27, %v7190_v27 }
 0x14b   : > { %v1510_v32 = vld [vmem:[%s7089_s8 + $0x740] sm:$0xff]  ;;  %v5420_v37 = vcombine.high %v1382_v30, %v1386_v31  ;;  %4467 = vmatprep.subr.bf16.mxu1 %v5556_v29  ;;  %v5419_v44 = vcombine.low %v1382_v30, %v1386_v31  ;;  %v7197_v35 = vrot.slane %v1807_v25, %v7104_v23 }
 0x14c   : > { %v1514_v34 = vld [vmem:[%s7089_s8 + $0x760] sm:$0xff]  ;;  %4468 = vmatpush2.bf16.msra.mxu1 %v5555_v36 }
 0x14d   : > { %v5548_v38 = vcombine.high %v1510_v32, %v1514_v34  ;;  %v1374_v39 = vld [vmem:[%s7089_s8 + $0x300] sm:$0xff]  ;;  %4428 = vmatprep.subr.bf16.mxu0 %v5420_v37  ;;  %v5547_v45 = vcombine.low %v1510_v32, %v1514_v34 }
 0x14e   : > { %v1378_v40 = vld [vmem:[%s7089_s8 + $0x320] sm:$0xff]  ;;  %4429 = vmatpush2.bf16.msra.mxu0 %v5419_v44  ;;  %v7210_v44 = vcombine.high %v7197_v35, %v7197_v35 }
 0x14f   : > { %v1502_v41 = vld [vmem:[%s7089_s8 + $0x700] sm:$0xff]  ;;  %v5412_v46 = vcombine.high %v1374_v39, %v1378_v40  ;;  %4469 = vmatprep.subr.bf16.mxu1 %v5548_v38  ;;  %v5411_v53 = vcombine.low %v1374_v39, %v1378_v40 }
 0x150   : > { %v1506_v42 = vld [vmem:[%s7089_s8 + $0x720] sm:$0xff]  ;;  %4470 = vmatpush2.bf16.msra.mxu1 %v5547_v45 }
 0x151   : > { %v5540_v47 = vcombine.high %v1502_v41, %v1506_v42  ;;  %v1366_v49 = vld [vmem:[%s7089_s8 + $0x2c0] sm:$0xff]  ;;  %4430 = vmatprep.subr.bf16.mxu0 %v5412_v46  ;;  %v5539_v54 = vcombine.low %v1502_v41, %v1506_v42 }
 0x152   : > { %v1370_v50 = vld [vmem:[%s7089_s8 + $0x2e0] sm:$0xff]  ;;  %4431 = vmatpush2.bf16.msra.mxu0 %v5411_v53 }
 0x153   : > { %v1494_v51 = vld [vmem:[%s7089_s8 + $0x6c0] sm:$0xff]  ;;  %v5404_v55 = vcombine.high %v1366_v49, %v1370_v50  ;;  %4471 = vmatprep.subr.bf16.mxu1 %v5540_v47  ;;  %v5403_v62 = vcombine.low %v1366_v49, %v1370_v50 }
 0x154   : > { %v1498_v52 = vld [vmem:[%s7089_s8 + $0x6e0] sm:$0xff]  ;;  %4472 = vmatpush2.bf16.msra.mxu1 %v5539_v54 }
 0x155   : > { %v5532_v56 = vcombine.high %v1494_v51, %v1498_v52  ;;  %v1358_v58 = vld [vmem:[%s7089_s8 + $0x280] sm:$0xff]  ;;  %4432 = vmatprep.subr.bf16.mxu0 %v5404_v55  ;;  %v5531_v0 = vcombine.low %v1494_v51, %v1498_v52 }
 0x156   : > { %v1362_v59 = vld [vmem:[%s7089_s8 + $0x2a0] sm:$0xff]  ;;  %4433 = vmatpush2.bf16.msra.mxu0 %v5403_v62 }
 0x157   : > { %v1486_v60 = vld [vmem:[%s7089_s8 + $0x680] sm:$0xff]  ;;  %v5396_v1 = vcombine.high %v1358_v58, %v1362_v59  ;;  %4473 = vmatprep.subr.bf16.mxu1 %v5532_v56  ;;  %v5395_v8 = vcombine.low %v1358_v58, %v1362_v59 }
 0x158   : > { %v1490_v61 = vld [vmem:[%s7089_s8 + $0x6a0] sm:$0xff]  ;;  %4474 = vmatpush2.bf16.msra.mxu1 %v5531_v0 }
 0x159   : > { %v5524_v2 = vcombine.high %v1486_v60, %v1490_v61  ;;  %v1350_v4 = vld [vmem:[%s7089_s8 + $0x240] sm:$0xff]  ;;  %4434 = vmatprep.subr.bf16.mxu0 %v5396_v1  ;;  %v5523_v9 = vcombine.low %v1486_v60, %v1490_v61 }
 0x15a   : > { %v1354_v5 = vld [vmem:[%s7089_s8 + $0x260] sm:$0xff]  ;;  %4435 = vmatpush2.bf16.msra.mxu0 %v5395_v8 }
 0x15b   : > { %v1478_v6 = vld [vmem:[%s7089_s8 + $0x640] sm:$0xff]  ;;  %v5388_v10 = vcombine.high %v1350_v4, %v1354_v5  ;;  %4475 = vmatprep.subr.bf16.mxu1 %v5524_v2  ;;  %v5387_v16 = vcombine.low %v1350_v4, %v1354_v5 }
 0x15c   : > { %v1482_v7 = vld [vmem:[%s7089_s8 + $0x660] sm:$0xff]  ;;  %4476 = vmatpush2.bf16.msra.mxu1 %v5523_v9 }
 0x15d   : > { %v5516_v11 = vcombine.high %v1478_v6, %v1482_v7  ;;  %v1342_v12 = vld [vmem:[%s7089_s8 + $0x200] sm:$0xff]  ;;  %4436 = vmatprep.subr.bf16.mxu0 %v5388_v10  ;;  %v5515_v17 = vcombine.low %v1478_v6, %v1482_v7 }
 0x15e   : > { %v1346_v13 = vld [vmem:[%s7089_s8 + $0x220] sm:$0xff]  ;;  %4437 = vmatpush2.bf16.msra.mxu0 %v5387_v16 }
 0x15f   : > { %v1470_v14 = vld [vmem:[%s7089_s8 + $0x600] sm:$0xff]  ;;  %v5380_v18 = vcombine.high %v1342_v12, %v1346_v13  ;;  %4477 = vmatprep.subr.bf16.mxu1 %v5516_v11  ;;  %v5379_v26 = vcombine.low %v1342_v12, %v1346_v13 }
 0x160   : > { %v1474_v15 = vld [vmem:[%s7089_s8 + $0x620] sm:$0xff]  ;;  %4478 = vmatpush2.bf16.msra.mxu1 %v5515_v17 }
 0x161   : > { %v5508_v19 = vcombine.high %v1470_v14, %v1474_v15  ;;  %v1590_v20 = vld [vmem:[%s7089_s8 + $0x9c0] sm:$0xff]  ;;  %4438 = vmatprep.subr.bf16.mxu0 %v5380_v18  ;;  %v5507_v28 = vcombine.low %v1470_v14, %v1474_v15 }
 0x162   : > { %v1594_v21 = vld [vmem:[%s7089_s8 + $0x9e0] sm:$0xff]  ;;  %4439 = vmatpush2.bf16.msra.mxu0 %v5379_v26 }
 0x163   : > { %v1718_v22 = vld [vmem:[%s7089_s8 + $0xdc0] sm:$0xff]  ;;  %v5628_v29 = vcombine.high %v1590_v20, %v1594_v21  ;;  %4479 = vmatprep.subr.bf16.mxu1 %v5508_v19  ;;  %v5627_v36 = vcombine.low %v1590_v20, %v1594_v21 }
 0x164   : > { %v1722_v24 = vld [vmem:[%s7089_s8 + $0xde0] sm:$0xff]  ;;  %4480 = vmatpush2.bf16.msra.mxu1 %v5507_v28 }
 0x165   : > { %v5756_v30 = vcombine.high %v1718_v22, %v1722_v24  ;;  %v1582_v31 = vld [vmem:[%s7089_s8 + $0x980] sm:$0xff]  ;;  %4490 = vmatprep.subr.bf16.mxu0 %v5628_v29  ;;  %v5755_v37 = vcombine.low %v1718_v22, %v1722_v24  ;;  %4441 = vmatmul.mubr.bf16.vlgmr.msra.gmra.mxu0 %v7190_v27 }
 0x166   : > { %v1586_v32 = vld [vmem:[%s7089_s8 + $0x9a0] sm:$0xff]  ;;  %4491 = vmatpush1.bf16.msra.mxu0 %v5627_v36  ;;  %4522 = vmatprep.mubr.bf16.mxu0 %v7197_v35 }
 0x167   : > { %v1710_v34 = vld [vmem:[%s7089_s8 + $0xd80] sm:$0xff]  ;;  %v5620_v38 = vcombine.high %v1582_v31, %v1586_v32  ;;  %4531 = vmatprep.subr.bf16.mxu1 %v5756_v30  ;;  %4482 = vmatmul.mubr.bf16.vlgmr.msra.gmra.mxu1 %v7201_v33  ;;  %v5619_v45 = vcombine.low %v1582_v31, %v1586_v32 }
 0x168   : > { %v1714_v57 = vld [vmem:[%s7089_s8 + $0xda0] sm:$0xff]  ;;  %4532 = vmatpush1.bf16.msra.mxu1 %v5755_v37  ;;  %4563 = vmatprep.mubr.bf16.mxu1 %v7210_v44 }
 0x169   : > { %v5748_v39 = vcombine.high %v1710_v34, %v1714_v57  ;;  %v1574_v40 = vld [vmem:[%s7089_s8 + $0x940] sm:$0xff]  ;;  %4492 = vmatprep.subr.bf16.mxu0 %v5620_v38  ;;  %v5747_v46 = vcombine.low %v1710_v34, %v1714_v57 }
 0x16a   : > { %v1578_v41 = vld [vmem:[%s7089_s8 + $0x960] sm:$0xff]  ;;  %4493 = vmatpush1.bf16.msra.mxu0 %v5619_v45 }
 0x16b   : > { %v1702_v23 = vld [vmem:[%s7089_s8 + $0xd40] sm:$0xff]  ;;  %v5612_v47 = vcombine.high %v1574_v40, %v1578_v41  ;;  %4533 = vmatprep.subr.bf16.mxu1 %v5748_v39  ;;  %v5611_v54 = vcombine.low %v1574_v40, %v1578_v41 }
 0x16c   : > { %v1706_v42 = vld [vmem:[%s7089_s8 + $0xd60] sm:$0xff]  ;;  %4534 = vmatpush1.bf16.msra.mxu1 %v5747_v46 }
 0x16d   : > { %v5740_v49 = vcombine.high %v1702_v23, %v1706_v42  ;;  %v1566_v50 = vld [vmem:[%s7089_s8 + $0x900] sm:$0xff]  ;;  %4494 = vmatprep.subr.bf16.mxu0 %v5612_v47  ;;  %v5739_v55 = vcombine.low %v1702_v23, %v1706_v42 }
 0x16e   : > { %v1570_v51 = vld [vmem:[%s7089_s8 + $0x920] sm:$0xff]  ;;  %4495 = vmatpush1.bf16.msra.mxu0 %v5611_v54 }
 0x16f   : > { %v1694_v52 = vld [vmem:[%s7089_s8 + $0xd00] sm:$0xff]  ;;  %v5604_v56 = vcombine.high %v1566_v50, %v1570_v51  ;;  %4535 = vmatprep.subr.bf16.mxu1 %v5740_v49  ;;  %v5603_v0 = vcombine.low %v1566_v50, %v1570_v51 }
 0x170   : > { %v1698_v53 = vld [vmem:[%s7089_s8 + $0xd20] sm:$0xff]  ;;  %4536 = vmatpush1.bf16.msra.mxu1 %v5739_v55 }
 0x171   : > { %v5732_v58 = vcombine.high %v1694_v52, %v1698_v53  ;;  %v1558_v59 = vld [vmem:[%s7089_s8 + $0x8c0] sm:$0xff]  ;;  %4496 = vmatprep.subr.bf16.mxu0 %v5604_v56  ;;  %v5731_v1 = vcombine.low %v1694_v52, %v1698_v53 }
 0x172   : > { %v1562_v60 = vld [vmem:[%s7089_s8 + $0x8e0] sm:$0xff]  ;;  %4497 = vmatpush1.bf16.msra.mxu0 %v5603_v0 }
 0x173   : > { %v1686_v61 = vld [vmem:[%s7089_s8 + $0xcc0] sm:$0xff]  ;;  %v5596_v2 = vcombine.high %v1558_v59, %v1562_v60  ;;  %4537 = vmatprep.subr.bf16.mxu1 %v5732_v58  ;;  %v5595_v9 = vcombine.low %v1558_v59, %v1562_v60 }
 0x174   : > { %v1690_v62 = vld [vmem:[%s7089_s8 + $0xce0] sm:$0xff]  ;;  %4538 = vmatpush1.bf16.msra.mxu1 %v5731_v1 }
 0x175   : > { %v5724_v4 = vcombine.high %v1686_v61, %v1690_v62  ;;  %v1550_v5 = vld [vmem:[%s7089_s8 + $0x880] sm:$0xff]  ;;  %4498 = vmatprep.subr.bf16.mxu0 %v5596_v2  ;;  %v5723_v10 = vcombine.low %v1686_v61, %v1690_v62 }
 0x176   : > { %v1554_v6 = vld [vmem:[%s7089_s8 + $0x8a0] sm:$0xff]  ;;  %4499 = vmatpush1.bf16.msra.mxu0 %v5595_v9 }
 0x177   : > { %v1678_v7 = vld [vmem:[%s7089_s8 + $0xc80] sm:$0xff]  ;;  %v5588_v11 = vcombine.high %v1550_v5, %v1554_v6  ;;  %4539 = vmatprep.subr.bf16.mxu1 %v5724_v4  ;;  %v5587_v17 = vcombine.low %v1550_v5, %v1554_v6 }
 0x178   : > { %v1682_v8 = vld [vmem:[%s7089_s8 + $0xca0] sm:$0xff]  ;;  %4540 = vmatpush1.bf16.msra.mxu1 %v5723_v10 }
 0x179   : > { %v5716_v12 = vcombine.high %v1678_v7, %v1682_v8  ;;  %v1542_v13 = vld [vmem:[%s7089_s8 + $0x840] sm:$0xff]  ;;  %4500 = vmatprep.subr.bf16.mxu0 %v5588_v11  ;;  %v5715_v18 = vcombine.low %v1678_v7, %v1682_v8 }
 0x17a   : > { %v1546_v14 = vld [vmem:[%s7089_s8 + $0x860] sm:$0xff]  ;;  %4501 = vmatpush1.bf16.msra.mxu0 %v5587_v17 }
 0x17b   : > { %v1670_v15 = vld [vmem:[%s7089_s8 + $0xc40] sm:$0xff]  ;;  %v5580_v19 = vcombine.high %v1542_v13, %v1546_v14  ;;  %4541 = vmatprep.subr.bf16.mxu1 %v5716_v12  ;;  %v5579_v26 = vcombine.low %v1542_v13, %v1546_v14 }
 0x17c   : > { %v1674_v16 = vld [vmem:[%s7089_s8 + $0xc60] sm:$0xff]  ;;  %4542 = vmatpush1.bf16.msra.mxu1 %v5715_v18 }
 0x17d   : > { %v5708_v20 = vcombine.high %v1670_v15, %v1674_v16  ;;  %v1534_v21 = vld [vmem:[%s7089_s8 + $0x800] sm:$0xff]  ;;  %4502 = vmatprep.subr.bf16.mxu0 %v5580_v19  ;;  %v5707_v28 = vcombine.low %v1670_v15, %v1674_v16 }
 0x17e   : > { %v1538_v22 = vld [vmem:[%s7089_s8 + $0x820] sm:$0xff]  ;;  %4503 = vmatpush1.bf16.msra.mxu0 %v5579_v26 }
 0x17f   : > { %v1662_v24 = vld [vmem:[%s7089_s8 + $0xc00] sm:$0xff]  ;;  %v5572_v29 = vcombine.high %v1534_v21, %v1538_v22  ;;  %4543 = vmatprep.subr.bf16.mxu1 %v5708_v20  ;;  %v5571_v36 = vcombine.low %v1534_v21, %v1538_v22 }
 0x180   : > { %v1666_v25 = vld [vmem:[%s7089_s8 + $0xc20] sm:$0xff]  ;;  %4544 = vmatpush1.bf16.msra.mxu1 %v5707_v28 }
 0x181   : > { %v5700_v30 = vcombine.high %v1662_v24, %v1666_v25  ;;  %v1654_v31 = vld [vmem:[%s7089_s8 + $0xbc0] sm:$0xff]  ;;  %4504 = vmatprep.subr.bf16.mxu0 %v5572_v29  ;;  %v5699_v37 = vcombine.low %v1662_v24, %v1666_v25 }
 0x182   : > { %v1658_v32 = vld [vmem:[%s7089_s8 + $0xbe0] sm:$0xff]  ;;  %4505 = vmatpush1.bf16.msra.mxu0 %v5571_v36 }
 0x183   : > { %v1782_v34 = vld [vmem:[%s7089_s8 + $0xfc0] sm:$0xff]  ;;  %v5692_v38 = vcombine.high %v1654_v31, %v1658_v32  ;;  %4545 = vmatprep.subr.bf16.mxu1 %v5700_v30  ;;  %v5691_v45 = vcombine.low %v1654_v31, %v1658_v32 }
 0x184   : > { %v1786_v57 = vld [vmem:[%s7089_s8 + $0xfe0] sm:$0xff]  ;;  %4546 = vmatpush1.bf16.msra.mxu1 %v5699_v37 }
 0x185   : > { %v5820_v39 = vcombine.high %v1782_v34, %v1786_v57  ;;  %v1646_v40 = vld [vmem:[%s7089_s8 + $0xb80] sm:$0xff]  ;;  %4506 = vmatprep.subr.bf16.mxu0 %v5692_v38  ;;  %v5819_v46 = vcombine.low %v1782_v34, %v1786_v57 }
 0x186   : > { %v1650_v41 = vld [vmem:[%s7089_s8 + $0xba0] sm:$0xff]  ;;  %4507 = vmatpush2.bf16.msra.mxu0 %v5691_v45 }
 0x187   : > { %v1774_v23 = vld [vmem:[%s7089_s8 + $0xf80] sm:$0xff]  ;;  %v5684_v47 = vcombine.high %v1646_v40, %v1650_v41  ;;  %4547 = vmatprep.subr.bf16.mxu1 %v5820_v39  ;;  %v5683_v54 = vcombine.low %v1646_v40, %v1650_v41  ;;  %v1335_v40 = vld [vmem:[%s7089_s8 + $0x1c8] sm:$0xff] }
 0x188   : > { %v1778_v42 = vld [vmem:[%s7089_s8 + $0xfa0] sm:$0xff]  ;;  %4548 = vmatpush2.bf16.msra.mxu1 %v5819_v46  ;;  %v1339_v41 = vld [vmem:[%s7089_s8 + $0x1e8] sm:$0xff] }
 0x189   : > { %v5812_v49 = vcombine.high %v1774_v23, %v1778_v42  ;;  %v1638_v50 = vld [vmem:[%s7089_s8 + $0xb40] sm:$0xff]  ;;  %4508 = vmatprep.subr.bf16.mxu0 %v5684_v47  ;;  %v5811_v55 = vcombine.low %v1774_v23, %v1778_v42  ;;  %v1463_v23 = vld [vmem:[%s7089_s8 + $0x5c8] sm:$0xff]  ;;  %v5374_v47 = vcombine.high %v1335_v40, %v1339_v41 }
 0x18a   : > { %v1642_v51 = vld [vmem:[%s7089_s8 + $0xb60] sm:$0xff]  ;;  %4509 = vmatpush2.bf16.msra.mxu0 %v5683_v54  ;;  %v1467_v42 = vld [vmem:[%s7089_s8 + $0x5e8] sm:$0xff]  ;;  %v7277_v54 = vcombine.high %v7144_v63, %v7144_v63 }
 0x18b   : > { %v1766_v52 = vld [vmem:[%s7089_s8 + $0xf40] sm:$0xff]  ;;  %v5676_v56 = vcombine.high %v1638_v50, %v1642_v51  ;;  %4549 = vmatprep.subr.bf16.mxu1 %v5812_v49  ;;  %v5675_v0 = vcombine.low %v1638_v50, %v1642_v51  ;;  %v5502_v49 = vcombine.high %v1463_v23, %v1467_v42  ;;  %v1327_v50 = vld [vmem:[%s7089_s8 + $0x188] sm:$0xff] }
 0x18c   : > { %v1770_v53 = vld [vmem:[%s7089_s8 + $0xf60] sm:$0xff]  ;;  %4550 = vmatpush2.bf16.msra.mxu1 %v5811_v55  ;;  %v1331_v51 = vld [vmem:[%s7089_s8 + $0x1a8] sm:$0xff]  ;;  %v5373_v55 = vcombine.low %v1335_v40, %v1339_v41 }
 0x18d   : > { %v5804_v58 = vcombine.high %v1766_v52, %v1770_v53  ;;  %v1630_v59 = vld [vmem:[%s7089_s8 + $0xb00] sm:$0xff]  ;;  %4510 = vmatprep.subr.bf16.mxu0 %v5676_v56  ;;  %v5803_v1 = vcombine.low %v1766_v52, %v1770_v53  ;;  %v1455_v52 = vld [vmem:[%s7089_s8 + $0x588] sm:$0xff]  ;;  %v5501_v56 = vcombine.low %v1463_v23, %v1467_v42 }
 0x18e   : > { %v1634_v60 = vld [vmem:[%s7089_s8 + $0xb20] sm:$0xff]  ;;  %4511 = vmatpush2.bf16.msra.mxu0 %v5675_v0  ;;  %v1459_v53 = vld [vmem:[%s7089_s8 + $0x5a8] sm:$0xff] }
 0x18f   : > { %v1758_v61 = vld [vmem:[%s7089_s8 + $0xf00] sm:$0xff]  ;;  %v5668_v2 = vcombine.high %v1630_v59, %v1634_v60  ;;  %4551 = vmatprep.subr.bf16.mxu1 %v5804_v58  ;;  %v5667_v9 = vcombine.low %v1630_v59, %v1634_v60  ;;  %v5366_v58 = vcombine.high %v1327_v50, %v1331_v51  ;;  %v5494_v59 = vcombine.high %v1455_v52, %v1459_v53  ;;  %v1319_v60 = vld [vmem:[%s7089_s8 + $0x148] sm:$0xff] }
 0x190   : > { %v1762_v62 = vld [vmem:[%s7089_s8 + $0xf20] sm:$0xff]  ;;  %4552 = vmatpush2.bf16.msra.mxu1 %v5803_v1  ;;  %v1451_v0 = vld [vmem:[%s7089_s8 + $0x568] sm:$0xff]  ;;  %v5365_v1 = vcombine.low %v1327_v50, %v1331_v51 }
 0x191   : > { %v5796_v4 = vcombine.high %v1758_v61, %v1762_v62  ;;  %v1622_v5 = vld [vmem:[%s7089_s8 + $0xac0] sm:$0xff]  ;;  %4512 = vmatprep.subr.bf16.mxu0 %v5668_v2  ;;  %v5795_v10 = vcombine.low %v1758_v61, %v1762_v62  ;;  %v1323_v61 = vld [vmem:[%s7089_s8 + $0x168] sm:$0xff]  ;;  %v5493_v2 = vcombine.low %v1455_v52, %v1459_v53 }
 0x192   : > { %v1626_v6 = vld [vmem:[%s7089_s8 + $0xae0] sm:$0xff]  ;;  %4513 = vmatpush2.bf16.msra.mxu0 %v5667_v9  ;;  %v1447_v62 = vld [vmem:[%s7089_s8 + $0x548] sm:$0xff] }
 0x193   : > { %v1750_v7 = vld [vmem:[%s7089_s8 + $0xec0] sm:$0xff]  ;;  %v5660_v11 = vcombine.high %v1622_v5, %v1626_v6  ;;  %4553 = vmatprep.subr.bf16.mxu1 %v5796_v4  ;;  %v5659_v17 = vcombine.low %v1622_v5, %v1626_v6  ;;  %v5358_v4 = vcombine.high %v1319_v60, %v1323_v61  ;;  %v5486_v5 = vcombine.high %v1447_v62, %v1451_v0  ;;  %v1311_v6 = vld [vmem:[%s7089_s8 + $0x108] sm:$0xff] }
 0x194   : > { %v1754_v8 = vld [vmem:[%s7089_s8 + $0xee0] sm:$0xff]  ;;  %4554 = vmatpush2.bf16.msra.mxu1 %v5795_v10  ;;  %v1443_v9 = vld [vmem:[%s7089_s8 + $0x528] sm:$0xff]  ;;  %v5357_v10 = vcombine.low %v1319_v60, %v1323_v61 }
 0x195   : > { %v5788_v12 = vcombine.high %v1750_v7, %v1754_v8  ;;  %v1614_v13 = vld [vmem:[%s7089_s8 + $0xa80] sm:$0xff]  ;;  %4514 = vmatprep.subr.bf16.mxu0 %v5660_v11  ;;  %v5787_v18 = vcombine.low %v1750_v7, %v1754_v8  ;;  %v1315_v7 = vld [vmem:[%s7089_s8 + $0x128] sm:$0xff]  ;;  %v5485_v11 = vcombine.low %v1447_v62, %v1451_v0 }
 0x196   : > { %v1618_v14 = vld [vmem:[%s7089_s8 + $0xaa0] sm:$0xff]  ;;  %4515 = vmatpush2.bf16.msra.mxu0 %v5659_v17  ;;  %v1439_v8 = vld [vmem:[%s7089_s8 + $0x508] sm:$0xff] }
 0x197   : > { %v1742_v15 = vld [vmem:[%s7089_s8 + $0xe80] sm:$0xff]  ;;  %v5652_v19 = vcombine.high %v1614_v13, %v1618_v14  ;;  %4555 = vmatprep.subr.bf16.mxu1 %v5788_v12  ;;  %v5651_v26 = vcombine.low %v1614_v13, %v1618_v14  ;;  %v5350_v12 = vcombine.high %v1311_v6, %v1315_v7  ;;  %v5478_v13 = vcombine.high %v1439_v8, %v1443_v9  ;;  %v1303_v14 = vld [vmem:[%s7089_s8 + $0xc8] sm:$0xff] }
 0x198   : > { %v1746_v16 = vld [vmem:[%s7089_s8 + $0xea0] sm:$0xff]  ;;  %4556 = vmatpush2.bf16.msra.mxu1 %v5787_v18  ;;  %v1435_v17 = vld [vmem:[%s7089_s8 + $0x4e8] sm:$0xff]  ;;  %v5349_v18 = vcombine.low %v1311_v6, %v1315_v7 }
 0x199   : > { %v5780_v20 = vcombine.high %v1742_v15, %v1746_v16  ;;  %v1606_v21 = vld [vmem:[%s7089_s8 + $0xa40] sm:$0xff]  ;;  %4516 = vmatprep.subr.bf16.mxu0 %v5652_v19  ;;  %v5779_v28 = vcombine.low %v1742_v15, %v1746_v16  ;;  %v1307_v15 = vld [vmem:[%s7089_s8 + $0xe8] sm:$0xff]  ;;  %v5477_v19 = vcombine.low %v1439_v8, %v1443_v9 }
 0x19a   : > { %v1610_v22 = vld [vmem:[%s7089_s8 + $0xa60] sm:$0xff]  ;;  %4517 = vmatpush2.bf16.msra.mxu0 %v5651_v26  ;;  %v1431_v16 = vld [vmem:[%s7089_s8 + $0x4c8] sm:$0xff] }
 0x19b   : > { %v1734_v24 = vld [vmem:[%s7089_s8 + $0xe40] sm:$0xff]  ;;  %v5644_v29 = vcombine.high %v1606_v21, %v1610_v22  ;;  %4557 = vmatprep.subr.bf16.mxu1 %v5780_v20  ;;  %v5643_v36 = vcombine.low %v1606_v21, %v1610_v22  ;;  %v5342_v20 = vcombine.high %v1303_v14, %v1307_v15  ;;  %v5470_v21 = vcombine.high %v1431_v16, %v1435_v17  ;;  %v1295_v22 = vld [vmem:[%s7089_s8 + $0x88] sm:$0xff] }
 0x19c   : > { %v1738_v25 = vld [vmem:[%s7089_s8 + $0xe60] sm:$0xff]  ;;  %4558 = vmatpush2.bf16.msra.mxu1 %v5779_v28  ;;  %v1427_v26 = vld [vmem:[%s7089_s8 + $0x4a8] sm:$0xff]  ;;  %v5341_v28 = vcombine.low %v1303_v14, %v1307_v15 }
 0x19d   : > { %v5772_v30 = vcombine.high %v1734_v24, %v1738_v25  ;;  %v1598_v31 = vld [vmem:[%s7089_s8 + $0xa00] sm:$0xff]  ;;  %4518 = vmatprep.subr.bf16.mxu0 %v5644_v29  ;;  %v5771_v37 = vcombine.low %v1734_v24, %v1738_v25  ;;  %v1299_v24 = vld [vmem:[%s7089_s8 + $0xa8] sm:$0xff]  ;;  %v5469_v29 = vcombine.low %v1431_v16, %v1435_v17 }
 0x19e   : > { %v1602_v32 = vld [vmem:[%s7089_s8 + $0xa20] sm:$0xff]  ;;  %4519 = vmatpush2.bf16.msra.mxu0 %v5643_v36  ;;  %v1423_v25 = vld [vmem:[%s7089_s8 + $0x488] sm:$0xff] }
 0x19f   : > { %v1726_v34 = vld [vmem:[%s7089_s8 + $0xe00] sm:$0xff]  ;;  %v5636_v38 = vcombine.high %v1598_v31, %v1602_v32  ;;  %4559 = vmatprep.subr.bf16.mxu1 %v5772_v30  ;;  %v5635_v45 = vcombine.low %v1598_v31, %v1602_v32  ;;  %v5334_v30 = vcombine.high %v1295_v22, %v1299_v24  ;;  %v5462_v31 = vcombine.high %v1423_v25, %v1427_v26  ;;  %v1287_v32 = vld [vmem:[%s7089_s8 + $0x48] sm:$0xff] }
 0x1a0   : > { %v1730_v57 = vld [vmem:[%s7089_s8 + $0xe20] sm:$0xff]  ;;  %4560 = vmatpush2.bf16.msra.mxu1 %v5771_v37  ;;  %v1419_v36 = vld [vmem:[%s7089_s8 + $0x468] sm:$0xff]  ;;  %v5333_v37 = vcombine.low %v1295_v22, %v1299_v24 }
 0x1a1   : > { %v5764_v39 = vcombine.high %v1726_v34, %v1730_v57  ;;  %4520 = vmatprep.subr.bf16.mxu0 %v5636_v38  ;;  %v5763_v46 = vcombine.low %v1726_v34, %v1730_v57  ;;  %v1291_v34 = vld [vmem:[%s7089_s8 + $0x68] sm:$0xff]  ;;  %v5461_v38 = vcombine.low %v1423_v25, %v1427_v26 }
 0x1a2   : > { %4521 = vmatpush2.bf16.msra.mxu0 %v5635_v45  ;;  %v1415_v57 = vld [vmem:[%s7089_s8 + $0x448] sm:$0xff] }
 0x1a3   : > { %4561 = vmatprep.subr.bf16.mxu1 %v5764_v39  ;;  %4572 = vmatprep.subr.bf16.mxu0 %v5374_v47  ;;  %v5326_v39 = vcombine.high %v1287_v32, %v1291_v34  ;;  %v5454_v40 = vcombine.high %v1415_v57, %v1419_v36  ;;  %v1279_v41 = vld [vmem:[%s7089_s8 + $0x8] sm:$0xff]  ;;  %v5453_v47 = vcombine.low %v1415_v57, %v1419_v36 }
 0x1a4   : > { %4562 = vmatpush2.bf16.msra.mxu1 %v5763_v46  ;;  %v1283_v23 = vld [vmem:[%s7089_s8 + $0x28] sm:$0xff]  ;;  %v5325_v46 = vcombine.low %v1287_v32, %v1291_v34 }
 0x1a5   : > { %4613 = vmatprep.subr.bf16.mxu1 %v5502_v49  ;;  %4523 = vmatmul.mubr.bf16.vlgmr.msra.gmra.mxu0 %v7144_v63  ;;  %v1407_v42 = vld [vmem:[%s7089_s8 + $0x408] sm:$0xff]  ;;  %v5318_v49 = vcombine.high %v1279_v41, %v1283_v23 }
 0x1a6   : > { %4573 = vmatpush1.bf16.msra.mxu0 %v5373_v55  ;;  %4604 = vmatprep.mubr.bf16.mxu0 %v7123_v43  ;;  %v1411_v45 = vld [vmem:[%s7089_s8 + $0x428] sm:$0xff] }
 0x1a7   : > { %4564 = vmatmul.mubr.bf16.vlgmr.msra.gmra.mxu1 %v7277_v54  ;;  %4574 = vmatprep.subr.bf16.mxu0 %v5366_v58  ;;  %v5446_v50 = vcombine.high %v1407_v42, %v1411_v45  ;;  %v1399_v51 = vld [vmem:[%s7089_s8 + $0x3c8] sm:$0xff]  ;;  %v5445_v58 = vcombine.low %v1407_v42, %v1411_v45 }
 0x1a8   : > { %4614 = vmatpush1.bf16.msra.mxu1 %v5501_v56  ;;  %4645 = vmatprep.mubr.bf16.mxu1 %v7127_v48  ;;  %v1403_v52 = vld [vmem:[%s7089_s8 + $0x3e8] sm:$0xff]  ;;  %v5317_v56 = vcombine.low %v1279_v41, %v1283_v23 }
 0x1a9   : > { %4615 = vmatprep.subr.bf16.mxu1 %v5494_v59  ;;  %v1527_v53 = vld [vmem:[%s7089_s8 + $0x7c8] sm:$0xff]  ;;  %v5438_v59 = vcombine.high %v1399_v51, %v1403_v52 }
 0x1aa   : > { %4575 = vmatpush1.bf16.msra.mxu0 %v5365_v1  ;;  %v1531_v55 = vld [vmem:[%s7089_s8 + $0x7e8] sm:$0xff] }
 0x1ab   : > { %4576 = vmatprep.subr.bf16.mxu0 %v5358_v4  ;;  %v5566_v60 = vcombine.high %v1527_v53, %v1531_v55  ;;  %v1391_v61 = vld [vmem:[%s7089_s8 + $0x388] sm:$0xff]  ;;  %v5565_v4 = vcombine.low %v1527_v53, %v1531_v55 }
 0x1ac   : > { %4616 = vmatpush1.bf16.msra.mxu1 %v5493_v2  ;;  %v1395_v62 = vld [vmem:[%s7089_s8 + $0x3a8] sm:$0xff]  ;;  %v5437_v2 = vcombine.low %v1399_v51, %v1403_v52 }
 0x1ad   : > { %4617 = vmatprep.subr.bf16.mxu1 %v5486_v5  ;;  %v1519_v0 = vld [vmem:[%s7089_s8 + $0x788] sm:$0xff]  ;;  %v5430_v5 = vcombine.high %v1391_v61, %v1395_v62 }
 0x1ae   : > { %4577 = vmatpush1.bf16.msra.mxu0 %v5357_v10  ;;  %v1523_v1 = vld [vmem:[%s7089_s8 + $0x7a8] sm:$0xff] }
 0x1af   : > { %4578 = vmatprep.subr.bf16.mxu0 %v5350_v12  ;;  %v5558_v6 = vcombine.high %v1519_v0, %v1523_v1  ;;  %v1383_v7 = vld [vmem:[%s7089_s8 + $0x348] sm:$0xff]  ;;  %v5557_v12 = vcombine.low %v1519_v0, %v1523_v1 }
 0x1b0   : > { %4618 = vmatpush1.bf16.msra.mxu1 %v5485_v11  ;;  %v1387_v8 = vld [vmem:[%s7089_s8 + $0x368] sm:$0xff]  ;;  %v5429_v11 = vcombine.low %v1391_v61, %v1395_v62 }
 0x1b1   : > { %4619 = vmatprep.subr.bf16.mxu1 %v5478_v13  ;;  %v1511_v9 = vld [vmem:[%s7089_s8 + $0x748] sm:$0xff]  ;;  %v5422_v13 = vcombine.high %v1383_v7, %v1387_v8 }
 0x1b2   : > { %4579 = vmatpush1.bf16.msra.mxu0 %v5349_v18  ;;  %v1515_v10 = vld [vmem:[%s7089_s8 + $0x768] sm:$0xff] }
 0x1b3   : > { %4580 = vmatprep.subr.bf16.mxu0 %v5342_v20  ;;  %v5550_v14 = vcombine.high %v1511_v9, %v1515_v10  ;;  %v1375_v15 = vld [vmem:[%s7089_s8 + $0x308] sm:$0xff]  ;;  %v5549_v20 = vcombine.low %v1511_v9, %v1515_v10 }
 0x1b4   : > { %4620 = vmatpush1.bf16.msra.mxu1 %v5477_v19  ;;  %v1379_v16 = vld [vmem:[%s7089_s8 + $0x328] sm:$0xff]  ;;  %v5421_v19 = vcombine.low %v1383_v7, %v1387_v8 }
 0x1b5   : > { %4621 = vmatprep.subr.bf16.mxu1 %v5470_v21  ;;  %v1503_v17 = vld [vmem:[%s7089_s8 + $0x708] sm:$0xff]  ;;  %v5414_v21 = vcombine.high %v1375_v15, %v1379_v16 }
 0x1b6   : > { %4581 = vmatpush1.bf16.msra.mxu0 %v5341_v28  ;;  %v1507_v18 = vld [vmem:[%s7089_s8 + $0x728] sm:$0xff] }
 0x1b7   : > { %4582 = vmatprep.subr.bf16.mxu0 %v5334_v30  ;;  %v5542_v22 = vcombine.high %v1503_v17, %v1507_v18  ;;  %v1367_v24 = vld [vmem:[%s7089_s8 + $0x2c8] sm:$0xff]  ;;  %v5541_v30 = vcombine.low %v1503_v17, %v1507_v18 }
 0x1b8   : > { %4622 = vmatpush1.bf16.msra.mxu1 %v5469_v29  ;;  %v1371_v25 = vld [vmem:[%s7089_s8 + $0x2e8] sm:$0xff]  ;;  %v5413_v29 = vcombine.low %v1375_v15, %v1379_v16 }
 0x1b9   : > { %4623 = vmatprep.subr.bf16.mxu1 %v5462_v31  ;;  %v1495_v26 = vld [vmem:[%s7089_s8 + $0x6c8] sm:$0xff]  ;;  %v5406_v31 = vcombine.high %v1367_v24, %v1371_v25 }
 0x1ba   : > { %4583 = vmatpush1.bf16.msra.mxu0 %v5333_v37  ;;  %v1499_v28 = vld [vmem:[%s7089_s8 + $0x6e8] sm:$0xff] }
 0x1bb   : > { %4584 = vmatprep.subr.bf16.mxu0 %v5326_v39  ;;  %v5534_v32 = vcombine.high %v1495_v26, %v1499_v28  ;;  %v1359_v34 = vld [vmem:[%s7089_s8 + $0x288] sm:$0xff]  ;;  %v5533_v39 = vcombine.low %v1495_v26, %v1499_v28 }
 0x1bc   : > { %4624 = vmatpush1.bf16.msra.mxu1 %v5461_v38  ;;  %v1363_v57 = vld [vmem:[%s7089_s8 + $0x2a8] sm:$0xff]  ;;  %v5405_v38 = vcombine.low %v1367_v24, %v1371_v25 }
 0x1bd   : > { %4625 = vmatprep.subr.bf16.mxu1 %v5454_v40  ;;  %v1487_v36 = vld [vmem:[%s7089_s8 + $0x688] sm:$0xff]  ;;  %v5398_v40 = vcombine.high %v1359_v34, %v1363_v57 }
 0x1be   : > { %4585 = vmatpush1.bf16.msra.mxu0 %v5325_v46  ;;  %v1491_v37 = vld [vmem:[%s7089_s8 + $0x6a8] sm:$0xff] }
 0x1bf   : > { %4586 = vmatprep.subr.bf16.mxu0 %v5318_v49  ;;  %v5526_v41 = vcombine.high %v1487_v36, %v1491_v37  ;;  %v1351_v23 = vld [vmem:[%s7089_s8 + $0x248] sm:$0xff]  ;;  %v5525_v49 = vcombine.low %v1487_v36, %v1491_v37 }
 0x1c0   : > { %4626 = vmatpush1.bf16.msra.mxu1 %v5453_v47  ;;  %v1355_v42 = vld [vmem:[%s7089_s8 + $0x268] sm:$0xff]  ;;  %v5397_v47 = vcombine.low %v1359_v34, %v1363_v57 }
 0x1c1   : > { %4627 = vmatprep.subr.bf16.mxu1 %v5446_v50  ;;  %v1479_v45 = vld [vmem:[%s7089_s8 + $0x648] sm:$0xff]  ;;  %v5390_v50 = vcombine.high %v1351_v23, %v1355_v42 }
 0x1c2   : > { %4587 = vmatpush1.bf16.msra.mxu0 %v5317_v56  ;;  %v1483_v46 = vld [vmem:[%s7089_s8 + $0x668] sm:$0xff] }
 0x1c3   : > { %4588 = vmatprep.subr.bf16.mxu0 %v5438_v59  ;;  %v5518_v51 = vcombine.high %v1479_v45, %v1483_v46  ;;  %v1343_v52 = vld [vmem:[%s7089_s8 + $0x208] sm:$0xff]  ;;  %v5517_v59 = vcombine.low %v1479_v45, %v1483_v46 }
 0x1c4   : > { %4628 = vmatpush1.bf16.msra.mxu1 %v5445_v58  ;;  %v1347_v53 = vld [vmem:[%s7089_s8 + $0x228] sm:$0xff]  ;;  %v5389_v58 = vcombine.low %v1351_v23, %v1355_v42 }
 0x1c5   : > { %4629 = vmatprep.subr.bf16.mxu1 %v5566_v60  ;;  %v1471_v55 = vld [vmem:[%s7089_s8 + $0x608] sm:$0xff]  ;;  %v5382_v60 = vcombine.high %v1343_v52, %v1347_v53 }
 0x1c6   : > { %4589 = vmatpush2.bf16.msra.mxu0 %v5437_v2  ;;  %v1475_v56 = vld [vmem:[%s7089_s8 + $0x628] sm:$0xff] }
 0x1c7   : > { %4590 = vmatprep.subr.bf16.mxu0 %v5430_v5  ;;  %v5510_v61 = vcombine.high %v1471_v55, %v1475_v56  ;;  %v1591_v62 = vld [vmem:[%s7089_s8 + $0x9c8] sm:$0xff]  ;;  %v5509_v5 = vcombine.low %v1471_v55, %v1475_v56 }
 0x1c8   : > { %4630 = vmatpush2.bf16.msra.mxu1 %v5565_v4  ;;  %v1595_v0 = vld [vmem:[%s7089_s8 + $0x9e8] sm:$0xff]  ;;  %v5381_v4 = vcombine.low %v1343_v52, %v1347_v53 }
 0x1c9   : > { %4631 = vmatprep.subr.bf16.mxu1 %v5558_v6  ;;  %v1719_v1 = vld [vmem:[%s7089_s8 + $0xdc8] sm:$0xff]  ;;  %v5630_v6 = vcombine.high %v1591_v62, %v1595_v0 }
 0x1ca   : > { %4591 = vmatpush2.bf16.msra.mxu0 %v5429_v11  ;;  %v1723_v2 = vld [vmem:[%s7089_s8 + $0xde8] sm:$0xff] }
 0x1cb   : > { %4592 = vmatprep.subr.bf16.mxu0 %v5422_v13  ;;  %v5758_v7 = vcombine.high %v1719_v1, %v1723_v2  ;;  %v1583_v8 = vld [vmem:[%s7089_s8 + $0x988] sm:$0xff]  ;;  %v5757_v13 = vcombine.low %v1719_v1, %v1723_v2 }
 0x1cc   : > { %4632 = vmatpush2.bf16.msra.mxu1 %v5557_v12  ;;  %v1587_v9 = vld [vmem:[%s7089_s8 + $0x9a8] sm:$0xff]  ;;  %v5629_v12 = vcombine.low %v1591_v62, %v1595_v0 }
 0x1cd   : > { %4633 = vmatprep.subr.bf16.mxu1 %v5550_v14  ;;  %v1711_v10 = vld [vmem:[%s7089_s8 + $0xd88] sm:$0xff]  ;;  %v5622_v14 = vcombine.high %v1583_v8, %v1587_v9 }
 0x1ce   : > { %4593 = vmatpush2.bf16.msra.mxu0 %v5421_v19  ;;  %v1715_v11 = vld [vmem:[%s7089_s8 + $0xda8] sm:$0xff] }
 0x1cf   : > { %4594 = vmatprep.subr.bf16.mxu0 %v5414_v21  ;;  %v5750_v15 = vcombine.high %v1711_v10, %v1715_v11  ;;  %v1575_v16 = vld [vmem:[%s7089_s8 + $0x948] sm:$0xff]  ;;  %v5749_v21 = vcombine.low %v1711_v10, %v1715_v11 }
 0x1d0   : > { %4634 = vmatpush2.bf16.msra.mxu1 %v5549_v20  ;;  %v1579_v17 = vld [vmem:[%s7089_s8 + $0x968] sm:$0xff]  ;;  %v5621_v20 = vcombine.low %v1583_v8, %v1587_v9 }
 0x1d1   : > { %4635 = vmatprep.subr.bf16.mxu1 %v5542_v22  ;;  %v1703_v18 = vld [vmem:[%s7089_s8 + $0xd48] sm:$0xff]  ;;  %v5614_v22 = vcombine.high %v1575_v16, %v1579_v17 }
 0x1d2   : > { %4595 = vmatpush2.bf16.msra.mxu0 %v5413_v29  ;;  %v1707_v19 = vld [vmem:[%s7089_s8 + $0xd68] sm:$0xff] }
 0x1d3   : > { %4596 = vmatprep.subr.bf16.mxu0 %v5406_v31  ;;  %v5742_v24 = vcombine.high %v1703_v18, %v1707_v19  ;;  %v1567_v25 = vld [vmem:[%s7089_s8 + $0x908] sm:$0xff]  ;;  %v5741_v31 = vcombine.low %v1703_v18, %v1707_v19 }
 0x1d4   : > { %4636 = vmatpush2.bf16.msra.mxu1 %v5541_v30  ;;  %v1571_v26 = vld [vmem:[%s7089_s8 + $0x928] sm:$0xff]  ;;  %v5613_v30 = vcombine.low %v1575_v16, %v1579_v17 }
 0x1d5   : > { %4637 = vmatprep.subr.bf16.mxu1 %v5534_v32  ;;  %v1695_v28 = vld [vmem:[%s7089_s8 + $0xd08] sm:$0xff]  ;;  %v5606_v32 = vcombine.high %v1567_v25, %v1571_v26 }
 0x1d6   : > { %4597 = vmatpush2.bf16.msra.mxu0 %v5405_v38  ;;  %v1699_v29 = vld [vmem:[%s7089_s8 + $0xd28] sm:$0xff] }
 0x1d7   : > { %4598 = vmatprep.subr.bf16.mxu0 %v5398_v40  ;;  %v5734_v34 = vcombine.high %v1695_v28, %v1699_v29  ;;  %v1559_v57 = vld [vmem:[%s7089_s8 + $0x8c8] sm:$0xff]  ;;  %v5733_v40 = vcombine.low %v1695_v28, %v1699_v29 }
 0x1d8   : > { %4638 = vmatpush2.bf16.msra.mxu1 %v5533_v39  ;;  %v1563_v36 = vld [vmem:[%s7089_s8 + $0x8e8] sm:$0xff]  ;;  %v5605_v39 = vcombine.low %v1567_v25, %v1571_v26 }
 0x1d9   : > { %4639 = vmatprep.subr.bf16.mxu1 %v5526_v41  ;;  %v1687_v37 = vld [vmem:[%s7089_s8 + $0xcc8] sm:$0xff]  ;;  %v5598_v41 = vcombine.high %v1559_v57, %v1563_v36 }
 0x1da   : > { %4599 = vmatpush2.bf16.msra.mxu0 %v5397_v47  ;;  %v1691_v38 = vld [vmem:[%s7089_s8 + $0xce8] sm:$0xff] }
 0x1db   : > { %4600 = vmatprep.subr.bf16.mxu0 %v5390_v50  ;;  %v5726_v23 = vcombine.high %v1687_v37, %v1691_v38  ;;  %v1551_v42 = vld [vmem:[%s7089_s8 + $0x888] sm:$0xff]  ;;  %v5725_v50 = vcombine.low %v1687_v37, %v1691_v38 }
 0x1dc   : > { %4640 = vmatpush2.bf16.msra.mxu1 %v5525_v49  ;;  %v1555_v45 = vld [vmem:[%s7089_s8 + $0x8a8] sm:$0xff]  ;;  %v5597_v49 = vcombine.low %v1559_v57, %v1563_v36 }
 0x1dd   : > { %4641 = vmatprep.subr.bf16.mxu1 %v5518_v51  ;;  %v1679_v46 = vld [vmem:[%s7089_s8 + $0xc88] sm:$0xff]  ;;  %v5590_v51 = vcombine.high %v1551_v42, %v1555_v45 }
 0x1de   : > { %4601 = vmatpush2.bf16.msra.mxu0 %v5389_v58  ;;  %v1683_v47 = vld [vmem:[%s7089_s8 + $0xca8] sm:$0xff] }
 0x1df   : > { %4602 = vmatprep.subr.bf16.mxu0 %v5382_v60  ;;  %v5718_v52 = vcombine.high %v1679_v46, %v1683_v47  ;;  %v1543_v53 = vld [vmem:[%s7089_s8 + $0x848] sm:$0xff]  ;;  %v5717_v60 = vcombine.low %v1679_v46, %v1683_v47 }
 0x1e0   : > { %4642 = vmatpush2.bf16.msra.mxu1 %v5517_v59  ;;  %v1547_v55 = vld [vmem:[%s7089_s8 + $0x868] sm:$0xff]  ;;  %v5589_v59 = vcombine.low %v1551_v42, %v1555_v45 }
 0x1e1   : > { %4643 = vmatprep.subr.bf16.mxu1 %v5510_v61  ;;  %v1671_v56 = vld [vmem:[%s7089_s8 + $0xc48] sm:$0xff]  ;;  %v5582_v61 = vcombine.high %v1543_v53, %v1547_v55 }
 0x1e2   : > { %4603 = vmatpush2.bf16.msra.mxu0 %v5381_v4  ;;  %v1675_v58 = vld [vmem:[%s7089_s8 + $0xc68] sm:$0xff] }
 0x1e3   : > { %4654 = vmatprep.subr.bf16.mxu0 %v5630_v6  ;;  %v5710_v62 = vcombine.high %v1671_v56, %v1675_v58  ;;  %v1535_v0 = vld [vmem:[%s7089_s8 + $0x808] sm:$0xff]  ;;  %v5709_v6 = vcombine.low %v1671_v56, %v1675_v58 }
 0x1e4   : > { %4644 = vmatpush2.bf16.msra.mxu1 %v5509_v5  ;;  %v1539_v1 = vld [vmem:[%s7089_s8 + $0x828] sm:$0xff]  ;;  %v5581_v5 = vcombine.low %v1543_v53, %v1547_v55 }
 0x1e5   : > { %4695 = vmatprep.subr.bf16.mxu1 %v5758_v7  ;;  %4605 = vmatmul.mubr.bf16.vlgmr.msra.gmra.mxu0 %v7190_v27  ;;  %v1663_v2 = vld [vmem:[%s7089_s8 + $0xc08] sm:$0xff]  ;;  %v5574_v7 = vcombine.high %v1535_v0, %v1539_v1 }
 0x1e6   : > { %4655 = vmatpush1.bf16.msra.mxu0 %v5629_v12  ;;  %4686 = vmatprep.mubr.bf16.mxu0 %v7197_v35  ;;  %v1667_v4 = vld [vmem:[%s7089_s8 + $0xc28] sm:$0xff] }
 0x1e7   : > { %4646 = vmatmul.mubr.bf16.vlgmr.msra.gmra.mxu1 %v7201_v33  ;;  %4656 = vmatprep.subr.bf16.mxu0 %v5622_v14  ;;  %v5702_v8 = vcombine.high %v1663_v2, %v1667_v4  ;;  %v1655_v9 = vld [vmem:[%s7089_s8 + $0xbc8] sm:$0xff]  ;;  %v5701_v14 = vcombine.low %v1663_v2, %v1667_v4 }
 0x1e8   : > { %4696 = vmatpush1.bf16.msra.mxu1 %v5757_v13  ;;  %4727 = vmatprep.mubr.bf16.mxu1 %v7210_v44  ;;  %v1659_v10 = vld [vmem:[%s7089_s8 + $0xbe8] sm:$0xff]  ;;  %v5573_v13 = vcombine.low %v1535_v0, %v1539_v1 }
 0x1e9   : > { %4697 = vmatprep.subr.bf16.mxu1 %v5750_v15  ;;  %v1783_v11 = vld [vmem:[%s7089_s8 + $0xfc8] sm:$0xff]  ;;  %v5694_v15 = vcombine.high %v1655_v9, %v1659_v10 }
 0x1ea   : > { %4657 = vmatpush1.bf16.msra.mxu0 %v5621_v20  ;;  %v1787_v12 = vld [vmem:[%s7089_s8 + $0xfe8] sm:$0xff] }
 0x1eb   : > { %4658 = vmatprep.subr.bf16.mxu0 %v5614_v22  ;;  %v5822_v16 = vcombine.high %v1783_v11, %v1787_v12  ;;  %v1647_v17 = vld [vmem:[%s7089_s8 + $0xb88] sm:$0xff]  ;;  %v5821_v22 = vcombine.low %v1783_v11, %v1787_v12 }
 0x1ec   : > { %4698 = vmatpush1.bf16.msra.mxu1 %v5749_v21  ;;  %v1651_v18 = vld [vmem:[%s7089_s8 + $0xba8] sm:$0xff]  ;;  %v5693_v21 = vcombine.low %v1655_v9, %v1659_v10 }
 0x1ed   : > { %4699 = vmatprep.subr.bf16.mxu1 %v5742_v24  ;;  %v1775_v19 = vld [vmem:[%s7089_s8 + $0xf88] sm:$0xff]  ;;  %v5686_v24 = vcombine.high %v1647_v17, %v1651_v18 }
 0x1ee   : > { %4659 = vmatpush1.bf16.msra.mxu0 %v5613_v30  ;;  %v1779_v20 = vld [vmem:[%s7089_s8 + $0xfa8] sm:$0xff] }
 0x1ef   : > { %4660 = vmatprep.subr.bf16.mxu0 %v5606_v32  ;;  %v5814_v25 = vcombine.high %v1775_v19, %v1779_v20  ;;  %v1639_v26 = vld [vmem:[%s7089_s8 + $0xb48] sm:$0xff]  ;;  %v5813_v32 = vcombine.low %v1775_v19, %v1779_v20  ;;  %v1340_v19 = vld [vmem:[%s7089_s8 + $0x1f0] sm:$0xff] }
 0x1f0   : > { %4700 = vmatpush1.bf16.msra.mxu1 %v5741_v31  ;;  %v1643_v28 = vld [vmem:[%s7089_s8 + $0xb68] sm:$0xff]  ;;  %v5685_v31 = vcombine.low %v1647_v17, %v1651_v18  ;;  %v1336_v18 = vld [vmem:[%s7089_s8 + $0x1d0] sm:$0xff] }
 0x1f1   : > { %4701 = vmatprep.subr.bf16.mxu1 %v5734_v34  ;;  %v1767_v29 = vld [vmem:[%s7089_s8 + $0xf48] sm:$0xff]  ;;  %v5678_v34 = vcombine.high %v1639_v26, %v1643_v28  ;;  %v1464_v20 = vld [vmem:[%s7089_s8 + $0x5d0] sm:$0xff] }
 0x1f2   : > { %4661 = vmatpush1.bf16.msra.mxu0 %v5605_v39  ;;  %v1771_v30 = vld [vmem:[%s7089_s8 + $0xf68] sm:$0xff] }
 0x1f3   : > { %4662 = vmatprep.subr.bf16.mxu0 %v5598_v41  ;;  %v5806_v57 = vcombine.high %v1767_v29, %v1771_v30  ;;  %v1631_v36 = vld [vmem:[%s7089_s8 + $0xb08] sm:$0xff]  ;;  %v5805_v41 = vcombine.low %v1767_v29, %v1771_v30  ;;  %v1332_v29 = vld [vmem:[%s7089_s8 + $0x1b0] sm:$0xff] }
 0x1f4   : > { %4702 = vmatpush1.bf16.msra.mxu1 %v5733_v40  ;;  %v1635_v37 = vld [vmem:[%s7089_s8 + $0xb28] sm:$0xff]  ;;  %v5677_v40 = vcombine.low %v1639_v26, %v1643_v28  ;;  %v1328_v28 = vld [vmem:[%s7089_s8 + $0x190] sm:$0xff] }
 0x1f5   : > { %4703 = vmatprep.subr.bf16.mxu1 %v5726_v23  ;;  %v1759_v38 = vld [vmem:[%s7089_s8 + $0xf08] sm:$0xff]  ;;  %v5670_v23 = vcombine.high %v1631_v36, %v1635_v37  ;;  %v1456_v30 = vld [vmem:[%s7089_s8 + $0x590] sm:$0xff] }
 0x1f6   : > { %4663 = vmatpush1.bf16.msra.mxu0 %v5597_v49  ;;  %v1763_v39 = vld [vmem:[%s7089_s8 + $0xf28] sm:$0xff] }
 0x1f7   : > { %4664 = vmatprep.subr.bf16.mxu0 %v5590_v51  ;;  %v5798_v42 = vcombine.high %v1759_v38, %v1763_v39  ;;  %v1623_v45 = vld [vmem:[%s7089_s8 + $0xac8] sm:$0xff]  ;;  %v5797_v51 = vcombine.low %v1759_v38, %v1763_v39  ;;  %v1324_v38 = vld [vmem:[%s7089_s8 + $0x170] sm:$0xff] }
 0x1f8   : > { %4704 = vmatpush1.bf16.msra.mxu1 %v5725_v50  ;;  %v1627_v46 = vld [vmem:[%s7089_s8 + $0xae8] sm:$0xff]  ;;  %v5669_v50 = vcombine.low %v1631_v36, %v1635_v37  ;;  %v1320_v37 = vld [vmem:[%s7089_s8 + $0x150] sm:$0xff] }
 0x1f9   : > { %4705 = vmatprep.subr.bf16.mxu1 %v5718_v52  ;;  %v1751_v47 = vld [vmem:[%s7089_s8 + $0xec8] sm:$0xff]  ;;  %v5662_v52 = vcombine.high %v1623_v45, %v1627_v46 }
 0x1fa   : > { %4665 = vmatpush1.bf16.msra.mxu0 %v5589_v59  ;;  %v1755_v49 = vld [vmem:[%s7089_s8 + $0xee8] sm:$0xff] }
 0x1fb   : > { %4666 = vmatprep.subr.bf16.mxu0 %v5582_v61  ;;  %v5790_v53 = vcombine.high %v1751_v47, %v1755_v49  ;;  %v1615_v55 = vld [vmem:[%s7089_s8 + $0xa88] sm:$0xff]  ;;  %v5789_v61 = vcombine.low %v1751_v47, %v1755_v49  ;;  %v5360_v49 = vcombine.high %v1320_v37, %v1324_v38 }
 0x1fc   : > { %4706 = vmatpush1.bf16.msra.mxu1 %v5717_v60  ;;  %v1619_v56 = vld [vmem:[%s7089_s8 + $0xaa8] sm:$0xff]  ;;  %v5661_v60 = vcombine.low %v1623_v45, %v1627_v46 }
 0x1fd   : > { %4707 = vmatprep.subr.bf16.mxu1 %v5710_v62  ;;  %v1743_v58 = vld [vmem:[%s7089_s8 + $0xe88] sm:$0xff]  ;;  %v5654_v62 = vcombine.high %v1615_v55, %v1619_v56 }
 0x1fe   : > { %4667 = vmatpush1.bf16.msra.mxu0 %v5581_v5  ;;  %v1747_v59 = vld [vmem:[%s7089_s8 + $0xea8] sm:$0xff] }
 0x1ff   : > { %4668 = vmatprep.subr.bf16.mxu0 %v5574_v7  ;;  %v5782_v0 = vcombine.high %v1743_v58, %v1747_v59  ;;  %v1607_v1 = vld [vmem:[%s7089_s8 + $0xa48] sm:$0xff]  ;;  %v5781_v7 = vcombine.low %v1743_v58, %v1747_v59  ;;  %v1440_v58 = vld [vmem:[%s7089_s8 + $0x510] sm:$0xff] }
 0x200   : > { %4708 = vmatpush1.bf16.msra.mxu1 %v5709_v6  ;;  %v1611_v2 = vld [vmem:[%s7089_s8 + $0xa68] sm:$0xff]  ;;  %v5653_v6 = vcombine.low %v1615_v55, %v1619_v56  ;;  %v1444_v59 = vld [vmem:[%s7089_s8 + $0x530] sm:$0xff] }
 0x201   : > { %4709 = vmatprep.subr.bf16.mxu1 %v5702_v8  ;;  %v1735_v4 = vld [vmem:[%s7089_s8 + $0xe48] sm:$0xff]  ;;  %v5646_v8 = vcombine.high %v1607_v1, %v1611_v2 }
 0x202   : > { %4669 = vmatpush1.bf16.msra.mxu0 %v5573_v13  ;;  %v1739_v5 = vld [vmem:[%s7089_s8 + $0xe68] sm:$0xff] }
 0x203   : > { %4670 = vmatprep.subr.bf16.mxu0 %v5694_v15  ;;  %v5774_v9 = vcombine.high %v1735_v4, %v1739_v5  ;;  %v1599_v10 = vld [vmem:[%s7089_s8 + $0xa08] sm:$0xff]  ;;  %v5773_v15 = vcombine.low %v1735_v4, %v1739_v5  ;;  %v5480_v4 = vcombine.high %v1440_v58, %v1444_v59  ;;  %v1304_v5 = vld [vmem:[%s7089_s8 + $0xd0] sm:$0xff] }
 0x204   : > { %4710 = vmatpush1.bf16.msra.mxu1 %v5701_v14  ;;  %v1603_v11 = vld [vmem:[%s7089_s8 + $0xa28] sm:$0xff]  ;;  %v5645_v14 = vcombine.low %v1607_v1, %v1611_v2 }
 0x205   : > { %4711 = vmatprep.subr.bf16.mxu1 %v5822_v16  ;;  %v1727_v12 = vld [vmem:[%s7089_s8 + $0xe08] sm:$0xff]  ;;  %v5638_v16 = vcombine.high %v1599_v10, %v1603_v11 }
 0x206   : > { %4671 = vmatpush2.bf16.msra.mxu0 %v5693_v21  ;;  %v1731_v13 = vld [vmem:[%s7089_s8 + $0xe28] sm:$0xff]  ;;  %v1468_v21 = vld [vmem:[%s7089_s8 + $0x5f0] sm:$0xff] }
 0x207   : > { %4672 = vmatprep.subr.bf16.mxu0 %v5686_v24  ;;  %v5766_v17 = vcombine.high %v1727_v12, %v1731_v13  ;;  %v5765_v24 = vcombine.low %v1727_v12, %v1731_v13  ;;  %v5504_v26 = vcombine.high %v1464_v20, %v1468_v21  ;;  %v1296_v13 = vld [vmem:[%s7089_s8 + $0x90] sm:$0xff] }
 0x208   : > { %4712 = vmatpush2.bf16.msra.mxu1 %v5821_v22  ;;  %v5637_v22 = vcombine.low %v1599_v10, %v1603_v11  ;;  %v5479_v10 = vcombine.low %v1440_v58, %v1444_v59 }
 0x209   : > { %4713 = vmatprep.subr.bf16.mxu1 %v5814_v25  ;;  %v5376_v25 = vcombine.high %v1336_v18, %v1340_v19 }
 0x20a   : > { %4673 = vmatpush2.bf16.msra.mxu0 %v5685_v31  ;;  %v1460_v31 = vld [vmem:[%s7089_s8 + $0x5b0] sm:$0xff] }
 0x20b   : > { %4674 = vmatprep.subr.bf16.mxu0 %v5678_v34  ;;  %v5503_v34 = vcombine.low %v1464_v20, %v1468_v21  ;;  %v5496_v36 = vcombine.high %v1456_v30, %v1460_v31  ;;  %v5495_v47 = vcombine.low %v1456_v30, %v1460_v31  ;;  %v1288_v21 = vld [vmem:[%s7089_s8 + $0x50] sm:$0xff] }
 0x20c   : > { %4714 = vmatpush2.bf16.msra.mxu1 %v5813_v32  ;;  %v5375_v32 = vcombine.low %v1336_v18, %v1340_v19  ;;  %v1280_v31 = vld [vmem:[%s7089_s8 + $0x10] sm:$0xff] }
 0x20d   : > { %4715 = vmatprep.subr.bf16.mxu1 %v5806_v57  ;;  %v5368_v57 = vcombine.high %v1328_v28, %v1332_v29 }
 0x20e   : > { %4675 = vmatpush2.bf16.msra.mxu0 %v5677_v40  ;;  %v1448_v40 = vld [vmem:[%s7089_s8 + $0x550] sm:$0xff] }
 0x20f   : > { %4676 = vmatprep.subr.bf16.mxu0 %v5670_v23 }
 0x210   : > { %4716 = vmatpush2.bf16.msra.mxu1 %v5805_v41  ;;  %v1452_v41 = vld [vmem:[%s7089_s8 + $0x570] sm:$0xff] }
 0x211   : > { %4717 = vmatprep.subr.bf16.mxu1 %v5798_v42  ;;  %v5367_v42 = vcombine.low %v1328_v28, %v1332_v29 }
 0x212   : > { %4677 = vmatpush2.bf16.msra.mxu0 %v5669_v50 }
 0x213   : > { %4678 = vmatprep.subr.bf16.mxu0 %v5662_v52  ;;  %v1312_v52 = vld [vmem:[%s7089_s8 + $0x110] sm:$0xff] }
 0x214   : > { %4718 = vmatpush2.bf16.msra.mxu1 %v5797_v51  ;;  %v5488_v51 = vcombine.high %v1448_v40, %v1452_v41 }
 0x215   : > { %4719 = vmatprep.subr.bf16.mxu1 %v5790_v53  ;;  %v1316_v53 = vld [vmem:[%s7089_s8 + $0x130] sm:$0xff] }
 0x216   : > { %4679 = vmatpush2.bf16.msra.mxu0 %v5661_v60  ;;  %v5352_v1 = vcombine.high %v1312_v52, %v1316_v53 }
 0x217   : > { %4680 = vmatprep.subr.bf16.mxu0 %v5654_v62 }
 0x218   : > { %4720 = vmatpush2.bf16.msra.mxu1 %v5789_v61  ;;  %v5359_v61 = vcombine.low %v1320_v37, %v1324_v38 }
 0x219   : > { %4721 = vmatprep.subr.bf16.mxu1 %v5782_v0  ;;  %v5487_v0 = vcombine.low %v1448_v40, %v1452_v41  ;;  %v1400_v40 = vld [vmem:[%s7089_s8 + $0x3d0] sm:$0xff] }
 0x21a   : > { %4681 = vmatpush2.bf16.msra.mxu0 %v5653_v6  ;;  %v1308_v6 = vld [vmem:[%s7089_s8 + $0xf0] sm:$0xff] }
 0x21b   : > { %4682 = vmatprep.subr.bf16.mxu0 %v5646_v8  ;;  %v1436_v8 = vld [vmem:[%s7089_s8 + $0x4f0] sm:$0xff]  ;;  %v5344_v11 = vcombine.high %v1304_v5, %v1308_v6 }
 0x21c   : > { %4722 = vmatpush2.bf16.msra.mxu1 %v5781_v7  ;;  %v1432_v7 = vld [vmem:[%s7089_s8 + $0x4d0] sm:$0xff] }
 0x21d   : > { %4723 = vmatprep.subr.bf16.mxu1 %v5774_v9  ;;  %v5351_v9 = vcombine.low %v1312_v52, %v1316_v53  ;;  %v5472_v12 = vcombine.high %v1432_v7, %v1436_v8  ;;  %v5471_v18 = vcombine.low %v1432_v7, %v1436_v8  ;;  %v1404_v41 = vld [vmem:[%s7089_s8 + $0x3f0] sm:$0xff] }
 0x21e   : > { %4683 = vmatpush2.bf16.msra.mxu0 %v5645_v14  ;;  %v1300_v14 = vld [vmem:[%s7089_s8 + $0xb0] sm:$0xff]  ;;  %v5439_v58 = vcombine.low %v1400_v40, %v1404_v41 }
 0x21f   : > { %4684 = vmatprep.subr.bf16.mxu0 %v5638_v16  ;;  %v1428_v16 = vld [vmem:[%s7089_s8 + $0x4b0] sm:$0xff]  ;;  %v5336_v19 = vcombine.high %v1296_v13, %v1300_v14 }
 0x220   : > { %4724 = vmatpush2.bf16.msra.mxu1 %v5773_v15  ;;  %v1424_v15 = vld [vmem:[%s7089_s8 + $0x490] sm:$0xff] }
 0x221   : > { %4725 = vmatprep.subr.bf16.mxu1 %v5766_v17  ;;  %v5343_v17 = vcombine.low %v1304_v5, %v1308_v6  ;;  %v5464_v20 = vcombine.high %v1424_v15, %v1428_v16  ;;  %v5463_v28 = vcombine.low %v1424_v15, %v1428_v16  ;;  %v1396_v52 = vld [vmem:[%s7089_s8 + $0x3b0] sm:$0xff] }
 0x222   : > { %4685 = vmatpush2.bf16.msra.mxu0 %v5637_v22  ;;  %v1292_v22 = vld [vmem:[%s7089_s8 + $0x70] sm:$0xff] }
 0x223   : > { %4736 = vmatprep.subr.bf16.mxu0 %v5376_v25  ;;  %v1420_v25 = vld [vmem:[%s7089_s8 + $0x470] sm:$0xff]  ;;  %v5328_v29 = vcombine.high %v1288_v21, %v1292_v22 }
 0x224   : > { %4726 = vmatpush2.bf16.msra.mxu1 %v5765_v24  ;;  %v1416_v24 = vld [vmem:[%s7089_s8 + $0x450] sm:$0xff] }
 0x225   : > { %4777 = vmatprep.subr.bf16.mxu1 %v5504_v26  ;;  %v4442_v39 = vpop.f32.mrf.mxu0  ;;  %4687 = vmatmul.mubr.bf16.vlgmr.msra.gmra.mxu0 %v7144_v63  ;;  %v5335_v26 = vcombine.low %v1296_v13, %v1300_v14  ;;  %v5456_v30 = vcombine.high %v1416_v24, %v1420_v25  ;;  %v5455_v37 = vcombine.low %v1416_v24, %v1420_v25  ;;  %v1520_v53 = vld [vmem:[%s7089_s8 + $0x790] sm:$0xff] }
 0x226   : > { %4737 = vmatpush1.bf16.msra.mxu0 %v5375_v32  ;;  %4768 = vmatprep.mubr.bf16.mxu0 %v7123_v43  ;;  %v1284_v32 = vld [vmem:[%s7089_s8 + $0x30] sm:$0xff] }
 0x227   : > { %v4483_v23 = vpop.f32.mrf.mxu1  ;;  %4728 = vmatmul.mubr.bf16.vlgmr.msra.gmra.mxu1 %v7277_v54  ;;  %v4444_v46 = vpop.f32.mrf.mxu0  ;;  %4738 = vmatprep.subr.bf16.mxu0 %v5368_v57  ;;  %v1412_v57 = vld [vmem:[%s7089_s8 + $0x430] sm:$0xff]  ;;  %v5320_v38 = vcombine.high %v1280_v31, %v1284_v32 }
 0x228   : > { %v7421_v45 = vadd.f32 %v4483_v23, %v4442_v39  ;;  %4778 = vmatpush1.bf16.msra.mxu1 %v5503_v34  ;;  %4809 = vmatprep.mubr.bf16.mxu1 %v7127_v48  ;;  %v1408_v34 = vld [vmem:[%s7089_s8 + $0x410] sm:$0xff] }
 0x229   : > { %v4485_v50 = vpop.f32.mrf.mxu1  ;;  %4779 = vmatprep.subr.bf16.mxu1 %v5496_v36  ;;  %v4446_v56 = vpop.f32.mrf.mxu0  ;;  %v5327_v36 = vcombine.low %v1288_v21, %v1292_v22  ;;  %v5448_v39 = vcombine.high %v1408_v34, %v1412_v57  ;;  %v1528_v23 = vld [vmem:[%s7089_s8 + $0x7d0] sm:$0xff] }
 0x22a   : > { %v7426_v55 = vadd.f32 %v4485_v50, %v4444_v46  ;;  %4739 = vmatpush1.bf16.msra.mxu0 %v5367_v42  ;;  %v1532_v42 = vld [vmem:[%s7089_s8 + $0x7f0] sm:$0xff]  ;;  %v5319_v46 = vcombine.low %v1280_v31, %v1284_v32 }
 0x22b   : > { %v4487_v60 = vpop.f32.mrf.mxu1  ;;  %v4447_v62 = vpop.f32.mrf.mxu0  ;;  %4740 = vmatprep.subr.bf16.mxu0 %v5360_v49  ;;  %v5440_v49 = vcombine.high %v1400_v40, %v1404_v41  ;;  %v5568_v50 = vcombine.high %v1528_v23, %v1532_v42  ;;  %v1524_v56 = vld [vmem:[%s7089_s8 + $0x7b0] sm:$0xff]  ;;  %v5567_v59 = vcombine.low %v1528_v23, %v1532_v42 }
 0x22c   : > { %4780 = vmatpush1.bf16.msra.mxu1 %v5495_v47  ;;  %v5447_v47 = vcombine.low %v1408_v34, %v1412_v57  ;;  %v1384_v62 = vld [vmem:[%s7089_s8 + $0x350] sm:$0xff]  ;;  %v5559_v5 = vcombine.low %v1520_v53, %v1524_v56 }
 0x22d   : > { %v4488_v2 = vpop.f32.mrf.mxu1  ;;  %4781 = vmatprep.subr.bf16.mxu1 %v5488_v51  ;;  %v1392_v51 = vld [vmem:[%s7089_s8 + $0x390] sm:$0xff] }
 0x22e   : > { %4741 = vmatpush1.bf16.msra.mxu0 %v5359_v61  ;;  %v5432_v60 = vcombine.high %v1392_v51, %v1396_v52  ;;  %v5560_v61 = vcombine.high %v1520_v53, %v1524_v56  ;;  %v1516_v2 = vld [vmem:[%s7089_s8 + $0x770] sm:$0xff] }
 0x22f   : > { %4742 = vmatprep.subr.bf16.mxu0 %v5352_v1  ;;  %v1512_v1 = vld [vmem:[%s7089_s8 + $0x750] sm:$0xff] }
 0x230   : > { %4782 = vmatpush1.bf16.msra.mxu1 %v5487_v0  ;;  %v1388_v0 = vld [vmem:[%s7089_s8 + $0x370] sm:$0xff]  ;;  %v5552_v7 = vcombine.high %v1512_v1, %v1516_v2  ;;  %v5551_v13 = vcombine.low %v1512_v1, %v1516_v2 }
 0x231   : > { %4783 = vmatprep.subr.bf16.mxu1 %v5480_v4  ;;  %v5431_v4 = vcombine.low %v1392_v51, %v1396_v52  ;;  %v5424_v6 = vcombine.high %v1384_v62, %v1388_v0  ;;  %v1376_v8 = vld [vmem:[%s7089_s8 + $0x310] sm:$0xff] }
 0x232   : > { %4743 = vmatpush1.bf16.msra.mxu0 %v5351_v9  ;;  %v1380_v9 = vld [vmem:[%s7089_s8 + $0x330] sm:$0xff] }
 0x233   : > { %4744 = vmatprep.subr.bf16.mxu0 %v5344_v11  ;;  %v1508_v11 = vld [vmem:[%s7089_s8 + $0x730] sm:$0xff]  ;;  %v5416_v14 = vcombine.high %v1376_v8, %v1380_v9 }
 0x234   : > { %4784 = vmatpush1.bf16.msra.mxu1 %v5479_v10  ;;  %v1504_v10 = vld [vmem:[%s7089_s8 + $0x710] sm:$0xff] }
 0x235   : > { %4785 = vmatprep.subr.bf16.mxu1 %v5472_v12  ;;  %v5423_v12 = vcombine.low %v1384_v62, %v1388_v0  ;;  %v5544_v15 = vcombine.high %v1504_v10, %v1508_v11  ;;  %v1368_v16 = vld [vmem:[%s7089_s8 + $0x2d0] sm:$0xff]  ;;  %v5543_v21 = vcombine.low %v1504_v10, %v1508_v11 }
 0x236   : > { %4745 = vmatpush1.bf16.msra.mxu0 %v5343_v17  ;;  %v1372_v17 = vld [vmem:[%s7089_s8 + $0x2f0] sm:$0xff] }
 0x237   : > { %4746 = vmatprep.subr.bf16.mxu0 %v5336_v19  ;;  %v1500_v19 = vld [vmem:[%s7089_s8 + $0x6f0] sm:$0xff]  ;;  %v5408_v22 = vcombine.high %v1368_v16, %v1372_v17 }
 0x238   : > { %4786 = vmatpush1.bf16.msra.mxu1 %v5471_v18  ;;  %v1496_v18 = vld [vmem:[%s7089_s8 + $0x6d0] sm:$0xff] }
 0x239   : > { %4787 = vmatprep.subr.bf16.mxu1 %v5464_v20  ;;  %v5415_v20 = vcombine.low %v1376_v8, %v1380_v9  ;;  %v5536_v24 = vcombine.high %v1496_v18, %v1500_v19  ;;  %v1360_v25 = vld [vmem:[%s7089_s8 + $0x290] sm:$0xff]  ;;  %v5535_v31 = vcombine.low %v1496_v18, %v1500_v19 }
 0x23a   : > { %4747 = vmatpush1.bf16.msra.mxu0 %v5335_v26  ;;  %v1364_v26 = vld [vmem:[%s7089_s8 + $0x2b0] sm:$0xff] }
 0x23b   : > { %4748 = vmatprep.subr.bf16.mxu0 %v5328_v29  ;;  %v1492_v29 = vld [vmem:[%s7089_s8 + $0x6b0] sm:$0xff]  ;;  %v5400_v32 = vcombine.high %v1360_v25, %v1364_v26 }
 0x23c   : > { %4788 = vmatpush1.bf16.msra.mxu1 %v5463_v28  ;;  %v1488_v28 = vld [vmem:[%s7089_s8 + $0x690] sm:$0xff] }
 0x23d   : > { %4789 = vmatprep.subr.bf16.mxu1 %v5456_v30  ;;  %v5407_v30 = vcombine.low %v1368_v16, %v1372_v17  ;;  %v5528_v34 = vcombine.high %v1488_v28, %v1492_v29  ;;  %v1352_v57 = vld [vmem:[%s7089_s8 + $0x250] sm:$0xff]  ;;  %v5527_v40 = vcombine.low %v1488_v28, %v1492_v29 }
 0x23e   : > { %4749 = vmatpush1.bf16.msra.mxu0 %v5327_v36  ;;  %v1356_v36 = vld [vmem:[%s7089_s8 + $0x270] sm:$0xff] }
 0x23f   : > { %4750 = vmatprep.subr.bf16.mxu0 %v5320_v38  ;;  %v1484_v38 = vld [vmem:[%s7089_s8 + $0x670] sm:$0xff]  ;;  %v5392_v41 = vcombine.high %v1352_v57, %v1356_v36 }
 0x240   : > { %4790 = vmatpush1.bf16.msra.mxu1 %v5455_v37  ;;  %v1480_v37 = vld [vmem:[%s7089_s8 + $0x650] sm:$0xff] }
 0x241   : > { %4791 = vmatprep.subr.bf16.mxu1 %v5448_v39  ;;  %v5399_v39 = vcombine.low %v1360_v25, %v1364_v26  ;;  %v5520_v23 = vcombine.high %v1480_v37, %v1484_v38  ;;  %v1344_v42 = vld [vmem:[%s7089_s8 + $0x210] sm:$0xff]  ;;  %v5519_v51 = vcombine.low %v1480_v37, %v1484_v38 }
 0x242   : > { %4751 = vmatpush1.bf16.msra.mxu0 %v5319_v46  ;;  %v1348_v46 = vld [vmem:[%s7089_s8 + $0x230] sm:$0xff] }
 0x243   : > { %4752 = vmatprep.subr.bf16.mxu0 %v5440_v49  ;;  %v1476_v49 = vld [vmem:[%s7089_s8 + $0x630] sm:$0xff]  ;;  %v5384_v52 = vcombine.high %v1344_v42, %v1348_v46 }
 0x244   : > { %4792 = vmatpush1.bf16.msra.mxu1 %v5447_v47  ;;  %v1472_v47 = vld [vmem:[%s7089_s8 + $0x610] sm:$0xff] }
 0x245   : > { %4793 = vmatprep.subr.bf16.mxu1 %v5568_v50  ;;  %v5391_v50 = vcombine.low %v1352_v57, %v1356_v36  ;;  %v5512_v53 = vcombine.high %v1472_v47, %v1476_v49  ;;  %v1592_v56 = vld [vmem:[%s7089_s8 + $0x9d0] sm:$0xff]  ;;  %v5511_v62 = vcombine.low %v1472_v47, %v1476_v49 }
 0x246   : > { %4753 = vmatpush2.bf16.msra.mxu0 %v5439_v58  ;;  %v1596_v58 = vld [vmem:[%s7089_s8 + $0x9f0] sm:$0xff] }
 0x247   : > { %4754 = vmatprep.subr.bf16.mxu0 %v5432_v60  ;;  %v1724_v60 = vld [vmem:[%s7089_s8 + $0xdf0] sm:$0xff]  ;;  %v5632_v0 = vcombine.high %v1592_v56, %v1596_v58 }
 0x248   : > { %4794 = vmatpush2.bf16.msra.mxu1 %v5567_v59  ;;  %v1720_v59 = vld [vmem:[%s7089_s8 + $0xdd0] sm:$0xff] }
 0x249   : > { %4795 = vmatprep.subr.bf16.mxu1 %v5560_v61  ;;  %v5383_v61 = vcombine.low %v1344_v42, %v1348_v46  ;;  %v5760_v1 = vcombine.high %v1720_v59, %v1724_v60  ;;  %v1584_v2 = vld [vmem:[%s7089_s8 + $0x990] sm:$0xff]  ;;  %v5759_v8 = vcombine.low %v1720_v59, %v1724_v60 }
 0x24a   : > { %4755 = vmatpush2.bf16.msra.mxu0 %v5431_v4  ;;  %v1588_v4 = vld [vmem:[%s7089_s8 + $0x9b0] sm:$0xff] }
 0x24b   : > { %4756 = vmatprep.subr.bf16.mxu0 %v5424_v6  ;;  %v1716_v6 = vld [vmem:[%s7089_s8 + $0xdb0] sm:$0xff]  ;;  %v5624_v9 = vcombine.high %v1584_v2, %v1588_v4  ;;  %v5623_v18 = vcombine.low %v1584_v2, %v1588_v4 }
 0x24c   : > { %4796 = vmatpush2.bf16.msra.mxu1 %v5559_v5  ;;  %v1712_v5 = vld [vmem:[%s7089_s8 + $0xd90] sm:$0xff] }
 0x24d   : > { %4797 = vmatprep.subr.bf16.mxu1 %v5552_v7  ;;  %v5631_v7 = vcombine.low %v1592_v56, %v1596_v58  ;;  %v5752_v10 = vcombine.high %v1712_v5, %v1716_v6  ;;  %v1576_v11 = vld [vmem:[%s7089_s8 + $0x950] sm:$0xff] }
 0x24e   : > { %4757 = vmatpush2.bf16.msra.mxu0 %v5423_v12  ;;  %v1580_v12 = vld [vmem:[%s7089_s8 + $0x970] sm:$0xff] }
 0x24f   : > { %4758 = vmatprep.subr.bf16.mxu0 %v5416_v14  ;;  %v1704_v14 = vld [vmem:[%s7089_s8 + $0xd50] sm:$0xff] }
 0x250   : > { %4798 = vmatpush2.bf16.msra.mxu1 %v5551_v13  ;;  %v1568_v26 = vld [vmem:[%s7089_s8 + $0x910] sm:$0xff] }
 0x251   : > { %4799 = vmatprep.subr.bf16.mxu1 %v5544_v15  ;;  %v1708_v15 = vld [vmem:[%s7089_s8 + $0xd70] sm:$0xff] }
 0x252   : > { %4759 = vmatpush2.bf16.msra.mxu0 %v5415_v20  ;;  %v5751_v20 = vcombine.low %v1712_v5, %v1716_v6  ;;  %v1572_v28 = vld [vmem:[%s7089_s8 + $0x930] sm:$0xff]  ;;  %v5743_v36 = vcombine.low %v1704_v14, %v1708_v15 }
 0x253   : > { %4760 = vmatprep.subr.bf16.mxu0 %v5408_v22  ;;  %v5608_v37 = vcombine.high %v1568_v26, %v1572_v28  ;;  %v1688_v42 = vld [vmem:[%s7089_s8 + $0xcd0] sm:$0xff]  ;;  %v5607_v47 = vcombine.low %v1568_v26, %v1572_v28 }
 0x254   : > { %4800 = vmatpush2.bf16.msra.mxu1 %v5543_v21  ;;  %v5616_v21 = vcombine.high %v1576_v11, %v1580_v12  ;;  %v1692_v46 = vld [vmem:[%s7089_s8 + $0xcf0] sm:$0xff] }
 0x255   : > { %4801 = vmatprep.subr.bf16.mxu1 %v5536_v24  ;;  %v1680_v56 = vld [vmem:[%s7089_s8 + $0xc90] sm:$0xff]  ;;  %v5727_v60 = vcombine.low %v1688_v42, %v1692_v46 }
 0x256   : > { %4761 = vmatpush2.bf16.msra.mxu0 %v5407_v30  ;;  %v1696_v30 = vld [vmem:[%s7089_s8 + $0xd10] sm:$0xff] }
 0x257   : > { %4762 = vmatprep.subr.bf16.mxu0 %v5400_v32  ;;  %v1684_v58 = vld [vmem:[%s7089_s8 + $0xcb0] sm:$0xff] }
 0x258   : > { %4802 = vmatpush2.bf16.msra.mxu1 %v5535_v31  ;;  %v1700_v31 = vld [vmem:[%s7089_s8 + $0xd30] sm:$0xff]  ;;  %v5719_v6 = vcombine.low %v1680_v56, %v1684_v58 }
 0x259   : > { %4803 = vmatprep.subr.bf16.mxu1 %v5528_v34  ;;  %v5735_v49 = vcombine.low %v1696_v30, %v1700_v31  ;;  %v1672_v2 = vld [vmem:[%s7089_s8 + $0xc50] sm:$0xff] }
 0x25a   : > { %4763 = vmatpush2.bf16.msra.mxu0 %v5399_v39  ;;  %v1676_v4 = vld [vmem:[%s7089_s8 + $0xc70] sm:$0xff] }
 0x25b   : > { %4764 = vmatprep.subr.bf16.mxu0 %v5392_v41  ;;  %v1560_v41 = vld [vmem:[%s7089_s8 + $0x8d0] sm:$0xff] }
 0x25c   : > { %4804 = vmatpush2.bf16.msra.mxu1 %v5527_v40  ;;  %v5736_v40 = vcombine.high %v1696_v30, %v1700_v31  ;;  %v1648_v26 = vld [vmem:[%s7089_s8 + $0xb90] sm:$0xff] }
 0x25d   : > { %4805 = vmatprep.subr.bf16.mxu1 %v5520_v23  ;;  %v1564_v23 = vld [vmem:[%s7089_s8 + $0x8f0] sm:$0xff] }
 0x25e   : > { %4765 = vmatpush2.bf16.msra.mxu0 %v5391_v50  ;;  %v5600_v50 = vcombine.high %v1560_v41, %v1564_v23  ;;  %v5599_v59 = vcombine.low %v1560_v41, %v1564_v23  ;;  %v1652_v28 = vld [vmem:[%s7089_s8 + $0xbb0] sm:$0xff] }
 0x25f   : > { %4766 = vmatprep.subr.bf16.mxu0 %v5384_v52  ;;  %v1552_v52 = vld [vmem:[%s7089_s8 + $0x890] sm:$0xff]  ;;  %v5687_v41 = vcombine.low %v1648_v26, %v1652_v28 }
 0x260   : > { %4806 = vmatpush2.bf16.msra.mxu1 %v5519_v51  ;;  %v5728_v51 = vcombine.high %v1688_v42, %v1692_v46  ;;  %v1780_v30 = vld [vmem:[%s7089_s8 + $0xfb0] sm:$0xff] }
 0x261   : > { %4807 = vmatprep.subr.bf16.mxu1 %v5512_v53  ;;  %v1556_v53 = vld [vmem:[%s7089_s8 + $0x8b0] sm:$0xff] }
 0x262   : > { %4767 = vmatpush2.bf16.msra.mxu0 %v5383_v61  ;;  %v5592_v61 = vcombine.high %v1552_v52, %v1556_v53  ;;  %v5591_v5 = vcombine.low %v1552_v52, %v1556_v53 }
 0x263   : > { %4818 = vmatprep.subr.bf16.mxu0 %v5632_v0  ;;  %v1544_v0 = vld [vmem:[%s7089_s8 + $0x850] sm:$0xff] }
 0x264   : > { %4808 = vmatpush2.bf16.msra.mxu1 %v5511_v62  ;;  %v5720_v62 = vcombine.high %v1680_v56, %v1684_v58 }
 0x265   : > { %4859 = vmatprep.subr.bf16.mxu1 %v5760_v1  ;;  %v4524_v13 = vpop.f32.mrf.mxu0  ;;  %4769 = vmatmul.mubr.bf16.vlgmr.msra.gmra.mxu0 %v7190_v27  ;;  %v1548_v1 = vld [vmem:[%s7089_s8 + $0x870] sm:$0xff] }
 0x266   : > { %v4525_v16 = vadd.f32 %v4524_v13, %v7421_v45  ;;  %4819 = vmatpush1.bf16.msra.mxu0 %v5631_v7  ;;  %v5744_v45 = vcombine.high %v1704_v14, %v1708_v15  ;;  %4850 = vmatprep.mubr.bf16.mxu0 %v7197_v35  ;;  %v5584_v7 = vcombine.high %v1544_v0, %v1548_v1 }
 0x267   : > { %v4565_v17 = vpop.f32.mrf.mxu1  ;;  %4810 = vmatmul.mubr.bf16.vlgmr.msra.gmra.mxu1 %v7201_v33  ;;  %v4526_v19 = vpop.f32.mrf.mxu0  ;;  %4820 = vmatprep.subr.bf16.mxu0 %v5624_v9  ;;  %v1536_v9 = vld [vmem:[%s7089_s8 + $0x810] sm:$0xff]  ;;  %v5583_v13 = vcombine.low %v1544_v0, %v1548_v1  ;;  %v5711_v14 = vcombine.low %v1672_v2, %v1676_v4 }
 0x268   : > { %4860 = vmatpush1.bf16.msra.mxu1 %v5759_v8  ;;  %v7494_v22 = vadd.f32 %v4565_v17, %v4525_v16  ;;  %v4527_v24 = vadd.f32 %v4526_v19, %v7426_v55  ;;  %4891 = vmatprep.mubr.bf16.mxu1 %v7210_v44  ;;  %v5615_v55 = vcombine.low %v1576_v11, %v1580_v12  ;;  %v1664_v11 = vld [vmem:[%s7089_s8 + $0xc10] sm:$0xff] }
 0x269   : > { %v4567_v25 = vpop.f32.mrf.mxu1  ;;  %4861 = vmatprep.subr.bf16.mxu1 %v5752_v10  ;;  %v4528_v29 = vpop.f32.mrf.mxu0  ;;  %v5712_v8 = vcombine.high %v1672_v2, %v1676_v4  ;;  %v1540_v10 = vld [vmem:[%s7089_s8 + $0x830] sm:$0xff] }
 0x26a   : > { %v7503_v32 = vadd.f32 %v4567_v25, %v4527_v24  ;;  %4821 = vmatpush1.bf16.msra.mxu0 %v5623_v18  ;;  %v1668_v12 = vld [vmem:[%s7089_s8 + $0xc30] sm:$0xff]  ;;  %v5576_v15 = vcombine.high %v1536_v9, %v1540_v10 }
 0x26b   : > { %v4569_v34 = vpop.f32.mrf.mxu1  ;;  %v4529_v57 = vpop.f32.mrf.mxu0  ;;  %4822 = vmatprep.subr.bf16.mxu0 %v5616_v21  ;;  %v5704_v16 = vcombine.high %v1664_v11, %v1668_v12  ;;  %v1656_v17 = vld [vmem:[%s7089_s8 + $0xbd0] sm:$0xff]  ;;  %v5575_v21 = vcombine.low %v1536_v9, %v1540_v10  ;;  %v5703_v24 = vcombine.low %v1664_v11, %v1668_v12 }
 0x26c   : > { %4862 = vmatpush1.bf16.msra.mxu1 %v5751_v20  ;;  %v5072_v38 = vcombine.low %v7494_v22, %v7503_v32  ;;  %v1660_v18 = vld [vmem:[%s7089_s8 + $0xbf0] sm:$0xff]  ;;  %v1557_v22 = vld [vmem:[%s7089_s8 + $0x8b8] sm:$0xff] }
 0x26d   : > { %v4570_v39 = vpop.f32.mrf.mxu1  ;;  %4863 = vmatprep.subr.bf16.mxu1 %v5744_v45  ;;  %v1784_v19 = vld [vmem:[%s7089_s8 + $0xfd0] sm:$0xff]  ;;  %v5696_v25 = vcombine.high %v1656_v17, %v1660_v18  ;;  %v5695_v31 = vcombine.low %v1656_v17, %v1660_v18  ;;  %v1681_v32 = vld [vmem:[%s7089_s8 + $0xc98] sm:$0xff] }
 0x26e   : > { %4823 = vmatpush1.bf16.msra.mxu0 %v5615_v55  ;;  %v1788_v20 = vld [vmem:[%s7089_s8 + $0xff0] sm:$0xff]  ;;  %v5688_v55 = vcombine.high %v1648_v26, %v1652_v28 }
 0x26f   : > { %4824 = vmatprep.subr.bf16.mxu0 %v5608_v37  ;;  %v5824_v45 = vcombine.high %v1784_v19, %v1788_v20  ;;  %v1776_v29 = vld [vmem:[%s7089_s8 + $0xf90] sm:$0xff]  ;;  %v5823_v34 = vcombine.low %v1784_v19, %v1788_v20 }
 0x270   : > { %4864 = vmatpush1.bf16.msra.mxu1 %v5743_v36  ;;  %v5816_v57 = vcombine.high %v1776_v29, %v1780_v30  ;;  %v1640_v36 = vld [vmem:[%s7089_s8 + $0xb50] sm:$0xff]  ;;  %v5815_v23 = vcombine.low %v1776_v29, %v1780_v30 }
 0x271   : > { %4865 = vmatprep.subr.bf16.mxu1 %v5736_v40  ;;  %v1644_v37 = vld [vmem:[%s7089_s8 + $0xb70] sm:$0xff] }
 0x272   : > { %4825 = vmatpush1.bf16.msra.mxu0 %v5607_v47  ;;  %v1768_v39 = vld [vmem:[%s7089_s8 + $0xf50] sm:$0xff]  ;;  %v5680_v42 = vcombine.high %v1640_v36, %v1644_v37  ;;  %v5679_v52 = vcombine.low %v1640_v36, %v1644_v37 }
 0x273   : > { %4826 = vmatprep.subr.bf16.mxu0 %v5600_v50  ;;  %v1772_v40 = vld [vmem:[%s7089_s8 + $0xf70] sm:$0xff] }
 0x274   : > { %4866 = vmatpush1.bf16.msra.mxu1 %v5735_v49  ;;  %v5808_v46 = vcombine.high %v1768_v39, %v1772_v40  ;;  %v1632_v47 = vld [vmem:[%s7089_s8 + $0xb10] sm:$0xff]  ;;  %v5807_v53 = vcombine.low %v1768_v39, %v1772_v40 }
 0x275   : > { %4867 = vmatprep.subr.bf16.mxu1 %v5728_v51  ;;  %v1636_v49 = vld [vmem:[%s7089_s8 + $0xb30] sm:$0xff] }
 0x276   : > { %4827 = vmatpush1.bf16.msra.mxu0 %v5599_v59  ;;  %v1760_v50 = vld [vmem:[%s7089_s8 + $0xf10] sm:$0xff]  ;;  %v5672_v56 = vcombine.high %v1632_v47, %v1636_v49  ;;  %v5671_v0 = vcombine.low %v1632_v47, %v1636_v49 }
 0x277   : > { %4828 = vmatprep.subr.bf16.mxu0 %v5592_v61  ;;  %v1764_v51 = vld [vmem:[%s7089_s8 + $0xf30] sm:$0xff] }
 0x278   : > { %4868 = vmatpush1.bf16.msra.mxu1 %v5727_v60  ;;  %v5800_v58 = vcombine.high %v1760_v50, %v1764_v51  ;;  %v1624_v59 = vld [vmem:[%s7089_s8 + $0xad0] sm:$0xff]  ;;  %v5799_v1 = vcombine.low %v1760_v50, %v1764_v51 }
 0x279   : > { %4869 = vmatprep.subr.bf16.mxu1 %v5720_v62  ;;  %v1628_v60 = vld [vmem:[%s7089_s8 + $0xaf0] sm:$0xff] }
 0x27a   : > { %4829 = vmatpush1.bf16.msra.mxu0 %v5591_v5  ;;  %v1752_v61 = vld [vmem:[%s7089_s8 + $0xed0] sm:$0xff]  ;;  %v5664_v2 = vcombine.high %v1624_v59, %v1628_v60  ;;  %v5663_v9 = vcombine.low %v1624_v59, %v1628_v60  ;;  %v1453_v59 = vld [vmem:[%s7089_s8 + $0x578] sm:$0xff] }
 0x27b   : > { %4830 = vmatprep.subr.bf16.mxu0 %v5584_v7  ;;  %v1756_v62 = vld [vmem:[%s7089_s8 + $0xef0] sm:$0xff] }
 0x27c   : > { %4870 = vmatpush1.bf16.msra.mxu1 %v5719_v6  ;;  %v5792_v4 = vcombine.high %v1752_v61, %v1756_v62  ;;  %v1616_v5 = vld [vmem:[%s7089_s8 + $0xa90] sm:$0xff]  ;;  %v5791_v10 = vcombine.low %v1752_v61, %v1756_v62 }
 0x27d   : > { %4871 = vmatprep.subr.bf16.mxu1 %v5712_v8  ;;  %v1620_v6 = vld [vmem:[%s7089_s8 + $0xab0] sm:$0xff] }
 0x27e   : > { %4831 = vmatpush1.bf16.msra.mxu0 %v5583_v13  ;;  %v1744_v7 = vld [vmem:[%s7089_s8 + $0xe90] sm:$0xff]  ;;  %v5656_v11 = vcombine.high %v1616_v5, %v1620_v6  ;;  %v5655_v17 = vcombine.low %v1616_v5, %v1620_v6  ;;  %v1313_v5 = vld [vmem:[%s7089_s8 + $0x118] sm:$0xff] }
 0x27f   : > { %4832 = vmatprep.subr.bf16.mxu0 %v5576_v15  ;;  %v1748_v8 = vld [vmem:[%s7089_s8 + $0xeb0] sm:$0xff]  ;;  %v1317_v6 = vld [vmem:[%s7089_s8 + $0x138] sm:$0xff] }
 0x280   : > { %4872 = vmatpush1.bf16.msra.mxu1 %v5711_v14  ;;  %v5784_v12 = vcombine.high %v1744_v7, %v1748_v8  ;;  %v1608_v13 = vld [vmem:[%s7089_s8 + $0xa50] sm:$0xff]  ;;  %v5783_v18 = vcombine.low %v1744_v7, %v1748_v8  ;;  %v1441_v8 = vld [vmem:[%s7089_s8 + $0x518] sm:$0xff] }
 0x281   : > { %4873 = vmatprep.subr.bf16.mxu1 %v5704_v16  ;;  %v1612_v14 = vld [vmem:[%s7089_s8 + $0xa70] sm:$0xff] }
 0x282   : > { %4833 = vmatpush1.bf16.msra.mxu0 %v5575_v21  ;;  %v1736_v15 = vld [vmem:[%s7089_s8 + $0xe50] sm:$0xff]  ;;  %v5648_v19 = vcombine.high %v1608_v13, %v1612_v14  ;;  %v5647_v26 = vcombine.low %v1608_v13, %v1612_v14  ;;  %v5354_v14 = vcombine.high %v1313_v5, %v1317_v6 }
 0x283   : > { %4834 = vmatprep.subr.bf16.mxu0 %v5696_v25  ;;  %v1740_v16 = vld [vmem:[%s7089_s8 + $0xe70] sm:$0xff] }
 0x284   : > { %4874 = vmatpush1.bf16.msra.mxu1 %v5703_v24  ;;  %v5776_v20 = vcombine.high %v1736_v15, %v1740_v16  ;;  %v1600_v21 = vld [vmem:[%s7089_s8 + $0xa10] sm:$0xff]  ;;  %v5775_v28 = vcombine.low %v1736_v15, %v1740_v16  ;;  %v1305_v16 = vld [vmem:[%s7089_s8 + $0xd8] sm:$0xff] }
 0x285   : > { %4875 = vmatprep.subr.bf16.mxu1 %v5824_v45  ;;  %v1604_v24 = vld [vmem:[%s7089_s8 + $0xa30] sm:$0xff] }
 0x286   : > { %4835 = vmatpush2.bf16.msra.mxu0 %v5695_v31  ;;  %v1728_v25 = vld [vmem:[%s7089_s8 + $0xe10] sm:$0xff]  ;;  %v5640_v29 = vcombine.high %v1600_v21, %v1604_v24  ;;  %v1337_v31 = vld [vmem:[%s7089_s8 + $0x1d8] sm:$0xff]  ;;  %v5639_v36 = vcombine.low %v1600_v21, %v1604_v24 }
 0x287   : > { %4836 = vmatprep.subr.bf16.mxu0 %v5688_v55  ;;  %v1732_v45 = vld [vmem:[%s7089_s8 + $0xe30] sm:$0xff]  ;;  %v1465_v55 = vld [vmem:[%s7089_s8 + $0x5d8] sm:$0xff] }
 0x288   : > { %4876 = vmatpush2.bf16.msra.mxu1 %v5823_v34  ;;  %v5768_v30 = vcombine.high %v1728_v25, %v1732_v45  ;;  %v1341_v34 = vld [vmem:[%s7089_s8 + $0x1f8] sm:$0xff]  ;;  %v5767_v37 = vcombine.low %v1728_v25, %v1732_v45 }
 0x289   : > { %4877 = vmatprep.subr.bf16.mxu1 %v5816_v57  ;;  %v1469_v57 = vld [vmem:[%s7089_s8 + $0x5f8] sm:$0xff]  ;;  %v5378_v39 = vcombine.high %v1337_v31, %v1341_v34  ;;  %v5377_v47 = vcombine.low %v1337_v31, %v1341_v34 }
 0x28a   : > { %4837 = vmatpush2.bf16.msra.mxu0 %v5687_v41  ;;  %v5506_v40 = vcombine.high %v1465_v55, %v1469_v57  ;;  %v1329_v41 = vld [vmem:[%s7089_s8 + $0x198] sm:$0xff]  ;;  %v5505_v49 = vcombine.low %v1465_v55, %v1469_v57 }
 0x28b   : > { %4838 = vmatprep.subr.bf16.mxu0 %v5680_v42  ;;  %v1457_v42 = vld [vmem:[%s7089_s8 + $0x598] sm:$0xff] }
 0x28c   : > { %4878 = vmatpush2.bf16.msra.mxu1 %v5815_v23  ;;  %v1333_v23 = vld [vmem:[%s7089_s8 + $0x1b8] sm:$0xff] }
 0x28d   : > { %4879 = vmatprep.subr.bf16.mxu1 %v5808_v46  ;;  %v1461_v46 = vld [vmem:[%s7089_s8 + $0x5b8] sm:$0xff]  ;;  %v5370_v50 = vcombine.high %v1329_v41, %v1333_v23  ;;  %v5369_v61 = vcombine.low %v1329_v41, %v1333_v23 }
 0x28e   : > { %4839 = vmatpush2.bf16.msra.mxu0 %v5679_v52  ;;  %v5498_v51 = vcombine.high %v1457_v42, %v1461_v46  ;;  %v1321_v52 = vld [vmem:[%s7089_s8 + $0x158] sm:$0xff] }
 0x28f   : > { %4840 = vmatprep.subr.bf16.mxu0 %v5672_v56  ;;  %v1297_v25 = vld [vmem:[%s7089_s8 + $0x98] sm:$0xff] }
 0x290   : > { %4880 = vmatpush2.bf16.msra.mxu1 %v5807_v53  ;;  %v1325_v53 = vld [vmem:[%s7089_s8 + $0x178] sm:$0xff] }
 0x291   : > { %4881 = vmatprep.subr.bf16.mxu1 %v5800_v58  ;;  %v1449_v58 = vld [vmem:[%s7089_s8 + $0x558] sm:$0xff] }
 0x292   : > { %4841 = vmatpush2.bf16.msra.mxu0 %v5671_v0  ;;  %v5497_v0 = vcombine.low %v1457_v42, %v1461_v46  ;;  %v5489_v13 = vcombine.low %v1449_v58, %v1453_v59  ;;  %v1301_v45 = vld [vmem:[%s7089_s8 + $0xb8] sm:$0xff] }
 0x293   : > { %4842 = vmatprep.subr.bf16.mxu0 %v5664_v2  ;;  %v5338_v31 = vcombine.high %v1297_v25, %v1301_v45  ;;  %v1289_v55 = vld [vmem:[%s7089_s8 + $0x58] sm:$0xff] }
 0x294   : > { %4882 = vmatpush2.bf16.msra.mxu1 %v5799_v1  ;;  %v5362_v1 = vcombine.high %v1321_v52, %v1325_v53  ;;  %v1293_v57 = vld [vmem:[%s7089_s8 + $0x78] sm:$0xff] }
 0x295   : > { %4883 = vmatprep.subr.bf16.mxu1 %v5792_v4  ;;  %v5490_v4 = vcombine.high %v1449_v58, %v1453_v59  ;;  %v5330_v41 = vcombine.high %v1289_v55, %v1293_v57  ;;  %v1281_v42 = vld [vmem:[%s7089_s8 + $0x18] sm:$0xff] }
 0x296   : > { %4843 = vmatpush2.bf16.msra.mxu0 %v5663_v9  ;;  %v1445_v9 = vld [vmem:[%s7089_s8 + $0x538] sm:$0xff] }
 0x297   : > { %4844 = vmatprep.subr.bf16.mxu0 %v5656_v11  ;;  %v5361_v11 = vcombine.low %v1321_v52, %v1325_v53  ;;  %v1285_v46 = vld [vmem:[%s7089_s8 + $0x38] sm:$0xff] }
 0x298   : > { %4884 = vmatpush2.bf16.msra.mxu1 %v5791_v10  ;;  %v5322_v52 = vcombine.high %v1281_v42, %v1285_v46  ;;  %v1401_v58 = vld [vmem:[%s7089_s8 + $0x3d8] sm:$0xff] }
 0x299   : > { %4885 = vmatprep.subr.bf16.mxu1 %v5784_v12  ;;  %v1405_v59 = vld [vmem:[%s7089_s8 + $0x3f8] sm:$0xff] }
 0x29a   : > { %4845 = vmatpush2.bf16.msra.mxu0 %v5655_v17  ;;  %v1309_v17 = vld [vmem:[%s7089_s8 + $0xf8] sm:$0xff] }
 0x29b   : > { %4846 = vmatprep.subr.bf16.mxu0 %v5648_v19  ;;  %v1437_v19 = vld [vmem:[%s7089_s8 + $0x4f8] sm:$0xff]  ;;  %v5346_v21 = vcombine.high %v1305_v16, %v1309_v17 }
 0x29c   : > { %4886 = vmatpush2.bf16.msra.mxu1 %v5783_v18  ;;  %v1433_v18 = vld [vmem:[%s7089_s8 + $0x4d8] sm:$0xff] }
 0x29d   : > { %4887 = vmatprep.subr.bf16.mxu1 %v5776_v20  ;;  %v5481_v20 = vcombine.low %v1441_v8, %v1445_v9  ;;  %v5474_v24 = vcombine.high %v1433_v18, %v1437_v19 }
 0x29e   : > { %4847 = vmatpush2.bf16.msra.mxu0 %v5647_v26  ;;  %v1425_v26 = vld [vmem:[%s7089_s8 + $0x498] sm:$0xff] }
 0x29f   : > { %4848 = vmatprep.subr.bf16.mxu0 %v5640_v29  ;;  %v5345_v29 = vcombine.low %v1305_v16, %v1309_v17  ;;  %v1513_v16 = vld [vmem:[%s7089_s8 + $0x758] sm:$0xff] }
 0x2a0   : > { %4888 = vmatpush2.bf16.msra.mxu1 %v5775_v28  ;;  %v1429_v28 = vld [vmem:[%s7089_s8 + $0x4b8] sm:$0xff] }
 0x2a1   : > { %4889 = vmatprep.subr.bf16.mxu1 %v5768_v30  ;;  %v5473_v30 = vcombine.low %v1433_v18, %v1437_v19  ;;  %v5466_v34 = vcombine.high %v1425_v26, %v1429_v28  ;;  %v1517_v17 = vld [vmem:[%s7089_s8 + $0x778] sm:$0xff] }
 0x2a2   : > { %4849 = vmatpush2.bf16.msra.mxu0 %v5639_v36  ;;  %v1417_v36 = vld [vmem:[%s7089_s8 + $0x458] sm:$0xff] }
 0x2a3   : > { %4900 = vmatprep.subr.bf16.mxu0 %v5378_v39  ;;  %v5337_v39 = vcombine.low %v1297_v25, %v1301_v45  ;;  %v1505_v25 = vld [vmem:[%s7089_s8 + $0x718] sm:$0xff] }
 0x2a4   : > { %4890 = vmatpush2.bf16.msra.mxu1 %v5767_v37  ;;  %v1421_v37 = vld [vmem:[%s7089_s8 + $0x478] sm:$0xff] }
 0x2a5   : > { %4941 = vmatprep.subr.bf16.mxu1 %v5506_v40  ;;  %v7565_v56 = vpop.f32.mrf.mxu0  ;;  %4851 = vmatmul.mubr.bf16.vlgmr.msra.gmra.mxu0 %v7144_v63  ;;  %v5465_v40 = vcombine.low %v1425_v26, %v1429_v28  ;;  %v5458_v23 = vcombine.high %v1417_v36, %v1421_v37  ;;  %v1509_v45 = vld [vmem:[%s7089_s8 + $0x738] sm:$0xff]  ;;  %v5553_v28 = vcombine.low %v1513_v16, %v1517_v17 }
 0x2a6   : > { %4901 = vmatpush1.bf16.msra.mxu0 %v5377_v47  ;;  %4932 = vmatprep.mubr.bf16.mxu0 %v7123_v43  ;;  %v5482_v43 = vcombine.high %v1441_v8, %v1445_v9  ;;  %v1409_v47 = vld [vmem:[%s7089_s8 + $0x418] sm:$0xff] }
 0x2a7   : > { %v7570_v60 = vpop.f32.mrf.mxu1  ;;  %4892 = vmatmul.mubr.bf16.vlgmr.msra.gmra.mxu1 %v7277_v54  ;;  %v7573_v62 = vpop.f32.mrf.mxu0  ;;  %4902 = vmatprep.subr.bf16.mxu0 %v5370_v50  ;;  %v5329_v50 = vcombine.low %v1289_v55, %v1293_v57  ;;  %v1397_v8 = vld [vmem:[%s7089_s8 + $0x3b8] sm:$0xff] }
 0x2a8   : > { %4942 = vmatpush1.bf16.msra.mxu1 %v5505_v49  ;;  %4973 = vmatprep.mubr.bf16.mxu1 %v7127_v48  ;;  %v5353_v48 = vcombine.low %v1313_v5, %v1317_v6  ;;  %v1413_v49 = vld [vmem:[%s7089_s8 + $0x438] sm:$0xff]  ;;  %v5442_v5 = vcombine.high %v1401_v58, %v1405_v59 }
 0x2a9   : > { %v7575_v2 = vpop.f32.mrf.mxu1  ;;  %4943 = vmatprep.subr.bf16.mxu1 %v5498_v51  ;;  %v4610_v7 = vpop.f32.mrf.mxu0  ;;  %v5457_v51 = vcombine.low %v1417_v36, %v1421_v37  ;;  %v5450_v53 = vcombine.high %v1409_v47, %v1413_v49  ;;  %v1521_v9 = vld [vmem:[%s7089_s8 + $0x798] sm:$0xff]  ;;  %v5545_v37 = vcombine.low %v1505_v25, %v1509_v45 }
 0x2aa   : > { %4903 = vmatpush1.bf16.msra.mxu0 %v5369_v61  ;;  %v1529_v61 = vld [vmem:[%s7089_s8 + $0x7d8] sm:$0xff] }
 0x2ab   : > { %v4651_v10 = vpop.f32.mrf.mxu1  ;;  %v4611_v12 = vpop.f32.mrf.mxu0  ;;  %4904 = vmatprep.subr.bf16.mxu0 %v5362_v1  ;;  %v5321_v1 = vcombine.low %v1281_v42, %v1285_v46  ;;  %v1393_v7 = vld [vmem:[%s7089_s8 + $0x398] sm:$0xff] }
 0x2ac   : > { %4944 = vmatpush1.bf16.msra.mxu1 %v5497_v0  ;;  %v1533_v0 = vld [vmem:[%s7089_s8 + $0x7f8] sm:$0xff]  ;;  %v5433_v18 = vcombine.low %v1393_v7, %v1397_v8 }
 0x2ad   : > { %v4652_v15 = vpop.f32.mrf.mxu1  ;;  %4945 = vmatprep.subr.bf16.mxu1 %v5490_v4  ;;  %v5449_v4 = vcombine.low %v1409_v47, %v1413_v49  ;;  %v5570_v6 = vcombine.high %v1529_v61, %v1533_v0  ;;  %v1525_v10 = vld [vmem:[%s7089_s8 + $0x7b8] sm:$0xff]  ;;  %v5569_v12 = vcombine.low %v1529_v61, %v1533_v0 }
 0x2ae   : > { %4905 = vmatpush1.bf16.msra.mxu0 %v5361_v11  ;;  %v5441_v11 = vcombine.low %v1401_v58, %v1405_v59  ;;  %v1385_v15 = vld [vmem:[%s7089_s8 + $0x358] sm:$0xff]  ;;  %v5561_v19 = vcombine.low %v1521_v9, %v1525_v10 }
 0x2af   : > { %4906 = vmatprep.subr.bf16.mxu0 %v5354_v14  ;;  %v5562_v14 = vcombine.high %v1521_v9, %v1525_v10  ;;  %v1497_v55 = vld [vmem:[%s7089_s8 + $0x6d8] sm:$0xff] }
 0x2b0   : > { %4946 = vmatpush1.bf16.msra.mxu1 %v5489_v13  ;;  %v5434_v13 = vcombine.high %v1393_v7, %v1397_v8  ;;  %v1501_v57 = vld [vmem:[%s7089_s8 + $0x6f8] sm:$0xff] }
 0x2b1   : > { %4947 = vmatprep.subr.bf16.mxu1 %v5482_v43  ;;  %v1389_v43 = vld [vmem:[%s7089_s8 + $0x378] sm:$0xff]  ;;  %v5537_v49 = vcombine.low %v1497_v55, %v1501_v57 }
 0x2b2   : > { %4907 = vmatpush1.bf16.msra.mxu0 %v5353_v48  ;;  %v5426_v48 = vcombine.high %v1385_v15, %v1389_v43  ;;  %v5425_v26 = vcombine.low %v1385_v15, %v1389_v43  ;;  %v1489_v42 = vld [vmem:[%s7089_s8 + $0x698] sm:$0xff] }
 0x2b3   : > { %4908 = vmatprep.subr.bf16.mxu0 %v5346_v21  ;;  %v1377_v21 = vld [vmem:[%s7089_s8 + $0x318] sm:$0xff] }
 0x2b4   : > { %4948 = vmatpush1.bf16.msra.mxu1 %v5481_v20  ;;  %v5554_v20 = vcombine.high %v1513_v16, %v1517_v17  ;;  %v1493_v46 = vld [vmem:[%s7089_s8 + $0x6b8] sm:$0xff]  ;;  %v5121_v16 = vsub.s32 0, %v7087_v3  ;;  %v5125_v17 = vsub.s32 1, %v7087_v3 }
 0x2b5   : > { %4949 = vmatprep.subr.bf16.mxu1 %v5474_v24  ;;  %v1381_v24 = vld [vmem:[%s7089_s8 + $0x338] sm:$0xff]  ;;  %v5529_v0 = vcombine.low %v1489_v42, %v1493_v46 }
 0x2b6   : > { %4909 = vmatpush1.bf16.msra.mxu0 %v5345_v29  ;;  %v5418_v29 = vcombine.high %v1377_v21, %v1381_v24  ;;  %v5417_v36 = vcombine.low %v1377_v21, %v1381_v24  ;;  %v1481_v58 = vld [vmem:[%s7089_s8 + $0x658] sm:$0xff] }
 0x2b7   : > { %4910 = vmatprep.subr.bf16.mxu0 %v5338_v31  ;;  %v1369_v31 = vld [vmem:[%s7089_s8 + $0x2d8] sm:$0xff] }
 0x2b8   : > { %4950 = vmatpush1.bf16.msra.mxu1 %v5473_v30  ;;  %v5546_v30 = vcombine.high %v1505_v25, %v1509_v45  ;;  %v1485_v59 = vld [vmem:[%s7089_s8 + $0x678] sm:$0xff]  ;;  %v5971_v25 = vmov 1983009808  }
 0x2b9   : > { %4951 = vmatprep.subr.bf16.mxu1 %v5466_v34  ;;  %v1373_v34 = vld [vmem:[%s7089_s8 + $0x2f8] sm:$0xff]  ;;  %v5521_v10 = vcombine.low %v1481_v58, %v1485_v59  ;;  %v5075_v45 = vunpack.c.l.s4 %v5971_v25 }
 0x2ba   : > { %4911 = vmatpush1.bf16.msra.mxu0 %v5337_v39  ;;  %v5410_v39 = vcombine.high %v1369_v31, %v1373_v34  ;;  %v5409_v47 = vcombine.low %v1369_v31, %v1373_v34  ;;  %v1473_v7 = vld [vmem:[%s7089_s8 + $0x618] sm:$0xff] }
 0x2bb   : > { %4912 = vmatprep.subr.bf16.mxu0 %v5330_v41  ;;  %v1361_v41 = vld [vmem:[%s7089_s8 + $0x298] sm:$0xff] }
 0x2bc   : > { %4952 = vmatpush1.bf16.msra.mxu1 %v5465_v40  ;;  %v5538_v40 = vcombine.high %v1497_v55, %v1501_v57  ;;  %v1477_v8 = vld [vmem:[%s7089_s8 + $0x638] sm:$0xff] }
 0x2bd   : > { %4953 = vmatprep.subr.bf16.mxu1 %v5458_v23  ;;  %v1365_v23 = vld [vmem:[%s7089_s8 + $0x2b8] sm:$0xff]  ;;  %v5513_v21 = vcombine.low %v1473_v7, %v1477_v8 }
 0x2be   : > { %4913 = vmatpush1.bf16.msra.mxu0 %v5329_v50  ;;  %v5402_v50 = vcombine.high %v1361_v41, %v1365_v23  ;;  %v5401_v61 = vcombine.low %v1361_v41, %v1365_v23  ;;  %v1721_v15 = vld [vmem:[%s7089_s8 + $0xdd8] sm:$0xff]  ;;  %v5076_v41 = vunpack.c.0.s8 %v5075_v45  ;;  %v4648_v23 = vadd.f32 %v7570_v60, %v7565_v56 }
 0x2bf   : > { %4914 = vmatprep.subr.bf16.mxu0 %v5322_v52  ;;  %v1353_v52 = vld [vmem:[%s7089_s8 + $0x258] sm:$0xff] }
 0x2c0   : > { %4954 = vmatpush1.bf16.msra.mxu1 %v5457_v51  ;;  %v5530_v51 = vcombine.high %v1489_v42, %v1493_v46  ;;  %v1725_v43 = vld [vmem:[%s7089_s8 + $0xdf8] sm:$0xff] }
 0x2c1   : > { %4955 = vmatprep.subr.bf16.mxu1 %v5450_v53  ;;  %v1357_v53 = vld [vmem:[%s7089_s8 + $0x278] sm:$0xff] }
 0x2c2   : > { %4915 = vmatpush1.bf16.msra.mxu0 %v5321_v1  ;;  %v5394_v1 = vcombine.high %v1353_v52, %v1357_v53  ;;  %v5393_v9 = vcombine.low %v1353_v52, %v1357_v53  ;;  %v1717_v31 = vld [vmem:[%s7089_s8 + $0xdb8] sm:$0xff] }
 0x2c3   : > { %4916 = vmatprep.subr.bf16.mxu0 %v5442_v5  ;;  %v1345_v5 = vld [vmem:[%s7089_s8 + $0x218] sm:$0xff] }
 0x2c4   : > { %4956 = vmatpush1.bf16.msra.mxu1 %v5449_v4  ;;  %v5522_v4 = vcombine.high %v1481_v58, %v1485_v59  ;;  %v1577_v46 = vld [vmem:[%s7089_s8 + $0x958] sm:$0xff]  ;;  %v4650_v58 = vadd.f32 %v7575_v2, %v7573_v62 }
 0x2c5   : > { %4957 = vmatprep.subr.bf16.mxu1 %v5570_v6  ;;  %v1349_v6 = vld [vmem:[%s7089_s8 + $0x238] sm:$0xff] }
 0x2c6   : > { %4917 = vmatpush2.bf16.msra.mxu0 %v5441_v11  ;;  %v5386_v11 = vcombine.high %v1345_v5, %v1349_v6  ;;  %v1709_v52 = vld [vmem:[%s7089_s8 + $0xd78] sm:$0xff] }
 0x2c7   : > { %4918 = vmatprep.subr.bf16.mxu0 %v5434_v13  ;;  %v1593_v13 = vld [vmem:[%s7089_s8 + $0x9d8] sm:$0xff] }
 0x2c8   : > { %4958 = vmatpush2.bf16.msra.mxu1 %v5569_v12  ;;  %v5514_v12 = vcombine.high %v1473_v7, %v1477_v8  ;;  %v1697_v8 = vld [vmem:[%s7089_s8 + $0xd18] sm:$0xff] }
 0x2c9   : > { %4959 = vmatprep.subr.bf16.mxu1 %v5562_v14  ;;  %v1597_v14 = vld [vmem:[%s7089_s8 + $0x9f8] sm:$0xff] }
 0x2ca   : > { %4919 = vmatpush2.bf16.msra.mxu0 %v5433_v18  ;;  %v5385_v18 = vcombine.low %v1345_v5, %v1349_v6  ;;  %v5634_v24 = vcombine.high %v1593_v13, %v1597_v14  ;;  %v5633_v57 = vcombine.low %v1593_v13, %v1597_v14  ;;  %v1569_v5 = vld [vmem:[%s7089_s8 + $0x918] sm:$0xff] }
 0x2cb   : > { %4920 = vmatprep.subr.bf16.mxu0 %v5426_v48  ;;  %v5129_v48 = vsub.s32 2, %v7087_v3  ;;  %v1573_v6 = vld [vmem:[%s7089_s8 + $0x938] sm:$0xff] }
 0x2cc   : > { %4960 = vmatpush2.bf16.msra.mxu1 %v5561_v19  ;;  %v7641_v19 = vld [vmem:[%s1266_s21] sm:$0xff]  ;;  %v5609_v45 = vcombine.low %v1569_v5, %v1573_v6 }
 0x2cd   : > { %4961 = vmatprep.subr.bf16.mxu1 %v5554_v20  ;;  %v5133_v20 = vsub.s32 3, %v7087_v3  ;;  %v5122_v34 = vrot.slane %v7641_v19, %v5121_v16  ;;  %v5126_v55 = vrot.slane %v7641_v19, %v5125_v17 }
 0x2ce   : > { %4921 = vmatpush2.bf16.msra.mxu0 %v5425_v26  ;;  %v5762_v26 = vcombine.high %v1721_v15, %v1725_v43 }
 0x2cf   : > { %4922 = vmatprep.subr.bf16.mxu0 %v5418_v29  ;;  %v1589_v29 = vld [vmem:[%s7089_s8 + $0x9b8] sm:$0xff]  ;;  %v5151_v53 = vcombine.low %v5122_v34, %v5126_v55 }
 0x2d0   : > { %4962 = vmatpush2.bf16.msra.mxu1 %v5553_v28  ;;  %v1585_v28 = vld [vmem:[%s7089_s8 + $0x998] sm:$0xff] }
 0x2d1   : > { %4963 = vmatprep.subr.bf16.mxu1 %v5546_v30  ;;  %v1713_v30 = vld [vmem:[%s7089_s8 + $0xd98] sm:$0xff] }
 0x2d2   : > { %4923 = vmatpush2.bf16.msra.mxu0 %v5417_v36  ;;  %v5130_v36 = vrot.slane %v7641_v19, %v5129_v48  ;;  %v5754_v42 = vcombine.high %v1713_v30, %v1717_v31  ;;  %v1565_v48 = vld [vmem:[%s7089_s8 + $0x8f8] sm:$0xff] }
 0x2d3   : > { %4924 = vmatprep.subr.bf16.mxu0 %v5410_v39  ;;  %v5761_v39 = vcombine.low %v1721_v15, %v1725_v43  ;;  %v5610_v43 = vcombine.high %v1569_v5, %v1573_v6  ;;  %v1553_v34 = vld [vmem:[%s7089_s8 + $0x898] sm:$0xff] }
 0x2d4   : > { %4964 = vmatpush2.bf16.msra.mxu1 %v5545_v37  ;;  %v5134_v37 = vrot.slane %v7641_v19, %v5133_v20  ;;  %v1689_v20 = vld [vmem:[%s7089_s8 + $0xcd8] sm:$0xff] }
 0x2d5   : > { %4965 = vmatprep.subr.bf16.mxu1 %v5538_v40  ;;  %v5626_v40 = vcombine.high %v1585_v28, %v1589_v29 }
 0x2d6   : > { %4925 = vmatpush2.bf16.msra.mxu0 %v5409_v47  ;;  %v1581_v47 = vld [vmem:[%s7089_s8 + $0x978] sm:$0xff]  ;;  %v5152_v56 = vcombine.low %v5130_v36, %v5134_v37  ;;  %v5594_v37 = vcombine.high %v1553_v34, %v1557_v22 }
 0x2d7   : > { %4926 = vmatprep.subr.bf16.mxu0 %v5402_v50  ;;  %v5625_v50 = vcombine.low %v1585_v28, %v1589_v29  ;;  %v5617_v7 = vcombine.low %v1577_v46, %v1581_v47 }
 0x2d8   : > { %4966 = vmatpush2.bf16.msra.mxu1 %v5537_v49 }
 0x2d9   : > { %4967 = vmatprep.subr.bf16.mxu1 %v5530_v51  ;;  %v1705_v51 = vld [vmem:[%s7089_s8 + $0xd58] sm:$0xff] }
 0x2da   : > { %4927 = vmatpush2.bf16.msra.mxu0 %v5401_v61  ;;  %v5746_v2 = vcombine.high %v1705_v51, %v1709_v52  ;;  %v5745_v15 = vcombine.low %v1705_v51, %v1709_v52  ;;  %v1537_v51 = vld [vmem:[%s7089_s8 + $0x818] sm:$0xff] }
 0x2db   : > { %4928 = vmatprep.subr.bf16.mxu0 %v5394_v1  ;;  %v7664_v1 = vsub.s32 %v5076_v41, %v7087_v3  ;;  %v1549_v41 = vld [vmem:[%s7089_s8 + $0x878] sm:$0xff] }
 0x2dc   : > { %4968 = vmatpush2.bf16.msra.mxu1 %v5529_v0  ;;  %v5618_v0 = vcombine.high %v1577_v46, %v1581_v47  ;;  %v5593_v46 = vcombine.low %v1553_v34, %v1557_v22  ;;  %v1541_v52 = vld [vmem:[%s7089_s8 + $0x838] sm:$0xff] }
 0x2dd   : > { %4969 = vmatprep.subr.bf16.mxu1 %v5522_v4  ;;  %v5159_v13 = vrot.slane %v5151_v53, %v7664_v1  ;;  %v5166_v14 = vrot.slane %v5152_v56, %v7664_v1  ;;  %v1665_v53 = vld [vmem:[%s7089_s8 + $0xc18] sm:$0xff]  ;;  %v5578_v56 = vcombine.high %v1537_v51, %v1541_v52 }
 0x2de   : > { %4929 = vmatpush2.bf16.msra.mxu0 %v5393_v9  ;;  %v1701_v9 = vld [vmem:[%s7089_s8 + $0xd38] sm:$0xff] }
 0x2df   : > { %4930 = vmatprep.subr.bf16.mxu0 %v5386_v11  ;;  %v5738_v17 = vcombine.high %v1697_v8, %v1701_v9  ;;  %v5737_v28 = vcombine.low %v1697_v8, %v1701_v9  ;;  %v1653_v8 = vld [vmem:[%s7089_s8 + $0xbb8] sm:$0xff] }
 0x2e0   : > { %4970 = vmatpush2.bf16.msra.mxu1 %v5521_v10  ;;  %v1777_v9 = vld [vmem:[%s7089_s8 + $0xf98] sm:$0xff] }
 0x2e1   : > { %4971 = vmatprep.subr.bf16.mxu1 %v5514_v12  ;;  %v1753_v34 = vld [vmem:[%s7089_s8 + $0xed8] sm:$0xff] }
 0x2e2   : > { %4931 = vmatpush2.bf16.msra.mxu0 %v5385_v18  ;;  %v1561_v18 = vld [vmem:[%s7089_s8 + $0x8d8] sm:$0xff] }
 0x2e3   : > { %4982 = vmatprep.subr.bf16.mxu0 %v5634_v24  ;;  %v5080_v24 = vrot.slane %v5072_v38, %v7664_v1  ;;  %v5602_v29 = vcombine.high %v1561_v18, %v1565_v48  ;;  %v1685_v38 = vld [vmem:[%s7089_s8 + $0xcb8] sm:$0xff]  ;;  %v5601_v55 = vcombine.low %v1561_v18, %v1565_v48 }
 0x2e4   : > { %4972 = vmatpush2.bf16.msra.mxu1 %v5513_v21  ;;  %v1693_v21 = vld [vmem:[%s7089_s8 + $0xcf8] sm:$0xff]  ;;  %v5721_v47 = vcombine.low %v1681_v32, %v1685_v38 }
 0x2e5   : > { %5023 = vmatprep.subr.bf16.mxu1 %v5762_v26  ;;  %v4688_v49 = vpop.f32.mrf.mxu0  ;;  %4933 = vmatmul.mubr.bf16.vlgmr.msra.gmra.mxu0 %v7190_v27  ;;  %v5753_v27 = vcombine.low %v1713_v30, %v1717_v31  ;;  %v5167_v26 = vcombine.low %v5159_v13, %v5166_v14  ;;  %v5730_v31 = vcombine.high %v1689_v20, %v1693_v21  ;;  %v1757_v22 = vld [vmem:[%s7089_s8 + $0xef8] sm:$0xff] }
 0x2e6   : > { %v4689_v59 = vadd.f32 %v4688_v49, %v4648_v23  ;;  %4983 = vmatpush1.bf16.msra.mxu0 %v5633_v57  ;;  %5014 = vmatprep.mubr.bf16.mxu0 %v7197_v35  ;;  %v5729_v36 = vcombine.low %v1689_v20, %v1693_v21  ;;  %v1673_v23 = vld [vmem:[%s7089_s8 + $0xc58] sm:$0xff] }
 0x2e7   : > { %v4729_v61 = vpop.f32.mrf.mxu1  ;;  %4974 = vmatmul.mubr.bf16.vlgmr.msra.gmra.mxu1 %v7201_v33  ;;  %v4690_v60 = vpop.f32.mrf.mxu0  ;;  %4984 = vmatprep.subr.bf16.mxu0 %v5626_v40  ;;  %v1545_v40 = vld [vmem:[%s7089_s8 + $0x858] sm:$0xff] }
 0x2e8   : > { %5024 = vmatpush1.bf16.msra.mxu1 %v5761_v39  ;;  %v4691_v4 = vadd.f32 %v4690_v60, %v4650_v58  ;;  %5055 = vmatprep.mubr.bf16.mxu1 %v7210_v44  ;;  %v4730_v10 = vadd.f32 %v4729_v61, %v4689_v59  ;;  %v5722_v39 = vcombine.high %v1681_v32, %v1685_v38  ;;  %v1669_v58 = vld [vmem:[%s7089_s8 + $0xc38] sm:$0xff] }
 0x2e9   : > { %v4731_v62 = vpop.f32.mrf.mxu1  ;;  %5025 = vmatprep.subr.bf16.mxu1 %v5754_v42  ;;  %v4692_v33 = vpop.f32.mrf.mxu0  ;;  %v1677_v42 = vld [vmem:[%s7089_s8 + $0xc78] sm:$0xff]  ;;  %v5586_v49 = vcombine.high %v1545_v40, %v1549_v41  ;;  %v5585_v59 = vcombine.low %v1545_v40, %v1549_v41  ;;  %v5706_v60 = vcombine.high %v1665_v53, %v1669_v58  ;;  %v5705_v5 = vcombine.low %v1665_v53, %v1669_v58 }
 0x2ea   : > { %v4732_v11 = vadd.f32 %v4731_v62, %v4691_v4  ;;  %4985 = vmatpush1.bf16.msra.mxu0 %v5625_v50  ;;  %v5714_v50 = vcombine.high %v1673_v23, %v1677_v42  ;;  %v5713_v61 = vcombine.low %v1673_v23, %v1677_v42  ;;  %v1785_v4 = vld [vmem:[%s7089_s8 + $0xfd8] sm:$0xff]  ;;  %v5793_v23 = vcombine.low %v1753_v34, %v1757_v22 }
 0x2eb   : > { %v4733_v12 = vpop.f32.mrf.mxu1  ;;  %v4693_v35 = vpop.f32.mrf.mxu0  ;;  %4986 = vmatprep.subr.bf16.mxu0 %v5618_v0  ;;  %v1661_v0 = vld [vmem:[%s7089_s8 + $0xbf8] sm:$0xff] }
 0x2ec   : > { %5026 = vmatpush1.bf16.msra.mxu1 %v5753_v27  ;;  %v5073_v16 = vcombine.low %v4730_v10, %v4732_v11  ;;  %v1657_v27 = vld [vmem:[%s7089_s8 + $0xbd8] sm:$0xff] }
 0x2ed   : > { %v4734_v44 = vpop.f32.mrf.mxu1  ;;  %5027 = vmatprep.subr.bf16.mxu1 %v5746_v2  ;;  %v1789_v62 = vld [vmem:[%s7089_s8 + $0xff8] sm:$0xff]  ;;  %v5577_v2 = vcombine.low %v1537_v51, %v1541_v52  ;;  %v5698_v6 = vcombine.high %v1657_v27, %v1661_v0  ;;  %v5697_v11 = vcombine.low %v1657_v27, %v1661_v0 }
 0x2ee   : > { %v5087_v25 = vrot.slane %v5073_v16, %v7664_v1  ;;  %4987 = vmatpush1.bf16.msra.mxu0 %v5617_v7  ;;  %v5826_v33 = vcombine.high %v1785_v4, %v1789_v62  ;;  %v1649_v7 = vld [vmem:[%s7089_s8 + $0xb98] sm:$0xff]  ;;  %v5825_v12 = vcombine.low %v1785_v4, %v1789_v62 }
 0x2ef   : > { %4988 = vmatprep.subr.bf16.mxu0 %v5610_v43  ;;  %v1781_v10 = vld [vmem:[%s7089_s8 + $0xfb8] sm:$0xff]  ;;  %v5690_v13 = vcombine.high %v1649_v7, %v1653_v8  ;;  %v5689_v44 = vcombine.low %v1649_v7, %v1653_v8 }
 0x2f0   : > { %5028 = vmatpush1.bf16.msra.mxu1 %v5745_v15  ;;  %v5088_v30 = vcombine.low %v5080_v24, %v5087_v25  ;;  %v5818_v14 = vcombine.high %v1777_v9, %v1781_v10  ;;  %v1641_v35 = vld [vmem:[%s7089_s8 + $0xb58] sm:$0xff] }
 0x2f1   : > { %5029 = vmatprep.subr.bf16.mxu1 %v5738_v17  ;;  %v1645_v15 = vld [vmem:[%s7089_s8 + $0xb78] sm:$0xff]  ;;  %v5817_v17 = vcombine.low %v1777_v9, %v1781_v10 }
 0x2f2   : > { %4989 = vmatpush1.bf16.msra.mxu0 %v5609_v45  ;;  %v5187_v57 = vadd.f32 %v5167_v26, %v5088_v30  ;;  %v1769_v43 = vld [vmem:[%s7089_s8 + $0xf58] sm:$0xff]  ;;  %v5682_v18 = vcombine.high %v1641_v35, %v1645_v15  ;;  %v5681_v45 = vcombine.low %v1641_v35, %v1645_v15 }
 0x2f3   : > { %4990 = vmatprep.subr.bf16.mxu0 %v5602_v29  ;;  %v1773_v16 = vld [vmem:[%s7089_s8 + $0xf78] sm:$0xff] }
 0x2f4   : > { %5030 = vmatpush1.bf16.msra.mxu1 %v5737_v28  ;;  %5189 = vst [vmem:[%s7690_s26] sm:$0xff] %v5187_v57  ;;  %v5810_v48 = vcombine.high %v1769_v43, %v1773_v16  ;;  %v1633_v20 = vld [vmem:[%s7089_s8 + $0xb18] sm:$0xff]  ;;  %v5809_v26 = vcombine.low %v1769_v43, %v1773_v16  ;;  %v5794_v57 = vcombine.high %v1753_v34, %v1757_v22 }
 0x2f5   : > { %5031 = vmatprep.subr.bf16.mxu1 %v5730_v31  ;;  %v1637_v21 = vld [vmem:[%s7089_s8 + $0xb38] sm:$0xff] }
 0x2f6   : > { %4991 = vmatpush1.bf16.msra.mxu0 %v5601_v55  ;;  %v1761_v24 = vld [vmem:[%s7089_s8 + $0xf18] sm:$0xff]  ;;  %v5674_v28 = vcombine.high %v1633_v20, %v1637_v21  ;;  %v5673_v32 = vcombine.low %v1633_v20, %v1637_v21 }
 0x2f7   : > { %4992 = vmatprep.subr.bf16.mxu0 %v5594_v37  ;;  %v1765_v25 = vld [vmem:[%s7089_s8 + $0xf38] sm:$0xff] }
 0x2f8   : > { %5032 = vmatpush1.bf16.msra.mxu1 %v5729_v36  ;;  %v5802_v29 = vcombine.high %v1761_v24, %v1765_v25  ;;  %v1625_v30 = vld [vmem:[%s7089_s8 + $0xad8] sm:$0xff]  ;;  %v5801_v38 = vcombine.low %v1761_v24, %v1765_v25 }
 0x2f9   : > { %5033 = vmatprep.subr.bf16.mxu1 %v5722_v39  ;;  %v1629_v31 = vld [vmem:[%s7089_s8 + $0xaf8] sm:$0xff] }
 0x2fa   : > { %4993 = vmatpush1.bf16.msra.mxu0 %v5593_v46  ;;  %v5666_v55 = vcombine.high %v1625_v30, %v1629_v31  ;;  %v1617_v36 = vld [vmem:[%s7089_s8 + $0xa98] sm:$0xff]  ;;  %v5665_v41 = vcombine.low %v1625_v30, %v1629_v31 }
 0x2fb   : > { %4994 = vmatprep.subr.bf16.mxu0 %v5586_v49  ;;  %v1621_v37 = vld [vmem:[%s7089_s8 + $0xab8] sm:$0xff] }
 0x2fc   : > { %5034 = vmatpush1.bf16.msra.mxu1 %v5721_v47  ;;  %v1745_v39 = vld [vmem:[%s7089_s8 + $0xe98] sm:$0xff]  ;;  %v5658_v42 = vcombine.high %v1617_v36, %v1621_v37  ;;  %v5657_v52 = vcombine.low %v1617_v36, %v1621_v37 }
 0x2fd   : > { %5035 = vmatprep.subr.bf16.mxu1 %v5714_v50  ;;  %v1749_v40 = vld [vmem:[%s7089_s8 + $0xeb8] sm:$0xff] }
 0x2fe   : > { %4995 = vmatpush1.bf16.msra.mxu0 %v5585_v59  ;;  %v5786_v46 = vcombine.high %v1745_v39, %v1749_v40  ;;  %v1609_v47 = vld [vmem:[%s7089_s8 + $0xa58] sm:$0xff]  ;;  %v5785_v53 = vcombine.low %v1745_v39, %v1749_v40 }
 0x2ff   : > { %4996 = vmatprep.subr.bf16.mxu0 %v5578_v56  ;;  %v1613_v49 = vld [vmem:[%s7089_s8 + $0xa78] sm:$0xff] }
 0x300   : > { %5036 = vmatpush1.bf16.msra.mxu1 %v5713_v61  ;;  %v1737_v50 = vld [vmem:[%s7089_s8 + $0xe58] sm:$0xff]  ;;  %v5650_v58 = vcombine.high %v1609_v47, %v1613_v49  ;;  %v5649_v0 = vcombine.low %v1609_v47, %v1613_v49 }
 0x301   : > { %5037 = vmatprep.subr.bf16.mxu1 %v5706_v60  ;;  %v1741_v51 = vld [vmem:[%s7089_s8 + $0xe78] sm:$0xff] }
 0x302   : > { %4997 = vmatpush1.bf16.msra.mxu0 %v5577_v2  ;;  %v5778_v59 = vcombine.high %v1737_v50, %v1741_v51  ;;  %v1601_v61 = vld [vmem:[%s7089_s8 + $0xa18] sm:$0xff]  ;;  %v5777_v4 = vcombine.low %v1737_v50, %v1741_v51 }
 0x303   : > { %4998 = vmatprep.subr.bf16.mxu0 %v5698_v6  ;;  %v1605_v56 = vld [vmem:[%s7089_s8 + $0xa38] sm:$0xff] }
 0x304   : > { %5038 = vmatpush1.bf16.msra.mxu1 %v5705_v5  ;;  %v1729_v60 = vld [vmem:[%s7089_s8 + $0xe18] sm:$0xff]  ;;  %v5642_v62 = vcombine.high %v1601_v61, %v1605_v56  ;;  %v5641_v5 = vcombine.low %v1601_v61, %v1605_v56 }
 0x305   : > { %5039 = vmatprep.subr.bf16.mxu1 %v5826_v33  ;;  %v1733_v27 = vld [vmem:[%s7089_s8 + $0xe38] sm:$0xff]  ;;  %s5972_s8 = smov [#allocation4]  }
 0x306   : > { %4999 = vmatpush2.bf16.msra.mxu0 %v5697_v11  ;;  %v5770_v2 = vcombine.high %v1729_v60, %v1733_v27  ;;  %v5769_v6 = vcombine.low %v1729_v60, %v1733_v27  ;;  %s5896_s9 = sshll.u32 %s5972_s8, 4  ;;  %s5897_s9 = int_to_ptr.vmem [resolvable:$false] %s5896_s9 }
 0x307   : > { %5000 = vmatprep.subr.bf16.mxu0 %v5690_v13  ;;  %s5898_s10 = scalar_lea.vmem %s5897_s9, 512  ;;  %p5899_p4 = scmp.lt.s32.totalorder %s5207_s28, %s5897_s9 }
 0x308   : > { %5040 = vmatpush2.bf16.msra.mxu1 %v5825_v12  ;;  %p5900_p6 = scmp.lt.s32.totalorder %s5898_s10, %s5892_s7 }
 0x309   : > { %5041 = vmatprep.subr.bf16.mxu1 %v5818_v14 }
 0x30a   : > { %5001 = vmatpush2.bf16.msra.mxu0 %v5689_v44  ;;  %p5901_p7 = por %p5900_p6, %p5899_p4 }
 0x30b   : > { %5002 = vmatprep.subr.bf16.mxu0 %v5682_v18 }
 0x30c   : > { %5042 = vmatpush2.bf16.msra.mxu1 %v5817_v17  ;;  %p5902_p8 = pnand %p5901_p7, %p5895_p3 }
 0x30d   : > { %5043 = vmatprep.subr.bf16.mxu1 %v5810_v48 }
 0x30e   : > { %5003 = vmatpush2.bf16.msra.mxu0 %v5681_v45 }
 0x30f   : > { %5004 = vmatprep.subr.bf16.mxu0 %v5674_v28 }
 0x310   : > { %5044 = vmatpush2.bf16.msra.mxu1 %v5809_v26 }
 0x311   : > { %5045 = vmatprep.subr.bf16.mxu1 %v5802_v29 }
 0x312   : > { %5005 = vmatpush2.bf16.msra.mxu0 %v5673_v32  ;;  %v5137_v32 = vsub.s32 4, %v7087_v3 }
 0x313   : > { %5006 = vmatprep.subr.bf16.mxu0 %v5666_v55  ;;  %v5145_v55 = vsub.s32 6, %v7087_v3 }
 0x314   : > { %5046 = vmatpush2.bf16.msra.mxu1 %v5801_v38  ;;  %v5141_v38 = vsub.s32 5, %v7087_v3  ;;  %v5138_v36 = vrot.slane %v7641_v19, %v5137_v32 }
 0x315   : > { %5047 = vmatprep.subr.bf16.mxu1 %v5794_v57  ;;  %v5149_v57 = vsub.s32 7, %v7087_v3  ;;  %v5146_v39 = vrot.slane %v7641_v19, %v5145_v55 }
 0x316   : > { %5007 = vmatpush2.bf16.msra.mxu0 %v5665_v41  ;;  %v5142_v37 = vrot.slane %v7641_v19, %v5141_v38 }
 0x317   : > { %5008 = vmatprep.subr.bf16.mxu0 %v5658_v42  ;;  %v5150_v40 = vrot.slane %v7641_v19, %v5149_v57 }
 0x318   : > { %5048 = vmatpush2.bf16.msra.mxu1 %v5793_v23  ;;  %v5168_v49 = vcombine.low %v5138_v36, %v5142_v37 }
 0x319   : > { %5049 = vmatprep.subr.bf16.mxu1 %v5786_v46  ;;  %v5169_v50 = vcombine.low %v5146_v39, %v5150_v40 }
 0x31a   : > { %5009 = vmatpush2.bf16.msra.mxu0 %v5657_v52  ;;  %v5176_v19 = vrot.slane %v5168_v49, %v7664_v1 }
 0x31b   : > { %5010 = vmatprep.subr.bf16.mxu0 %v5650_v58  ;;  %v5183_v56 = vrot.slane %v5169_v50, %v7664_v1 }
 0x31c   : > { %5050 = vmatpush2.bf16.msra.mxu1 %v5785_v53 }
 0x31d   : > { %5051 = vmatprep.subr.bf16.mxu1 %v5778_v59 }
 0x31e   : > { %5011 = vmatpush2.bf16.msra.mxu0 %v5649_v0 }
 0x31f   : > { %5012 = vmatprep.subr.bf16.mxu0 %v5642_v62 }
 0x320   : > { %5052 = vmatpush2.bf16.msra.mxu1 %v5777_v4 }
 0x321   : > { %5053 = vmatprep.subr.bf16.mxu1 %v5770_v2  ;;  %v5184_v2 = vcombine.low %v5176_v19, %v5183_v56 }
 0x322   : > { %5013 = vmatpush2.bf16.msra.mxu0 %v5641_v5 }
 0x324   : > { %5054 = vmatpush2.bf16.msra.mxu1 %v5769_v6 }
 0x325   : > { %v4770_v33 = vpop.f32.mrf.mxu0  ;;  %5015 = vmatmul.mubr.bf16.vlgmr.msra.gmra.mxu0 %v7144_v63 }
 0x327   : > { %v4811_v7 = vpop.f32.mrf.mxu1  ;;  %5056 = vmatmul.mubr.bf16.vlgmr.msra.gmra.mxu1 %v7277_v54  ;;  %v4772_v9 = vpop.f32.mrf.mxu0 }
 0x328   : > { %v4812_v8 = vadd.f32 %v4811_v7, %v4770_v33 }
 0x329   : > { %v4813_v10 = vpop.f32.mrf.mxu1  ;;  %v4774_v12 = vpop.f32.mrf.mxu0 }
 0x32a   : > { %v4814_v11 = vadd.f32 %v4813_v10, %v4772_v9 }
 0x32b   : > { %v4815_v13 = vpop.f32.mrf.mxu1  ;;  %v4775_v14 = vpop.f32.mrf.mxu0 }
 0x32d   : > { %v4816_v35 = vpop.f32.mrf.mxu1 }
 0x365   : > { %v4852_v15 = vpop.f32.mrf.mxu0 }
 0x366   : > { %v4853_v43 = vadd.f32 %v4852_v15, %v4812_v8 }
 0x367   : > { %v4893_v16 = vpop.f32.mrf.mxu1  ;;  %v4854_v44 = vpop.f32.mrf.mxu0 }
 0x368   : > { %v4894_v17 = vadd.f32 %v4893_v16, %v4853_v43  ;;  %v4855_v18 = vadd.f32 %v4854_v44, %v4814_v11 }
 0x369   : > { %v4895_v48 = vpop.f32.mrf.mxu1  ;;  %v4856_v20 = vpop.f32.mrf.mxu0 }
 0x36a   : > { %v4896_v63 = vadd.f32 %v4895_v48, %v4855_v18 }
 0x36b   : > { %v4897_v21 = vpop.f32.mrf.mxu1  ;;  %v4857_v24 = vpop.f32.mrf.mxu0 }
 0x36c   : > { %v5089_v54 = vcombine.low %v4894_v17, %v4896_v63 }
 0x36d   : > { %v4898_v25 = vpop.f32.mrf.mxu1 }
 0x36e   : > { %v5097_v4 = vrot.slane %v5089_v54, %v7664_v1 }
 0x3a5   : > { %v4934_v45 = vpop.f32.mrf.mxu0 }
 0x3a7   : > { %v4975_v26 = vpop.f32.mrf.mxu1  ;;  %v4936_v28 = vpop.f32.mrf.mxu0 }
 0x3a8   : > { %v4976_v41 = vadd.f32 %v4975_v26, %v4934_v45 }
 0x3a9   : > { %v4977_v29 = vpop.f32.mrf.mxu1  ;;  %v4938_v30 = vpop.f32.mrf.mxu0 }
 0x3aa   : > { %v4978_v42 = vadd.f32 %v4977_v29, %v4936_v28 }
 0x3ab   : > { %v4979_v31 = vpop.f32.mrf.mxu1  ;;  %v4939_v34 = vpop.f32.mrf.mxu0 }
 0x3ad   : > { %v4980_v22 = vpop.f32.mrf.mxu1 }
 0x3e5   : > { %v5016_v23 = vpop.f32.mrf.mxu0 }
 0x3e6   : > { %v5017_v46 = vadd.f32 %v5016_v23, %v4976_v41 }
 0x3e7   : > { %v5057_v47 = vpop.f32.mrf.mxu1  ;;  %v5018_v51 = vpop.f32.mrf.mxu0 }
 0x3e8   : > { %v5019_v52 = vadd.f32 %v5018_v51, %v4978_v42  ;;  %v5058_v58 = vadd.f32 %v5057_v47, %v5017_v46 }
 0x3e9   : > { %v5059_v3 = vpop.f32.mrf.mxu1  ;;  %v5020_v53 = vpop.f32.mrf.mxu0 }
 0x3ea   : > { %v5060_v59 = vadd.f32 %v5059_v3, %v5019_v52 }
 0x3eb   : > { %v5061_v61 = vpop.f32.mrf.mxu1  ;;  %v5021_v60 = vpop.f32.mrf.mxu0 }
 0x3ec   : > { %v5090_v27 = vcombine.low %v5058_v58, %v5060_v59 }
 0x3ed   : > { %v5062_v0 = vpop.f32.mrf.mxu1 }
 0x3ee   : > { %v5104_v62 = vrot.slane %v5090_v27, %v7664_v1 }
 0x3f0   : > { %v5105_v5 = vcombine.low %v5097_v4, %v5104_v62 }
 0x3f2   : > { %v5188_v6 = vadd.f32 %v5184_v2, %v5105_v5 }
 0x3f4   : > { %5190 = vst [vmem:[%s7690_s26 + $0x8] sm:$0xff] %v5188_v6 }
 0x3f5   : > { %5905 = shalt.err (!%p5902_p8)
}
 0x3f6   : > { %s5906_s15 = scalar_lea.hbm %s5204_s4, 256  ;;  %s5910_s18 = scalar_lea.hbm %s7789_s3, 1024 }
 0x3f7   : > { %p5907_p10 = scmp.ne.s32.totalorder %s5204_s4, %s5906_s15  ;;  %p5911_p13 = scmp.lt.s32.totalorder %s5204_s4, %s7789_s3 }
 0x3f8   : > { %p5912_p0 = scmp.lt.s32.totalorder %s5910_s18, %s5906_s15 }
 0x3f9   : > { %p5908_p11 = pnand %p5907_p10, %p6032_p5 }
 0x3fa   : > { %p5913_p1 = por %p5912_p0, %p5911_p13 }
 0x3fb   : > { %p5909_p12 = pneg %p5908_p11 }
 0x3fd   : > { %p5914_p2 = pnand %p5913_p1, %p5909_p12 }
 0x3ff   : > { %5917 = shalt.err (!%p5914_p2)
}
 0x400   : > { %5834 = dma.vmem_to_hbm [thread:$0]  (%p6032_p5), %s5207_s28, 256, %s5204_s4, %s5192_s5  }
 0x401 PF: > { %p5840_p3 = scmp.ge.s32.totalorder %s5968_s17, 2  ;;  %s5218_s23 = sand.u32 1, %s5948_s12  }
 0x402   : > { %s5219_s26 = scalar_lea.sflag [#allocation5], %s5218_s23 }
 0x403   : > { %p5837_p4 = pnand %p5840_p3, %p6043_p9 }
 0x405   : > { %p5838_p6 = pneg %p5837_p4 }
 0x407   : > { %5943 = dma.done.wait (%p5838_p6), %s5219_s26, 256  }
 0x408   : > { %5945 = vsyncadd (%p5838_p6), %s5219_s26, 4294967040  ;;  %s16_s17 = sadd.s32 1, %s5968_s17   ;;  %s7792_s12 = smov %s5952_s13 }
 0x409   : > { %p13_p7 = scmp.ge.s32.totalorder %s16_s17, 6   ;;  %s7793_s13 = smov %s5956_s14 }
 0x40a   : > { %s7794_s14 = smov %s6041_s24  ;;  %s7795_s15 = smov %s5964_s16 }
 0x40b   : > { %s7796_s16 = smov %s7798_s20  ;;  %15 = sbr.rel (!%p13_p7) target bundleno = 4 (0x4), region = 109 }
 0x410   :  { %5224 = vsyncpa [#allocation5], 1 }
 0x411   :  { %5226 = vsyncpa [#allocation5 + $0x1], 1 }

// kernel: chess_model_forward.8
= control target key start
LH: loop header
LB: loop body
LE: loop exit
PB: predicated region body
PF: predicated region fallthrough
CT: control target
= control target key end

     0   :  { %s6788_s0 = inlined_call_operand.vmem [shape: bf16[2,16384], index: 0, kind: input, shape index: {}]   ;;  %s6789_s1 = inlined_call_operand.hbm [shape: bf16[16384,1024], index: 1, kind: input, shape index: {}]   ;;  %s6790_s2 = inlined_call_operand.hbm [shape: f32[1,1024], index: 2, kind: input, shape index: {}]   ;;  %s6791_s3 = inlined_call_operand.vmem [shape: f32[2,1024], index: 3, kind: output, shape index: {}]  }
   0x1   :  { %6794 = sst [smem:[#allocation11_spill]] %s6789_s1 }
   0x2   :  { %8 = vsyncpa [#allocation4], 0 }
   0x3   :  { %10 = vsyncpa [#allocation4 + $0x1], 0 }
   0x4   :  { %11 = vsyncpa [#allocation6], 0 }
   0x5   :  { %13 = vsyncpa [#allocation6 + $0x1], 0  ;;  %s5895_s12 = smov 0   ;;  %s5897_s13 = smov 0  }
   0x6   :  { %s5899_s14 = smov 0   ;;  %s5901_s15 = smov 0  }
   0x7   :  { %s5903_s16 = smov 0   ;;  %s5905_s17 = smov 0  }
   0x8   :  { %s5907_s18 = smov 0   ;;  %s5909_s19 = smov 0  }
   0x9   :  { %s5911_s20 = smov 0   ;;  %s5913_s21 = smov 0  }
   0xa   :  { %s5915_s22 = smov 0  }
   0xb LB: > { %s28_s23 = sadd.s32 1, %s5857_s20  ;;  %p73_p1 = scmp.ne.s32.totalorder %s5845_s17, %s5841_s16  ;;  %s5865_s22 = sphi %s5915_s22, %s19_s22   ;;  %s5861_s21 = sphi %s5913_s21, %s6819_s21   ;;  %s5857_s20 = sphi %s5911_s20, %s6818_s20   ;;  %s5853_s19 = sphi %s5909_s19, %s6817_s19   ;;  %s5849_s18 = sphi %s5907_s18, %s6816_s18   ;;  %s5845_s17 = sphi %s5905_s17, %s6815_s17   ;;  %s5841_s16 = sphi %s5903_s16, %s6814_s16   ;;  %s5837_s15 = sphi %s5901_s15, %s6813_s15   ;;  %s5833_s14 = sphi %s5899_s14, %s6812_s14   ;;  %s5829_s13 = sphi %s5897_s13, %s6811_s13   ;;  %s5825_s12 = sphi %s5895_s12, %s6810_s12  }
   0xc   : > { %p5952_p0 = scmp.ge.s32.totalorder %s28_s23, 8  ;;  %p74_p2 = scmp.eq.s32.totalorder %s5865_s22, 0 }
   0xd   : > { %p4850_p4 = scmp.lt.s32.totalorder %s5865_s22, 16  ;;  %s163_s27 = sand.u32 1, %s5845_s17  }
   0xe   : > { %s6821_s23 = smov (%p5952_p0, %s28_s23), 0  ;;  %p75_p3 = por %p74_p2, %p73_p1 }
   0xf   : > { %6796 = sst [smem:[#allocation9_spill]] %s6821_s23  ;;  %s4307_s28 = sshll.u32 %s163_s27, 12 }
  0x10   : > { %s4309_s29 = sshll.u32 %s5861_s21, 2  ;;  %s4837_s30 = sshll.u32 %s5857_s20, 11 }
  0x11   : > { %s167_s4 = scalar_lea.vmem [#allocation3], %s4307_s28  ;;  %s174_s6 = sadd.s32 %s4837_s30, %s4309_s29 }
  0x12   : > { %s177_s5 = sshll.u32 %s167_s4, 4  ;;  %s4311_s7 = sshll.u32 %s174_s6, 6  ;;  %s178_s5 = int_to_ptr.vmem [resolvable:$true] %s177_s5 }
  0x13   : > { %p5973_p5 = pnand %p4850_p4, %p75_p3  ;;  %s6798_s1 = sld [smem:[#allocation11_spill]] }
  0x14   : > { %p4315_p6 = scmp.ge.s32.totalorder %s5865_s22, 1  ;;  %s164_s24 = scalar_lea.sflag [#allocation4], %s163_s27 }
  0x15   : > { %p5717_p7 = pneg %p5973_p5  ;;  %s5728_s26 = scalar_lea.vmem %s178_s5, 65536 }
  0x16   : > { %p5729_p8 = scmp.ne.s32.totalorder %s178_s5, %s5728_s26  ;;  %s5867_s28 = smov [#allocation3]  }
  0x17   : > { %s5733_s29 = sshll.u32 %s5867_s28, 4  ;;  %s5734_s29 = int_to_ptr.vmem [resolvable:$false] %s5733_s29 }
  0x18   : > { %p5731_p9 = pnand %p5729_p8, %p5717_p7  ;;  %s5735_s30 = scalar_lea.vmem %s5734_s29, 131072 }
  0x19   : > { %s176_s11 = scalar_lea.hbm %s6798_s1, %s4311_s7  ;;  %p5736_p11 = scmp.lt.s32.totalorder %s178_s5, %s5734_s29 }
  0x1a   : > { %p5732_p10 = pneg %p5731_p9  ;;  %p5737_p12 = scmp.lt.s32.totalorder %s5735_s30, %s5728_s26 }
  0x1c   : > { %p5738_p13 = por %p5737_p12, %p5736_p11 }
  0x1e   : > { %p5739_p1 = pnand %p5738_p13, %p5732_p10 }
  0x20   : > { %5742 = shalt.err (!%p5739_p1)
}
  0x21   : > { %s5868_s4 = smov 512   ;;  %s5869_s27 = smov 256  }
  0x22   : > { %s5870_s26 = smov 16   ;;  %p204_p3 = scmp.lt.s32.totalorder %s5865_s22, 17 }
  0x23   : > { %4846 = dma.hbm_to_vmem [thread:$0]  (!%p5973_p5), %s176_s11, 65536, %s178_s5, %s164_s24, %s5868_s4, %s5869_s27, %s5870_s26  }
  0x24   : > { %p5988_p7 = pnand %p4315_p6, %p204_p3  ;;  %s4303_s7 = sadd.s32 4294967295, %s5865_s22  }
  0x25   : > { %s31_s9 = sadd.s32 1, %s5861_s21  ;;  %p79_p8 = scmp.ne.s32.totalorder %s5841_s16, %s5837_s15 }
  0x26   : > { %s6823_s9 = smov (!%p5952_p0, %s31_s9), %s5861_s21  ;;  %p5999_p9 = scmp.eq.s32.totalorder %s4303_s7, 0 }
  0x27   : > { %p33_p5 = scmp.ge.s32.totalorder %s6823_s9, 2  ;;  %s92_s24 = sadd.s32 1, %s5833_s14 }
  0x28   : > { %p6006_p6 = por %p5999_p9, %p79_p8  ;;  %p99_p10 = scmp.ne.s32.totalorder %s5833_s14, %s5829_s13 }
  0x29   : > { %s6825_s9 = smov (%p33_p5, %s6823_s9), 0  ;;  %p105_p11 = scmp.ne.s32.totalorder %s5829_s13, %s5825_s12 }
  0x2a   : > { %6802 = sst [smem:[#allocation10_spill]] %s6825_s9  ;;  %p6016_p0 = por %p99_p10, %p74_p2 }
  0x2b   : > { %s62_s25 = ssub.s32 %s5861_s21, %s6825_s9  ;;  %s187_s10 = sand.u32 1, %s5833_s14  }
  0x2c   : > { %s6804_s11 = ssub.s32 %s5857_s20, %s6821_s23  ;;  %p90_p12 = scmp.eq.s32.totalorder %s62_s25, 0 }
  0x2d   : > { %s63_s28 = sor.u32 %s62_s25, %s6804_s11  ;;  %p6030_p1 = por %p105_p11, %p5999_p9 }
  0x2e   : > { %p64_p13 = scmp.eq.s32.totalorder %s63_s28, 0  ;;  %s6806_s4 = sadd.s32 1, %s5845_s17 }
  0x2f   : > { %s6035_s30 = scalar_select %p90_p12, %s5833_s14, %s92_s24  }
  0x30   : > { %s6040_s27 = scalar_select %p64_p13, %s5845_s17, %s6806_s4  }
  0x31   : > { %s4312_s26 = sshll.u32 %s187_s10, 2  ;;  %s4838_s7 = sshll.u32 %s5861_s21, 6 }
  0x32   : > { %s197_s9 = scalar_lea.hbm %s6790_s2, %s4838_s7  ;;  %s191_s23 = scalar_lea.vmem [#allocation5], %s4312_s26 }
  0x33   : > { %s199_s11 = sshll.u32 %s191_s23, 4  ;;  %p6050_p2 = pnand %p4850_p4, %p6016_p0  ;;  %s200_s11 = int_to_ptr.vmem [resolvable:$true] %s199_s11 }
  0x34   : > { %s188_s24 = scalar_lea.sflag [#allocation6], %s187_s10  ;;  %s5756_s25 = scalar_lea.vmem %s200_s11, 64 }
  0x35   : > { %p5745_p3 = pneg %p6050_p2  ;;  %p5757_p8 = scmp.ne.s32.totalorder %s200_s11, %s5756_s25 }
  0x36   : > { %s5871_s28 = smov [#allocation5]  }
  0x37   : > { %p5759_p9 = pnand %p5757_p8, %p5745_p3  ;;  %s5761_s1 = sshll.u32 %s5871_s28, 4  ;;  %s5762_s1 = int_to_ptr.vmem [resolvable:$false] %s5761_s1 }
  0x38   : > { %s5763_s4 = scalar_lea.vmem %s5762_s1, 128  ;;  %p5764_p10 = scmp.lt.s32.totalorder %s200_s11, %s5762_s1 }
  0x39   : > { %p5760_p5 = pneg %p5759_p9  ;;  %p5765_p11 = scmp.lt.s32.totalorder %s5763_s4, %s5756_s25 }
  0x3b   : > { %p5766_p12 = por %p5765_p11, %p5764_p10 }
  0x3d   : > { %p5767_p13 = pnand %p5766_p12, %p5760_p5 }
  0x3f   : > { %5770 = shalt.err (!%p5767_p13)
}
  0x40   : > { %4849 = dma.hbm_to_vmem [thread:$0]  (!%p6050_p2), %s197_s9, 64, %s200_s11, %s188_s24  }
  0x41   : > { %208 = sbr.rel (%p5988_p7) target bundleno = 823 (0x337), region = 32  ;;  %s210_s23 = sand.u32 (!%p5988_p7), 1, %s5841_s16  }
  0x42   : > { %s4316_s15 = sshll.u32 (!%p5988_p7), %s210_s23, 12  ;;  %s211_s10 = scalar_lea.sflag (!%p5988_p7), [#allocation4], %s210_s23 }
  0x43   : > { %s6061_s26 = scalar_lea.vmem (!%p5988_p7), [#allocation3], %s4316_s15 }
  0x46   : > { %5816 = dma.done.wait (%p6006_p6), %s211_s10, 65536  }
  0x47   : > { %5818 = vsyncadd (%p6006_p6), %s211_s10, 4294901760  ;;  %s219_s7 = sand.u32 1, %s5829_s13  }
  0x48   : > { %s6068_s12 = sshll.u32 %s219_s7, 2  ;;  %s220_s6 = scalar_lea.sflag [#allocation6], %s219_s7 }
  0x49   : > { %s223_s9 = scalar_lea.vmem [#allocation5], %s6068_s12 }
  0x4a   : > { %5820 = dma.done.wait (%p6030_p1), %s220_s6, 64  }
  0x4b   : > { %5822 = vsyncadd (%p6030_p1), %s220_s6, 4294967232  ;;  %s4318_s11 = sshll.u32 %s5849_s18, 4  ;;  %s4319_s8 = sshll.u32 %s5853_s19, 2 }
  0x4c   : > { %p256_p4 = scmp.lt.s32.totalorder %s4318_s11, 127  ;;  %p264_p7 = scmp.lt.s32.totalorder %s4319_s8, 7 }
  0x4d   : > { %p4321_p6 = scmp.ne.s32.totalorder %s5849_s18, 0 }
  0x4e   : > { %s6827_s11 = smov (!%p256_p4, %s4318_s11), 127  ;;  %s6829_s8 = smov (!%p264_p7, %s4319_s8), 7 }
  0x4f   : > { %s6080_s25 = scalar_lea.vmem %s6788_s0, %s6827_s11  ;;  %s4320_s28 = sshll.u32 %s6829_s8, 1 }
  0x50   : > { %s6085_s23 = scalar_lea.vmem %s6791_s3, %s4320_s28  ;;  %272 = sbr.rel (%p4321_p6) target bundleno = 87 (0x57), region = 44 }
  0x55   : > { %v5872_v0 = vmov 0.0  }
  0x56   : > { %273 = vst [vmem:[#allocation2] sm:$0xff] %v5872_v0 }
  0x57 PF: > { %v4945_v1 = vld [vmem:[%s6061_s26 + $0xe4] ss:$16 sps:$4 sm:$0xff]   ;;  %v4949_v3 = vld [vmem:[%s6061_s26 + $0xe0] ss:$16 sps:$4 sm:$0xff]   ;;  %v5873_v37 = vmov 1966171168   ;;  %v795_v39 = vlaneseq }
  0x58   : > { %v4947_v2 = vld [vmem:[%s6061_s26 + $0x2e4] ss:$16 sps:$4 sm:$0xff]   ;;  %3465 = vmatprep.subr.bf16.mxu0 %v4945_v1  ;;  %v4950_v4 = vld [vmem:[%s6061_s26 + $0x2e0] ss:$16 sps:$4 sm:$0xff]   ;;  %v793_v38 = vunpack.c.l.s4 %v5873_v37  ;;  %v275_v53 = vld [vmem:[%s6080_s25] sm:$0xff]  ;;  %p4834_p0 = scmp.ne.s32.totalorder %s5849_s18, 7 }
  0x59   : > { %3506 = vmatprep.subr.bf16.mxu1 %v4947_v2  ;;  %v4951_v5 = vld [vmem:[%s6061_s26 + $0xc4] ss:$16 sps:$4 sm:$0xff]   ;;  %3466 = vmatpush1.bf16.msra.mxu0 %v4949_v3  ;;  %v4955_v7 = vld [vmem:[%s6061_s26 + $0xc0] ss:$16 sps:$4 sm:$0xff]   ;;  %v6127_v44 = vshrl.u32 %v795_v39, 7  ;;  %v791_v2 = vcombine.high %v275_v53, %v275_v53 }
  0x5a   : > { %3507 = vmatpush1.bf16.msra.mxu1 %v4950_v4  ;;  %v4953_v6 = vld [vmem:[%s6061_s26 + $0x2c4] ss:$16 sps:$4 sm:$0xff]   ;;  %3467 = vmatprep.subr.bf16.mxu0 %v4951_v5  ;;  %v4956_v8 = vld [vmem:[%s6061_s26 + $0x2c0] ss:$16 sps:$4 sm:$0xff]   ;;  %v794_v43 = vunpack.c.0.s8 %v793_v38 }
  0x5b   : > { %3508 = vmatprep.subr.bf16.mxu1 %v4953_v6  ;;  %v4957_v9 = vld [vmem:[%s6061_s26 + $0xa4] ss:$16 sps:$4 sm:$0xff]   ;;  %v4961_v11 = vld [vmem:[%s6061_s26 + $0xa0] ss:$16 sps:$4 sm:$0xff]  }
  0x5c   : > { %v4959_v10 = vld [vmem:[%s6061_s26 + $0x2a4] ss:$16 sps:$4 sm:$0xff]   ;;  %v4962_v12 = vld [vmem:[%s6061_s26 + $0x2a0] ss:$16 sps:$4 sm:$0xff]   ;;  %v6135_v50 = vsub.s32 %v794_v43, %v6127_v44 }
  0x5d   : > { %3468 = vmatpush1.bf16.msra.mxu0 %v4955_v7  ;;  %v4963_v13 = vld [vmem:[%s6061_s26 + $0x84] ss:$16 sps:$4 sm:$0xff]   ;;  %v4967_v15 = vld [vmem:[%s6061_s26 + $0x80] ss:$16 sps:$4 sm:$0xff]  }
  0x5e   : > { %3509 = vmatpush1.bf16.msra.mxu1 %v4956_v8  ;;  %3469 = vmatprep.subr.bf16.mxu0 %v4957_v9  ;;  %v4965_v14 = vld [vmem:[%s6061_s26 + $0x284] ss:$16 sps:$4 sm:$0xff]   ;;  %v4968_v16 = vld [vmem:[%s6061_s26 + $0x280] ss:$16 sps:$4 sm:$0xff]   ;;  %v798_v55 = vrot.slane %v275_v53, %v6135_v50  ;;  %v6163_v7 = vrot.slane %v791_v2, %v6135_v50 }
  0x5f   : > { %3510 = vmatprep.subr.bf16.mxu1 %v4959_v10  ;;  %v4969_v17 = vld [vmem:[%s6061_s26 + $0x64] ss:$16 sps:$4 sm:$0xff]   ;;  %v4973_v19 = vld [vmem:[%s6061_s26 + $0x60] ss:$16 sps:$4 sm:$0xff]  }
  0x60   : > { %v4971_v18 = vld [vmem:[%s6061_s26 + $0x264] ss:$16 sps:$4 sm:$0xff]   ;;  %v4974_v20 = vld [vmem:[%s6061_s26 + $0x260] ss:$16 sps:$4 sm:$0xff]   ;;  %v806_v59 = vcombine.high %v798_v55, %v798_v55 }
  0x61   : > { %3470 = vmatpush1.bf16.msra.mxu0 %v4961_v11  ;;  %v4975_v21 = vld [vmem:[%s6061_s26 + $0x44] ss:$16 sps:$4 sm:$0xff]   ;;  %v4979_v23 = vld [vmem:[%s6061_s26 + $0x40] ss:$16 sps:$4 sm:$0xff]  }
  0x62   : > { %3511 = vmatpush1.bf16.msra.mxu1 %v4962_v12  ;;  %3471 = vmatprep.subr.bf16.mxu0 %v4963_v13  ;;  %v4977_v22 = vld [vmem:[%s6061_s26 + $0x244] ss:$16 sps:$4 sm:$0xff]   ;;  %v4980_v24 = vld [vmem:[%s6061_s26 + $0x240] ss:$16 sps:$4 sm:$0xff]   ;;  %v6147_v61 = vrot.slane %v806_v59, %v6135_v50  ;;  %v807_v12 = vcombine.high %v6163_v7, %v6163_v7 }
  0x63   : > { %3512 = vmatprep.subr.bf16.mxu1 %v4965_v14  ;;  %v4981_v25 = vld [vmem:[%s6061_s26 + $0x24] ss:$16 sps:$4 sm:$0xff]   ;;  %v4985_v27 = vld [vmem:[%s6061_s26 + $0x20] ss:$16 sps:$4 sm:$0xff]   ;;  %v6173_v14 = vrot.slane %v798_v55, %v6135_v50 }
  0x64   : > { %v4983_v26 = vld [vmem:[%s6061_s26 + $0x224] ss:$16 sps:$4 sm:$0xff]   ;;  %v4986_v28 = vld [vmem:[%s6061_s26 + $0x220] ss:$16 sps:$4 sm:$0xff]   ;;  %v6154_v1 = vcombine.high %v6147_v61, %v6147_v61  ;;  %3497 = vmatprep.mubr.bf16.mxu0 %v6147_v61 }
  0x65   : > { %3472 = vmatpush1.bf16.msra.mxu0 %v4967_v15  ;;  %v4987_v29 = vld [vmem:[%s6061_s26 + $0x4] ss:$16 sps:$4 sm:$0xff]   ;;  %v4991_v31 = vld [vmem:[%s6061_s26] ss:$16 sps:$4 sm:$0xff]  }
  0x66   : > { %3513 = vmatpush1.bf16.msra.mxu1 %v4968_v16  ;;  %3473 = vmatprep.subr.bf16.mxu0 %v4969_v17  ;;  %v4989_v30 = vld [vmem:[%s6061_s26 + $0x204] ss:$16 sps:$4 sm:$0xff]   ;;  %v4992_v32 = vld [vmem:[%s6061_s26 + $0x200] ss:$16 sps:$4 sm:$0xff]  }
  0x67   : > { %3514 = vmatprep.subr.bf16.mxu1 %v4971_v18  ;;  %v4993_v33 = vld [vmem:[%s6061_s26 + $0x1e4] ss:$16 sps:$4 sm:$0xff]   ;;  %v4997_v35 = vld [vmem:[%s6061_s26 + $0x1e0] ss:$16 sps:$4 sm:$0xff]   ;;  %3538 = vmatprep.mubr.bf16.mxu1 %v6154_v1  ;;  %v6179_v18 = vrot.slane %v807_v12, %v6135_v50 }
  0x68   : > { %v4995_v34 = vld [vmem:[%s6061_s26 + $0x3e4] ss:$16 sps:$4 sm:$0xff]   ;;  %v4998_v36 = vld [vmem:[%s6061_s26 + $0x3e0] ss:$16 sps:$4 sm:$0xff]  }
  0x69   : > { %3474 = vmatpush1.bf16.msra.mxu0 %v4973_v19  ;;  %v4999_v40 = vld [vmem:[%s6061_s26 + $0x1c4] ss:$16 sps:$4 sm:$0xff]   ;;  %v5003_v42 = vld [vmem:[%s6061_s26 + $0x1c0] ss:$16 sps:$4 sm:$0xff]   ;;  %v6183_v19 = vcombine.high %v6173_v14, %v6173_v14 }
  0x6a   : > { %3515 = vmatpush1.bf16.msra.mxu1 %v4974_v20  ;;  %3475 = vmatprep.subr.bf16.mxu0 %v4975_v21  ;;  %v5001_v41 = vld [vmem:[%s6061_s26 + $0x3c4] ss:$16 sps:$4 sm:$0xff]   ;;  %v5004_v45 = vld [vmem:[%s6061_s26 + $0x3c0] ss:$16 sps:$4 sm:$0xff]  }
  0x6b   : > { %3516 = vmatprep.subr.bf16.mxu1 %v4977_v22  ;;  %v5005_v46 = vld [vmem:[%s6061_s26 + $0x1a4] ss:$16 sps:$4 sm:$0xff]   ;;  %v5009_v48 = vld [vmem:[%s6061_s26 + $0x1a0] ss:$16 sps:$4 sm:$0xff]  }
  0x6c   : > { %v5007_v47 = vld [vmem:[%s6061_s26 + $0x3a4] ss:$16 sps:$4 sm:$0xff]   ;;  %v5010_v49 = vld [vmem:[%s6061_s26 + $0x3a0] ss:$16 sps:$4 sm:$0xff]  }
  0x6d   : > { %3476 = vmatpush1.bf16.msra.mxu0 %v4979_v23  ;;  %v5011_v51 = vld [vmem:[%s6061_s26 + $0x184] ss:$16 sps:$4 sm:$0xff]   ;;  %v5015_v54 = vld [vmem:[%s6061_s26 + $0x180] ss:$16 sps:$4 sm:$0xff]  }
  0x6e   : > { %3517 = vmatpush1.bf16.msra.mxu1 %v4980_v24  ;;  %3477 = vmatprep.subr.bf16.mxu0 %v4981_v25  ;;  %v5013_v52 = vld [vmem:[%s6061_s26 + $0x384] ss:$16 sps:$4 sm:$0xff]   ;;  %v5016_v56 = vld [vmem:[%s6061_s26 + $0x380] ss:$16 sps:$4 sm:$0xff]   ;;  %v6191_v24 = vcombine.high %v6179_v18, %v6179_v18 }
  0x6f   : > { %3518 = vmatprep.subr.bf16.mxu1 %v4983_v26  ;;  %v5017_v57 = vld [vmem:[%s6061_s26 + $0x164] ss:$16 sps:$4 sm:$0xff]   ;;  %v5021_v60 = vld [vmem:[%s6061_s26 + $0x160] ss:$16 sps:$4 sm:$0xff]  }
  0x70   : > { %v5019_v58 = vld [vmem:[%s6061_s26 + $0x364] ss:$16 sps:$4 sm:$0xff]   ;;  %v5022_v62 = vld [vmem:[%s6061_s26 + $0x360] ss:$16 sps:$4 sm:$0xff]  }
  0x71   : > { %3478 = vmatpush1.bf16.msra.mxu0 %v4985_v27  ;;  %v5023_v63 = vld [vmem:[%s6061_s26 + $0x144] ss:$16 sps:$4 sm:$0xff]   ;;  %v5027_v3 = vld [vmem:[%s6061_s26 + $0x140] ss:$16 sps:$4 sm:$0xff]  }
  0x72   : > { %3519 = vmatpush1.bf16.msra.mxu1 %v4986_v28  ;;  %3479 = vmatprep.subr.bf16.mxu0 %v4987_v29  ;;  %v5025_v0 = vld [vmem:[%s6061_s26 + $0x344] ss:$16 sps:$4 sm:$0xff]   ;;  %v5028_v4 = vld [vmem:[%s6061_s26 + $0x340] ss:$16 sps:$4 sm:$0xff]  }
  0x73   : > { %3520 = vmatprep.subr.bf16.mxu1 %v4989_v30  ;;  %v5029_v5 = vld [vmem:[%s6061_s26 + $0x124] ss:$16 sps:$4 sm:$0xff]   ;;  %v5033_v8 = vld [vmem:[%s6061_s26 + $0x120] ss:$16 sps:$4 sm:$0xff]  }
  0x74   : > { %v5031_v6 = vld [vmem:[%s6061_s26 + $0x324] ss:$16 sps:$4 sm:$0xff]   ;;  %v5034_v9 = vld [vmem:[%s6061_s26 + $0x320] ss:$16 sps:$4 sm:$0xff]  }
  0x75   : > { %3480 = vmatpush1.bf16.msra.mxu0 %v4991_v31  ;;  %v5035_v10 = vld [vmem:[%s6061_s26 + $0x104] ss:$16 sps:$4 sm:$0xff]   ;;  %v5039_v13 = vld [vmem:[%s6061_s26 + $0x100] ss:$16 sps:$4 sm:$0xff]  }
  0x76   : > { %3521 = vmatpush1.bf16.msra.mxu1 %v4992_v32  ;;  %3481 = vmatprep.subr.bf16.mxu0 %v4993_v33  ;;  %v5037_v11 = vld [vmem:[%s6061_s26 + $0x304] ss:$16 sps:$4 sm:$0xff]   ;;  %v5040_v15 = vld [vmem:[%s6061_s26 + $0x300] ss:$16 sps:$4 sm:$0xff]  }
  0x77   : > { %3522 = vmatprep.subr.bf16.mxu1 %v4995_v34  ;;  %v5043_v16 = vld [vmem:[%s6061_s26 + $0x4e4] ss:$16 sps:$4 sm:$0xff]   ;;  %v5041_v20 = vld [vmem:[%s6061_s26 + $0x4e0] ss:$16 sps:$4 sm:$0xff]  }
  0x78   : > { %v5046_v17 = vld [vmem:[%s6061_s26 + $0x6e4] ss:$16 sps:$4 sm:$0xff]   ;;  %v5044_v21 = vld [vmem:[%s6061_s26 + $0x6e0] ss:$16 sps:$4 sm:$0xff]  }
  0x79   : > { %3482 = vmatpush2.bf16.msra.mxu0 %v4997_v35  ;;  %v5049_v22 = vld [vmem:[%s6061_s26 + $0x4c4] ss:$16 sps:$4 sm:$0xff]   ;;  %v5047_v25 = vld [vmem:[%s6061_s26 + $0x4c0] ss:$16 sps:$4 sm:$0xff]  }
  0x7a   : > { %3523 = vmatpush2.bf16.msra.mxu1 %v4998_v36  ;;  %3483 = vmatprep.subr.bf16.mxu0 %v4999_v40  ;;  %v5052_v23 = vld [vmem:[%s6061_s26 + $0x6c4] ss:$16 sps:$4 sm:$0xff]   ;;  %v5050_v26 = vld [vmem:[%s6061_s26 + $0x6c0] ss:$16 sps:$4 sm:$0xff]  }
  0x7b   : > { %3524 = vmatprep.subr.bf16.mxu1 %v5001_v41  ;;  %v5055_v27 = vld [vmem:[%s6061_s26 + $0x4a4] ss:$16 sps:$4 sm:$0xff]   ;;  %v5053_v29 = vld [vmem:[%s6061_s26 + $0x4a0] ss:$16 sps:$4 sm:$0xff]  }
  0x7c   : > { %v5058_v28 = vld [vmem:[%s6061_s26 + $0x6a4] ss:$16 sps:$4 sm:$0xff]   ;;  %v5056_v30 = vld [vmem:[%s6061_s26 + $0x6a0] ss:$16 sps:$4 sm:$0xff]  }
  0x7d   : > { %3484 = vmatpush2.bf16.msra.mxu0 %v5003_v42  ;;  %v5061_v31 = vld [vmem:[%s6061_s26 + $0x484] ss:$16 sps:$4 sm:$0xff]   ;;  %v5059_v33 = vld [vmem:[%s6061_s26 + $0x480] ss:$16 sps:$4 sm:$0xff]  }
  0x7e   : > { %3525 = vmatpush2.bf16.msra.mxu1 %v5004_v45  ;;  %3485 = vmatprep.subr.bf16.mxu0 %v5005_v46  ;;  %v5064_v32 = vld [vmem:[%s6061_s26 + $0x684] ss:$16 sps:$4 sm:$0xff]   ;;  %v5062_v34 = vld [vmem:[%s6061_s26 + $0x680] ss:$16 sps:$4 sm:$0xff]  }
  0x7f   : > { %3526 = vmatprep.subr.bf16.mxu1 %v5007_v47  ;;  %v5067_v35 = vld [vmem:[%s6061_s26 + $0x464] ss:$16 sps:$4 sm:$0xff]   ;;  %v5065_v37 = vld [vmem:[%s6061_s26 + $0x460] ss:$16 sps:$4 sm:$0xff]  }
  0x80   : > { %v5070_v36 = vld [vmem:[%s6061_s26 + $0x664] ss:$16 sps:$4 sm:$0xff]   ;;  %v5068_v38 = vld [vmem:[%s6061_s26 + $0x660] ss:$16 sps:$4 sm:$0xff]  }
  0x81   : > { %3486 = vmatpush2.bf16.msra.mxu0 %v5009_v48  ;;  %v5073_v39 = vld [vmem:[%s6061_s26 + $0x444] ss:$16 sps:$4 sm:$0xff]   ;;  %v5071_v41 = vld [vmem:[%s6061_s26 + $0x440] ss:$16 sps:$4 sm:$0xff]  }
  0x82   : > { %3527 = vmatpush2.bf16.msra.mxu1 %v5010_v49  ;;  %3487 = vmatprep.subr.bf16.mxu0 %v5011_v51  ;;  %v5076_v40 = vld [vmem:[%s6061_s26 + $0x644] ss:$16 sps:$4 sm:$0xff]   ;;  %v5074_v42 = vld [vmem:[%s6061_s26 + $0x640] ss:$16 sps:$4 sm:$0xff]  }
  0x83   : > { %3528 = vmatprep.subr.bf16.mxu1 %v5013_v52  ;;  %v5079_v43 = vld [vmem:[%s6061_s26 + $0x424] ss:$16 sps:$4 sm:$0xff]   ;;  %v5077_v46 = vld [vmem:[%s6061_s26 + $0x420] ss:$16 sps:$4 sm:$0xff]  }
  0x84   : > { %v5082_v45 = vld [vmem:[%s6061_s26 + $0x624] ss:$16 sps:$4 sm:$0xff]   ;;  %v5080_v47 = vld [vmem:[%s6061_s26 + $0x620] ss:$16 sps:$4 sm:$0xff]  }
  0x85   : > { %3488 = vmatpush2.bf16.msra.mxu0 %v5015_v54  ;;  %v5085_v48 = vld [vmem:[%s6061_s26 + $0x404] ss:$16 sps:$4 sm:$0xff]   ;;  %v5083_v51 = vld [vmem:[%s6061_s26 + $0x400] ss:$16 sps:$4 sm:$0xff]  }
  0x86   : > { %3529 = vmatpush2.bf16.msra.mxu1 %v5016_v56  ;;  %3489 = vmatprep.subr.bf16.mxu0 %v5017_v57  ;;  %v5088_v49 = vld [vmem:[%s6061_s26 + $0x604] ss:$16 sps:$4 sm:$0xff]   ;;  %v5086_v52 = vld [vmem:[%s6061_s26 + $0x600] ss:$16 sps:$4 sm:$0xff]  }
  0x87   : > { %3530 = vmatprep.subr.bf16.mxu1 %v5019_v58  ;;  %v5091_v53 = vld [vmem:[%s6061_s26 + $0x5e4] ss:$16 sps:$4 sm:$0xff]   ;;  %v5089_v55 = vld [vmem:[%s6061_s26 + $0x5e0] ss:$16 sps:$4 sm:$0xff]  }
  0x88   : > { %v5094_v54 = vld [vmem:[%s6061_s26 + $0x7e4] ss:$16 sps:$4 sm:$0xff]   ;;  %v5092_v56 = vld [vmem:[%s6061_s26 + $0x7e0] ss:$16 sps:$4 sm:$0xff]  }
  0x89   : > { %3490 = vmatpush2.bf16.msra.mxu0 %v5021_v60  ;;  %v5097_v57 = vld [vmem:[%s6061_s26 + $0x5c4] ss:$16 sps:$4 sm:$0xff]   ;;  %v5095_v59 = vld [vmem:[%s6061_s26 + $0x5c0] ss:$16 sps:$4 sm:$0xff]  }
  0x8a   : > { %3531 = vmatpush2.bf16.msra.mxu1 %v5022_v62  ;;  %3491 = vmatprep.subr.bf16.mxu0 %v5023_v63  ;;  %v5100_v58 = vld [vmem:[%s6061_s26 + $0x7c4] ss:$16 sps:$4 sm:$0xff]   ;;  %v5098_v60 = vld [vmem:[%s6061_s26 + $0x7c0] ss:$16 sps:$4 sm:$0xff]  }
  0x8b   : > { %3532 = vmatprep.subr.bf16.mxu1 %v5025_v0  ;;  %v5103_v62 = vld [vmem:[%s6061_s26 + $0x5a4] ss:$16 sps:$4 sm:$0xff]   ;;  %v5101_v0 = vld [vmem:[%s6061_s26 + $0x5a0] ss:$16 sps:$4 sm:$0xff]  }
  0x8c   : > { %v5106_v63 = vld [vmem:[%s6061_s26 + $0x7a4] ss:$16 sps:$4 sm:$0xff]   ;;  %v5104_v2 = vld [vmem:[%s6061_s26 + $0x7a0] ss:$16 sps:$4 sm:$0xff]  }
  0x8d   : > { %3492 = vmatpush2.bf16.msra.mxu0 %v5027_v3  ;;  %v5109_v3 = vld [vmem:[%s6061_s26 + $0x584] ss:$16 sps:$4 sm:$0xff]  }
  0x8e   : > { %3533 = vmatpush2.bf16.msra.mxu1 %v5028_v4  ;;  %3493 = vmatprep.subr.bf16.mxu0 %v5029_v5  ;;  %v5112_v4 = vld [vmem:[%s6061_s26 + $0x784] ss:$16 sps:$4 sm:$0xff]   ;;  %v5107_v5 = vld [vmem:[%s6061_s26 + $0x580] ss:$16 sps:$4 sm:$0xff]  }
  0x8f   : > { %3534 = vmatprep.subr.bf16.mxu1 %v5031_v6  ;;  %v5110_v6 = vld [vmem:[%s6061_s26 + $0x780] ss:$16 sps:$4 sm:$0xff]   ;;  %v5121_v12 = vld [vmem:[%s6061_s26 + $0x544] ss:$16 sps:$4 sm:$0xff]  }
  0x91   : > { %3494 = vmatpush2.bf16.msra.mxu0 %v5033_v8  ;;  %v5115_v8 = vld [vmem:[%s6061_s26 + $0x564] ss:$16 sps:$4 sm:$0xff]  }
  0x92   : > { %3535 = vmatpush2.bf16.msra.mxu1 %v5034_v9  ;;  %3495 = vmatprep.subr.bf16.mxu0 %v5035_v10  ;;  %v5118_v9 = vld [vmem:[%s6061_s26 + $0x764] ss:$16 sps:$4 sm:$0xff]   ;;  %v5113_v10 = vld [vmem:[%s6061_s26 + $0x560] ss:$16 sps:$4 sm:$0xff]  }
  0x93   : > { %3536 = vmatprep.subr.bf16.mxu1 %v5037_v11  ;;  %v5116_v11 = vld [vmem:[%s6061_s26 + $0x760] ss:$16 sps:$4 sm:$0xff]  }
  0x95   : > { %3496 = vmatpush2.bf16.msra.mxu0 %v5039_v13  ;;  %v5124_v13 = vld [vmem:[%s6061_s26 + $0x744] ss:$16 sps:$4 sm:$0xff]  }
  0x96   : > { %3537 = vmatpush2.bf16.msra.mxu1 %v5040_v15  ;;  %3547 = vmatprep.subr.bf16.mxu0 %v5043_v16  ;;  %v5119_v15 = vld [vmem:[%s6061_s26 + $0x540] ss:$16 sps:$4 sm:$0xff]  }
  0x97   : > { %3588 = vmatprep.subr.bf16.mxu1 %v5046_v17  ;;  %v5122_v16 = vld [vmem:[%s6061_s26 + $0x740] ss:$16 sps:$4 sm:$0xff]   ;;  %v5127_v17 = vld [vmem:[%s6061_s26 + $0x524] ss:$16 sps:$4 sm:$0xff]  }
  0x98   : > { %3498 = vmatmul.mubr.bf16.vlgmr.msra.gmra.mxu0 %v6173_v14 }
  0x99   : > { %3539 = vmatmul.mubr.bf16.vlgmr.msra.gmra.mxu1 %v6183_v19  ;;  %3548 = vmatpush1.bf16.msra.mxu0 %v5041_v20  ;;  %v5130_v20 = vld [vmem:[%s6061_s26 + $0x724] ss:$16 sps:$4 sm:$0xff]  }
  0x9a   : > { %3589 = vmatpush1.bf16.msra.mxu1 %v5044_v21  ;;  %3549 = vmatprep.subr.bf16.mxu0 %v5049_v22  ;;  %v5125_v21 = vld [vmem:[%s6061_s26 + $0x520] ss:$16 sps:$4 sm:$0xff]  }
  0x9b   : > { %3590 = vmatprep.subr.bf16.mxu1 %v5052_v23  ;;  %3579 = vmatprep.mubr.bf16.mxu0 %v6179_v18  ;;  %v5128_v22 = vld [vmem:[%s6061_s26 + $0x720] ss:$16 sps:$4 sm:$0xff]   ;;  %v5133_v23 = vld [vmem:[%s6061_s26 + $0x504] ss:$16 sps:$4 sm:$0xff]  }
  0x9c   : > { %3620 = vmatprep.mubr.bf16.mxu1 %v6191_v24 }
  0x9d   : > { %3550 = vmatpush1.bf16.msra.mxu0 %v5047_v25  ;;  %v5136_v25 = vld [vmem:[%s6061_s26 + $0x704] ss:$16 sps:$4 sm:$0xff]  }
  0x9e   : > { %3591 = vmatpush1.bf16.msra.mxu1 %v5050_v26  ;;  %3551 = vmatprep.subr.bf16.mxu0 %v5055_v27  ;;  %v5131_v26 = vld [vmem:[%s6061_s26 + $0x500] ss:$16 sps:$4 sm:$0xff]   ;;  %v6256_v27 = vrot.slane %v6163_v7, %v6135_v50 }
  0x9f   : > { %3592 = vmatprep.subr.bf16.mxu1 %v5058_v28  ;;  %v5134_v28 = vld [vmem:[%s6061_s26 + $0x700] ss:$16 sps:$4 sm:$0xff]  }
  0xa0   : > { %v5141_v7 = vld [vmem:[%s6061_s26 + $0xae0] ss:$16 sps:$4 sm:$0xff]  }
  0xa1   : > { %3552 = vmatpush1.bf16.msra.mxu0 %v5053_v29  ;;  %v5140_v29 = vld [vmem:[%s6061_s26 + $0x8e4] ss:$16 sps:$4 sm:$0xff]  }
  0xa2   : > { %3593 = vmatpush1.bf16.msra.mxu1 %v5056_v30  ;;  %3553 = vmatprep.subr.bf16.mxu0 %v5061_v31  ;;  %v5143_v30 = vld [vmem:[%s6061_s26 + $0xae4] ss:$16 sps:$4 sm:$0xff]   ;;  %v6263_v31 = vcombine.high %v6256_v27, %v6256_v27 }
  0xa3   : > { %3594 = vmatprep.subr.bf16.mxu1 %v5064_v32  ;;  %v5138_v32 = vld [vmem:[%s6061_s26 + $0x8e0] ss:$16 sps:$4 sm:$0xff]  }
  0xa5   : > { %3554 = vmatpush1.bf16.msra.mxu0 %v5059_v33  ;;  %v6268_v33 = vld [vmem:[%s6080_s25 + $0x8] sm:$0xff] }
  0xa6   : > { %3595 = vmatpush1.bf16.msra.mxu1 %v5062_v34  ;;  %3555 = vmatprep.subr.bf16.mxu0 %v5067_v35  ;;  %v5146_v34 = vld [vmem:[%s6061_s26 + $0x8c4] ss:$16 sps:$4 sm:$0xff]  }
  0xa7   : > { %3596 = vmatprep.subr.bf16.mxu1 %v5070_v36  ;;  %v5149_v35 = vld [vmem:[%s6061_s26 + $0xac4] ss:$16 sps:$4 sm:$0xff]   ;;  %v6274_v36 = vrot.slane %v6268_v33, %v6135_v50 }
  0xa9   : > { %3556 = vmatpush1.bf16.msra.mxu0 %v5065_v37  ;;  %v855_v37 = vcombine.high %v6274_v36, %v6274_v36 }
  0xaa   : > { %3597 = vmatpush1.bf16.msra.mxu1 %v5068_v38  ;;  %3557 = vmatprep.subr.bf16.mxu0 %v5073_v39  ;;  %v5144_v38 = vld [vmem:[%s6061_s26 + $0x8c0] ss:$16 sps:$4 sm:$0xff]  }
  0xab   : > { %3598 = vmatprep.subr.bf16.mxu1 %v5076_v40  ;;  %v5147_v39 = vld [vmem:[%s6061_s26 + $0xac0] ss:$16 sps:$4 sm:$0xff]   ;;  %v5152_v40 = vld [vmem:[%s6061_s26 + $0x8a4] ss:$16 sps:$4 sm:$0xff]  }
  0xad   : > { %3558 = vmatpush1.bf16.msra.mxu0 %v5071_v41  ;;  %v5155_v41 = vld [vmem:[%s6061_s26 + $0xaa4] ss:$16 sps:$4 sm:$0xff]  }
  0xae   : > { %3599 = vmatpush1.bf16.msra.mxu1 %v5074_v42  ;;  %3559 = vmatprep.subr.bf16.mxu0 %v5079_v43  ;;  %v6285_v42 = vrot.slane %v855_v37, %v6135_v50  ;;  %v5216_v37 = vld [vmem:[%s6061_s26 + $0x940] ss:$16 sps:$4 sm:$0xff]  }
  0xaf   : > { %3600 = vmatprep.subr.bf16.mxu1 %v5082_v45  ;;  %v5150_v45 = vld [vmem:[%s6061_s26 + $0x8a0] ss:$16 sps:$4 sm:$0xff]  }
  0xb0   : > { %v6290_v43 = vcombine.high %v6285_v42, %v6285_v42 }
  0xb1   : > { %3560 = vmatpush1.bf16.msra.mxu0 %v5077_v46  ;;  %v5153_v46 = vld [vmem:[%s6061_s26 + $0xaa0] ss:$16 sps:$4 sm:$0xff]  }
  0xb2   : > { %3601 = vmatpush1.bf16.msra.mxu1 %v5080_v47  ;;  %3561 = vmatprep.subr.bf16.mxu0 %v5085_v48  ;;  %v5158_v47 = vld [vmem:[%s6061_s26 + $0x884] ss:$16 sps:$4 sm:$0xff]  }
  0xb3   : > { %3602 = vmatprep.subr.bf16.mxu1 %v5088_v49  ;;  %v5161_v48 = vld [vmem:[%s6061_s26 + $0xa84] ss:$16 sps:$4 sm:$0xff]   ;;  %v5156_v49 = vld [vmem:[%s6061_s26 + $0x880] ss:$16 sps:$4 sm:$0xff]  }
  0xb5   : > { %3562 = vmatpush1.bf16.msra.mxu0 %v5083_v51  ;;  %v5159_v51 = vld [vmem:[%s6061_s26 + $0xa80] ss:$16 sps:$4 sm:$0xff]  }
  0xb6   : > { %3603 = vmatpush1.bf16.msra.mxu1 %v5086_v52  ;;  %3563 = vmatprep.subr.bf16.mxu0 %v5091_v53  ;;  %v5164_v52 = vld [vmem:[%s6061_s26 + $0x864] ss:$16 sps:$4 sm:$0xff]  }
  0xb7   : > { %3604 = vmatprep.subr.bf16.mxu1 %v5094_v54  ;;  %v5167_v53 = vld [vmem:[%s6061_s26 + $0xa64] ss:$16 sps:$4 sm:$0xff]   ;;  %v5162_v54 = vld [vmem:[%s6061_s26 + $0x860] ss:$16 sps:$4 sm:$0xff]  }
  0xb9   : > { %3564 = vmatpush2.bf16.msra.mxu0 %v5089_v55  ;;  %v5165_v55 = vld [vmem:[%s6061_s26 + $0xa60] ss:$16 sps:$4 sm:$0xff]  }
  0xba   : > { %3605 = vmatpush2.bf16.msra.mxu1 %v5092_v56  ;;  %3565 = vmatprep.subr.bf16.mxu0 %v5097_v57  ;;  %v5170_v56 = vld [vmem:[%s6061_s26 + $0x844] ss:$16 sps:$4 sm:$0xff]  }
  0xbb   : > { %3606 = vmatprep.subr.bf16.mxu1 %v5100_v58  ;;  %v5173_v57 = vld [vmem:[%s6061_s26 + $0xa44] ss:$16 sps:$4 sm:$0xff]   ;;  %v5168_v58 = vld [vmem:[%s6061_s26 + $0x840] ss:$16 sps:$4 sm:$0xff]  }
  0xbd   : > { %3566 = vmatpush2.bf16.msra.mxu0 %v5095_v59  ;;  %v5171_v59 = vld [vmem:[%s6061_s26 + $0xa40] ss:$16 sps:$4 sm:$0xff]  }
  0xbe   : > { %3607 = vmatpush2.bf16.msra.mxu1 %v5098_v60  ;;  %3567 = vmatprep.subr.bf16.mxu0 %v5103_v62  ;;  %v5176_v60 = vld [vmem:[%s6061_s26 + $0x824] ss:$16 sps:$4 sm:$0xff]  }
  0xbf   : > { %3608 = vmatprep.subr.bf16.mxu1 %v5106_v63  ;;  %v5179_v62 = vld [vmem:[%s6061_s26 + $0xa24] ss:$16 sps:$4 sm:$0xff]   ;;  %v5174_v63 = vld [vmem:[%s6061_s26 + $0x820] ss:$16 sps:$4 sm:$0xff]  }
  0xc1   : > { %3568 = vmatpush2.bf16.msra.mxu0 %v5101_v0  ;;  %v5177_v0 = vld [vmem:[%s6061_s26 + $0xa20] ss:$16 sps:$4 sm:$0xff]  }
  0xc2   : > { %3609 = vmatpush2.bf16.msra.mxu1 %v5104_v2  ;;  %3569 = vmatprep.subr.bf16.mxu0 %v5109_v3  ;;  %v5182_v2 = vld [vmem:[%s6061_s26 + $0x804] ss:$16 sps:$4 sm:$0xff]  }
  0xc3   : > { %3610 = vmatprep.subr.bf16.mxu1 %v5112_v4  ;;  %v5185_v3 = vld [vmem:[%s6061_s26 + $0xa04] ss:$16 sps:$4 sm:$0xff]   ;;  %v5180_v4 = vld [vmem:[%s6061_s26 + $0x800] ss:$16 sps:$4 sm:$0xff]  }
  0xc5   : > { %3570 = vmatpush2.bf16.msra.mxu0 %v5107_v5  ;;  %v5183_v5 = vld [vmem:[%s6061_s26 + $0xa00] ss:$16 sps:$4 sm:$0xff]  }
  0xc6   : > { %3611 = vmatpush2.bf16.msra.mxu1 %v5110_v6  ;;  %3571 = vmatprep.subr.bf16.mxu0 %v5115_v8  ;;  %v5188_v6 = vld [vmem:[%s6061_s26 + $0x9e4] ss:$16 sps:$4 sm:$0xff]  }
  0xc7   : > { %3612 = vmatprep.subr.bf16.mxu1 %v5118_v9  ;;  %v5191_v8 = vld [vmem:[%s6061_s26 + $0xbe4] ss:$16 sps:$4 sm:$0xff]   ;;  %v5186_v9 = vld [vmem:[%s6061_s26 + $0x9e0] ss:$16 sps:$4 sm:$0xff]  }
  0xc9   : > { %3572 = vmatpush2.bf16.msra.mxu0 %v5113_v10  ;;  %v5189_v10 = vld [vmem:[%s6061_s26 + $0xbe0] ss:$16 sps:$4 sm:$0xff]  }
  0xca   : > { %3613 = vmatpush2.bf16.msra.mxu1 %v5116_v11  ;;  %3573 = vmatprep.subr.bf16.mxu0 %v5121_v12  ;;  %v5194_v11 = vld [vmem:[%s6061_s26 + $0x9c4] ss:$16 sps:$4 sm:$0xff]  }
  0xcb   : > { %3614 = vmatprep.subr.bf16.mxu1 %v5124_v13  ;;  %v5197_v12 = vld [vmem:[%s6061_s26 + $0xbc4] ss:$16 sps:$4 sm:$0xff]   ;;  %v5192_v13 = vld [vmem:[%s6061_s26 + $0x9c0] ss:$16 sps:$4 sm:$0xff]  }
  0xcd   : > { %3574 = vmatpush2.bf16.msra.mxu0 %v5119_v15  ;;  %v5195_v15 = vld [vmem:[%s6061_s26 + $0xbc0] ss:$16 sps:$4 sm:$0xff]  }
  0xce   : > { %3615 = vmatpush2.bf16.msra.mxu1 %v5122_v16  ;;  %3575 = vmatprep.subr.bf16.mxu0 %v5127_v17  ;;  %v5200_v16 = vld [vmem:[%s6061_s26 + $0x9a4] ss:$16 sps:$4 sm:$0xff]  }
  0xcf   : > { %3616 = vmatprep.subr.bf16.mxu1 %v5130_v20  ;;  %v5203_v17 = vld [vmem:[%s6061_s26 + $0xba4] ss:$16 sps:$4 sm:$0xff]   ;;  %v5198_v20 = vld [vmem:[%s6061_s26 + $0x9a0] ss:$16 sps:$4 sm:$0xff]  }
  0xd1   : > { %3576 = vmatpush2.bf16.msra.mxu0 %v5125_v21  ;;  %v5201_v21 = vld [vmem:[%s6061_s26 + $0xba0] ss:$16 sps:$4 sm:$0xff]  }
  0xd2   : > { %3617 = vmatpush2.bf16.msra.mxu1 %v5128_v22  ;;  %3577 = vmatprep.subr.bf16.mxu0 %v5133_v23  ;;  %v5206_v22 = vld [vmem:[%s6061_s26 + $0x984] ss:$16 sps:$4 sm:$0xff]  }
  0xd3   : > { %3618 = vmatprep.subr.bf16.mxu1 %v5136_v25  ;;  %v5209_v23 = vld [vmem:[%s6061_s26 + $0xb84] ss:$16 sps:$4 sm:$0xff]   ;;  %v5204_v25 = vld [vmem:[%s6061_s26 + $0x980] ss:$16 sps:$4 sm:$0xff]  }
  0xd5   : > { %3578 = vmatpush2.bf16.msra.mxu0 %v5131_v26  ;;  %v5207_v26 = vld [vmem:[%s6061_s26 + $0xb80] ss:$16 sps:$4 sm:$0xff]  }
  0xd6   : > { %3619 = vmatpush2.bf16.msra.mxu1 %v5134_v28  ;;  %3629 = vmatprep.subr.bf16.mxu0 %v5140_v29  ;;  %v5212_v28 = vld [vmem:[%s6061_s26 + $0x964] ss:$16 sps:$4 sm:$0xff]  }
  0xd7   : > { %3670 = vmatprep.subr.bf16.mxu1 %v5143_v30  ;;  %v5215_v29 = vld [vmem:[%s6061_s26 + $0xb64] ss:$16 sps:$4 sm:$0xff]   ;;  %v5210_v30 = vld [vmem:[%s6061_s26 + $0x960] ss:$16 sps:$4 sm:$0xff]  }
  0xd8   : > { %3580 = vmatmul.mubr.bf16.vlgmr.msra.gmra.mxu0 %v6256_v27 }
  0xd9   : > { %3621 = vmatmul.mubr.bf16.vlgmr.msra.gmra.mxu1 %v6263_v31  ;;  %3630 = vmatpush1.bf16.msra.mxu0 %v5138_v32  ;;  %v5213_v32 = vld [vmem:[%s6061_s26 + $0xb60] ss:$16 sps:$4 sm:$0xff]  }
  0xda   : > { %3671 = vmatpush1.bf16.msra.mxu1 %v5141_v7  ;;  %3631 = vmatprep.subr.bf16.mxu0 %v5146_v34  ;;  %v5218_v7 = vld [vmem:[%s6061_s26 + $0x944] ss:$16 sps:$4 sm:$0xff]  }
  0xdb   : > { %3672 = vmatprep.subr.bf16.mxu1 %v5149_v35  ;;  %3661 = vmatprep.mubr.bf16.mxu0 %v6285_v42  ;;  %v5221_v34 = vld [vmem:[%s6061_s26 + $0xb44] ss:$16 sps:$4 sm:$0xff]   ;;  %v840_v35 = vcombine.high %v6268_v33, %v6268_v33  ;;  %v5222_v33 = vld [vmem:[%s6061_s26 + $0x920] ss:$16 sps:$4 sm:$0xff]  }
  0xdc   : > { %3702 = vmatprep.mubr.bf16.mxu1 %v6290_v43 }
  0xdd   : > { %3632 = vmatpush1.bf16.msra.mxu0 %v5144_v38  ;;  %v5219_v38 = vld [vmem:[%s6061_s26 + $0xb40] ss:$16 sps:$4 sm:$0xff]  }
  0xde   : > { %3673 = vmatpush1.bf16.msra.mxu1 %v5147_v39  ;;  %3633 = vmatprep.subr.bf16.mxu0 %v5152_v40  ;;  %v5224_v39 = vld [vmem:[%s6061_s26 + $0x924] ss:$16 sps:$4 sm:$0xff]  }
  0xdf   : > { %3674 = vmatprep.subr.bf16.mxu1 %v5155_v41  ;;  %v5227_v40 = vld [vmem:[%s6061_s26 + $0xb24] ss:$16 sps:$4 sm:$0xff]   ;;  %v6344_v41 = vrot.slane %v840_v35, %v6135_v50  ;;  %v5285_v35 = vld [vmem:[%s6061_s26 + $0xfe0] ss:$16 sps:$4 sm:$0xff]  }
  0xe1   : > { %3634 = vmatpush1.bf16.msra.mxu0 %v5150_v45  ;;  %v5225_v45 = vld [vmem:[%s6061_s26 + $0xb20] ss:$16 sps:$4 sm:$0xff]  }
  0xe2   : > { %3675 = vmatpush1.bf16.msra.mxu1 %v5153_v46  ;;  %3635 = vmatprep.subr.bf16.mxu0 %v5158_v47  ;;  %v5230_v46 = vld [vmem:[%s6061_s26 + $0x904] ss:$16 sps:$4 sm:$0xff]  }
  0xe3   : > { %3676 = vmatprep.subr.bf16.mxu1 %v5161_v48  ;;  %v5233_v47 = vld [vmem:[%s6061_s26 + $0xb04] ss:$16 sps:$4 sm:$0xff]   ;;  %v856_v48 = vcombine.high %v6344_v41, %v6344_v41 }
  0xe5   : > { %3636 = vmatpush1.bf16.msra.mxu0 %v5156_v49  ;;  %v6354_v49 = vrot.slane %v6274_v36, %v6135_v50  ;;  %v5234_v36 = vld [vmem:[%s6061_s26 + $0xce0] ss:$16 sps:$4 sm:$0xff]  }
  0xe6   : > { %3677 = vmatpush1.bf16.msra.mxu1 %v5159_v51  ;;  %3637 = vmatprep.subr.bf16.mxu0 %v5164_v52  ;;  %v5228_v51 = vld [vmem:[%s6061_s26 + $0x900] ss:$16 sps:$4 sm:$0xff]  }
  0xe7   : > { %3678 = vmatprep.subr.bf16.mxu1 %v5167_v53  ;;  %v5231_v52 = vld [vmem:[%s6061_s26 + $0xb00] ss:$16 sps:$4 sm:$0xff]   ;;  %v5236_v53 = vld [vmem:[%s6061_s26 + $0xce4] ss:$16 sps:$4 sm:$0xff]  }
  0xe9   : > { %3638 = vmatpush1.bf16.msra.mxu0 %v5162_v54  ;;  %v5239_v54 = vld [vmem:[%s6061_s26 + $0xee4] ss:$16 sps:$4 sm:$0xff]  }
  0xea   : > { %3679 = vmatpush1.bf16.msra.mxu1 %v5165_v55  ;;  %3639 = vmatprep.subr.bf16.mxu0 %v5170_v56  ;;  %v6361_v55 = vrot.slane %v856_v48, %v6135_v50  ;;  %v6365_v56 = vcombine.high %v6354_v49, %v6354_v49  ;;  %v5302_v48 = vld [vmem:[%s6061_s26 + $0xd84] ss:$16 sps:$4 sm:$0xff]  }
  0xeb   : > { %3680 = vmatprep.subr.bf16.mxu1 %v5173_v57  ;;  %v5237_v57 = vld [vmem:[%s6061_s26 + $0xee0] ss:$16 sps:$4 sm:$0xff]  }
  0xed   : > { %3640 = vmatpush1.bf16.msra.mxu0 %v5168_v58  ;;  %v5242_v58 = vld [vmem:[%s6061_s26 + $0xcc4] ss:$16 sps:$4 sm:$0xff]  }
  0xee   : > { %3681 = vmatpush1.bf16.msra.mxu1 %v5171_v59  ;;  %3641 = vmatprep.subr.bf16.mxu0 %v5176_v60  ;;  %v5245_v59 = vld [vmem:[%s6061_s26 + $0xec4] ss:$16 sps:$4 sm:$0xff]   ;;  %v6373_v60 = vcombine.high %v6361_v55, %v6361_v55 }
  0xef   : > { %3682 = vmatprep.subr.bf16.mxu1 %v5179_v62  ;;  %v5240_v62 = vld [vmem:[%s6061_s26 + $0xcc0] ss:$16 sps:$4 sm:$0xff]  }
  0xf1   : > { %3642 = vmatpush1.bf16.msra.mxu0 %v5174_v63  ;;  %v5243_v63 = vld [vmem:[%s6061_s26 + $0xec0] ss:$16 sps:$4 sm:$0xff]  }
  0xf2   : > { %3683 = vmatpush1.bf16.msra.mxu1 %v5177_v0  ;;  %3643 = vmatprep.subr.bf16.mxu0 %v5182_v2  ;;  %v5248_v0 = vld [vmem:[%s6061_s26 + $0xca4] ss:$16 sps:$4 sm:$0xff]  }
  0xf3   : > { %3684 = vmatprep.subr.bf16.mxu1 %v5185_v3  ;;  %v5251_v2 = vld [vmem:[%s6061_s26 + $0xea4] ss:$16 sps:$4 sm:$0xff]   ;;  %v5246_v3 = vld [vmem:[%s6061_s26 + $0xca0] ss:$16 sps:$4 sm:$0xff]  }
  0xf5   : > { %3644 = vmatpush1.bf16.msra.mxu0 %v5180_v4  ;;  %v5249_v4 = vld [vmem:[%s6061_s26 + $0xea0] ss:$16 sps:$4 sm:$0xff]  }
  0xf6   : > { %3685 = vmatpush1.bf16.msra.mxu1 %v5183_v5  ;;  %3645 = vmatprep.subr.bf16.mxu0 %v5188_v6  ;;  %v5254_v5 = vld [vmem:[%s6061_s26 + $0xc84] ss:$16 sps:$4 sm:$0xff]  }
  0xf7   : > { %3686 = vmatprep.subr.bf16.mxu1 %v5191_v8  ;;  %v5257_v6 = vld [vmem:[%s6061_s26 + $0xe84] ss:$16 sps:$4 sm:$0xff]   ;;  %v5252_v8 = vld [vmem:[%s6061_s26 + $0xc80] ss:$16 sps:$4 sm:$0xff]  }
  0xf9   : > { %3646 = vmatpush2.bf16.msra.mxu0 %v5186_v9  ;;  %v5255_v9 = vld [vmem:[%s6061_s26 + $0xe80] ss:$16 sps:$4 sm:$0xff]  }
  0xfa   : > { %3687 = vmatpush2.bf16.msra.mxu1 %v5189_v10  ;;  %3647 = vmatprep.subr.bf16.mxu0 %v5194_v11  ;;  %v5260_v10 = vld [vmem:[%s6061_s26 + $0xc64] ss:$16 sps:$4 sm:$0xff]  }
  0xfb   : > { %3688 = vmatprep.subr.bf16.mxu1 %v5197_v12  ;;  %v5263_v11 = vld [vmem:[%s6061_s26 + $0xe64] ss:$16 sps:$4 sm:$0xff]   ;;  %v5258_v12 = vld [vmem:[%s6061_s26 + $0xc60] ss:$16 sps:$4 sm:$0xff]  }
  0xfd   : > { %3648 = vmatpush2.bf16.msra.mxu0 %v5192_v13  ;;  %v5261_v13 = vld [vmem:[%s6061_s26 + $0xe60] ss:$16 sps:$4 sm:$0xff]  }
  0xfe   : > { %3689 = vmatpush2.bf16.msra.mxu1 %v5195_v15  ;;  %3649 = vmatprep.subr.bf16.mxu0 %v5200_v16  ;;  %v5266_v15 = vld [vmem:[%s6061_s26 + $0xc44] ss:$16 sps:$4 sm:$0xff]  }
  0xff   : > { %3690 = vmatprep.subr.bf16.mxu1 %v5203_v17  ;;  %v5269_v16 = vld [vmem:[%s6061_s26 + $0xe44] ss:$16 sps:$4 sm:$0xff]   ;;  %v5264_v17 = vld [vmem:[%s6061_s26 + $0xc40] ss:$16 sps:$4 sm:$0xff]  }
 0x101   : > { %3650 = vmatpush2.bf16.msra.mxu0 %v5198_v20  ;;  %v5267_v20 = vld [vmem:[%s6061_s26 + $0xe40] ss:$16 sps:$4 sm:$0xff]  }
 0x102   : > { %3691 = vmatpush2.bf16.msra.mxu1 %v5201_v21  ;;  %3651 = vmatprep.subr.bf16.mxu0 %v5206_v22  ;;  %v5272_v21 = vld [vmem:[%s6061_s26 + $0xc24] ss:$16 sps:$4 sm:$0xff]  }
 0x103   : > { %3692 = vmatprep.subr.bf16.mxu1 %v5209_v23  ;;  %v5275_v22 = vld [vmem:[%s6061_s26 + $0xe24] ss:$16 sps:$4 sm:$0xff]   ;;  %v5270_v23 = vld [vmem:[%s6061_s26 + $0xc20] ss:$16 sps:$4 sm:$0xff]  }
 0x105   : > { %3652 = vmatpush2.bf16.msra.mxu0 %v5204_v25  ;;  %v5273_v25 = vld [vmem:[%s6061_s26 + $0xe20] ss:$16 sps:$4 sm:$0xff]  }
 0x106   : > { %3693 = vmatpush2.bf16.msra.mxu1 %v5207_v26  ;;  %3653 = vmatprep.subr.bf16.mxu0 %v5212_v28  ;;  %v5278_v26 = vld [vmem:[%s6061_s26 + $0xc04] ss:$16 sps:$4 sm:$0xff]  }
 0x107   : > { %3694 = vmatprep.subr.bf16.mxu1 %v5215_v29  ;;  %v5281_v28 = vld [vmem:[%s6061_s26 + $0xe04] ss:$16 sps:$4 sm:$0xff]   ;;  %v5276_v29 = vld [vmem:[%s6061_s26 + $0xc00] ss:$16 sps:$4 sm:$0xff]  }
 0x109   : > { %3654 = vmatpush2.bf16.msra.mxu0 %v5210_v30  ;;  %v5279_v30 = vld [vmem:[%s6061_s26 + $0xe00] ss:$16 sps:$4 sm:$0xff]  }
 0x10a   : > { %3695 = vmatpush2.bf16.msra.mxu1 %v5213_v32  ;;  %3655 = vmatprep.subr.bf16.mxu0 %v5218_v7  ;;  %v5284_v32 = vld [vmem:[%s6061_s26 + $0xde4] ss:$16 sps:$4 sm:$0xff]  }
 0x10b   : > { %3696 = vmatprep.subr.bf16.mxu1 %v5221_v34  ;;  %v5287_v7 = vld [vmem:[%s6061_s26 + $0xfe4] ss:$16 sps:$4 sm:$0xff]   ;;  %v5282_v34 = vld [vmem:[%s6061_s26 + $0xde0] ss:$16 sps:$4 sm:$0xff]  }
 0x10d   : > { %3656 = vmatpush2.bf16.msra.mxu0 %v5216_v37  ;;  %v5290_v37 = vld [vmem:[%s6061_s26 + $0xdc4] ss:$16 sps:$4 sm:$0xff]  }
 0x10e   : > { %3697 = vmatpush2.bf16.msra.mxu1 %v5219_v38  ;;  %3657 = vmatprep.subr.bf16.mxu0 %v5224_v39  ;;  %v5293_v38 = vld [vmem:[%s6061_s26 + $0xfc4] ss:$16 sps:$4 sm:$0xff]   ;;  %v5288_v39 = vld [vmem:[%s6061_s26 + $0xdc0] ss:$16 sps:$4 sm:$0xff]  }
 0x10f   : > { %3698 = vmatprep.subr.bf16.mxu1 %v5227_v40  ;;  %v5291_v40 = vld [vmem:[%s6061_s26 + $0xfc0] ss:$16 sps:$4 sm:$0xff]  }
 0x111   : > { %3658 = vmatpush2.bf16.msra.mxu0 %v5222_v33  ;;  %v5296_v33 = vld [vmem:[%s6061_s26 + $0xda4] ss:$16 sps:$4 sm:$0xff]  }
 0x112   : > { %3699 = vmatpush2.bf16.msra.mxu1 %v5225_v45  ;;  %3659 = vmatprep.subr.bf16.mxu0 %v5230_v46  ;;  %v5299_v45 = vld [vmem:[%s6061_s26 + $0xfa4] ss:$16 sps:$4 sm:$0xff]   ;;  %v5294_v46 = vld [vmem:[%s6061_s26 + $0xda0] ss:$16 sps:$4 sm:$0xff]  }
 0x113   : > { %3700 = vmatprep.subr.bf16.mxu1 %v5233_v47  ;;  %v5297_v47 = vld [vmem:[%s6061_s26 + $0xfa0] ss:$16 sps:$4 sm:$0xff]  }
 0x115   : > { %3660 = vmatpush2.bf16.msra.mxu0 %v5228_v51  ;;  %v5305_v51 = vld [vmem:[%s6061_s26 + $0xf84] ss:$16 sps:$4 sm:$0xff]  }
 0x116   : > { %3701 = vmatpush2.bf16.msra.mxu1 %v5231_v52  ;;  %3711 = vmatprep.subr.bf16.mxu0 %v5236_v53  ;;  %v5300_v52 = vld [vmem:[%s6061_s26 + $0xd80] ss:$16 sps:$4 sm:$0xff]  }
 0x117   : > { %3752 = vmatprep.subr.bf16.mxu1 %v5239_v54  ;;  %v5303_v53 = vld [vmem:[%s6061_s26 + $0xf80] ss:$16 sps:$4 sm:$0xff]   ;;  %v5308_v54 = vld [vmem:[%s6061_s26 + $0xd64] ss:$16 sps:$4 sm:$0xff]  }
 0x118   : > { %3662 = vmatmul.mubr.bf16.vlgmr.msra.gmra.mxu0 %v6354_v49 }
 0x119   : > { %3703 = vmatmul.mubr.bf16.vlgmr.msra.gmra.mxu1 %v6365_v56  ;;  %3712 = vmatpush1.bf16.msra.mxu0 %v5234_v36  ;;  %v5311_v36 = vld [vmem:[%s6061_s26 + $0xf64] ss:$16 sps:$4 sm:$0xff]  }
 0x11a   : > { %3753 = vmatpush1.bf16.msra.mxu1 %v5237_v57  ;;  %3713 = vmatprep.subr.bf16.mxu0 %v5242_v58  ;;  %v5306_v57 = vld [vmem:[%s6061_s26 + $0xd60] ss:$16 sps:$4 sm:$0xff]  }
 0x11b   : > { %3754 = vmatprep.subr.bf16.mxu1 %v5245_v59  ;;  %3743 = vmatprep.mubr.bf16.mxu0 %v6361_v55  ;;  %v5309_v58 = vld [vmem:[%s6061_s26 + $0xf60] ss:$16 sps:$4 sm:$0xff]   ;;  %v5314_v59 = vld [vmem:[%s6061_s26 + $0xd44] ss:$16 sps:$4 sm:$0xff]  }
 0x11c   : > { %3784 = vmatprep.mubr.bf16.mxu1 %v6373_v60 }
 0x11d   : > { %3714 = vmatpush1.bf16.msra.mxu0 %v5240_v62  ;;  %v5317_v62 = vld [vmem:[%s6061_s26 + $0xf44] ss:$16 sps:$4 sm:$0xff]  }
 0x11e   : > { %3755 = vmatpush1.bf16.msra.mxu1 %v5243_v63  ;;  %3715 = vmatprep.subr.bf16.mxu0 %v5248_v0  ;;  %v5312_v63 = vld [vmem:[%s6061_s26 + $0xd40] ss:$16 sps:$4 sm:$0xff]  }
 0x11f   : > { %3756 = vmatprep.subr.bf16.mxu1 %v5251_v2  ;;  %v5315_v0 = vld [vmem:[%s6061_s26 + $0xf40] ss:$16 sps:$4 sm:$0xff]   ;;  %v5320_v2 = vld [vmem:[%s6061_s26 + $0xd24] ss:$16 sps:$4 sm:$0xff]  }
 0x121   : > { %3716 = vmatpush1.bf16.msra.mxu0 %v5246_v3  ;;  %v5323_v3 = vld [vmem:[%s6061_s26 + $0xf24] ss:$16 sps:$4 sm:$0xff]  }
 0x122   : > { %3757 = vmatpush1.bf16.msra.mxu1 %v5249_v4  ;;  %3717 = vmatprep.subr.bf16.mxu0 %v5254_v5  ;;  %v5318_v4 = vld [vmem:[%s6061_s26 + $0xd20] ss:$16 sps:$4 sm:$0xff]  }
 0x123   : > { %3758 = vmatprep.subr.bf16.mxu1 %v5257_v6  ;;  %v5321_v5 = vld [vmem:[%s6061_s26 + $0xf20] ss:$16 sps:$4 sm:$0xff]   ;;  %v5326_v6 = vld [vmem:[%s6061_s26 + $0xd04] ss:$16 sps:$4 sm:$0xff]  }
 0x125   : > { %3718 = vmatpush1.bf16.msra.mxu0 %v5252_v8  ;;  %v5329_v8 = vld [vmem:[%s6061_s26 + $0xf04] ss:$16 sps:$4 sm:$0xff]  }
 0x126   : > { %3759 = vmatpush1.bf16.msra.mxu1 %v5255_v9  ;;  %3719 = vmatprep.subr.bf16.mxu0 %v5260_v10  ;;  %v6437_v9 = vrot.slane %v6344_v41, %v6135_v50  ;;  %v5324_v10 = vld [vmem:[%s6061_s26 + $0xd00] ss:$16 sps:$4 sm:$0xff]   ;;  %v5334_v50 = vld [vmem:[%s6061_s26 + $0x2e8] ss:$16 sps:$4 sm:$0xff]   ;;  %v5339_v41 = vld [vmem:[%s6061_s26 + $0xcc] ss:$16 sps:$4 sm:$0xff]  }
 0x127   : > { %3760 = vmatprep.subr.bf16.mxu1 %v5263_v11  ;;  %v5327_v11 = vld [vmem:[%s6061_s26 + $0xf00] ss:$16 sps:$4 sm:$0xff]  }
 0x129   : > { %3720 = vmatpush1.bf16.msra.mxu0 %v5258_v12  ;;  %v5333_v12 = vld [vmem:[%s6061_s26 + $0xec] ss:$16 sps:$4 sm:$0xff]  }
 0x12a   : > { %3761 = vmatpush1.bf16.msra.mxu1 %v5261_v13  ;;  %3721 = vmatprep.subr.bf16.mxu0 %v5266_v15  ;;  %v5336_v13 = vld [vmem:[%s6061_s26 + $0x2ec] ss:$16 sps:$4 sm:$0xff]   ;;  %v6445_v15 = vcombine.high %v6437_v9, %v6437_v9 }
 0x12b   : > { %3762 = vmatprep.subr.bf16.mxu1 %v5269_v16  ;;  %v5331_v16 = vld [vmem:[%s6061_s26 + $0xe8] ss:$16 sps:$4 sm:$0xff]  }
 0x12d   : > { %3722 = vmatpush1.bf16.msra.mxu0 %v5264_v17  ;;  %v5342_v17 = vld [vmem:[%s6061_s26 + $0x2cc] ss:$16 sps:$4 sm:$0xff]  }
 0x12e   : > { %3763 = vmatpush1.bf16.msra.mxu1 %v5267_v20  ;;  %3723 = vmatprep.subr.bf16.mxu0 %v5272_v21  ;;  %v5337_v20 = vld [vmem:[%s6061_s26 + $0xc8] ss:$16 sps:$4 sm:$0xff]  }
 0x12f   : > { %3764 = vmatprep.subr.bf16.mxu1 %v5275_v22 }
 0x131   : > { %3724 = vmatpush1.bf16.msra.mxu0 %v5270_v23  ;;  %v5340_v23 = vld [vmem:[%s6061_s26 + $0x2c8] ss:$16 sps:$4 sm:$0xff]  }
 0x132   : > { %3765 = vmatpush1.bf16.msra.mxu1 %v5273_v25  ;;  %3725 = vmatprep.subr.bf16.mxu0 %v5278_v26 }
 0x133   : > { %3766 = vmatprep.subr.bf16.mxu1 %v5281_v28 }
 0x135   : > { %3726 = vmatpush1.bf16.msra.mxu0 %v5276_v29  ;;  %v5345_v29 = vld [vmem:[%s6061_s26 + $0xac] ss:$16 sps:$4 sm:$0xff]  }
 0x136   : > { %3767 = vmatpush1.bf16.msra.mxu1 %v5279_v30  ;;  %3727 = vmatprep.subr.bf16.mxu0 %v5284_v32  ;;  %v5348_v30 = vld [vmem:[%s6061_s26 + $0x2ac] ss:$16 sps:$4 sm:$0xff]  }
 0x137   : > { %3768 = vmatprep.subr.bf16.mxu1 %v5287_v7  ;;  %v5343_v7 = vld [vmem:[%s6061_s26 + $0xa8] ss:$16 sps:$4 sm:$0xff]  }
 0x139   : > { %3728 = vmatpush2.bf16.msra.mxu0 %v5282_v34  ;;  %v5346_v34 = vld [vmem:[%s6061_s26 + $0x2a8] ss:$16 sps:$4 sm:$0xff]  }
 0x13a   : > { %3769 = vmatpush2.bf16.msra.mxu1 %v5285_v35  ;;  %3729 = vmatprep.subr.bf16.mxu0 %v5290_v37 }
 0x13b   : > { %3770 = vmatprep.subr.bf16.mxu1 %v5293_v38 }
 0x13d   : > { %3730 = vmatpush2.bf16.msra.mxu0 %v5288_v39 }
 0x13e   : > { %3771 = vmatpush2.bf16.msra.mxu1 %v5291_v40  ;;  %3731 = vmatprep.subr.bf16.mxu0 %v5296_v33  ;;  %v5351_v40 = vld [vmem:[%s6061_s26 + $0x8c] ss:$16 sps:$4 sm:$0xff]  }
 0x13f   : > { %3772 = vmatprep.subr.bf16.mxu1 %v5299_v45  ;;  %v5354_v33 = vld [vmem:[%s6061_s26 + $0x28c] ss:$16 sps:$4 sm:$0xff]  }
 0x140   : > { %v5357_v45 = vld [vmem:[%s6061_s26 + $0x6c] ss:$16 sps:$4 sm:$0xff]  }
 0x141   : > { %3732 = vmatpush2.bf16.msra.mxu0 %v5294_v46  ;;  %v5360_v46 = vld [vmem:[%s6061_s26 + $0x26c] ss:$16 sps:$4 sm:$0xff]  }
 0x142   : > { %3773 = vmatpush2.bf16.msra.mxu1 %v5297_v47  ;;  %3733 = vmatprep.subr.bf16.mxu0 %v5302_v48  ;;  %v5355_v47 = vld [vmem:[%s6061_s26 + $0x68] ss:$16 sps:$4 sm:$0xff]  }
 0x143   : > { %3774 = vmatprep.subr.bf16.mxu1 %v5305_v51  ;;  %v5358_v48 = vld [vmem:[%s6061_s26 + $0x268] ss:$16 sps:$4 sm:$0xff]   ;;  %v5363_v51 = vld [vmem:[%s6061_s26 + $0x4c] ss:$16 sps:$4 sm:$0xff]  }
 0x145   : > { %3734 = vmatpush2.bf16.msra.mxu0 %v5300_v52  ;;  %v5366_v52 = vld [vmem:[%s6061_s26 + $0x24c] ss:$16 sps:$4 sm:$0xff]  }
 0x146   : > { %3775 = vmatpush2.bf16.msra.mxu1 %v5303_v53  ;;  %3735 = vmatprep.subr.bf16.mxu0 %v5308_v54  ;;  %v5361_v53 = vld [vmem:[%s6061_s26 + $0x48] ss:$16 sps:$4 sm:$0xff]  }
 0x147   : > { %3776 = vmatprep.subr.bf16.mxu1 %v5311_v36  ;;  %v5364_v54 = vld [vmem:[%s6061_s26 + $0x248] ss:$16 sps:$4 sm:$0xff]   ;;  %v5369_v36 = vld [vmem:[%s6061_s26 + $0x2c] ss:$16 sps:$4 sm:$0xff]  }
 0x149   : > { %3736 = vmatpush2.bf16.msra.mxu0 %v5306_v57  ;;  %v5372_v57 = vld [vmem:[%s6061_s26 + $0x22c] ss:$16 sps:$4 sm:$0xff]  }
 0x14a   : > { %3777 = vmatpush2.bf16.msra.mxu1 %v5309_v58  ;;  %3737 = vmatprep.subr.bf16.mxu0 %v5314_v59  ;;  %v5367_v58 = vld [vmem:[%s6061_s26 + $0x28] ss:$16 sps:$4 sm:$0xff]  }
 0x14b   : > { %3778 = vmatprep.subr.bf16.mxu1 %v5317_v62  ;;  %v5370_v59 = vld [vmem:[%s6061_s26 + $0x228] ss:$16 sps:$4 sm:$0xff]   ;;  %v5375_v62 = vld [vmem:[%s6061_s26 + $0xc] ss:$16 sps:$4 sm:$0xff]  }
 0x14d   : > { %3738 = vmatpush2.bf16.msra.mxu0 %v5312_v63  ;;  %v5378_v63 = vld [vmem:[%s6061_s26 + $0x20c] ss:$16 sps:$4 sm:$0xff]  }
 0x14e   : > { %3779 = vmatpush2.bf16.msra.mxu1 %v5315_v0  ;;  %3739 = vmatprep.subr.bf16.mxu0 %v5320_v2  ;;  %v5373_v0 = vld [vmem:[%s6061_s26 + $0x8] ss:$16 sps:$4 sm:$0xff]  }
 0x14f   : > { %3780 = vmatprep.subr.bf16.mxu1 %v5323_v3  ;;  %v5376_v2 = vld [vmem:[%s6061_s26 + $0x208] ss:$16 sps:$4 sm:$0xff]   ;;  %v5381_v3 = vld [vmem:[%s6061_s26 + $0x1ec] ss:$16 sps:$4 sm:$0xff]  }
 0x151   : > { %3740 = vmatpush2.bf16.msra.mxu0 %v5318_v4  ;;  %v5384_v4 = vld [vmem:[%s6061_s26 + $0x3ec] ss:$16 sps:$4 sm:$0xff]  }
 0x152   : > { %3781 = vmatpush2.bf16.msra.mxu1 %v5321_v5  ;;  %3741 = vmatprep.subr.bf16.mxu0 %v5326_v6  ;;  %v5379_v5 = vld [vmem:[%s6061_s26 + $0x1e8] ss:$16 sps:$4 sm:$0xff]  }
 0x153   : > { %3782 = vmatprep.subr.bf16.mxu1 %v5329_v8  ;;  %v5382_v6 = vld [vmem:[%s6061_s26 + $0x3e8] ss:$16 sps:$4 sm:$0xff]   ;;  %v5387_v8 = vld [vmem:[%s6061_s26 + $0x1cc] ss:$16 sps:$4 sm:$0xff]  }
 0x155   : > { %3742 = vmatpush2.bf16.msra.mxu0 %v5324_v10  ;;  %v5390_v10 = vld [vmem:[%s6061_s26 + $0x3cc] ss:$16 sps:$4 sm:$0xff]  }
 0x156   : > { %3783 = vmatpush2.bf16.msra.mxu1 %v5327_v11  ;;  %3793 = vmatprep.subr.bf16.mxu0 %v5333_v12  ;;  %v5385_v11 = vld [vmem:[%s6061_s26 + $0x1c8] ss:$16 sps:$4 sm:$0xff]  }
 0x157   : > { %3834 = vmatprep.subr.bf16.mxu1 %v5336_v13  ;;  %v5388_v12 = vld [vmem:[%s6061_s26 + $0x3c8] ss:$16 sps:$4 sm:$0xff]   ;;  %v5393_v13 = vld [vmem:[%s6061_s26 + $0x1ac] ss:$16 sps:$4 sm:$0xff]  }
 0x158   : > { %v3499_v21 = vpop.f32.mrf.mxu0  ;;  %3744 = vmatmul.mubr.bf16.vlgmr.msra.gmra.mxu0 %v6437_v9 }
 0x159   : > { %v3540_v22 = vpop.f32.mrf.mxu1  ;;  %3785 = vmatmul.mubr.bf16.vlgmr.msra.gmra.mxu1 %v6445_v15  ;;  %3794 = vmatpush1.bf16.msra.mxu0 %v5331_v16  ;;  %v5396_v16 = vld [vmem:[%s6061_s26 + $0x3ac] ss:$16 sps:$4 sm:$0xff]  }
 0x15a   : > { %v6455_v25 = vadd.f32 %v3540_v22, %v3499_v21  ;;  %3835 = vmatpush1.bf16.msra.mxu1 %v5334_v50  ;;  %v3501_v26 = vpop.f32.mrf.mxu0  ;;  %3795 = vmatprep.subr.bf16.mxu0 %v5339_v41  ;;  %v5391_v50 = vld [vmem:[%s6061_s26 + $0x1a8] ss:$16 sps:$4 sm:$0xff]  }
 0x15b   : > { %v3542_v28 = vpop.f32.mrf.mxu1  ;;  %3836 = vmatprep.subr.bf16.mxu1 %v5342_v17  ;;  %3825 = vmatprep.mubr.bf16.mxu0 %v6147_v61  ;;  %v5349_v61 = vld [vmem:[%s6061_s26 + $0x88] ss:$16 sps:$4 sm:$0xff]   ;;  %v5399_v17 = vld [vmem:[%s6061_s26 + $0x18c] ss:$16 sps:$4 sm:$0xff]  }
 0x15c   : > { %v6459_v32 = vadd.f32 %v3542_v28, %v3501_v26  ;;  %3866 = vmatprep.mubr.bf16.mxu1 %v6154_v1  ;;  %v3503_v35 = vpop.f32.mrf.mxu0  ;;  %v5352_v1 = vld [vmem:[%s6061_s26 + $0x288] ss:$16 sps:$4 sm:$0xff]   ;;  %v5408_v26 = vld [vmem:[%s6061_s26 + $0x36c] ss:$16 sps:$4 sm:$0xff]  }
 0x15d   : > { %v3544_v37 = vpop.f32.mrf.mxu1  ;;  %3796 = vmatpush1.bf16.msra.mxu0 %v5337_v20  ;;  %v5394_v41 = vld [vmem:[%s6061_s26 + $0x3a8] ss:$16 sps:$4 sm:$0xff]   ;;  %v5402_v20 = vld [vmem:[%s6061_s26 + $0x38c] ss:$16 sps:$4 sm:$0xff]  }
 0x15e   : > { %3837 = vmatpush1.bf16.msra.mxu1 %v5340_v23  ;;  %v3504_v38 = vpop.f32.mrf.mxu0  ;;  %3797 = vmatprep.subr.bf16.mxu0 %v5345_v29  ;;  %v5397_v21 = vld [vmem:[%s6061_s26 + $0x188] ss:$16 sps:$4 sm:$0xff]   ;;  %v5405_v23 = vld [vmem:[%s6061_s26 + $0x16c] ss:$16 sps:$4 sm:$0xff]  }
 0x15f   : > { %v3545_v39 = vpop.f32.mrf.mxu1  ;;  %3838 = vmatprep.subr.bf16.mxu1 %v5348_v30  ;;  %v5400_v22 = vld [vmem:[%s6061_s26 + $0x388] ss:$16 sps:$4 sm:$0xff]   ;;  %v5411_v30 = vld [vmem:[%s6061_s26 + $0x14c] ss:$16 sps:$4 sm:$0xff]  }
 0x160   : > { %v5403_v28 = vld [vmem:[%s6061_s26 + $0x168] ss:$16 sps:$4 sm:$0xff]   ;;  %v5417_v37 = vld [vmem:[%s6061_s26 + $0x12c] ss:$16 sps:$4 sm:$0xff]  }
 0x161   : > { %3798 = vmatpush1.bf16.msra.mxu0 %v5343_v7  ;;  %v5406_v29 = vld [vmem:[%s6061_s26 + $0x368] ss:$16 sps:$4 sm:$0xff]   ;;  %v5414_v7 = vld [vmem:[%s6061_s26 + $0x34c] ss:$16 sps:$4 sm:$0xff]  }
 0x162   : > { %3839 = vmatpush1.bf16.msra.mxu1 %v5346_v34  ;;  %3799 = vmatprep.subr.bf16.mxu0 %v5351_v40  ;;  %v5409_v34 = vld [vmem:[%s6061_s26 + $0x148] ss:$16 sps:$4 sm:$0xff]   ;;  %v5420_v38 = vld [vmem:[%s6061_s26 + $0x32c] ss:$16 sps:$4 sm:$0xff]  }
 0x163   : > { %3840 = vmatprep.subr.bf16.mxu1 %v5354_v33  ;;  %v5412_v35 = vld [vmem:[%s6061_s26 + $0x348] ss:$16 sps:$4 sm:$0xff]   ;;  %v5423_v33 = vld [vmem:[%s6061_s26 + $0x10c] ss:$16 sps:$4 sm:$0xff]  }
 0x164   : > { %v5415_v39 = vld [vmem:[%s6061_s26 + $0x128] ss:$16 sps:$4 sm:$0xff]  }
 0x165   : > { %3800 = vmatpush1.bf16.msra.mxu0 %v5349_v61  ;;  %v5418_v40 = vld [vmem:[%s6061_s26 + $0x328] ss:$16 sps:$4 sm:$0xff]   ;;  %v5426_v61 = vld [vmem:[%s6061_s26 + $0x30c] ss:$16 sps:$4 sm:$0xff]  }
 0x166   : > { %3841 = vmatpush1.bf16.msra.mxu1 %v5352_v1  ;;  %3801 = vmatprep.subr.bf16.mxu0 %v5357_v45  ;;  %v5421_v1 = vld [vmem:[%s6061_s26 + $0x108] ss:$16 sps:$4 sm:$0xff]  }
 0x167   : > { %3842 = vmatprep.subr.bf16.mxu1 %v5360_v46  ;;  %v5424_v45 = vld [vmem:[%s6061_s26 + $0x308] ss:$16 sps:$4 sm:$0xff]   ;;  %v5429_v46 = vld [vmem:[%s6061_s26 + $0x4ec] ss:$16 sps:$4 sm:$0xff]  }
 0x169   : > { %3802 = vmatpush1.bf16.msra.mxu0 %v5355_v47  ;;  %v5432_v47 = vld [vmem:[%s6061_s26 + $0x6ec] ss:$16 sps:$4 sm:$0xff]  }
 0x16a   : > { %3843 = vmatpush1.bf16.msra.mxu1 %v5358_v48  ;;  %3803 = vmatprep.subr.bf16.mxu0 %v5363_v51  ;;  %v5427_v48 = vld [vmem:[%s6061_s26 + $0x4e8] ss:$16 sps:$4 sm:$0xff]  }
 0x16b   : > { %3844 = vmatprep.subr.bf16.mxu1 %v5366_v52  ;;  %v5430_v51 = vld [vmem:[%s6061_s26 + $0x6e8] ss:$16 sps:$4 sm:$0xff]   ;;  %v5435_v52 = vld [vmem:[%s6061_s26 + $0x4cc] ss:$16 sps:$4 sm:$0xff]  }
 0x16d   : > { %3804 = vmatpush1.bf16.msra.mxu0 %v5361_v53  ;;  %v5438_v53 = vld [vmem:[%s6061_s26 + $0x6cc] ss:$16 sps:$4 sm:$0xff]  }
 0x16e   : > { %3845 = vmatpush1.bf16.msra.mxu1 %v5364_v54  ;;  %3805 = vmatprep.subr.bf16.mxu0 %v5369_v36 }
 0x16f   : > { %3846 = vmatprep.subr.bf16.mxu1 %v5372_v57 }
 0x171   : > { %3806 = vmatpush1.bf16.msra.mxu0 %v5367_v58  ;;  %v5433_v58 = vld [vmem:[%s6061_s26 + $0x4c8] ss:$16 sps:$4 sm:$0xff]  }
 0x172   : > { %3847 = vmatpush1.bf16.msra.mxu1 %v5370_v59  ;;  %3807 = vmatprep.subr.bf16.mxu0 %v5375_v62  ;;  %v5436_v59 = vld [vmem:[%s6061_s26 + $0x6c8] ss:$16 sps:$4 sm:$0xff]  }
 0x173   : > { %3848 = vmatprep.subr.bf16.mxu1 %v5378_v63 }
 0x175   : > { %3808 = vmatpush1.bf16.msra.mxu0 %v5373_v0  ;;  %v5441_v0 = vld [vmem:[%s6061_s26 + $0x4ac] ss:$16 sps:$4 sm:$0xff]  }
 0x176   : > { %3849 = vmatpush1.bf16.msra.mxu1 %v5376_v2  ;;  %3809 = vmatprep.subr.bf16.mxu0 %v5381_v3  ;;  %v5444_v2 = vld [vmem:[%s6061_s26 + $0x6ac] ss:$16 sps:$4 sm:$0xff]  }
 0x177   : > { %3850 = vmatprep.subr.bf16.mxu1 %v5384_v4 }
 0x179   : > { %3810 = vmatpush2.bf16.msra.mxu0 %v5379_v5  ;;  %v5439_v5 = vld [vmem:[%s6061_s26 + $0x4a8] ss:$16 sps:$4 sm:$0xff]  }
 0x17a   : > { %3851 = vmatpush2.bf16.msra.mxu1 %v5382_v6  ;;  %3811 = vmatprep.subr.bf16.mxu0 %v5387_v8  ;;  %v5442_v6 = vld [vmem:[%s6061_s26 + $0x6a8] ss:$16 sps:$4 sm:$0xff]  }
 0x17b   : > { %3852 = vmatprep.subr.bf16.mxu1 %v5390_v10 }
 0x17d   : > { %3812 = vmatpush2.bf16.msra.mxu0 %v5385_v11  ;;  %v5448_v11 = vld [vmem:[%s6061_s26 + $0x688] ss:$16 sps:$4 sm:$0xff]  }
 0x17e   : > { %3853 = vmatpush2.bf16.msra.mxu1 %v5388_v12  ;;  %3813 = vmatprep.subr.bf16.mxu0 %v5393_v13  ;;  %v5453_v12 = vld [vmem:[%s6061_s26 + $0x46c] ss:$16 sps:$4 sm:$0xff]  }
 0x17f   : > { %3854 = vmatprep.subr.bf16.mxu1 %v5396_v16  ;;  %v5456_v13 = vld [vmem:[%s6061_s26 + $0x66c] ss:$16 sps:$4 sm:$0xff]   ;;  %v5451_v16 = vld [vmem:[%s6061_s26 + $0x468] ss:$16 sps:$4 sm:$0xff]  }
 0x181   : > { %3814 = vmatpush2.bf16.msra.mxu0 %v5391_v50  ;;  %v5454_v50 = vld [vmem:[%s6061_s26 + $0x668] ss:$16 sps:$4 sm:$0xff]  }
 0x182   : > { %3855 = vmatpush2.bf16.msra.mxu1 %v5394_v41  ;;  %3815 = vmatprep.subr.bf16.mxu0 %v5399_v17  ;;  %v5459_v41 = vld [vmem:[%s6061_s26 + $0x44c] ss:$16 sps:$4 sm:$0xff]  }
 0x183   : > { %3856 = vmatprep.subr.bf16.mxu1 %v5402_v20  ;;  %v5462_v17 = vld [vmem:[%s6061_s26 + $0x64c] ss:$16 sps:$4 sm:$0xff]   ;;  %v5457_v20 = vld [vmem:[%s6061_s26 + $0x448] ss:$16 sps:$4 sm:$0xff]  }
 0x185   : > { %3816 = vmatpush2.bf16.msra.mxu0 %v5397_v21  ;;  %v5460_v21 = vld [vmem:[%s6061_s26 + $0x648] ss:$16 sps:$4 sm:$0xff]  }
 0x186   : > { %3857 = vmatpush2.bf16.msra.mxu1 %v5400_v22  ;;  %3817 = vmatprep.subr.bf16.mxu0 %v5405_v23  ;;  %v5465_v22 = vld [vmem:[%s6061_s26 + $0x42c] ss:$16 sps:$4 sm:$0xff]  }
 0x187   : > { %3858 = vmatprep.subr.bf16.mxu1 %v5408_v26  ;;  %v5468_v23 = vld [vmem:[%s6061_s26 + $0x62c] ss:$16 sps:$4 sm:$0xff]   ;;  %v5463_v26 = vld [vmem:[%s6061_s26 + $0x428] ss:$16 sps:$4 sm:$0xff]  }
 0x189   : > { %3818 = vmatpush2.bf16.msra.mxu0 %v5403_v28  ;;  %v5466_v28 = vld [vmem:[%s6061_s26 + $0x628] ss:$16 sps:$4 sm:$0xff]  }
 0x18a   : > { %3859 = vmatpush2.bf16.msra.mxu1 %v5406_v29  ;;  %3819 = vmatprep.subr.bf16.mxu0 %v5411_v30  ;;  %v5471_v29 = vld [vmem:[%s6061_s26 + $0x40c] ss:$16 sps:$4 sm:$0xff]  }
 0x18b   : > { %3860 = vmatprep.subr.bf16.mxu1 %v5414_v7  ;;  %v5474_v30 = vld [vmem:[%s6061_s26 + $0x60c] ss:$16 sps:$4 sm:$0xff]   ;;  %v5469_v7 = vld [vmem:[%s6061_s26 + $0x408] ss:$16 sps:$4 sm:$0xff]  }
 0x18d   : > { %3820 = vmatpush2.bf16.msra.mxu0 %v5409_v34  ;;  %v5472_v34 = vld [vmem:[%s6061_s26 + $0x608] ss:$16 sps:$4 sm:$0xff]  }
 0x18e   : > { %3861 = vmatpush2.bf16.msra.mxu1 %v5412_v35  ;;  %3821 = vmatprep.subr.bf16.mxu0 %v5417_v37  ;;  %v5477_v35 = vld [vmem:[%s6061_s26 + $0x5ec] ss:$16 sps:$4 sm:$0xff]  }
 0x18f   : > { %3862 = vmatprep.subr.bf16.mxu1 %v5420_v38  ;;  %v5480_v37 = vld [vmem:[%s6061_s26 + $0x7ec] ss:$16 sps:$4 sm:$0xff]   ;;  %v5475_v38 = vld [vmem:[%s6061_s26 + $0x5e8] ss:$16 sps:$4 sm:$0xff]  }
 0x191   : > { %3822 = vmatpush2.bf16.msra.mxu0 %v5415_v39  ;;  %v5478_v39 = vld [vmem:[%s6061_s26 + $0x7e8] ss:$16 sps:$4 sm:$0xff]  }
 0x192   : > { %3863 = vmatpush2.bf16.msra.mxu1 %v5418_v40  ;;  %3823 = vmatprep.subr.bf16.mxu0 %v5423_v33  ;;  %v5483_v40 = vld [vmem:[%s6061_s26 + $0x5cc] ss:$16 sps:$4 sm:$0xff]  }
 0x193   : > { %3864 = vmatprep.subr.bf16.mxu1 %v5426_v61  ;;  %v5486_v33 = vld [vmem:[%s6061_s26 + $0x7cc] ss:$16 sps:$4 sm:$0xff]   ;;  %v5481_v61 = vld [vmem:[%s6061_s26 + $0x5c8] ss:$16 sps:$4 sm:$0xff]  }
 0x195   : > { %3824 = vmatpush2.bf16.msra.mxu0 %v5421_v1  ;;  %v5484_v1 = vld [vmem:[%s6061_s26 + $0x7c8] ss:$16 sps:$4 sm:$0xff]  }
 0x196   : > { %3865 = vmatpush2.bf16.msra.mxu1 %v5424_v45  ;;  %3875 = vmatprep.subr.bf16.mxu0 %v5429_v46  ;;  %v5489_v45 = vld [vmem:[%s6061_s26 + $0x5ac] ss:$16 sps:$4 sm:$0xff]  }
 0x197   : > { %3916 = vmatprep.subr.bf16.mxu1 %v5432_v47  ;;  %v5492_v46 = vld [vmem:[%s6061_s26 + $0x7ac] ss:$16 sps:$4 sm:$0xff]   ;;  %v5487_v47 = vld [vmem:[%s6061_s26 + $0x5a8] ss:$16 sps:$4 sm:$0xff]  }
 0x198   : > { %v3581_v54 = vpop.f32.mrf.mxu0  ;;  %3826 = vmatmul.mubr.bf16.vlgmr.msra.gmra.mxu0 %v6173_v14 }
 0x199   : > { %v3622_v36 = vpop.f32.mrf.mxu1  ;;  %3867 = vmatmul.mubr.bf16.vlgmr.msra.gmra.mxu1 %v6183_v19  ;;  %v3582_v57 = vadd.f32 %v3581_v54, %v6455_v25  ;;  %3876 = vmatpush1.bf16.msra.mxu0 %v5427_v48  ;;  %v5490_v48 = vld [vmem:[%s6061_s26 + $0x7a8] ss:$16 sps:$4 sm:$0xff]  }
 0x19a   : > { %3917 = vmatpush1.bf16.msra.mxu1 %v5430_v51  ;;  %v3583_v62 = vpop.f32.mrf.mxu0  ;;  %3877 = vmatprep.subr.bf16.mxu0 %v5435_v52  ;;  %v5495_v51 = vld [vmem:[%s6061_s26 + $0x58c] ss:$16 sps:$4 sm:$0xff]   ;;  %v5496_v54 = vld [vmem:[%s6061_s26 + $0x788] ss:$16 sps:$4 sm:$0xff]  }
 0x19b   : > { %v3624_v63 = vpop.f32.mrf.mxu1  ;;  %3918 = vmatprep.subr.bf16.mxu1 %v5438_v53  ;;  %v6530_v3 = vadd.f32 %v3622_v36, %v3582_v57  ;;  %v3584_v14 = vadd.f32 %v3583_v62, %v6459_v32  ;;  %3907 = vmatprep.mubr.bf16.mxu0 %v6179_v18  ;;  %v5447_v18 = vld [vmem:[%s6061_s26 + $0x48c] ss:$16 sps:$4 sm:$0xff]   ;;  %v5445_v32 = vld [vmem:[%s6061_s26 + $0x488] ss:$16 sps:$4 sm:$0xff]  }
 0x19c   : > { %3948 = vmatprep.mubr.bf16.mxu1 %v6191_v24  ;;  %v3585_v19 = vpop.f32.mrf.mxu0  ;;  %v5450_v24 = vld [vmem:[%s6061_s26 + $0x68c] ss:$16 sps:$4 sm:$0xff]   ;;  %v5493_v53 = vld [vmem:[%s6061_s26 + $0x588] ss:$16 sps:$4 sm:$0xff]  }
 0x19d   : > { %v3626_v25 = vpop.f32.mrf.mxu1  ;;  %v6535_v4 = vadd.f32 %v3624_v63, %v3584_v14  ;;  %3878 = vmatpush1.bf16.msra.mxu0 %v5433_v58  ;;  %v5498_v52 = vld [vmem:[%s6061_s26 + $0x78c] ss:$16 sps:$4 sm:$0xff]   ;;  %v5499_v58 = vld [vmem:[%s6061_s26 + $0x568] ss:$16 sps:$4 sm:$0xff]  }
 0x19e   : > { %3919 = vmatpush1.bf16.msra.mxu1 %v5436_v59  ;;  %v3586_v8 = vpop.f32.mrf.mxu0  ;;  %3879 = vmatprep.subr.bf16.mxu0 %v5441_v0  ;;  %v5501_v36 = vld [vmem:[%s6061_s26 + $0x56c] ss:$16 sps:$4 sm:$0xff]   ;;  %v5502_v59 = vld [vmem:[%s6061_s26 + $0x768] ss:$16 sps:$4 sm:$0xff]  }
 0x19f   : > { %v3627_v10 = vpop.f32.mrf.mxu1  ;;  %3920 = vmatprep.subr.bf16.mxu1 %v5444_v2  ;;  %v5504_v57 = vld [vmem:[%s6061_s26 + $0x76c] ss:$16 sps:$4 sm:$0xff]   ;;  %v5505_v0 = vld [vmem:[%s6061_s26 + $0x548] ss:$16 sps:$4 sm:$0xff]  }
 0x1a0   : > { %v5507_v62 = vld [vmem:[%s6061_s26 + $0x54c] ss:$16 sps:$4 sm:$0xff]   ;;  %v5508_v2 = vld [vmem:[%s6061_s26 + $0x748] ss:$16 sps:$4 sm:$0xff]  }
 0x1a1   : > { %3880 = vmatpush1.bf16.msra.mxu0 %v5439_v5  ;;  %v5510_v63 = vld [vmem:[%s6061_s26 + $0x74c] ss:$16 sps:$4 sm:$0xff]   ;;  %v5511_v25 = vld [vmem:[%s6061_s26 + $0x528] ss:$16 sps:$4 sm:$0xff]  }
 0x1a2   : > { %3921 = vmatpush1.bf16.msra.mxu1 %v5442_v6  ;;  %3881 = vmatprep.subr.bf16.mxu0 %v5447_v18  ;;  %v5513_v14 = vld [vmem:[%s6061_s26 + $0x52c] ss:$16 sps:$4 sm:$0xff]   ;;  %v5514_v5 = vld [vmem:[%s6061_s26 + $0x728] ss:$16 sps:$4 sm:$0xff]  }
 0x1a3   : > { %3922 = vmatprep.subr.bf16.mxu1 %v5450_v24  ;;  %v5516_v19 = vld [vmem:[%s6061_s26 + $0x72c] ss:$16 sps:$4 sm:$0xff]   ;;  %v5517_v10 = vld [vmem:[%s6061_s26 + $0x508] ss:$16 sps:$4 sm:$0xff]  }
 0x1a4   : > { %v5519_v6 = vld [vmem:[%s6061_s26 + $0x50c] ss:$16 sps:$4 sm:$0xff]   ;;  %v5520_v18 = vld [vmem:[%s6061_s26 + $0x708] ss:$16 sps:$4 sm:$0xff]  }
 0x1a5   : > { %3882 = vmatpush1.bf16.msra.mxu0 %v5445_v32  ;;  %v5522_v8 = vld [vmem:[%s6061_s26 + $0x70c] ss:$16 sps:$4 sm:$0xff]  }
 0x1a6   : > { %3923 = vmatpush1.bf16.msra.mxu1 %v5448_v11  ;;  %3883 = vmatprep.subr.bf16.mxu0 %v5453_v12  ;;  %v5525_v24 = vld [vmem:[%s6061_s26 + $0x8ec] ss:$16 sps:$4 sm:$0xff]   ;;  %v5523_v11 = vld [vmem:[%s6061_s26 + $0x8e8] ss:$16 sps:$4 sm:$0xff]  }
 0x1a7   : > { %3924 = vmatprep.subr.bf16.mxu1 %v5456_v13  ;;  %v5528_v32 = vld [vmem:[%s6061_s26 + $0xaec] ss:$16 sps:$4 sm:$0xff]   ;;  %v5526_v12 = vld [vmem:[%s6061_s26 + $0xae8] ss:$16 sps:$4 sm:$0xff]  }
 0x1a8   : > { %v5531_v13 = vld [vmem:[%s6061_s26 + $0x8cc] ss:$16 sps:$4 sm:$0xff]  }
 0x1a9   : > { %3884 = vmatpush1.bf16.msra.mxu0 %v5451_v16  ;;  %v5534_v16 = vld [vmem:[%s6061_s26 + $0xacc] ss:$16 sps:$4 sm:$0xff]  }
 0x1aa   : > { %3925 = vmatpush1.bf16.msra.mxu1 %v5454_v50  ;;  %3885 = vmatprep.subr.bf16.mxu0 %v5459_v41 }
 0x1ab   : > { %3926 = vmatprep.subr.bf16.mxu1 %v5462_v17 }
 0x1ad   : > { %3886 = vmatpush1.bf16.msra.mxu0 %v5457_v20  ;;  %v5529_v20 = vld [vmem:[%s6061_s26 + $0x8c8] ss:$16 sps:$4 sm:$0xff]  }
 0x1ae   : > { %3927 = vmatpush1.bf16.msra.mxu1 %v5460_v21  ;;  %3887 = vmatprep.subr.bf16.mxu0 %v5465_v22  ;;  %v5532_v21 = vld [vmem:[%s6061_s26 + $0xac8] ss:$16 sps:$4 sm:$0xff]  }
 0x1af   : > { %3928 = vmatprep.subr.bf16.mxu1 %v5468_v23 }
 0x1b1   : > { %3888 = vmatpush1.bf16.msra.mxu0 %v5463_v26  ;;  %v5537_v26 = vld [vmem:[%s6061_s26 + $0x8ac] ss:$16 sps:$4 sm:$0xff]  }
 0x1b2   : > { %3929 = vmatpush1.bf16.msra.mxu1 %v5466_v28  ;;  %3889 = vmatprep.subr.bf16.mxu0 %v5471_v29  ;;  %v5540_v28 = vld [vmem:[%s6061_s26 + $0xaac] ss:$16 sps:$4 sm:$0xff]  }
 0x1b3   : > { %3930 = vmatprep.subr.bf16.mxu1 %v5474_v30 }
 0x1b5   : > { %3890 = vmatpush1.bf16.msra.mxu0 %v5469_v7  ;;  %v5535_v7 = vld [vmem:[%s6061_s26 + $0x8a8] ss:$16 sps:$4 sm:$0xff]  }
 0x1b6   : > { %3931 = vmatpush1.bf16.msra.mxu1 %v5472_v34  ;;  %3891 = vmatprep.subr.bf16.mxu0 %v5477_v35  ;;  %v5538_v34 = vld [vmem:[%s6061_s26 + $0xaa8] ss:$16 sps:$4 sm:$0xff]  }
 0x1b7   : > { %3932 = vmatprep.subr.bf16.mxu1 %v5480_v37 }
 0x1b9   : > { %3892 = vmatpush2.bf16.msra.mxu0 %v5475_v38  ;;  %v5544_v38 = vld [vmem:[%s6061_s26 + $0xa88] ss:$16 sps:$4 sm:$0xff]  }
 0x1ba   : > { %3933 = vmatpush2.bf16.msra.mxu1 %v5478_v39  ;;  %3893 = vmatprep.subr.bf16.mxu0 %v5483_v40  ;;  %v5549_v39 = vld [vmem:[%s6061_s26 + $0x86c] ss:$16 sps:$4 sm:$0xff]  }
 0x1bb   : > { %3934 = vmatprep.subr.bf16.mxu1 %v5486_v33  ;;  %v5552_v40 = vld [vmem:[%s6061_s26 + $0xa6c] ss:$16 sps:$4 sm:$0xff]   ;;  %v5547_v33 = vld [vmem:[%s6061_s26 + $0x868] ss:$16 sps:$4 sm:$0xff]  }
 0x1bd   : > { %3894 = vmatpush2.bf16.msra.mxu0 %v5481_v61  ;;  %v5550_v61 = vld [vmem:[%s6061_s26 + $0xa68] ss:$16 sps:$4 sm:$0xff]  }
 0x1be   : > { %3935 = vmatpush2.bf16.msra.mxu1 %v5484_v1  ;;  %3895 = vmatprep.subr.bf16.mxu0 %v5489_v45  ;;  %v5555_v1 = vld [vmem:[%s6061_s26 + $0x84c] ss:$16 sps:$4 sm:$0xff]  }
 0x1bf   : > { %3936 = vmatprep.subr.bf16.mxu1 %v5492_v46  ;;  %v5558_v45 = vld [vmem:[%s6061_s26 + $0xa4c] ss:$16 sps:$4 sm:$0xff]   ;;  %v5553_v46 = vld [vmem:[%s6061_s26 + $0x848] ss:$16 sps:$4 sm:$0xff]  }
 0x1c1   : > { %3896 = vmatpush2.bf16.msra.mxu0 %v5487_v47  ;;  %v5556_v47 = vld [vmem:[%s6061_s26 + $0xa48] ss:$16 sps:$4 sm:$0xff]  }
 0x1c2   : > { %3937 = vmatpush2.bf16.msra.mxu1 %v5490_v48  ;;  %3897 = vmatprep.subr.bf16.mxu0 %v5495_v51  ;;  %v5561_v48 = vld [vmem:[%s6061_s26 + $0x82c] ss:$16 sps:$4 sm:$0xff]  }
 0x1c3   : > { %3938 = vmatprep.subr.bf16.mxu1 %v5498_v52  ;;  %v5564_v51 = vld [vmem:[%s6061_s26 + $0xa2c] ss:$16 sps:$4 sm:$0xff]   ;;  %v5559_v52 = vld [vmem:[%s6061_s26 + $0x828] ss:$16 sps:$4 sm:$0xff]  }
 0x1c5   : > { %3898 = vmatpush2.bf16.msra.mxu0 %v5493_v53  ;;  %v5562_v53 = vld [vmem:[%s6061_s26 + $0xa28] ss:$16 sps:$4 sm:$0xff]  }
 0x1c6   : > { %3939 = vmatpush2.bf16.msra.mxu1 %v5496_v54  ;;  %3899 = vmatprep.subr.bf16.mxu0 %v5501_v36  ;;  %v5567_v54 = vld [vmem:[%s6061_s26 + $0x80c] ss:$16 sps:$4 sm:$0xff]  }
 0x1c7   : > { %3940 = vmatprep.subr.bf16.mxu1 %v5504_v57  ;;  %v5570_v36 = vld [vmem:[%s6061_s26 + $0xa0c] ss:$16 sps:$4 sm:$0xff]   ;;  %v5565_v57 = vld [vmem:[%s6061_s26 + $0x808] ss:$16 sps:$4 sm:$0xff]  }
 0x1c9   : > { %3900 = vmatpush2.bf16.msra.mxu0 %v5499_v58  ;;  %v5568_v58 = vld [vmem:[%s6061_s26 + $0xa08] ss:$16 sps:$4 sm:$0xff]  }
 0x1ca   : > { %3941 = vmatpush2.bf16.msra.mxu1 %v5502_v59  ;;  %3901 = vmatprep.subr.bf16.mxu0 %v5507_v62  ;;  %v5573_v59 = vld [vmem:[%s6061_s26 + $0x9ec] ss:$16 sps:$4 sm:$0xff]  }
 0x1cb   : > { %3942 = vmatprep.subr.bf16.mxu1 %v5510_v63  ;;  %v5576_v62 = vld [vmem:[%s6061_s26 + $0xbec] ss:$16 sps:$4 sm:$0xff]   ;;  %v5571_v63 = vld [vmem:[%s6061_s26 + $0x9e8] ss:$16 sps:$4 sm:$0xff]  }
 0x1cd   : > { %3902 = vmatpush2.bf16.msra.mxu0 %v5505_v0  ;;  %v5574_v0 = vld [vmem:[%s6061_s26 + $0xbe8] ss:$16 sps:$4 sm:$0xff]  }
 0x1ce   : > { %3943 = vmatpush2.bf16.msra.mxu1 %v5508_v2  ;;  %3903 = vmatprep.subr.bf16.mxu0 %v5513_v14  ;;  %v5579_v2 = vld [vmem:[%s6061_s26 + $0x9cc] ss:$16 sps:$4 sm:$0xff]  }
 0x1cf   : > { %3944 = vmatprep.subr.bf16.mxu1 %v5516_v19  ;;  %v5582_v14 = vld [vmem:[%s6061_s26 + $0xbcc] ss:$16 sps:$4 sm:$0xff]   ;;  %v5577_v19 = vld [vmem:[%s6061_s26 + $0x9c8] ss:$16 sps:$4 sm:$0xff]  }
 0x1d1   : > { %3904 = vmatpush2.bf16.msra.mxu0 %v5511_v25  ;;  %v5580_v25 = vld [vmem:[%s6061_s26 + $0xbc8] ss:$16 sps:$4 sm:$0xff]  }
 0x1d2   : > { %3945 = vmatpush2.bf16.msra.mxu1 %v5514_v5  ;;  %3905 = vmatprep.subr.bf16.mxu0 %v5519_v6  ;;  %v5585_v5 = vld [vmem:[%s6061_s26 + $0x9ac] ss:$16 sps:$4 sm:$0xff]  }
 0x1d3   : > { %3946 = vmatprep.subr.bf16.mxu1 %v5522_v8  ;;  %v5588_v6 = vld [vmem:[%s6061_s26 + $0xbac] ss:$16 sps:$4 sm:$0xff]   ;;  %v5583_v8 = vld [vmem:[%s6061_s26 + $0x9a8] ss:$16 sps:$4 sm:$0xff]  }
 0x1d5   : > { %3906 = vmatpush2.bf16.msra.mxu0 %v5517_v10  ;;  %v5586_v10 = vld [vmem:[%s6061_s26 + $0xba8] ss:$16 sps:$4 sm:$0xff]  }
 0x1d6   : > { %3947 = vmatpush2.bf16.msra.mxu1 %v5520_v18  ;;  %3957 = vmatprep.subr.bf16.mxu0 %v5525_v24  ;;  %v5591_v18 = vld [vmem:[%s6061_s26 + $0x98c] ss:$16 sps:$4 sm:$0xff]  }
 0x1d7   : > { %3998 = vmatprep.subr.bf16.mxu1 %v5528_v32  ;;  %v5594_v24 = vld [vmem:[%s6061_s26 + $0xb8c] ss:$16 sps:$4 sm:$0xff]   ;;  %v5589_v32 = vld [vmem:[%s6061_s26 + $0x988] ss:$16 sps:$4 sm:$0xff]  }
 0x1d8   : > { %v3663_v50 = vpop.f32.mrf.mxu0  ;;  %3908 = vmatmul.mubr.bf16.vlgmr.msra.gmra.mxu0 %v6256_v27 }
 0x1d9   : > { %v3704_v41 = vpop.f32.mrf.mxu1  ;;  %3949 = vmatmul.mubr.bf16.vlgmr.msra.gmra.mxu1 %v6263_v31  ;;  %v3664_v17 = vadd.f32 %v3663_v50, %v6530_v3  ;;  %3958 = vmatpush1.bf16.msra.mxu0 %v5523_v11  ;;  %v5592_v11 = vld [vmem:[%s6061_s26 + $0xb88] ss:$16 sps:$4 sm:$0xff]  }
 0x1da   : > { %3999 = vmatpush1.bf16.msra.mxu1 %v5526_v12  ;;  %v3665_v22 = vpop.f32.mrf.mxu0  ;;  %3959 = vmatprep.subr.bf16.mxu0 %v5531_v13  ;;  %v5597_v12 = vld [vmem:[%s6061_s26 + $0x96c] ss:$16 sps:$4 sm:$0xff]   ;;  %v5598_v50 = vld [vmem:[%s6061_s26 + $0xb68] ss:$16 sps:$4 sm:$0xff]  }
 0x1db   : > { %v3706_v23 = vpop.f32.mrf.mxu1  ;;  %4000 = vmatprep.subr.bf16.mxu1 %v5534_v16  ;;  %v6604_v29 = vadd.f32 %v3704_v41, %v3664_v17  ;;  %v3666_v27 = vadd.f32 %v3665_v22, %v6535_v4  ;;  %3989 = vmatprep.mubr.bf16.mxu0 %v6285_v42  ;;  %v5543_v42 = vld [vmem:[%s6061_s26 + $0x88c] ss:$16 sps:$4 sm:$0xff]   ;;  %v5541_v4 = vld [vmem:[%s6061_s26 + $0x888] ss:$16 sps:$4 sm:$0xff]  }
 0x1dc   : > { %4030 = vmatprep.mubr.bf16.mxu1 %v6290_v43  ;;  %v3667_v31 = vpop.f32.mrf.mxu0  ;;  %v5546_v43 = vld [vmem:[%s6061_s26 + $0xa8c] ss:$16 sps:$4 sm:$0xff]   ;;  %v5595_v16 = vld [vmem:[%s6061_s26 + $0x968] ss:$16 sps:$4 sm:$0xff]  }
 0x1dd   : > { %v3708_v3 = vpop.f32.mrf.mxu1  ;;  %v6609_v30 = vadd.f32 %v3706_v23, %v3666_v27  ;;  %3960 = vmatpush1.bf16.msra.mxu0 %v5529_v20  ;;  %v5600_v13 = vld [vmem:[%s6061_s26 + $0xb6c] ss:$16 sps:$4 sm:$0xff]   ;;  %v5601_v20 = vld [vmem:[%s6061_s26 + $0x948] ss:$16 sps:$4 sm:$0xff]  }
 0x1de   : > { %4001 = vmatpush1.bf16.msra.mxu1 %v5532_v21  ;;  %v3668_v35 = vpop.f32.mrf.mxu0  ;;  %3961 = vmatprep.subr.bf16.mxu0 %v5537_v26  ;;  %v5603_v41 = vld [vmem:[%s6061_s26 + $0x94c] ss:$16 sps:$4 sm:$0xff]   ;;  %v5604_v21 = vld [vmem:[%s6061_s26 + $0xb48] ss:$16 sps:$4 sm:$0xff]  }
 0x1df   : > { %v3709_v37 = vpop.f32.mrf.mxu1  ;;  %4002 = vmatprep.subr.bf16.mxu1 %v5540_v28  ;;  %v5606_v17 = vld [vmem:[%s6061_s26 + $0xb4c] ss:$16 sps:$4 sm:$0xff]   ;;  %v5607_v26 = vld [vmem:[%s6061_s26 + $0x928] ss:$16 sps:$4 sm:$0xff]  }
 0x1e0   : > { %v5609_v22 = vld [vmem:[%s6061_s26 + $0x92c] ss:$16 sps:$4 sm:$0xff]   ;;  %v5610_v28 = vld [vmem:[%s6061_s26 + $0xb28] ss:$16 sps:$4 sm:$0xff]  }
 0x1e1   : > { %3962 = vmatpush1.bf16.msra.mxu0 %v5535_v7  ;;  %v5612_v23 = vld [vmem:[%s6061_s26 + $0xb2c] ss:$16 sps:$4 sm:$0xff]   ;;  %v5613_v3 = vld [vmem:[%s6061_s26 + $0x908] ss:$16 sps:$4 sm:$0xff]  }
 0x1e2   : > { %4003 = vmatpush1.bf16.msra.mxu1 %v5538_v34  ;;  %3963 = vmatprep.subr.bf16.mxu0 %v5543_v42  ;;  %v5615_v27 = vld [vmem:[%s6061_s26 + $0x90c] ss:$16 sps:$4 sm:$0xff]   ;;  %v5616_v7 = vld [vmem:[%s6061_s26 + $0xb08] ss:$16 sps:$4 sm:$0xff]  }
 0x1e3   : > { %4004 = vmatprep.subr.bf16.mxu1 %v5546_v43  ;;  %v5618_v31 = vld [vmem:[%s6061_s26 + $0xb0c] ss:$16 sps:$4 sm:$0xff]   ;;  %v5619_v37 = vld [vmem:[%s6061_s26 + $0xce8] ss:$16 sps:$4 sm:$0xff]  }
 0x1e4   : > { %v5621_v34 = vld [vmem:[%s6061_s26 + $0xcec] ss:$16 sps:$4 sm:$0xff]   ;;  %v5622_v42 = vld [vmem:[%s6061_s26 + $0xee8] ss:$16 sps:$4 sm:$0xff]  }
 0x1e5   : > { %3964 = vmatpush1.bf16.msra.mxu0 %v5541_v4  ;;  %v5624_v35 = vld [vmem:[%s6061_s26 + $0xeec] ss:$16 sps:$4 sm:$0xff]  }
 0x1e6   : > { %4005 = vmatpush1.bf16.msra.mxu1 %v5544_v38  ;;  %3965 = vmatprep.subr.bf16.mxu0 %v5549_v39  ;;  %v5627_v43 = vld [vmem:[%s6061_s26 + $0xccc] ss:$16 sps:$4 sm:$0xff]  }
 0x1e7   : > { %4006 = vmatprep.subr.bf16.mxu1 %v5552_v40  ;;  %v5630_v4 = vld [vmem:[%s6061_s26 + $0xecc] ss:$16 sps:$4 sm:$0xff]  }
 0x1e9   : > { %3966 = vmatpush1.bf16.msra.mxu0 %v5547_v33  ;;  %v5625_v33 = vld [vmem:[%s6061_s26 + $0xcc8] ss:$16 sps:$4 sm:$0xff]  }
 0x1ea   : > { %4007 = vmatpush1.bf16.msra.mxu1 %v5550_v61  ;;  %3967 = vmatprep.subr.bf16.mxu0 %v5555_v1  ;;  %v5628_v61 = vld [vmem:[%s6061_s26 + $0xec8] ss:$16 sps:$4 sm:$0xff]  }
 0x1eb   : > { %4008 = vmatprep.subr.bf16.mxu1 %v5558_v45 }
 0x1ed   : > { %3968 = vmatpush1.bf16.msra.mxu0 %v5553_v46  ;;  %v5633_v46 = vld [vmem:[%s6061_s26 + $0xcac] ss:$16 sps:$4 sm:$0xff]  }
 0x1ee   : > { %4009 = vmatpush1.bf16.msra.mxu1 %v5556_v47  ;;  %3969 = vmatprep.subr.bf16.mxu0 %v5561_v48  ;;  %v5636_v47 = vld [vmem:[%s6061_s26 + $0xeac] ss:$16 sps:$4 sm:$0xff]  }
 0x1ef   : > { %4010 = vmatprep.subr.bf16.mxu1 %v5564_v51 }
 0x1f1   : > { %3970 = vmatpush1.bf16.msra.mxu0 %v5559_v52  ;;  %v5631_v52 = vld [vmem:[%s6061_s26 + $0xca8] ss:$16 sps:$4 sm:$0xff]  }
 0x1f2   : > { %4011 = vmatpush1.bf16.msra.mxu1 %v5562_v53  ;;  %3971 = vmatprep.subr.bf16.mxu0 %v5567_v54  ;;  %v5634_v53 = vld [vmem:[%s6061_s26 + $0xea8] ss:$16 sps:$4 sm:$0xff]  }
 0x1f3   : > { %4012 = vmatprep.subr.bf16.mxu1 %v5570_v36 }
 0x1f5   : > { %3972 = vmatpush1.bf16.msra.mxu0 %v5565_v57  ;;  %v5637_v57 = vld [vmem:[%s6061_s26 + $0xc88] ss:$16 sps:$4 sm:$0xff]  }
 0x1f6   : > { %4013 = vmatpush1.bf16.msra.mxu1 %v5568_v58  ;;  %3973 = vmatprep.subr.bf16.mxu0 %v5573_v59  ;;  %v5640_v58 = vld [vmem:[%s6061_s26 + $0xe88] ss:$16 sps:$4 sm:$0xff]   ;;  %v5645_v59 = vld [vmem:[%s6061_s26 + $0xc6c] ss:$16 sps:$4 sm:$0xff]  }
 0x1f7   : > { %4014 = vmatprep.subr.bf16.mxu1 %v5576_v62  ;;  %v5648_v62 = vld [vmem:[%s6061_s26 + $0xe6c] ss:$16 sps:$4 sm:$0xff]  }
 0x1f9   : > { %3974 = vmatpush2.bf16.msra.mxu0 %v5571_v63  ;;  %v5643_v63 = vld [vmem:[%s6061_s26 + $0xc68] ss:$16 sps:$4 sm:$0xff]  }
 0x1fa   : > { %4015 = vmatpush2.bf16.msra.mxu1 %v5574_v0  ;;  %3975 = vmatprep.subr.bf16.mxu0 %v5579_v2  ;;  %v5646_v0 = vld [vmem:[%s6061_s26 + $0xe68] ss:$16 sps:$4 sm:$0xff]   ;;  %v5651_v2 = vld [vmem:[%s6061_s26 + $0xc4c] ss:$16 sps:$4 sm:$0xff]  }
 0x1fb   : > { %4016 = vmatprep.subr.bf16.mxu1 %v5582_v14  ;;  %v5654_v14 = vld [vmem:[%s6061_s26 + $0xe4c] ss:$16 sps:$4 sm:$0xff]  }
 0x1fd   : > { %3976 = vmatpush2.bf16.msra.mxu0 %v5577_v19  ;;  %v5649_v19 = vld [vmem:[%s6061_s26 + $0xc48] ss:$16 sps:$4 sm:$0xff]  }
 0x1fe   : > { %4017 = vmatpush2.bf16.msra.mxu1 %v5580_v25  ;;  %3977 = vmatprep.subr.bf16.mxu0 %v5585_v5  ;;  %v5652_v25 = vld [vmem:[%s6061_s26 + $0xe48] ss:$16 sps:$4 sm:$0xff]   ;;  %v5657_v5 = vld [vmem:[%s6061_s26 + $0xc2c] ss:$16 sps:$4 sm:$0xff]  }
 0x1ff   : > { %4018 = vmatprep.subr.bf16.mxu1 %v5588_v6  ;;  %v5660_v6 = vld [vmem:[%s6061_s26 + $0xe2c] ss:$16 sps:$4 sm:$0xff]  }
 0x201   : > { %3978 = vmatpush2.bf16.msra.mxu0 %v5583_v8  ;;  %v5655_v8 = vld [vmem:[%s6061_s26 + $0xc28] ss:$16 sps:$4 sm:$0xff]  }
 0x202   : > { %4019 = vmatpush2.bf16.msra.mxu1 %v5586_v10  ;;  %3979 = vmatprep.subr.bf16.mxu0 %v5591_v18  ;;  %v5658_v10 = vld [vmem:[%s6061_s26 + $0xe28] ss:$16 sps:$4 sm:$0xff]   ;;  %v5663_v18 = vld [vmem:[%s6061_s26 + $0xc0c] ss:$16 sps:$4 sm:$0xff]  }
 0x203   : > { %4020 = vmatprep.subr.bf16.mxu1 %v5594_v24  ;;  %v5666_v24 = vld [vmem:[%s6061_s26 + $0xe0c] ss:$16 sps:$4 sm:$0xff]  }
 0x205   : > { %3980 = vmatpush2.bf16.msra.mxu0 %v5589_v32  ;;  %v5661_v32 = vld [vmem:[%s6061_s26 + $0xc08] ss:$16 sps:$4 sm:$0xff]  }
 0x206   : > { %4021 = vmatpush2.bf16.msra.mxu1 %v5592_v11  ;;  %3981 = vmatprep.subr.bf16.mxu0 %v5597_v12  ;;  %v5664_v11 = vld [vmem:[%s6061_s26 + $0xe08] ss:$16 sps:$4 sm:$0xff]   ;;  %v5669_v12 = vld [vmem:[%s6061_s26 + $0xdec] ss:$16 sps:$4 sm:$0xff]  }
 0x207   : > { %4022 = vmatprep.subr.bf16.mxu1 %v5600_v13  ;;  %v5672_v13 = vld [vmem:[%s6061_s26 + $0xfec] ss:$16 sps:$4 sm:$0xff]  }
 0x209   : > { %3982 = vmatpush2.bf16.msra.mxu0 %v5595_v16  ;;  %v5667_v16 = vld [vmem:[%s6061_s26 + $0xde8] ss:$16 sps:$4 sm:$0xff]  }
 0x20a   : > { %4023 = vmatpush2.bf16.msra.mxu1 %v5598_v50  ;;  %3983 = vmatprep.subr.bf16.mxu0 %v5603_v41  ;;  %v5670_v50 = vld [vmem:[%s6061_s26 + $0xfe8] ss:$16 sps:$4 sm:$0xff]   ;;  %v5675_v41 = vld [vmem:[%s6061_s26 + $0xdcc] ss:$16 sps:$4 sm:$0xff]  }
 0x20b   : > { %4024 = vmatprep.subr.bf16.mxu1 %v5606_v17  ;;  %v5678_v17 = vld [vmem:[%s6061_s26 + $0xfcc] ss:$16 sps:$4 sm:$0xff]  }
 0x20d   : > { %3984 = vmatpush2.bf16.msra.mxu0 %v5601_v20  ;;  %v5673_v20 = vld [vmem:[%s6061_s26 + $0xdc8] ss:$16 sps:$4 sm:$0xff]  }
 0x20e   : > { %4025 = vmatpush2.bf16.msra.mxu1 %v5604_v21  ;;  %3985 = vmatprep.subr.bf16.mxu0 %v5609_v22  ;;  %v5676_v21 = vld [vmem:[%s6061_s26 + $0xfc8] ss:$16 sps:$4 sm:$0xff]   ;;  %v5681_v22 = vld [vmem:[%s6061_s26 + $0xdac] ss:$16 sps:$4 sm:$0xff]  }
 0x20f   : > { %4026 = vmatprep.subr.bf16.mxu1 %v5612_v23  ;;  %v5684_v23 = vld [vmem:[%s6061_s26 + $0xfac] ss:$16 sps:$4 sm:$0xff]  }
 0x211   : > { %3986 = vmatpush2.bf16.msra.mxu0 %v5607_v26  ;;  %v5679_v26 = vld [vmem:[%s6061_s26 + $0xda8] ss:$16 sps:$4 sm:$0xff]  }
 0x212   : > { %4027 = vmatpush2.bf16.msra.mxu1 %v5610_v28  ;;  %3987 = vmatprep.subr.bf16.mxu0 %v5615_v27  ;;  %v5682_v28 = vld [vmem:[%s6061_s26 + $0xfa8] ss:$16 sps:$4 sm:$0xff]   ;;  %v5687_v27 = vld [vmem:[%s6061_s26 + $0xd8c] ss:$16 sps:$4 sm:$0xff]  }
 0x213   : > { %4028 = vmatprep.subr.bf16.mxu1 %v5618_v31  ;;  %v5690_v31 = vld [vmem:[%s6061_s26 + $0xf8c] ss:$16 sps:$4 sm:$0xff]  }
 0x215   : > { %3988 = vmatpush2.bf16.msra.mxu0 %v5613_v3  ;;  %v5685_v3 = vld [vmem:[%s6061_s26 + $0xd88] ss:$16 sps:$4 sm:$0xff]  }
 0x216   : > { %4029 = vmatpush2.bf16.msra.mxu1 %v5616_v7  ;;  %4039 = vmatprep.subr.bf16.mxu0 %v5621_v34  ;;  %v5688_v7 = vld [vmem:[%s6061_s26 + $0xf88] ss:$16 sps:$4 sm:$0xff]   ;;  %v5693_v34 = vld [vmem:[%s6061_s26 + $0xd6c] ss:$16 sps:$4 sm:$0xff]  }
 0x217   : > { %4080 = vmatprep.subr.bf16.mxu1 %v5624_v35  ;;  %v5696_v35 = vld [vmem:[%s6061_s26 + $0xf6c] ss:$16 sps:$4 sm:$0xff]  }
 0x218   : > { %v3745_v38 = vpop.f32.mrf.mxu0  ;;  %3990 = vmatmul.mubr.bf16.vlgmr.msra.gmra.mxu0 %v6354_v49 }
 0x219   : > { %v3786_v39 = vpop.f32.mrf.mxu1  ;;  %4031 = vmatmul.mubr.bf16.vlgmr.msra.gmra.mxu1 %v6365_v56  ;;  %v3746_v40 = vadd.f32 %v3745_v38, %v6604_v29  ;;  %4040 = vmatpush1.bf16.msra.mxu0 %v5619_v37  ;;  %v5691_v37 = vld [vmem:[%s6061_s26 + $0xd68] ss:$16 sps:$4 sm:$0xff]  }
 0x21a   : > { %4081 = vmatpush1.bf16.msra.mxu1 %v5622_v42  ;;  %v3747_v1 = vpop.f32.mrf.mxu0  ;;  %4041 = vmatprep.subr.bf16.mxu0 %v5627_v43  ;;  %v5694_v42 = vld [vmem:[%s6061_s26 + $0xf68] ss:$16 sps:$4 sm:$0xff]   ;;  %v5699_v43 = vld [vmem:[%s6061_s26 + $0xd4c] ss:$16 sps:$4 sm:$0xff]  }
 0x21b   : > { %v3788_v45 = vpop.f32.mrf.mxu1  ;;  %4082 = vmatprep.subr.bf16.mxu1 %v5630_v4  ;;  %v6678_v48 = vadd.f32 %v3786_v39, %v3746_v40  ;;  %v3748_v49 = vadd.f32 %v3747_v1, %v6609_v30  ;;  %4071 = vmatprep.mubr.bf16.mxu0 %v6361_v55  ;;  %v5639_v55 = vld [vmem:[%s6061_s26 + $0xc8c] ss:$16 sps:$4 sm:$0xff]   ;;  %v5697_v38 = vld [vmem:[%s6061_s26 + $0xd48] ss:$16 sps:$4 sm:$0xff]  }
 0x21c   : > { %4112 = vmatprep.mubr.bf16.mxu1 %v6373_v60  ;;  %v3749_v56 = vpop.f32.mrf.mxu0  ;;  %v5642_v60 = vld [vmem:[%s6061_s26 + $0xe8c] ss:$16 sps:$4 sm:$0xff]   ;;  %v5700_v39 = vld [vmem:[%s6061_s26 + $0xf48] ss:$16 sps:$4 sm:$0xff]  }
 0x21d   : > { %v3790_v29 = vpop.f32.mrf.mxu1  ;;  %v6683_v51 = vadd.f32 %v3788_v45, %v3748_v49  ;;  %4042 = vmatpush1.bf16.msra.mxu0 %v5625_v33  ;;  %v5702_v4 = vld [vmem:[%s6061_s26 + $0xf4c] ss:$16 sps:$4 sm:$0xff]   ;;  %v5706_v1 = vld [vmem:[%s6061_s26 + $0xf28] ss:$16 sps:$4 sm:$0xff]  }
 0x21e   : > { %4083 = vmatpush1.bf16.msra.mxu1 %v5628_v61  ;;  %v3750_v54 = vpop.f32.mrf.mxu0  ;;  %4043 = vmatprep.subr.bf16.mxu0 %v5633_v46  ;;  %v5705_v40 = vld [vmem:[%s6061_s26 + $0xd2c] ss:$16 sps:$4 sm:$0xff]   ;;  %v5703_v61 = vld [vmem:[%s6061_s26 + $0xd28] ss:$16 sps:$4 sm:$0xff]  }
 0x21f   : > { %v3791_v36 = vpop.f32.mrf.mxu1  ;;  %4084 = vmatprep.subr.bf16.mxu1 %v5636_v47  ;;  %v4125_v30 = vcombine.low %v6678_v48, %v6683_v51  ;;  %v5708_v33 = vld [vmem:[%s6061_s26 + $0xf2c] ss:$16 sps:$4 sm:$0xff]   ;;  %v5709_v47 = vld [vmem:[%s6061_s26 + $0xd08] ss:$16 sps:$4 sm:$0xff]  }
 0x220   : > { %v5711_v45 = vld [vmem:[%s6061_s26 + $0xd0c] ss:$16 sps:$4 sm:$0xff]   ;;  %v5712_v49 = vld [vmem:[%s6061_s26 + $0xf08] ss:$16 sps:$4 sm:$0xff]  }
 0x221   : > { %4044 = vmatpush1.bf16.msra.mxu0 %v5631_v52  ;;  %v5714_v46 = vld [vmem:[%s6061_s26 + $0xf0c] ss:$16 sps:$4 sm:$0xff]  }
 0x222   : > { %4085 = vmatpush1.bf16.msra.mxu1 %v5634_v53  ;;  %4045 = vmatprep.subr.bf16.mxu0 %v5639_v55 }
 0x223   : > { %4086 = vmatprep.subr.bf16.mxu1 %v5642_v60 }
 0x225   : > { %4046 = vmatpush1.bf16.msra.mxu0 %v5637_v57 }
 0x226   : > { %4087 = vmatpush1.bf16.msra.mxu1 %v5640_v58  ;;  %4047 = vmatprep.subr.bf16.mxu0 %v5645_v59 }
 0x227   : > { %4088 = vmatprep.subr.bf16.mxu1 %v5648_v62 }
 0x229   : > { %4048 = vmatpush1.bf16.msra.mxu0 %v5643_v63 }
 0x22a   : > { %4089 = vmatpush1.bf16.msra.mxu1 %v5646_v0  ;;  %4049 = vmatprep.subr.bf16.mxu0 %v5651_v2 }
 0x22b   : > { %4090 = vmatprep.subr.bf16.mxu1 %v5654_v14 }
 0x22d   : > { %4050 = vmatpush1.bf16.msra.mxu0 %v5649_v19 }
 0x22e   : > { %4091 = vmatpush1.bf16.msra.mxu1 %v5652_v25  ;;  %4051 = vmatprep.subr.bf16.mxu0 %v5657_v5 }
 0x22f   : > { %4092 = vmatprep.subr.bf16.mxu1 %v5660_v6 }
 0x231   : > { %4052 = vmatpush1.bf16.msra.mxu0 %v5655_v8 }
 0x232   : > { %4093 = vmatpush1.bf16.msra.mxu1 %v5658_v10  ;;  %4053 = vmatprep.subr.bf16.mxu0 %v5663_v18 }
 0x233   : > { %4094 = vmatprep.subr.bf16.mxu1 %v5666_v24 }
 0x235   : > { %4054 = vmatpush1.bf16.msra.mxu0 %v5661_v32 }
 0x236   : > { %4095 = vmatpush1.bf16.msra.mxu1 %v5664_v11  ;;  %4055 = vmatprep.subr.bf16.mxu0 %v5669_v12 }
 0x237   : > { %4096 = vmatprep.subr.bf16.mxu1 %v5672_v13 }
 0x239   : > { %4056 = vmatpush2.bf16.msra.mxu0 %v5667_v16 }
 0x23a   : > { %4097 = vmatpush2.bf16.msra.mxu1 %v5670_v50  ;;  %4057 = vmatprep.subr.bf16.mxu0 %v5675_v41  ;;  %v5874_v41 = vmov 1983009808  }
 0x23b   : > { %4098 = vmatprep.subr.bf16.mxu1 %v5678_v17  ;;  %v4128_v17 = vunpack.c.l.s4 %v5874_v41 }
 0x23d   : > { %4058 = vmatpush2.bf16.msra.mxu0 %v5673_v20 }
 0x23e   : > { %4099 = vmatpush2.bf16.msra.mxu1 %v5676_v21  ;;  %4059 = vmatprep.subr.bf16.mxu0 %v5681_v22 }
 0x23f   : > { %4100 = vmatprep.subr.bf16.mxu1 %v5684_v23  ;;  %v4129_v23 = vunpack.c.0.s8 %v4128_v17 }
 0x241   : > { %4060 = vmatpush2.bf16.msra.mxu0 %v5679_v26 }
 0x242   : > { %4101 = vmatpush2.bf16.msra.mxu1 %v5682_v28  ;;  %4061 = vmatprep.subr.bf16.mxu0 %v5687_v27 }
 0x243   : > { %4102 = vmatprep.subr.bf16.mxu1 %v5690_v31 }
 0x245   : > { %4062 = vmatpush2.bf16.msra.mxu0 %v5685_v3 }
 0x246   : > { %4103 = vmatpush2.bf16.msra.mxu1 %v5688_v7  ;;  %4063 = vmatprep.subr.bf16.mxu0 %v5693_v34 }
 0x247   : > { %4104 = vmatprep.subr.bf16.mxu1 %v5696_v35  ;;  %v4132_v35 = vsub.s32 %v4129_v23, %v6127_v44 }
 0x249   : > { %4064 = vmatpush2.bf16.msra.mxu0 %v5691_v37 }
 0x24a   : > { %4105 = vmatpush2.bf16.msra.mxu1 %v5694_v42  ;;  %4065 = vmatprep.subr.bf16.mxu0 %v5699_v43 }
 0x24b   : > { %4106 = vmatprep.subr.bf16.mxu1 %v5702_v4 }
 0x24d   : > { %4066 = vmatpush2.bf16.msra.mxu0 %v5697_v38 }
 0x24e   : > { %4107 = vmatpush2.bf16.msra.mxu1 %v5700_v39  ;;  %4067 = vmatprep.subr.bf16.mxu0 %v5705_v40  ;;  %v4133_v39 = vrot.slane %v4125_v30, %v4132_v35 }
 0x24f   : > { %4108 = vmatprep.subr.bf16.mxu1 %v5708_v33  ;;  %v274_v33 = vld [vmem:[#allocation2] sm:$0xff] }
 0x251   : > { %4068 = vmatpush2.bf16.msra.mxu0 %v5703_v61 }
 0x252   : > { %4109 = vmatpush2.bf16.msra.mxu1 %v5706_v1  ;;  %4069 = vmatprep.subr.bf16.mxu0 %v5711_v45 }
 0x253   : > { %4110 = vmatprep.subr.bf16.mxu1 %v5714_v46 }
 0x255   : > { %4070 = vmatpush2.bf16.msra.mxu0 %v5709_v47 }
 0x256   : > { %4111 = vmatpush2.bf16.msra.mxu1 %v5712_v49 }
 0x258   : > { %v3827_v56 = vpop.f32.mrf.mxu0  ;;  %4072 = vmatmul.mubr.bf16.vlgmr.msra.gmra.mxu0 %v6437_v9 }
 0x259   : > { %v3868_v29 = vpop.f32.mrf.mxu1  ;;  %4113 = vmatmul.mubr.bf16.vlgmr.msra.gmra.mxu1 %v6445_v15 }
 0x25a   : > { %v3869_v52 = vadd.f32 %v3868_v29, %v3827_v56  ;;  %v3829_v53 = vpop.f32.mrf.mxu0 }
 0x25b   : > { %v3870_v54 = vpop.f32.mrf.mxu1 }
 0x25c   : > { %v3871_v36 = vadd.f32 %v3870_v54, %v3829_v53  ;;  %v3831_v55 = vpop.f32.mrf.mxu0 }
 0x25d   : > { %v3872_v60 = vpop.f32.mrf.mxu1 }
 0x25e   : > { %v3832_v57 = vpop.f32.mrf.mxu0 }
 0x25f   : > { %v3873_v58 = vpop.f32.mrf.mxu1 }
 0x298   : > { %v3909_v59 = vpop.f32.mrf.mxu0 }
 0x299   : > { %v3950_v62 = vpop.f32.mrf.mxu1  ;;  %v3910_v63 = vadd.f32 %v3909_v59, %v3869_v52 }
 0x29a   : > { %v3911_v0 = vpop.f32.mrf.mxu0 }
 0x29b   : > { %v3952_v2 = vpop.f32.mrf.mxu1  ;;  %v3951_v14 = vadd.f32 %v3950_v62, %v3910_v63  ;;  %v3912_v19 = vadd.f32 %v3911_v0, %v3871_v36 }
 0x29c   : > { %v3913_v25 = vpop.f32.mrf.mxu0 }
 0x29d   : > { %v3954_v5 = vpop.f32.mrf.mxu1  ;;  %v3953_v9 = vadd.f32 %v3952_v2, %v3912_v19 }
 0x29e   : > { %v3914_v6 = vpop.f32.mrf.mxu0 }
 0x29f   : > { %v3955_v15 = vpop.f32.mrf.mxu1 }
 0x2d8   : > { %v3991_v8 = vpop.f32.mrf.mxu0 }
 0x2d9   : > { %v4032_v10 = vpop.f32.mrf.mxu1  ;;  %v3992_v18 = vadd.f32 %v3991_v8, %v3951_v14 }
 0x2da   : > { %v3993_v24 = vpop.f32.mrf.mxu0 }
 0x2db   : > { %v4034_v32 = vpop.f32.mrf.mxu1  ;;  %v4033_v11 = vadd.f32 %v4032_v10, %v3992_v18  ;;  %v3994_v20 = vadd.f32 %v3993_v24, %v3953_v9 }
 0x2dc   : > { %v3995_v12 = vpop.f32.mrf.mxu0 }
 0x2dd   : > { %v4036_v13 = vpop.f32.mrf.mxu1  ;;  %v4035_v26 = vadd.f32 %v4034_v32, %v3994_v20 }
 0x2de   : > { %v3996_v16 = vpop.f32.mrf.mxu0 }
 0x2df   : > { %v4037_v50 = vpop.f32.mrf.mxu1 }
 0x318   : > { %v4073_v21 = vpop.f32.mrf.mxu0 }
 0x319   : > { %v4114_v22 = vpop.f32.mrf.mxu1  ;;  %v4074_v28 = vadd.f32 %v4073_v21, %v4033_v11 }
 0x31a   : > { %v4075_v27 = vpop.f32.mrf.mxu0 }
 0x31b   : > { %v4116_v31 = vpop.f32.mrf.mxu1  ;;  %v4076_v3 = vadd.f32 %v4075_v27, %v4035_v26  ;;  %v4115_v37 = vadd.f32 %v4114_v22, %v4074_v28 }
 0x31c   : > { %v4077_v7 = vpop.f32.mrf.mxu0 }
 0x31d   : > { %v4118_v34 = vpop.f32.mrf.mxu1  ;;  %v4117_v42 = vadd.f32 %v4116_v31, %v4076_v3 }
 0x31e   : > { %v4078_v43 = vpop.f32.mrf.mxu0 }
 0x31f   : > { %v4119_v4 = vpop.f32.mrf.mxu1  ;;  %v4126_v38 = vcombine.low %v4115_v37, %v4117_v42 }
 0x321   : > { %v4140_v40 = vrot.slane %v4126_v38, %v4132_v35 }
 0x323   : > { %v4141_v61 = vcombine.low %v4133_v39, %v4140_v40  ;;  %4148 = sbr.rel (%p4834_p0) target bundleno = 823 (0x337), region = 48 }
 0x325   : > { %v4143_v1 = vadd.f32 %v4141_v61, %v274_v33 }
 0x327   : > { %4144 = vst [vmem:[#allocation2] sm:$0xff] %v4143_v1 }
 0x328   : > { %v4150_v45 = vld [vmem:[%s223_s9] sm:$0xf]  ;;  %v4154_v46 = vsub.s32 0, %v6127_v44  ;;  %v4158_v47 = vsub.s32 1, %v6127_v44  ;;  %v4162_v49 = vsub.s32 2, %v6127_v44  ;;  %v4166_v48 = vsub.s32 3, %v6127_v44 }
 0x32a   : > { %v4155_v51 = vrot.slane %v4150_v45, %v4154_v46  ;;  %v4159_v30 = vrot.slane %v4150_v45, %v4158_v47  ;;  %v4163_v56 = vrot.slane %v4150_v45, %v4162_v49  ;;  %v4167_v29 = vrot.slane %v4150_v45, %v4166_v48 }
 0x32c   : > { %v4168_v52 = vcombine.low %v4155_v51, %v4159_v30  ;;  %v4169_v53 = vcombine.low %v4163_v56, %v4167_v29 }
 0x32e   : > { %v4176_v54 = vrot.slane %v4168_v52, %v4132_v35  ;;  %v4183_v36 = vrot.slane %v4169_v53, %v4132_v35  ;;  %v4149_v55 = vld [vmem:[#allocation2] sm:$0xff] }
 0x330   : > { %v4184_v60 = vcombine.low %v4176_v54, %v4183_v36 }
 0x332   : > { %v4186_v57 = vadd.f32 %v4184_v60, %v4149_v55 }
 0x334   : > { %v4187_v58 = vmax.f32 %v4186_v57, 0.0 }
 0x336   : > { %4188 = vst [vmem:[%s6085_s23] sm:$0xff] %v4187_v58 }
 0x337 PF: > { %s19_s22 = sadd.s32 1, %s5865_s22   ;;  %s6808_s29 = sld [smem:[#allocation9_spill]] }
 0x338   : > { %p16_p1 = scmp.ge.s32.totalorder %s19_s22, 18   ;;  %s6809_s10 = sld [smem:[#allocation10_spill]] }
 0x339   : > { %s6810_s12 = smov %s5829_s13  ;;  %s6811_s13 = smov %s5833_s14 }
 0x33a   : > { %s6812_s14 = smov %s6035_s30  ;;  %s6813_s15 = smov %s5841_s16 }
 0x33b   : > { %s6814_s16 = smov %s5845_s17  ;;  %s6815_s17 = smov %s6040_s27 }
 0x33c   : > { %s6816_s18 = smov %s5857_s20  ;;  %s6817_s19 = smov %s5861_s21 }
 0x33d   : > { %s6818_s20 = smov %s6808_s29  ;;  %18 = sbr.rel (!%p16_p1) target bundleno = 11 (0xb), region = 96 }
 0x33e   : > { %s6819_s21 = smov %s6809_s10 }
 0x342   :  { %4211 = vsyncpa [#allocation4], 1 }
 0x343   :  { %4213 = vsyncpa [#allocation4 + $0x1], 1 }
 0x344   :  { %4214 = vsyncpa [#allocation6], 1 }
 0x345   :  { %4216 = vsyncpa [#allocation6 + $0x1], 1 }

</bundles_post_ra>
